<compile_context>
chip_gen: v7x
topology: tpu7x:2x2x1
jax: 0.10.0
libtpu: 0.0.40
codegen_flags: <defaults>
</compile_context>

<pallas_src>
import numpy as np
import jax
import jax.numpy as jnp
from jax.experimental import pallas as pl
from jax.experimental.pallas import tpu as pltpu

_EPS = 1e-5


# ----------------------------------------------------------------------------
# Module geometry (mirrors RestCNN.__init__)
# ----------------------------------------------------------------------------
def conv_output_size(w, kernel_size=1, stride=1, padding=0):
    return (w - kernel_size + 2 * padding) / stride + 1


def fc_in_features(shape=(242, 13)):
    _x = conv_output_size(shape[0], kernel_size=5, padding=1)
    _x = int(_x / 2)
    _x = conv_output_size(_x, kernel_size=3)
    _x = int(_x / 2)
    _y = conv_output_size(shape[1], kernel_size=5, padding=1)
    _y = int(_y / 2)
    _y = conv_output_size(_y, kernel_size=3)
    _y = int(_y / 2)
    return int(8 * _x * _y)


def _dims(shape, batch):
    H, W = shape
    d = {"B": batch, "H": H, "W": W}
    d["Wp"] = W + 2                              # conv1 padding = 1
    Hp = H + 2
    d["Hp4"] = ((Hp + 3) // 4) * 4               # pad H to a multiple of 4 phases
    d["Kx"] = d["Hp4"] // 4                      # padded-input rows per phase
    d["H1"], d["W1"] = Hp - 4, W + 2 - 4         # conv1 out (240, 11)
    assert d["H1"] % 4 == 0, "H-phase decomposition requires conv1 H % 4 == 0"
    d["K1"] = d["H1"] // 4                       # conv1 rows per phase (60)
    d["Hq1"], d["Wq1"] = d["H1"] // 2, d["W1"] // 2   # pool1 (120, 5)
    d["H2"], d["W2"] = d["Hq1"] - 2, d["Wq1"] - 2     # conv2 out (118, 3)
    assert d["H2"] % 2 == 0, "pool2 phase decomposition requires conv2 H % 2 == 0"
    d["K2"] = d["H2"] // 2                       # final spatial rows (59)
    d["Hf"], d["Wf"] = d["H2"] // 2, d["W2"] // 2     # pool2 (59, 1)
    Hs, Ws = (H - 10) // 4 + 1, (W - 10) // 4 + 1     # conv_skip output
    assert (Hs, Ws) == (d["Hf"], d["Wf"]) and d["Wf"] == 1, \
        "conv_block / conv_skip spatial shapes must match for the residual add"
    d["FIN"] = 8 * d["Hf"] * d["Wf"]
    assert d["FIN"] == fc_in_features(shape)
    return d


# ----------------------------------------------------------------------------
# The single fused kernel
# ----------------------------------------------------------------------------
def _make_kernel(d):
    B, Wp = d["B"], d["Wp"]
    W1, K1 = d["W1"], d["K1"]
    Wq1 = d["Wq1"]
    W2, K2 = d["W2"], d["K2"]
    Wf = d["Wf"]
    C1, C2 = 4, 8
    KB1, KB2 = K1 * B, K2 * B

    def kernel(xph_ref, w1_ref, b1_ref, g1_ref, be1_ref,
               w2_ref, b2_ref, g2_ref, be2_ref,
               ws_ref, bs_ref, gs_ref, bes_ref,
               perm_ref, wf1_ref, bf1_ref, gf_ref, bef_ref,
               wf2_ref, bf2_ref, o_ref):
        f32 = jnp.float32
        # Padded input, one (Wp, Kx*B) slab per H-phase; columns are (k*B + b).
        X = [xph_ref[p] for p in range(4)]

        # ---------------- conv1 (1->4, 5x5, pad=1) + ReLU ----------------
        w1 = w1_ref[...]                    # (4, 25), cols (i*5 + j)
        bc1 = b1_ref[...]                   # (4, 1)
        a1 = []
        s1 = jnp.zeros((C1, 1), f32)
        s2 = jnp.zeros((C1, 1), f32)
        for r in range(4):                  # output H-phase: row = 4k + r
            cols = []
            for w in range(W1):             # output W position
                blocks = []
                for i in range(5):          # kernel row -> input phase / offset
                    p, q = (r + i) % 4, (r + i) // 4
                    blocks.append(X[p][w:w + 5, q * B:(q + K1) * B])
                cols.append(jnp.concatenate(blocks, axis=0))        # (25, K1*B)
            rhs = jnp.concatenate(cols, axis=1)                     # (25, W1*K1*B)
            z = jnp.dot(w1, rhs, preferred_element_type=f32) + bc1
            a = jnp.maximum(z, 0.0)
            a1.append(a)
            s1 = s1 + jnp.sum(a, axis=1, keepdims=True)
            s2 = s2 + jnp.sum(a * a, axis=1, keepdims=True)
        n1 = float(4 * W1 * K1 * B)                                  # = B*H1*W1
        m1 = s1 / n1
        v1 = s2 / n1 - m1 * m1
        sc1 = g1_ref[...] * jax.lax.rsqrt(v1 + _EPS)
        sh1 = be1_ref[...] - m1 * sc1

        # ---------------- BN1 + MaxPool(2,2) ----------------
        q1 = [jnp.maximum(a1[2 * s] * sc1 + sh1, a1[2 * s + 1] * sc1 + sh1)
              for s in range(2)]            # H pairs pooled; pool1 row = 2k + s
        P1 = {}
        for s in range(2):
            for wq in range(Wq1):           # W pairs pooled (last column dropped)
                lo = q1[s][:, (2 * wq) * KB1:(2 * wq + 1) * KB1]
                hi = q1[s][:, (2 * wq + 1) * KB1:(2 * wq + 2) * KB1]
                P1[(wq, s)] = jnp.maximum(lo, hi)                   # (4, K1*B)

        # ---------------- conv2 (4->8, 3x3) + ReLU ----------------
        w2 = w2_ref[...]                    # (8, 36), cols (i, j, ci)
        bc2 = b2_ref[...]
        a2 = []
        s1 = jnp.zeros((C2, 1), f32)
        s2 = jnp.zeros((C2, 1), f32)
        for s in range(2):                  # output H-phase: row = 2m + s
            cols = []
            for w in range(W2):
                blocks = []
                for i in range(3):
                    sp, q = (s + i) % 2, (s + i) // 2
                    for j in range(3):
                        blocks.append(P1[(w + j, sp)][:, q * B:(q + K2) * B])
                cols.append(jnp.concatenate(blocks, axis=0))        # (36, K2*B)
            rhs = jnp.concatenate(cols, axis=1)                     # (36, W2*K2*B)
            z = jnp.dot(w2, rhs, preferred_element_type=f32) + bc2
            a = jnp.maximum(z, 0.0)
            a2.append(a)
            s1 = s1 + jnp.sum(a, axis=1, keepdims=True)
            s2 = s2 + jnp.sum(a * a, axis=1, keepdims=True)
        n2 = float(2 * W2 * K2 * B)                                  # = B*H2*W2
        m2 = s1 / n2
        v2 = s2 / n2 - m2 * m2
        sc2 = g2_ref[...] * jax.lax.rsqrt(v2 + _EPS)
        sh2 = be2_ref[...] - m2 * sc2

        # ---------------- BN2 + MaxPool(2,2) -> conv_block output ----------------
        y = jnp.maximum(a2[0] * sc2 + sh2, a2[1] * sc2 + sh2)       # (8, W2*K2*B)
        cb = y[:, 0:KB2]
        for w in range(1, 2 * Wf):          # last W column dropped by floor pool
            cb = jnp.maximum(cb, y[:, w * KB2:(w + 1) * KB2])       # (8, K2*B)

        # ---------------- conv_skip (1->8, 10x10, stride 4) + BN ----------------
        wsk = ws_ref[...]                   # (8, 100), cols (i*10 + j)
        blocks = []
        for i in range(10):
            p, q = (i + 1) % 4, (i + 1) // 4
            blocks.append(X[p][1:11, q * B:(q + K2) * B])
        rhs = jnp.concatenate(blocks, axis=0)                       # (100, K2*B)
        zs = jnp.dot(wsk, rhs, preferred_element_type=f32) + bs_ref[...]
        ms = jnp.mean(zs, axis=1, keepdims=True)
        vs = jnp.mean(zs * zs, axis=1, keepdims=True) - ms * ms
        scs = gs_ref[...] * jax.lax.rsqrt(vs + _EPS)
        sk = (zs - ms) * scs + bes_ref[...]

        # ---------------- residual add ----------------
        res = cb + sk                                               # (8, K2*B), col m*B+b

        # ---------------- flatten (torch NCHW order) + fc_block ----------------
        rb = jnp.dot(res, perm_ref[...], preferred_element_type=f32)  # col b*K2 + m
        rows = []
        for b in range(B):
            rows.append(jnp.concatenate(
                [rb[c:c + 1, b * K2:(b + 1) * K2] for c in range(C2)], axis=1))
        feat = jnp.concatenate(rows, axis=0)                        # (B, 8*K2)
        h = jnp.dot(feat, wf1_ref[...], preferred_element_type=f32) + bf1_ref[...]
        h = jnp.maximum(h, 0.0)
        mh = jnp.mean(h, axis=0, keepdims=True)
        vh = jnp.mean(h * h, axis=0, keepdims=True) - mh * mh
        h = (h - mh) * (gf_ref[...] * jax.lax.rsqrt(vh + _EPS)) + bef_ref[...]
        o_ref[...] = jnp.dot(h, wf2_ref[...], preferred_element_type=f32) + bf2_ref[...]

    return kernel


def _full_spec(shape):
    nd = len(shape)
    return pl.BlockSpec(shape, lambda i, _nd=nd: (0,) * _nd)


# ----------------------------------------------------------------------------
# Parameters: canonical (PyTorch-shaped) init + one-time kernel-layout prep
# ----------------------------------------------------------------------------
def init_params(key, shape=(242, 13)):
    fin = fc_in_features(shape)
    ks = jax.random.split(key, 18)

    def n(k, s, scale=0.1):
        return scale * jax.random.normal(k, s, jnp.float32)

    return {
        "conv1_w": n(ks[0], (4, 1, 5, 5)), "conv1_b": n(ks[1], (4,)),
        "bn1_g": 1.0 + n(ks[2], (4,), 0.05), "bn1_b": n(ks[3], (4,), 0.05),
        "conv2_w": n(ks[4], (8, 4, 3, 3)), "conv2_b": n(ks[5], (8,)),
        "bn2_g": 1.0 + n(ks[6], (8,), 0.05), "bn2_b": n(ks[7], (8,), 0.05),
        "skip_w": n(ks[8], (8, 1, 10, 10)), "skip_b": n(ks[9], (8,)),
        "bns_g": 1.0 + n(ks[10], (8,), 0.05), "bns_b": n(ks[11], (8,), 0.05),
        "fc1_w": n(ks[12], (120, fin), 0.05), "fc1_b": n(ks[13], (120,)),
        "bnf_g": 1.0 + n(ks[14], (120,), 0.05), "bnf_b": n(ks[15], (120,), 0.05),
        "fc2_w": n(ks[16], (10, 120), 0.05), "fc2_b": n(ks[17], (10,)),
    }


def _flatten_perm(K, B):
    # rb = res @ P maps interleaved columns (m*B + b) to batch-major (b*K + m).
    n = K * B
    P = np.zeros((n, n), np.float32)
    for b in range(B):
        for m in range(K):
            P[m * B + b, b * K + m] = 1.0
    return jnp.asarray(P)


def prepare_params(params, shape=(242, 13), batch=2):
    d = _dims(shape, batch)
    f32 = jnp.float32
    kp = {
        "w1": params["conv1_w"].reshape(4, 25).astype(f32),
        "b1": params["conv1_b"].reshape(4, 1).astype(f32),
        "g1": params["bn1_g"].reshape(4, 1).astype(f32),
        "be1": params["bn1_b"].reshape(4, 1).astype(f32),
        "w2": jnp.transpose(params["conv2_w"], (0, 2, 3, 1)).reshape(8, 36).astype(f32),
        "b2": params["conv2_b"].reshape(8, 1).astype(f32),
        "g2": params["bn2_g"].reshape(8, 1).astype(f32),
        "be2": params["bn2_b"].reshape(8, 1).astype(f32),
        "ws": params["skip_w"].reshape(8, 100).astype(f32),
        "bs": params["skip_b"].reshape(8, 1).astype(f32),
        "gs": params["bns_g"].reshape(8, 1).astype(f32),
        "bes": params["bns_b"].reshape(8, 1).astype(f32),
        "perm": _flatten_perm(d["K2"], d["B"]),
        "wf1": params["fc1_w"].T.astype(f32),          # (fin, 120)
        "bf1": params["fc1_b"].reshape(1, 120).astype(f32),
        "gf": params["bnf_g"].reshape(1, 120).astype(f32),
        "bef": params["bnf_b"].reshape(1, 120).astype(f32),
        "wf2": params["fc2_w"].T.astype(f32),          # (120, 10)
        "bf2": params["fc2_b"].reshape(1, 10).astype(f32),
    }
    return kp, d


# ----------------------------------------------------------------------------
# Forward pass (mirrors RestCNN.forward) — one pallas_call
# ----------------------------------------------------------------------------
def rest_cnn_forward(x, kp, d):
    B, H, W = d["B"], d["H"], d["W"]
    Wp, Kx = d["Wp"], d["Kx"]
    assert x.shape == (B, 1, H, W)

    # Tiny input prep (reads x once): pad for conv1, split H into 4 phases and
    # interleave the batch on the minor (lane) axis: column index = k*B + b.
    x2 = x.reshape(B, H, W).astype(jnp.float32)
    xpad = jnp.pad(x2, ((0, 0), (1, d["Hp4"] - H - 1), (1, 1)))     # (B, Hp4, Wp)
    xph = jnp.stack([xpad[:, r::4, :] for r in range(4)], axis=0)   # (4, B, Kx, Wp)
    xph = jnp.transpose(xph, (0, 3, 2, 1)).reshape(4, Wp, Kx * B)   # (4, Wp, Kx*B)

    args = (xph, kp["w1"], kp["b1"], kp["g1"], kp["be1"],
            kp["w2"], kp["b2"], kp["g2"], kp["be2"],
            kp["ws"], kp["bs"], kp["gs"], kp["bes"],
            kp["perm"], kp["wf1"], kp["bf1"], kp["gf"], kp["bef"],
            kp["wf2"], kp["bf2"])

    return pl.pallas_call(
        _make_kernel(d),
        grid=(1,),
        in_specs=[_full_spec(a.shape) for a in args],
        out_specs=_full_spec((B, 10)),
        out_shape=jax.ShapeDtypeStruct((B, 10), jnp.float32),
        compiler_params=pltpu.CompilerParams(dimension_semantics=("arbitrary",)),
    )(*args)


if __name__ == "__main__":
    key = jax.random.PRNGKey(0)
    kx, kparam = jax.random.split(key)
    B, shape = 2, (242, 13)                 # module default spatial shape, small batch
    x = jax.random.normal(kx, (B, 1, shape[0], shape[1]), jnp.float32)

    params = init_params(kparam, shape)
    kp, d = prepare_params(params, shape, B)

    fwd = jax.jit(lambda xx, pp: rest_cnn_forward(xx, pp, d))
    out = fwd(x, kp)
    jax.block_until_ready(out)
    assert out.shape == (B, 10) and out.dtype == jnp.float32
    assert bool(jnp.all(jnp.isfinite(out)))
    print("KERNEL_OK")
</pallas_src>

<mosaic_0001>
module attributes {stable_mosaic.version = 11 : i64} {
  func.func @kernel(%arg0: i32, %arg1: memref<4x15x122xf32, #tpu.memory_space<vmem>>, %arg2: memref<4x25xf32, #tpu.memory_space<vmem>>, %arg3: memref<4x1xf32, #tpu.memory_space<vmem>>, %arg4: memref<4x1xf32, #tpu.memory_space<vmem>>, %arg5: memref<4x1xf32, #tpu.memory_space<vmem>>, %arg6: memref<8x36xf32, #tpu.memory_space<vmem>>, %arg7: memref<8x1xf32, #tpu.memory_space<vmem>>, %arg8: memref<8x1xf32, #tpu.memory_space<vmem>>, %arg9: memref<8x1xf32, #tpu.memory_space<vmem>>, %arg10: memref<8x100xf32, #tpu.memory_space<vmem>>, %arg11: memref<8x1xf32, #tpu.memory_space<vmem>>, %arg12: memref<8x1xf32, #tpu.memory_space<vmem>>, %arg13: memref<8x1xf32, #tpu.memory_space<vmem>>, %arg14: memref<118x118xf32, #tpu.memory_space<vmem>>, %arg15: memref<472x120xf32, #tpu.memory_space<vmem>>, %arg16: memref<1x120xf32, #tpu.memory_space<vmem>>, %arg17: memref<1x120xf32, #tpu.memory_space<vmem>>, %arg18: memref<1x120xf32, #tpu.memory_space<vmem>>, %arg19: memref<120x10xf32, #tpu.memory_space<vmem>>, %arg20: memref<1x10xf32, #tpu.memory_space<vmem>>, %arg21: memref<2x10xf32, #tpu.memory_space<vmem>>) attributes {dimension_semantics = [#tpu.dimension_semantics<arbitrary>], iteration_bounds = array<i64: 1>, scalar_prefetch = 0 : i64, scratch_operands = 0 : i64, tpu.core_type = #tpu.core_type<tc>, window_params = [{pipeline_mode = #tpu.pipeline_mode<synchronous>, transform_indices = @transform_0, window_bounds = array<i64: 4, 15, 122>}, {pipeline_mode = #tpu.pipeline_mode<synchronous>, transform_indices = @transform_1, window_bounds = array<i64: 4, 25>}, {pipeline_mode = #tpu.pipeline_mode<synchronous>, transform_indices = @transform_2, window_bounds = array<i64: 4, 1>}, {pipeline_mode = #tpu.pipeline_mode<synchronous>, transform_indices = @transform_3, window_bounds = array<i64: 4, 1>}, {pipeline_mode = #tpu.pipeline_mode<synchronous>, transform_indices = @transform_4, window_bounds = array<i64: 4, 1>}, {pipeline_mode = #tpu.pipeline_mode<synchronous>, transform_indices = @transform_5, window_bounds = array<i64: 8, 36>}, {pipeline_mode = #tpu.pipeline_mode<synchronous>, transform_indices = @transform_6, window_bounds = array<i64: 8, 1>}, {pipeline_mode = #tpu.pipeline_mode<synchronous>, transform_indices = @transform_7, window_bounds = array<i64: 8, 1>}, {pipeline_mode = #tpu.pipeline_mode<synchronous>, transform_indices = @transform_8, window_bounds = array<i64: 8, 1>}, {pipeline_mode = #tpu.pipeline_mode<synchronous>, transform_indices = @transform_9, window_bounds = array<i64: 8, 100>}, {pipeline_mode = #tpu.pipeline_mode<synchronous>, transform_indices = @transform_10, window_bounds = array<i64: 8, 1>}, {pipeline_mode = #tpu.pipeline_mode<synchronous>, transform_indices = @transform_11, window_bounds = array<i64: 8, 1>}, {pipeline_mode = #tpu.pipeline_mode<synchronous>, transform_indices = @transform_12, window_bounds = array<i64: 8, 1>}, {pipeline_mode = #tpu.pipeline_mode<synchronous>, transform_indices = @transform_13, window_bounds = array<i64: 118, 118>}, {pipeline_mode = #tpu.pipeline_mode<synchronous>, transform_indices = @transform_14, window_bounds = array<i64: 472, 120>}, {pipeline_mode = #tpu.pipeline_mode<synchronous>, transform_indices = @transform_15, window_bounds = array<i64: 1, 120>}, {pipeline_mode = #tpu.pipeline_mode<synchronous>, transform_indices = @transform_16, window_bounds = array<i64: 1, 120>}, {pipeline_mode = #tpu.pipeline_mode<synchronous>, transform_indices = @transform_17, window_bounds = array<i64: 1, 120>}, {pipeline_mode = #tpu.pipeline_mode<synchronous>, transform_indices = @transform_18, window_bounds = array<i64: 120, 10>}, {pipeline_mode = #tpu.pipeline_mode<synchronous>, transform_indices = @transform_19, window_bounds = array<i64: 1, 10>}, {pipeline_mode = #tpu.pipeline_mode<synchronous>, transform_indices = @transform_20, window_bounds = array<i64: 2, 10>}]} {
    %c0 = arith.constant 0 : index
    %c0_0 = arith.constant 0 : index
    %c0_1 = arith.constant 0 : index
    %0 = vector.load %arg1[%c0, %c0_0, %c0_1] : memref<4x15x122xf32, #tpu.memory_space<vmem>>, vector<1x15x122xf32>
    %1 = vector.shape_cast %0 : vector<1x15x122xf32> to vector<15x122xf32>
    %c1 = arith.constant 1 : index
    %c0_2 = arith.constant 0 : index
    %c0_3 = arith.constant 0 : index
    %2 = vector.load %arg1[%c1, %c0_2, %c0_3] : memref<4x15x122xf32, #tpu.memory_space<vmem>>, vector<1x15x122xf32>
    %3 = vector.shape_cast %2 : vector<1x15x122xf32> to vector<15x122xf32>
    %c2 = arith.constant 2 : index
    %c0_4 = arith.constant 0 : index
    %c0_5 = arith.constant 0 : index
    %4 = vector.load %arg1[%c2, %c0_4, %c0_5] : memref<4x15x122xf32, #tpu.memory_space<vmem>>, vector<1x15x122xf32>
    %5 = vector.shape_cast %4 : vector<1x15x122xf32> to vector<15x122xf32>
    %c3 = arith.constant 3 : index
    %c0_6 = arith.constant 0 : index
    %c0_7 = arith.constant 0 : index
    %6 = vector.load %arg1[%c3, %c0_6, %c0_7] : memref<4x15x122xf32, #tpu.memory_space<vmem>>, vector<1x15x122xf32>
    %7 = vector.shape_cast %6 : vector<1x15x122xf32> to vector<15x122xf32>
    %c0_8 = arith.constant 0 : index
    %c0_9 = arith.constant 0 : index
    %8 = vector.load %arg2[%c0_8, %c0_9] : memref<4x25xf32, #tpu.memory_space<vmem>>, vector<4x25xf32>
    %c0_10 = arith.constant 0 : index
    %c0_11 = arith.constant 0 : index
    %9 = vector.load %arg3[%c0_10, %c0_11] : memref<4x1xf32, #tpu.memory_space<vmem>>, vector<4x1xf32>
    %cst = arith.constant 0.000000e+00 : f32
    %10 = vector.broadcast %cst : f32 to vector<4x1xf32>
    %cst_12 = arith.constant 0.000000e+00 : f32
    %11 = vector.broadcast %cst_12 : f32 to vector<4x1xf32>
    %12 = vector.extract_strided_slice %1 {offsets = [0, 0], sizes = [5, 120], strides = [1, 1]} : vector<15x122xf32> to vector<5x120xf32>
    %13 = vector.extract_strided_slice %3 {offsets = [0, 0], sizes = [5, 120], strides = [1, 1]} : vector<15x122xf32> to vector<5x120xf32>
    %14 = vector.extract_strided_slice %5 {offsets = [0, 0], sizes = [5, 120], strides = [1, 1]} : vector<15x122xf32> to vector<5x120xf32>
    %15 = vector.extract_strided_slice %7 {offsets = [0, 0], sizes = [5, 120], strides = [1, 1]} : vector<15x122xf32> to vector<5x120xf32>
    %16 = vector.extract_strided_slice %1 {offsets = [0, 2], sizes = [5, 120], strides = [1, 1]} : vector<15x122xf32> to vector<5x120xf32>
    %17 = tpu.concatenate %12, %13, %14, %15, %16 in 0 : vector<5x120xf32>, vector<5x120xf32>, vector<5x120xf32>, vector<5x120xf32>, vector<5x120xf32> -> vector<25x120xf32>
    %18 = vector.extract_strided_slice %1 {offsets = [1, 0], sizes = [5, 120], strides = [1, 1]} : vector<15x122xf32> to vector<5x120xf32>
    %19 = vector.extract_strided_slice %3 {offsets = [1, 0], sizes = [5, 120], strides = [1, 1]} : vector<15x122xf32> to vector<5x120xf32>
    %20 = vector.extract_strided_slice %5 {offsets = [1, 0], sizes = [5, 120], strides = [1, 1]} : vector<15x122xf32> to vector<5x120xf32>
    %21 = vector.extract_strided_slice %7 {offsets = [1, 0], sizes = [5, 120], strides = [1, 1]} : vector<15x122xf32> to vector<5x120xf32>
    %22 = vector.extract_strided_slice %1 {offsets = [1, 2], sizes = [5, 120], strides = [1, 1]} : vector<15x122xf32> to vector<5x120xf32>
    %23 = tpu.concatenate %18, %19, %20, %21, %22 in 0 : vector<5x120xf32>, vector<5x120xf32>, vector<5x120xf32>, vector<5x120xf32>, vector<5x120xf32> -> vector<25x120xf32>
    %24 = vector.extract_strided_slice %1 {offsets = [2, 0], sizes = [5, 120], strides = [1, 1]} : vector<15x122xf32> to vector<5x120xf32>
    %25 = vector.extract_strided_slice %3 {offsets = [2, 0], sizes = [5, 120], strides = [1, 1]} : vector<15x122xf32> to vector<5x120xf32>
    %26 = vector.extract_strided_slice %5 {offsets = [2, 0], sizes = [5, 120], strides = [1, 1]} : vector<15x122xf32> to vector<5x120xf32>
    %27 = vector.extract_strided_slice %7 {offsets = [2, 0], sizes = [5, 120], strides = [1, 1]} : vector<15x122xf32> to vector<5x120xf32>
    %28 = vector.extract_strided_slice %1 {offsets = [2, 2], sizes = [5, 120], strides = [1, 1]} : vector<15x122xf32> to vector<5x120xf32>
    %29 = tpu.concatenate %24, %25, %26, %27, %28 in 0 : vector<5x120xf32>, vector<5x120xf32>, vector<5x120xf32>, vector<5x120xf32>, vector<5x120xf32> -> vector<25x120xf32>
    %30 = vector.extract_strided_slice %1 {offsets = [3, 0], sizes = [5, 120], strides = [1, 1]} : vector<15x122xf32> to vector<5x120xf32>
    %31 = vector.extract_strided_slice %3 {offsets = [3, 0], sizes = [5, 120], strides = [1, 1]} : vector<15x122xf32> to vector<5x120xf32>
    %32 = vector.extract_strided_slice %5 {offsets = [3, 0], sizes = [5, 120], strides = [1, 1]} : vector<15x122xf32> to vector<5x120xf32>
    %33 = vector.extract_strided_slice %7 {offsets = [3, 0], sizes = [5, 120], strides = [1, 1]} : vector<15x122xf32> to vector<5x120xf32>
    %34 = vector.extract_strided_slice %1 {offsets = [3, 2], sizes = [5, 120], strides = [1, 1]} : vector<15x122xf32> to vector<5x120xf32>
    %35 = tpu.concatenate %30, %31, %32, %33, %34 in 0 : vector<5x120xf32>, vector<5x120xf32>, vector<5x120xf32>, vector<5x120xf32>, vector<5x120xf32> -> vector<25x120xf32>
    %36 = vector.extract_strided_slice %1 {offsets = [4, 0], sizes = [5, 120], strides = [1, 1]} : vector<15x122xf32> to vector<5x120xf32>
    %37 = vector.extract_strided_slice %3 {offsets = [4, 0], sizes = [5, 120], strides = [1, 1]} : vector<15x122xf32> to vector<5x120xf32>
    %38 = vector.extract_strided_slice %5 {offsets = [4, 0], sizes = [5, 120], strides = [1, 1]} : vector<15x122xf32> to vector<5x120xf32>
    %39 = vector.extract_strided_slice %7 {offsets = [4, 0], sizes = [5, 120], strides = [1, 1]} : vector<15x122xf32> to vector<5x120xf32>
    %40 = vector.extract_strided_slice %1 {offsets = [4, 2], sizes = [5, 120], strides = [1, 1]} : vector<15x122xf32> to vector<5x120xf32>
    %41 = tpu.concatenate %36, %37, %38, %39, %40 in 0 : vector<5x120xf32>, vector<5x120xf32>, vector<5x120xf32>, vector<5x120xf32>, vector<5x120xf32> -> vector<25x120xf32>
    %42 = vector.extract_strided_slice %1 {offsets = [5, 0], sizes = [5, 120], strides = [1, 1]} : vector<15x122xf32> to vector<5x120xf32>
    %43 = vector.extract_strided_slice %3 {offsets = [5, 0], sizes = [5, 120], strides = [1, 1]} : vector<15x122xf32> to vector<5x120xf32>
    %44 = vector.extract_strided_slice %5 {offsets = [5, 0], sizes = [5, 120], strides = [1, 1]} : vector<15x122xf32> to vector<5x120xf32>
    %45 = vector.extract_strided_slice %7 {offsets = [5, 0], sizes = [5, 120], strides = [1, 1]} : vector<15x122xf32> to vector<5x120xf32>
    %46 = vector.extract_strided_slice %1 {offsets = [5, 2], sizes = [5, 120], strides = [1, 1]} : vector<15x122xf32> to vector<5x120xf32>
    %47 = tpu.concatenate %42, %43, %44, %45, %46 in 0 : vector<5x120xf32>, vector<5x120xf32>, vector<5x120xf32>, vector<5x120xf32>, vector<5x120xf32> -> vector<25x120xf32>
    %48 = vector.extract_strided_slice %1 {offsets = [6, 0], sizes = [5, 120], strides = [1, 1]} : vector<15x122xf32> to vector<5x120xf32>
    %49 = vector.extract_strided_slice %3 {offsets = [6, 0], sizes = [5, 120], strides = [1, 1]} : vector<15x122xf32> to vector<5x120xf32>
    %50 = vector.extract_strided_slice %5 {offsets = [6, 0], sizes = [5, 120], strides = [1, 1]} : vector<15x122xf32> to vector<5x120xf32>
    %51 = vector.extract_strided_slice %7 {offsets = [6, 0], sizes = [5, 120], strides = [1, 1]} : vector<15x122xf32> to vector<5x120xf32>
    %52 = vector.extract_strided_slice %1 {offsets = [6, 2], sizes = [5, 120], strides = [1, 1]} : vector<15x122xf32> to vector<5x120xf32>
    %53 = tpu.concatenate %48, %49, %50, %51, %52 in 0 : vector<5x120xf32>, vector<5x120xf32>, vector<5x120xf32>, vector<5x120xf32>, vector<5x120xf32> -> vector<25x120xf32>
    %54 = vector.extract_strided_slice %1 {offsets = [7, 0], sizes = [5, 120], strides = [1, 1]} : vector<15x122xf32> to vector<5x120xf32>
    %55 = vector.extract_strided_slice %3 {offsets = [7, 0], sizes = [5, 120], strides = [1, 1]} : vector<15x122xf32> to vector<5x120xf32>
    %56 = vector.extract_strided_slice %5 {offsets = [7, 0], sizes = [5, 120], strides = [1, 1]} : vector<15x122xf32> to vector<5x120xf32>
    %57 = vector.extract_strided_slice %7 {offsets = [7, 0], sizes = [5, 120], strides = [1, 1]} : vector<15x122xf32> to vector<5x120xf32>
    %58 = vector.extract_strided_slice %1 {offsets = [7, 2], sizes = [5, 120], strides = [1, 1]} : vector<15x122xf32> to vector<5x120xf32>
    %59 = tpu.concatenate %54, %55, %56, %57, %58 in 0 : vector<5x120xf32>, vector<5x120xf32>, vector<5x120xf32>, vector<5x120xf32>, vector<5x120xf32> -> vector<25x120xf32>
    %60 = vector.extract_strided_slice %1 {offsets = [8, 0], sizes = [5, 120], strides = [1, 1]} : vector<15x122xf32> to vector<5x120xf32>
    %61 = vector.extract_strided_slice %3 {offsets = [8, 0], sizes = [5, 120], strides = [1, 1]} : vector<15x122xf32> to vector<5x120xf32>
    %62 = vector.extract_strided_slice %5 {offsets = [8, 0], sizes = [5, 120], strides = [1, 1]} : vector<15x122xf32> to vector<5x120xf32>
    %63 = vector.extract_strided_slice %7 {offsets = [8, 0], sizes = [5, 120], strides = [1, 1]} : vector<15x122xf32> to vector<5x120xf32>
    %64 = vector.extract_strided_slice %1 {offsets = [8, 2], sizes = [5, 120], strides = [1, 1]} : vector<15x122xf32> to vector<5x120xf32>
    %65 = tpu.concatenate %60, %61, %62, %63, %64 in 0 : vector<5x120xf32>, vector<5x120xf32>, vector<5x120xf32>, vector<5x120xf32>, vector<5x120xf32> -> vector<25x120xf32>
    %66 = vector.extract_strided_slice %1 {offsets = [9, 0], sizes = [5, 120], strides = [1, 1]} : vector<15x122xf32> to vector<5x120xf32>
    %67 = vector.extract_strided_slice %3 {offsets = [9, 0], sizes = [5, 120], strides = [1, 1]} : vector<15x122xf32> to vector<5x120xf32>
    %68 = vector.extract_strided_slice %5 {offsets = [9, 0], sizes = [5, 120], strides = [1, 1]} : vector<15x122xf32> to vector<5x120xf32>
    %69 = vector.extract_strided_slice %7 {offsets = [9, 0], sizes = [5, 120], strides = [1, 1]} : vector<15x122xf32> to vector<5x120xf32>
    %70 = vector.extract_strided_slice %1 {offsets = [9, 2], sizes = [5, 120], strides = [1, 1]} : vector<15x122xf32> to vector<5x120xf32>
    %71 = tpu.concatenate %66, %67, %68, %69, %70 in 0 : vector<5x120xf32>, vector<5x120xf32>, vector<5x120xf32>, vector<5x120xf32>, vector<5x120xf32> -> vector<25x120xf32>
    %72 = vector.extract_strided_slice %1 {offsets = [10, 0], sizes = [5, 120], strides = [1, 1]} : vector<15x122xf32> to vector<5x120xf32>
    %73 = vector.extract_strided_slice %3 {offsets = [10, 0], sizes = [5, 120], strides = [1, 1]} : vector<15x122xf32> to vector<5x120xf32>
    %74 = vector.extract_strided_slice %5 {offsets = [10, 0], sizes = [5, 120], strides = [1, 1]} : vector<15x122xf32> to vector<5x120xf32>
    %75 = vector.extract_strided_slice %7 {offsets = [10, 0], sizes = [5, 120], strides = [1, 1]} : vector<15x122xf32> to vector<5x120xf32>
    %76 = vector.extract_strided_slice %1 {offsets = [10, 2], sizes = [5, 120], strides = [1, 1]} : vector<15x122xf32> to vector<5x120xf32>
    %77 = tpu.concatenate %72, %73, %74, %75, %76 in 0 : vector<5x120xf32>, vector<5x120xf32>, vector<5x120xf32>, vector<5x120xf32>, vector<5x120xf32> -> vector<25x120xf32>
    %78 = tpu.concatenate %17, %23, %29, %35, %41, %47, %53, %59, %65, %71, %77 in 1 : vector<25x120xf32>, vector<25x120xf32>, vector<25x120xf32>, vector<25x120xf32>, vector<25x120xf32>, vector<25x120xf32>, vector<25x120xf32>, vector<25x120xf32>, vector<25x120xf32>, vector<25x120xf32>, vector<25x120xf32> -> vector<25x1320xf32>
    %cst_13 = arith.constant dense<0.000000e+00> : vector<4x1320xf32>
    %79 = tpu.matmul %8, %78, %cst_13 {dimension_numbers = #tpu.dot_dimension_numbers<[1], [0], [0], [1], [0, 0, 1, 1], [], []>} : vector<4x25xf32>, vector<25x1320xf32>, vector<4x1320xf32> -> vector<4x1320xf32>
    %80 = vector.broadcast %9 : vector<4x1xf32> to vector<4x1320xf32>
    %81 = arith.addf %79, %80 : vector<4x1320xf32>
    %cst_14 = arith.constant 0.000000e+00 : f32
    %82 = vector.broadcast %cst_14 : f32 to vector<4x1320xf32>
    %83 = arith.maximumf %81, %82 : vector<4x1320xf32>
    %cst_15 = arith.constant dense<0.000000e+00> : vector<4xf32>
    %84 = vector.multi_reduction <add>, %83, %cst_15 [1] : vector<4x1320xf32> to vector<4xf32>
    %85 = vector.shape_cast %84 : vector<4xf32> to vector<4x1xf32>
    %86 = arith.addf %10, %85 : vector<4x1xf32>
    %87 = arith.mulf %83, %83 : vector<4x1320xf32>
    %cst_16 = arith.constant dense<0.000000e+00> : vector<4xf32>
    %88 = vector.multi_reduction <add>, %87, %cst_16 [1] : vector<4x1320xf32> to vector<4xf32>
    %89 = vector.shape_cast %88 : vector<4xf32> to vector<4x1xf32>
    %90 = arith.addf %11, %89 : vector<4x1xf32>
    %91 = vector.extract_strided_slice %3 {offsets = [0, 0], sizes = [5, 120], strides = [1, 1]} : vector<15x122xf32> to vector<5x120xf32>
    %92 = vector.extract_strided_slice %5 {offsets = [0, 0], sizes = [5, 120], strides = [1, 1]} : vector<15x122xf32> to vector<5x120xf32>
    %93 = vector.extract_strided_slice %7 {offsets = [0, 0], sizes = [5, 120], strides = [1, 1]} : vector<15x122xf32> to vector<5x120xf32>
    %94 = vector.extract_strided_slice %1 {offsets = [0, 2], sizes = [5, 120], strides = [1, 1]} : vector<15x122xf32> to vector<5x120xf32>
    %95 = vector.extract_strided_slice %3 {offsets = [0, 2], sizes = [5, 120], strides = [1, 1]} : vector<15x122xf32> to vector<5x120xf32>
    %96 = tpu.concatenate %91, %92, %93, %94, %95 in 0 : vector<5x120xf32>, vector<5x120xf32>, vector<5x120xf32>, vector<5x120xf32>, vector<5x120xf32> -> vector<25x120xf32>
    %97 = vector.extract_strided_slice %3 {offsets = [1, 0], sizes = [5, 120], strides = [1, 1]} : vector<15x122xf32> to vector<5x120xf32>
    %98 = vector.extract_strided_slice %5 {offsets = [1, 0], sizes = [5, 120], strides = [1, 1]} : vector<15x122xf32> to vector<5x120xf32>
    %99 = vector.extract_strided_slice %7 {offsets = [1, 0], sizes = [5, 120], strides = [1, 1]} : vector<15x122xf32> to vector<5x120xf32>
    %100 = vector.extract_strided_slice %1 {offsets = [1, 2], sizes = [5, 120], strides = [1, 1]} : vector<15x122xf32> to vector<5x120xf32>
    %101 = vector.extract_strided_slice %3 {offsets = [1, 2], sizes = [5, 120], strides = [1, 1]} : vector<15x122xf32> to vector<5x120xf32>
    %102 = tpu.concatenate %97, %98, %99, %100, %101 in 0 : vector<5x120xf32>, vector<5x120xf32>, vector<5x120xf32>, vector<5x120xf32>, vector<5x120xf32> -> vector<25x120xf32>
    %103 = vector.extract_strided_slice %3 {offsets = [2, 0], sizes = [5, 120], strides = [1, 1]} : vector<15x122xf32> to vector<5x120xf32>
    %104 = vector.extract_strided_slice %5 {offsets = [2, 0], sizes = [5, 120], strides = [1, 1]} : vector<15x122xf32> to vector<5x120xf32>
    %105 = vector.extract_strided_slice %7 {offsets = [2, 0], sizes = [5, 120], strides = [1, 1]} : vector<15x122xf32> to vector<5x120xf32>
    %106 = vector.extract_strided_slice %1 {offsets = [2, 2], sizes = [5, 120], strides = [1, 1]} : vector<15x122xf32> to vector<5x120xf32>
    %107 = vector.extract_strided_slice %3 {offsets = [2, 2], sizes = [5, 120], strides = [1, 1]} : vector<15x122xf32> to vector<5x120xf32>
    %108 = tpu.concatenate %103, %104, %105, %106, %107 in 0 : vector<5x120xf32>, vector<5x120xf32>, vector<5x120xf32>, vector<5x120xf32>, vector<5x120xf32> -> vector<25x120xf32>
    %109 = vector.extract_strided_slice %3 {offsets = [3, 0], sizes = [5, 120], strides = [1, 1]} : vector<15x122xf32> to vector<5x120xf32>
    %110 = vector.extract_strided_slice %5 {offsets = [3, 0], sizes = [5, 120], strides = [1, 1]} : vector<15x122xf32> to vector<5x120xf32>
    %111 = vector.extract_strided_slice %7 {offsets = [3, 0], sizes = [5, 120], strides = [1, 1]} : vector<15x122xf32> to vector<5x120xf32>
    %112 = vector.extract_strided_slice %1 {offsets = [3, 2], sizes = [5, 120], strides = [1, 1]} : vector<15x122xf32> to vector<5x120xf32>
    %113 = vector.extract_strided_slice %3 {offsets = [3, 2], sizes = [5, 120], strides = [1, 1]} : vector<15x122xf32> to vector<5x120xf32>
    %114 = tpu.concatenate %109, %110, %111, %112, %113 in 0 : vector<5x120xf32>, vector<5x120xf32>, vector<5x120xf32>, vector<5x120xf32>, vector<5x120xf32> -> vector<25x120xf32>
    %115 = vector.extract_strided_slice %3 {offsets = [4, 0], sizes = [5, 120], strides = [1, 1]} : vector<15x122xf32> to vector<5x120xf32>
    %116 = vector.extract_strided_slice %5 {offsets = [4, 0], sizes = [5, 120], strides = [1, 1]} : vector<15x122xf32> to vector<5x120xf32>
    %117 = vector.extract_strided_slice %7 {offsets = [4, 0], sizes = [5, 120], strides = [1, 1]} : vector<15x122xf32> to vector<5x120xf32>
    %118 = vector.extract_strided_slice %1 {offsets = [4, 2], sizes = [5, 120], strides = [1, 1]} : vector<15x122xf32> to vector<5x120xf32>
    %119 = vector.extract_strided_slice %3 {offsets = [4, 2], sizes = [5, 120], strides = [1, 1]} : vector<15x122xf32> to vector<5x120xf32>
    %120 = tpu.concatenate %115, %116, %117, %118, %119 in 0 : vector<5x120xf32>, vector<5x120xf32>, vector<5x120xf32>, vector<5x120xf32>, vector<5x120xf32> -> vector<25x120xf32>
    %121 = vector.extract_strided_slice %3 {offsets = [5, 0], sizes = [5, 120], strides = [1, 1]} : vector<15x122xf32> to vector<5x120xf32>
    %122 = vector.extract_strided_slice %5 {offsets = [5, 0], sizes = [5, 120], strides = [1, 1]} : vector<15x122xf32> to vector<5x120xf32>
    %123 = vector.extract_strided_slice %7 {offsets = [5, 0], sizes = [5, 120], strides = [1, 1]} : vector<15x122xf32> to vector<5x120xf32>
    %124 = vector.extract_strided_slice %1 {offsets = [5, 2], sizes = [5, 120], strides = [1, 1]} : vector<15x122xf32> to vector<5x120xf32>
    %125 = vector.extract_strided_slice %3 {offsets = [5, 2], sizes = [5, 120], strides = [1, 1]} : vector<15x122xf32> to vector<5x120xf32>
    %126 = tpu.concatenate %121, %122, %123, %124, %125 in 0 : vector<5x120xf32>, vector<5x120xf32>, vector<5x120xf32>, vector<5x120xf32>, vector<5x120xf32> -> vector<25x120xf32>
    %127 = vector.extract_strided_slice %3 {offsets = [6, 0], sizes = [5, 120], strides = [1, 1]} : vector<15x122xf32> to vector<5x120xf32>
    %128 = vector.extract_strided_slice %5 {offsets = [6, 0], sizes = [5, 120], strides = [1, 1]} : vector<15x122xf32> to vector<5x120xf32>
    %129 = vector.extract_strided_slice %7 {offsets = [6, 0], sizes = [5, 120], strides = [1, 1]} : vector<15x122xf32> to vector<5x120xf32>
    %130 = vector.extract_strided_slice %1 {offsets = [6, 2], sizes = [5, 120], strides = [1, 1]} : vector<15x122xf32> to vector<5x120xf32>
    %131 = vector.extract_strided_slice %3 {offsets = [6, 2], sizes = [5, 120], strides = [1, 1]} : vector<15x122xf32> to vector<5x120xf32>
    %132 = tpu.concatenate %127, %128, %129, %130, %131 in 0 : vector<5x120xf32>, vector<5x120xf32>, vector<5x120xf32>, vector<5x120xf32>, vector<5x120xf32> -> vector<25x120xf32>
    %133 = vector.extract_strided_slice %3 {offsets = [7, 0], sizes = [5, 120], strides = [1, 1]} : vector<15x122xf32> to vector<5x120xf32>
    %134 = vector.extract_strided_slice %5 {offsets = [7, 0], sizes = [5, 120], strides = [1, 1]} : vector<15x122xf32> to vector<5x120xf32>
    %135 = vector.extract_strided_slice %7 {offsets = [7, 0], sizes = [5, 120], strides = [1, 1]} : vector<15x122xf32> to vector<5x120xf32>
    %136 = vector.extract_strided_slice %1 {offsets = [7, 2], sizes = [5, 120], strides = [1, 1]} : vector<15x122xf32> to vector<5x120xf32>
    %137 = vector.extract_strided_slice %3 {offsets = [7, 2], sizes = [5, 120], strides = [1, 1]} : vector<15x122xf32> to vector<5x120xf32>
    %138 = tpu.concatenate %133, %134, %135, %136, %137 in 0 : vector<5x120xf32>, vector<5x120xf32>, vector<5x120xf32>, vector<5x120xf32>, vector<5x120xf32> -> vector<25x120xf32>
    %139 = vector.extract_strided_slice %3 {offsets = [8, 0], sizes = [5, 120], strides = [1, 1]} : vector<15x122xf32> to vector<5x120xf32>
    %140 = vector.extract_strided_slice %5 {offsets = [8, 0], sizes = [5, 120], strides = [1, 1]} : vector<15x122xf32> to vector<5x120xf32>
    %141 = vector.extract_strided_slice %7 {offsets = [8, 0], sizes = [5, 120], strides = [1, 1]} : vector<15x122xf32> to vector<5x120xf32>
    %142 = vector.extract_strided_slice %1 {offsets = [8, 2], sizes = [5, 120], strides = [1, 1]} : vector<15x122xf32> to vector<5x120xf32>
    %143 = vector.extract_strided_slice %3 {offsets = [8, 2], sizes = [5, 120], strides = [1, 1]} : vector<15x122xf32> to vector<5x120xf32>
    %144 = tpu.concatenate %139, %140, %141, %142, %143 in 0 : vector<5x120xf32>, vector<5x120xf32>, vector<5x120xf32>, vector<5x120xf32>, vector<5x120xf32> -> vector<25x120xf32>
    %145 = vector.extract_strided_slice %3 {offsets = [9, 0], sizes = [5, 120], strides = [1, 1]} : vector<15x122xf32> to vector<5x120xf32>
    %146 = vector.extract_strided_slice %5 {offsets = [9, 0], sizes = [5, 120], strides = [1, 1]} : vector<15x122xf32> to vector<5x120xf32>
    %147 = vector.extract_strided_slice %7 {offsets = [9, 0], sizes = [5, 120], strides = [1, 1]} : vector<15x122xf32> to vector<5x120xf32>
    %148 = vector.extract_strided_slice %1 {offsets = [9, 2], sizes = [5, 120], strides = [1, 1]} : vector<15x122xf32> to vector<5x120xf32>
    %149 = vector.extract_strided_slice %3 {offsets = [9, 2], sizes = [5, 120], strides = [1, 1]} : vector<15x122xf32> to vector<5x120xf32>
    %150 = tpu.concatenate %145, %146, %147, %148, %149 in 0 : vector<5x120xf32>, vector<5x120xf32>, vector<5x120xf32>, vector<5x120xf32>, vector<5x120xf32> -> vector<25x120xf32>
    %151 = vector.extract_strided_slice %3 {offsets = [10, 0], sizes = [5, 120], strides = [1, 1]} : vector<15x122xf32> to vector<5x120xf32>
    %152 = vector.extract_strided_slice %5 {offsets = [10, 0], sizes = [5, 120], strides = [1, 1]} : vector<15x122xf32> to vector<5x120xf32>
    %153 = vector.extract_strided_slice %7 {offsets = [10, 0], sizes = [5, 120], strides = [1, 1]} : vector<15x122xf32> to vector<5x120xf32>
    %154 = vector.extract_strided_slice %1 {offsets = [10, 2], sizes = [5, 120], strides = [1, 1]} : vector<15x122xf32> to vector<5x120xf32>
    %155 = vector.extract_strided_slice %3 {offsets = [10, 2], sizes = [5, 120], strides = [1, 1]} : vector<15x122xf32> to vector<5x120xf32>
    %156 = tpu.concatenate %151, %152, %153, %154, %155 in 0 : vector<5x120xf32>, vector<5x120xf32>, vector<5x120xf32>, vector<5x120xf32>, vector<5x120xf32> -> vector<25x120xf32>
    %157 = tpu.concatenate %96, %102, %108, %114, %120, %126, %132, %138, %144, %150, %156 in 1 : vector<25x120xf32>, vector<25x120xf32>, vector<25x120xf32>, vector<25x120xf32>, vector<25x120xf32>, vector<25x120xf32>, vector<25x120xf32>, vector<25x120xf32>, vector<25x120xf32>, vector<25x120xf32>, vector<25x120xf32> -> vector<25x1320xf32>
    %cst_17 = arith.constant dense<0.000000e+00> : vector<4x1320xf32>
    %158 = tpu.matmul %8, %157, %cst_17 {dimension_numbers = #tpu.dot_dimension_numbers<[1], [0], [0], [1], [0, 0, 1, 1], [], []>} : vector<4x25xf32>, vector<25x1320xf32>, vector<4x1320xf32> -> vector<4x1320xf32>
    %159 = vector.broadcast %9 : vector<4x1xf32> to vector<4x1320xf32>
    %160 = arith.addf %158, %159 : vector<4x1320xf32>
    %cst_18 = arith.constant 0.000000e+00 : f32
    %161 = vector.broadcast %cst_18 : f32 to vector<4x1320xf32>
    %162 = arith.maximumf %160, %161 : vector<4x1320xf32>
    %cst_19 = arith.constant dense<0.000000e+00> : vector<4xf32>
    %163 = vector.multi_reduction <add>, %162, %cst_19 [1] : vector<4x1320xf32> to vector<4xf32>
    %164 = vector.shape_cast %163 : vector<4xf32> to vector<4x1xf32>
    %165 = arith.addf %86, %164 : vector<4x1xf32>
    %166 = arith.mulf %162, %162 : vector<4x1320xf32>
    %cst_20 = arith.constant dense<0.000000e+00> : vector<4xf32>
    %167 = vector.multi_reduction <add>, %166, %cst_20 [1] : vector<4x1320xf32> to vector<4xf32>
    %168 = vector.shape_cast %167 : vector<4xf32> to vector<4x1xf32>
    %169 = arith.addf %90, %168 : vector<4x1xf32>
    %170 = vector.extract_strided_slice %5 {offsets = [0, 0], sizes = [5, 120], strides = [1, 1]} : vector<15x122xf32> to vector<5x120xf32>
    %171 = vector.extract_strided_slice %7 {offsets = [0, 0], sizes = [5, 120], strides = [1, 1]} : vector<15x122xf32> to vector<5x120xf32>
    %172 = vector.extract_strided_slice %1 {offsets = [0, 2], sizes = [5, 120], strides = [1, 1]} : vector<15x122xf32> to vector<5x120xf32>
    %173 = vector.extract_strided_slice %3 {offsets = [0, 2], sizes = [5, 120], strides = [1, 1]} : vector<15x122xf32> to vector<5x120xf32>
    %174 = vector.extract_strided_slice %5 {offsets = [0, 2], sizes = [5, 120], strides = [1, 1]} : vector<15x122xf32> to vector<5x120xf32>
    %175 = tpu.concatenate %170, %171, %172, %173, %174 in 0 : vector<5x120xf32>, vector<5x120xf32>, vector<5x120xf32>, vector<5x120xf32>, vector<5x120xf32> -> vector<25x120xf32>
    %176 = vector.extract_strided_slice %5 {offsets = [1, 0], sizes = [5, 120], strides = [1, 1]} : vector<15x122xf32> to vector<5x120xf32>
    %177 = vector.extract_strided_slice %7 {offsets = [1, 0], sizes = [5, 120], strides = [1, 1]} : vector<15x122xf32> to vector<5x120xf32>
    %178 = vector.extract_strided_slice %1 {offsets = [1, 2], sizes = [5, 120], strides = [1, 1]} : vector<15x122xf32> to vector<5x120xf32>
    %179 = vector.extract_strided_slice %3 {offsets = [1, 2], sizes = [5, 120], strides = [1, 1]} : vector<15x122xf32> to vector<5x120xf32>
    %180 = vector.extract_strided_slice %5 {offsets = [1, 2], sizes = [5, 120], strides = [1, 1]} : vector<15x122xf32> to vector<5x120xf32>
    %181 = tpu.concatenate %176, %177, %178, %179, %180 in 0 : vector<5x120xf32>, vector<5x120xf32>, vector<5x120xf32>, vector<5x120xf32>, vector<5x120xf32> -> vector<25x120xf32>
    %182 = vector.extract_strided_slice %5 {offsets = [2, 0], sizes = [5, 120], strides = [1, 1]} : vector<15x122xf32> to vector<5x120xf32>
    %183 = vector.extract_strided_slice %7 {offsets = [2, 0], sizes = [5, 120], strides = [1, 1]} : vector<15x122xf32> to vector<5x120xf32>
    %184 = vector.extract_strided_slice %1 {offsets = [2, 2], sizes = [5, 120], strides = [1, 1]} : vector<15x122xf32> to vector<5x120xf32>
    %185 = vector.extract_strided_slice %3 {offsets = [2, 2], sizes = [5, 120], strides = [1, 1]} : vector<15x122xf32> to vector<5x120xf32>
    %186 = vector.extract_strided_slice %5 {offsets = [2, 2], sizes = [5, 120], strides = [1, 1]} : vector<15x122xf32> to vector<5x120xf32>
    %187 = tpu.concatenate %182, %183, %184, %185, %186 in 0 : vector<5x120xf32>, vector<5x120xf32>, vector<5x120xf32>, vector<5x120xf32>, vector<5x120xf32> -> vector<25x120xf32>
    %188 = vector.extract_strided_slice %5 {offsets = [3, 0], sizes = [5, 120], strides = [1, 1]} : vector<15x122xf32> to vector<5x120xf32>
    %189 = vector.extract_strided_slice %7 {offsets = [3, 0], sizes = [5, 120], strides = [1, 1]} : vector<15x122xf32> to vector<5x120xf32>
    %190 = vector.extract_strided_slice %1 {offsets = [3, 2], sizes = [5, 120], strides = [1, 1]} : vector<15x122xf32> to vector<5x120xf32>
    %191 = vector.extract_strided_slice %3 {offsets = [3, 2], sizes = [5, 120], strides = [1, 1]} : vector<15x122xf32> to vector<5x120xf32>
    %192 = vector.extract_strided_slice %5 {offsets = [3, 2], sizes = [5, 120], strides = [1, 1]} : vector<15x122xf32> to vector<5x120xf32>
    %193 = tpu.concatenate %188, %189, %190, %191, %192 in 0 : vector<5x120xf32>, vector<5x120xf32>, vector<5x120xf32>, vector<5x120xf32>, vector<5x120xf32> -> vector<25x120xf32>
    %194 = vector.extract_strided_slice %5 {offsets = [4, 0], sizes = [5, 120], strides = [1, 1]} : vector<15x122xf32> to vector<5x120xf32>
    %195 = vector.extract_strided_slice %7 {offsets = [4, 0], sizes = [5, 120], strides = [1, 1]} : vector<15x122xf32> to vector<5x120xf32>
    %196 = vector.extract_strided_slice %1 {offsets = [4, 2], sizes = [5, 120], strides = [1, 1]} : vector<15x122xf32> to vector<5x120xf32>
    %197 = vector.extract_strided_slice %3 {offsets = [4, 2], sizes = [5, 120], strides = [1, 1]} : vector<15x122xf32> to vector<5x120xf32>
    %198 = vector.extract_strided_slice %5 {offsets = [4, 2], sizes = [5, 120], strides = [1, 1]} : vector<15x122xf32> to vector<5x120xf32>
    %199 = tpu.concatenate %194, %195, %196, %197, %198 in 0 : vector<5x120xf32>, vector<5x120xf32>, vector<5x120xf32>, vector<5x120xf32>, vector<5x120xf32> -> vector<25x120xf32>
    %200 = vector.extract_strided_slice %5 {offsets = [5, 0], sizes = [5, 120], strides = [1, 1]} : vector<15x122xf32> to vector<5x120xf32>
    %201 = vector.extract_strided_slice %7 {offsets = [5, 0], sizes = [5, 120], strides = [1, 1]} : vector<15x122xf32> to vector<5x120xf32>
    %202 = vector.extract_strided_slice %1 {offsets = [5, 2], sizes = [5, 120], strides = [1, 1]} : vector<15x122xf32> to vector<5x120xf32>
    %203 = vector.extract_strided_slice %3 {offsets = [5, 2], sizes = [5, 120], strides = [1, 1]} : vector<15x122xf32> to vector<5x120xf32>
    %204 = vector.extract_strided_slice %5 {offsets = [5, 2], sizes = [5, 120], strides = [1, 1]} : vector<15x122xf32> to vector<5x120xf32>
    %205 = tpu.concatenate %200, %201, %202, %203, %204 in 0 : vector<5x120xf32>, vector<5x120xf32>, vector<5x120xf32>, vector<5x120xf32>, vector<5x120xf32> -> vector<25x120xf32>
    %206 = vector.extract_strided_slice %5 {offsets = [6, 0], sizes = [5, 120], strides = [1, 1]} : vector<15x122xf32> to vector<5x120xf32>
    %207 = vector.extract_strided_slice %7 {offsets = [6, 0], sizes = [5, 120], strides = [1, 1]} : vector<15x122xf32> to vector<5x120xf32>
    %208 = vector.extract_strided_slice %1 {offsets = [6, 2], sizes = [5, 120], strides = [1, 1]} : vector<15x122xf32> to vector<5x120xf32>
    %209 = vector.extract_strided_slice %3 {offsets = [6, 2], sizes = [5, 120], strides = [1, 1]} : vector<15x122xf32> to vector<5x120xf32>
    %210 = vector.extract_strided_slice %5 {offsets = [6, 2], sizes = [5, 120], strides = [1, 1]} : vector<15x122xf32> to vector<5x120xf32>
    %211 = tpu.concatenate %206, %207, %208, %209, %210 in 0 : vector<5x120xf32>, vector<5x120xf32>, vector<5x120xf32>, vector<5x120xf32>, vector<5x120xf32> -> vector<25x120xf32>
    %212 = vector.extract_strided_slice %5 {offsets = [7, 0], sizes = [5, 120], strides = [1, 1]} : vector<15x122xf32> to vector<5x120xf32>
    %213 = vector.extract_strided_slice %7 {offsets = [7, 0], sizes = [5, 120], strides = [1, 1]} : vector<15x122xf32> to vector<5x120xf32>
    %214 = vector.extract_strided_slice %1 {offsets = [7, 2], sizes = [5, 120], strides = [1, 1]} : vector<15x122xf32> to vector<5x120xf32>
    %215 = vector.extract_strided_slice %3 {offsets = [7, 2], sizes = [5, 120], strides = [1, 1]} : vector<15x122xf32> to vector<5x120xf32>
    %216 = vector.extract_strided_slice %5 {offsets = [7, 2], sizes = [5, 120], strides = [1, 1]} : vector<15x122xf32> to vector<5x120xf32>
    %217 = tpu.concatenate %212, %213, %214, %215, %216 in 0 : vector<5x120xf32>, vector<5x120xf32>, vector<5x120xf32>, vector<5x120xf32>, vector<5x120xf32> -> vector<25x120xf32>
    %218 = vector.extract_strided_slice %5 {offsets = [8, 0], sizes = [5, 120], strides = [1, 1]} : vector<15x122xf32> to vector<5x120xf32>
    %219 = vector.extract_strided_slice %7 {offsets = [8, 0], sizes = [5, 120], strides = [1, 1]} : vector<15x122xf32> to vector<5x120xf32>
    %220 = vector.extract_strided_slice %1 {offsets = [8, 2], sizes = [5, 120], strides = [1, 1]} : vector<15x122xf32> to vector<5x120xf32>
    %221 = vector.extract_strided_slice %3 {offsets = [8, 2], sizes = [5, 120], strides = [1, 1]} : vector<15x122xf32> to vector<5x120xf32>
    %222 = vector.extract_strided_slice %5 {offsets = [8, 2], sizes = [5, 120], strides = [1, 1]} : vector<15x122xf32> to vector<5x120xf32>
    %223 = tpu.concatenate %218, %219, %220, %221, %222 in 0 : vector<5x120xf32>, vector<5x120xf32>, vector<5x120xf32>, vector<5x120xf32>, vector<5x120xf32> -> vector<25x120xf32>
    %224 = vector.extract_strided_slice %5 {offsets = [9, 0], sizes = [5, 120], strides = [1, 1]} : vector<15x122xf32> to vector<5x120xf32>
    %225 = vector.extract_strided_slice %7 {offsets = [9, 0], sizes = [5, 120], strides = [1, 1]} : vector<15x122xf32> to vector<5x120xf32>
    %226 = vector.extract_strided_slice %1 {offsets = [9, 2], sizes = [5, 120], strides = [1, 1]} : vector<15x122xf32> to vector<5x120xf32>
    %227 = vector.extract_strided_slice %3 {offsets = [9, 2], sizes = [5, 120], strides = [1, 1]} : vector<15x122xf32> to vector<5x120xf32>
    %228 = vector.extract_strided_slice %5 {offsets = [9, 2], sizes = [5, 120], strides = [1, 1]} : vector<15x122xf32> to vector<5x120xf32>
    %229 = tpu.concatenate %224, %225, %226, %227, %228 in 0 : vector<5x120xf32>, vector<5x120xf32>, vector<5x120xf32>, vector<5x120xf32>, vector<5x120xf32> -> vector<25x120xf32>
    %230 = vector.extract_strided_slice %5 {offsets = [10, 0], sizes = [5, 120], strides = [1, 1]} : vector<15x122xf32> to vector<5x120xf32>
    %231 = vector.extract_strided_slice %7 {offsets = [10, 0], sizes = [5, 120], strides = [1, 1]} : vector<15x122xf32> to vector<5x120xf32>
    %232 = vector.extract_strided_slice %1 {offsets = [10, 2], sizes = [5, 120], strides = [1, 1]} : vector<15x122xf32> to vector<5x120xf32>
    %233 = vector.extract_strided_slice %3 {offsets = [10, 2], sizes = [5, 120], strides = [1, 1]} : vector<15x122xf32> to vector<5x120xf32>
    %234 = vector.extract_strided_slice %5 {offsets = [10, 2], sizes = [5, 120], strides = [1, 1]} : vector<15x122xf32> to vector<5x120xf32>
    %235 = tpu.concatenate %230, %231, %232, %233, %234 in 0 : vector<5x120xf32>, vector<5x120xf32>, vector<5x120xf32>, vector<5x120xf32>, vector<5x120xf32> -> vector<25x120xf32>
    %236 = tpu.concatenate %175, %181, %187, %193, %199, %205, %211, %217, %223, %229, %235 in 1 : vector<25x120xf32>, vector<25x120xf32>, vector<25x120xf32>, vector<25x120xf32>, vector<25x120xf32>, vector<25x120xf32>, vector<25x120xf32>, vector<25x120xf32>, vector<25x120xf32>, vector<25x120xf32>, vector<25x120xf32> -> vector<25x1320xf32>
    %cst_21 = arith.constant dense<0.000000e+00> : vector<4x1320xf32>
    %237 = tpu.matmul %8, %236, %cst_21 {dimension_numbers = #tpu.dot_dimension_numbers<[1], [0], [0], [1], [0, 0, 1, 1], [], []>} : vector<4x25xf32>, vector<25x1320xf32>, vector<4x1320xf32> -> vector<4x1320xf32>
    %238 = vector.broadcast %9 : vector<4x1xf32> to vector<4x1320xf32>
    %239 = arith.addf %237, %238 : vector<4x1320xf32>
    %cst_22 = arith.constant 0.000000e+00 : f32
    %240 = vector.broadcast %cst_22 : f32 to vector<4x1320xf32>
    %241 = arith.maximumf %239, %240 : vector<4x1320xf32>
    %cst_23 = arith.constant dense<0.000000e+00> : vector<4xf32>
    %242 = vector.multi_reduction <add>, %241, %cst_23 [1] : vector<4x1320xf32> to vector<4xf32>
    %243 = vector.shape_cast %242 : vector<4xf32> to vector<4x1xf32>
    %244 = arith.addf %165, %243 : vector<4x1xf32>
    %245 = arith.mulf %241, %241 : vector<4x1320xf32>
    %cst_24 = arith.constant dense<0.000000e+00> : vector<4xf32>
    %246 = vector.multi_reduction <add>, %245, %cst_24 [1] : vector<4x1320xf32> to vector<4xf32>
    %247 = vector.shape_cast %246 : vector<4xf32> to vector<4x1xf32>
    %248 = arith.addf %169, %247 : vector<4x1xf32>
    %249 = vector.extract_strided_slice %7 {offsets = [0, 0], sizes = [5, 120], strides = [1, 1]} : vector<15x122xf32> to vector<5x120xf32>
    %250 = vector.extract_strided_slice %1 {offsets = [0, 2], sizes = [5, 120], strides = [1, 1]} : vector<15x122xf32> to vector<5x120xf32>
    %251 = vector.extract_strided_slice %3 {offsets = [0, 2], sizes = [5, 120], strides = [1, 1]} : vector<15x122xf32> to vector<5x120xf32>
    %252 = vector.extract_strided_slice %5 {offsets = [0, 2], sizes = [5, 120], strides = [1, 1]} : vector<15x122xf32> to vector<5x120xf32>
    %253 = vector.extract_strided_slice %7 {offsets = [0, 2], sizes = [5, 120], strides = [1, 1]} : vector<15x122xf32> to vector<5x120xf32>
    %254 = tpu.concatenate %249, %250, %251, %252, %253 in 0 : vector<5x120xf32>, vector<5x120xf32>, vector<5x120xf32>, vector<5x120xf32>, vector<5x120xf32> -> vector<25x120xf32>
    %255 = vector.extract_strided_slice %7 {offsets = [1, 0], sizes = [5, 120], strides = [1, 1]} : vector<15x122xf32> to vector<5x120xf32>
    %256 = vector.extract_strided_slice %1 {offsets = [1, 2], sizes = [5, 120], strides = [1, 1]} : vector<15x122xf32> to vector<5x120xf32>
    %257 = vector.extract_strided_slice %3 {offsets = [1, 2], sizes = [5, 120], strides = [1, 1]} : vector<15x122xf32> to vector<5x120xf32>
    %258 = vector.extract_strided_slice %5 {offsets = [1, 2], sizes = [5, 120], strides = [1, 1]} : vector<15x122xf32> to vector<5x120xf32>
    %259 = vector.extract_strided_slice %7 {offsets = [1, 2], sizes = [5, 120], strides = [1, 1]} : vector<15x122xf32> to vector<5x120xf32>
    %260 = tpu.concatenate %255, %256, %257, %258, %259 in 0 : vector<5x120xf32>, vector<5x120xf32>, vector<5x120xf32>, vector<5x120xf32>, vector<5x120xf32> -> vector<25x120xf32>
    %261 = vector.extract_strided_slice %7 {offsets = [2, 0], sizes = [5, 120], strides = [1, 1]} : vector<15x122xf32> to vector<5x120xf32>
    %262 = vector.extract_strided_slice %1 {offsets = [2, 2], sizes = [5, 120], strides = [1, 1]} : vector<15x122xf32> to vector<5x120xf32>
    %263 = vector.extract_strided_slice %3 {offsets = [2, 2], sizes = [5, 120], strides = [1, 1]} : vector<15x122xf32> to vector<5x120xf32>
    %264 = vector.extract_strided_slice %5 {offsets = [2, 2], sizes = [5, 120], strides = [1, 1]} : vector<15x122xf32> to vector<5x120xf32>
    %265 = vector.extract_strided_slice %7 {offsets = [2, 2], sizes = [5, 120], strides = [1, 1]} : vector<15x122xf32> to vector<5x120xf32>
    %266 = tpu.concatenate %261, %262, %263, %264, %265 in 0 : vector<5x120xf32>, vector<5x120xf32>, vector<5x120xf32>, vector<5x120xf32>, vector<5x120xf32> -> vector<25x120xf32>
    %267 = vector.extract_strided_slice %7 {offsets = [3, 0], sizes = [5, 120], strides = [1, 1]} : vector<15x122xf32> to vector<5x120xf32>
    %268 = vector.extract_strided_slice %1 {offsets = [3, 2], sizes = [5, 120], strides = [1, 1]} : vector<15x122xf32> to vector<5x120xf32>
    %269 = vector.extract_strided_slice %3 {offsets = [3, 2], sizes = [5, 120], strides = [1, 1]} : vector<15x122xf32> to vector<5x120xf32>
    %270 = vector.extract_strided_slice %5 {offsets = [3, 2], sizes = [5, 120], strides = [1, 1]} : vector<15x122xf32> to vector<5x120xf32>
    %271 = vector.extract_strided_slice %7 {offsets = [3, 2], sizes = [5, 120], strides = [1, 1]} : vector<15x122xf32> to vector<5x120xf32>
    %272 = tpu.concatenate %267, %268, %269, %270, %271 in 0 : vector<5x120xf32>, vector<5x120xf32>, vector<5x120xf32>, vector<5x120xf32>, vector<5x120xf32> -> vector<25x120xf32>
    %273 = vector.extract_strided_slice %7 {offsets = [4, 0], sizes = [5, 120], strides = [1, 1]} : vector<15x122xf32> to vector<5x120xf32>
    %274 = vector.extract_strided_slice %1 {offsets = [4, 2], sizes = [5, 120], strides = [1, 1]} : vector<15x122xf32> to vector<5x120xf32>
    %275 = vector.extract_strided_slice %3 {offsets = [4, 2], sizes = [5, 120], strides = [1, 1]} : vector<15x122xf32> to vector<5x120xf32>
    %276 = vector.extract_strided_slice %5 {offsets = [4, 2], sizes = [5, 120], strides = [1, 1]} : vector<15x122xf32> to vector<5x120xf32>
    %277 = vector.extract_strided_slice %7 {offsets = [4, 2], sizes = [5, 120], strides = [1, 1]} : vector<15x122xf32> to vector<5x120xf32>
    %278 = tpu.concatenate %273, %274, %275, %276, %277 in 0 : vector<5x120xf32>, vector<5x120xf32>, vector<5x120xf32>, vector<5x120xf32>, vector<5x120xf32> -> vector<25x120xf32>
    %279 = vector.extract_strided_slice %7 {offsets = [5, 0], sizes = [5, 120], strides = [1, 1]} : vector<15x122xf32> to vector<5x120xf32>
    %280 = vector.extract_strided_slice %1 {offsets = [5, 2], sizes = [5, 120], strides = [1, 1]} : vector<15x122xf32> to vector<5x120xf32>
    %281 = vector.extract_strided_slice %3 {offsets = [5, 2], sizes = [5, 120], strides = [1, 1]} : vector<15x122xf32> to vector<5x120xf32>
    %282 = vector.extract_strided_slice %5 {offsets = [5, 2], sizes = [5, 120], strides = [1, 1]} : vector<15x122xf32> to vector<5x120xf32>
    %283 = vector.extract_strided_slice %7 {offsets = [5, 2], sizes = [5, 120], strides = [1, 1]} : vector<15x122xf32> to vector<5x120xf32>
    %284 = tpu.concatenate %279, %280, %281, %282, %283 in 0 : vector<5x120xf32>, vector<5x120xf32>, vector<5x120xf32>, vector<5x120xf32>, vector<5x120xf32> -> vector<25x120xf32>
    %285 = vector.extract_strided_slice %7 {offsets = [6, 0], sizes = [5, 120], strides = [1, 1]} : vector<15x122xf32> to vector<5x120xf32>
    %286 = vector.extract_strided_slice %1 {offsets = [6, 2], sizes = [5, 120], strides = [1, 1]} : vector<15x122xf32> to vector<5x120xf32>
    %287 = vector.extract_strided_slice %3 {offsets = [6, 2], sizes = [5, 120], strides = [1, 1]} : vector<15x122xf32> to vector<5x120xf32>
    %288 = vector.extract_strided_slice %5 {offsets = [6, 2], sizes = [5, 120], strides = [1, 1]} : vector<15x122xf32> to vector<5x120xf32>
    %289 = vector.extract_strided_slice %7 {offsets = [6, 2], sizes = [5, 120], strides = [1, 1]} : vector<15x122xf32> to vector<5x120xf32>
    %290 = tpu.concatenate %285, %286, %287, %288, %289 in 0 : vector<5x120xf32>, vector<5x120xf32>, vector<5x120xf32>, vector<5x120xf32>, vector<5x120xf32> -> vector<25x120xf32>
    %291 = vector.extract_strided_slice %7 {offsets = [7, 0], sizes = [5, 120], strides = [1, 1]} : vector<15x122xf32> to vector<5x120xf32>
    %292 = vector.extract_strided_slice %1 {offsets = [7, 2], sizes = [5, 120], strides = [1, 1]} : vector<15x122xf32> to vector<5x120xf32>
    %293 = vector.extract_strided_slice %3 {offsets = [7, 2], sizes = [5, 120], strides = [1, 1]} : vector<15x122xf32> to vector<5x120xf32>
    %294 = vector.extract_strided_slice %5 {offsets = [7, 2], sizes = [5, 120], strides = [1, 1]} : vector<15x122xf32> to vector<5x120xf32>
    %295 = vector.extract_strided_slice %7 {offsets = [7, 2], sizes = [5, 120], strides = [1, 1]} : vector<15x122xf32> to vector<5x120xf32>
    %296 = tpu.concatenate %291, %292, %293, %294, %295 in 0 : vector<5x120xf32>, vector<5x120xf32>, vector<5x120xf32>, vector<5x120xf32>, vector<5x120xf32> -> vector<25x120xf32>
    %297 = vector.extract_strided_slice %7 {offsets = [8, 0], sizes = [5, 120], strides = [1, 1]} : vector<15x122xf32> to vector<5x120xf32>
    %298 = vector.extract_strided_slice %1 {offsets = [8, 2], sizes = [5, 120], strides = [1, 1]} : vector<15x122xf32> to vector<5x120xf32>
    %299 = vector.extract_strided_slice %3 {offsets = [8, 2], sizes = [5, 120], strides = [1, 1]} : vector<15x122xf32> to vector<5x120xf32>
    %300 = vector.extract_strided_slice %5 {offsets = [8, 2], sizes = [5, 120], strides = [1, 1]} : vector<15x122xf32> to vector<5x120xf32>
    %301 = vector.extract_strided_slice %7 {offsets = [8, 2], sizes = [5, 120], strides = [1, 1]} : vector<15x122xf32> to vector<5x120xf32>
    %302 = tpu.concatenate %297, %298, %299, %300, %301 in 0 : vector<5x120xf32>, vector<5x120xf32>, vector<5x120xf32>, vector<5x120xf32>, vector<5x120xf32> -> vector<25x120xf32>
    %303 = vector.extract_strided_slice %7 {offsets = [9, 0], sizes = [5, 120], strides = [1, 1]} : vector<15x122xf32> to vector<5x120xf32>
    %304 = vector.extract_strided_slice %1 {offsets = [9, 2], sizes = [5, 120], strides = [1, 1]} : vector<15x122xf32> to vector<5x120xf32>
    %305 = vector.extract_strided_slice %3 {offsets = [9, 2], sizes = [5, 120], strides = [1, 1]} : vector<15x122xf32> to vector<5x120xf32>
    %306 = vector.extract_strided_slice %5 {offsets = [9, 2], sizes = [5, 120], strides = [1, 1]} : vector<15x122xf32> to vector<5x120xf32>
    %307 = vector.extract_strided_slice %7 {offsets = [9, 2], sizes = [5, 120], strides = [1, 1]} : vector<15x122xf32> to vector<5x120xf32>
    %308 = tpu.concatenate %303, %304, %305, %306, %307 in 0 : vector<5x120xf32>, vector<5x120xf32>, vector<5x120xf32>, vector<5x120xf32>, vector<5x120xf32> -> vector<25x120xf32>
    %309 = vector.extract_strided_slice %7 {offsets = [10, 0], sizes = [5, 120], strides = [1, 1]} : vector<15x122xf32> to vector<5x120xf32>
    %310 = vector.extract_strided_slice %1 {offsets = [10, 2], sizes = [5, 120], strides = [1, 1]} : vector<15x122xf32> to vector<5x120xf32>
    %311 = vector.extract_strided_slice %3 {offsets = [10, 2], sizes = [5, 120], strides = [1, 1]} : vector<15x122xf32> to vector<5x120xf32>
    %312 = vector.extract_strided_slice %5 {offsets = [10, 2], sizes = [5, 120], strides = [1, 1]} : vector<15x122xf32> to vector<5x120xf32>
    %313 = vector.extract_strided_slice %7 {offsets = [10, 2], sizes = [5, 120], strides = [1, 1]} : vector<15x122xf32> to vector<5x120xf32>
    %314 = tpu.concatenate %309, %310, %311, %312, %313 in 0 : vector<5x120xf32>, vector<5x120xf32>, vector<5x120xf32>, vector<5x120xf32>, vector<5x120xf32> -> vector<25x120xf32>
    %315 = tpu.concatenate %254, %260, %266, %272, %278, %284, %290, %296, %302, %308, %314 in 1 : vector<25x120xf32>, vector<25x120xf32>, vector<25x120xf32>, vector<25x120xf32>, vector<25x120xf32>, vector<25x120xf32>, vector<25x120xf32>, vector<25x120xf32>, vector<25x120xf32>, vector<25x120xf32>, vector<25x120xf32> -> vector<25x1320xf32>
    %cst_25 = arith.constant dense<0.000000e+00> : vector<4x1320xf32>
    %316 = tpu.matmul %8, %315, %cst_25 {dimension_numbers = #tpu.dot_dimension_numbers<[1], [0], [0], [1], [0, 0, 1, 1], [], []>} : vector<4x25xf32>, vector<25x1320xf32>, vector<4x1320xf32> -> vector<4x1320xf32>
    %317 = vector.broadcast %9 : vector<4x1xf32> to vector<4x1320xf32>
    %318 = arith.addf %316, %317 : vector<4x1320xf32>
    %cst_26 = arith.constant 0.000000e+00 : f32
    %319 = vector.broadcast %cst_26 : f32 to vector<4x1320xf32>
    %320 = arith.maximumf %318, %319 : vector<4x1320xf32>
    %cst_27 = arith.constant dense<0.000000e+00> : vector<4xf32>
    %321 = vector.multi_reduction <add>, %320, %cst_27 [1] : vector<4x1320xf32> to vector<4xf32>
    %322 = vector.shape_cast %321 : vector<4xf32> to vector<4x1xf32>
    %323 = arith.addf %244, %322 : vector<4x1xf32>
    %324 = arith.mulf %320, %320 : vector<4x1320xf32>
    %cst_28 = arith.constant dense<0.000000e+00> : vector<4xf32>
    %325 = vector.multi_reduction <add>, %324, %cst_28 [1] : vector<4x1320xf32> to vector<4xf32>
    %326 = vector.shape_cast %325 : vector<4xf32> to vector<4x1xf32>
    %327 = arith.addf %248, %326 : vector<4x1xf32>
    %cst_29 = arith.constant 5.280000e+03 : f32
    %328 = vector.broadcast %cst_29 : f32 to vector<4x1xf32>
    %329 = arith.divf %323, %328 : vector<4x1xf32>
    %cst_30 = arith.constant 5.280000e+03 : f32
    %330 = vector.broadcast %cst_30 : f32 to vector<4x1xf32>
    %331 = arith.divf %327, %330 : vector<4x1xf32>
    %332 = arith.mulf %329, %329 : vector<4x1xf32>
    %333 = arith.subf %331, %332 : vector<4x1xf32>
    %c0_31 = arith.constant 0 : index
    %c0_32 = arith.constant 0 : index
    %334 = vector.load %arg4[%c0_31, %c0_32] : memref<4x1xf32, #tpu.memory_space<vmem>>, vector<4x1xf32>
    %cst_33 = arith.constant 9.99999974E-6 : f32
    %335 = vector.broadcast %cst_33 : f32 to vector<4x1xf32>
    %336 = arith.addf %333, %335 : vector<4x1xf32>
    %337 = math.rsqrt %336 : vector<4x1xf32>
    %338 = arith.mulf %334, %337 : vector<4x1xf32>
    %c0_34 = arith.constant 0 : index
    %c0_35 = arith.constant 0 : index
    %339 = vector.load %arg5[%c0_34, %c0_35] : memref<4x1xf32, #tpu.memory_space<vmem>>, vector<4x1xf32>
    %340 = arith.mulf %329, %338 : vector<4x1xf32>
    %341 = arith.subf %339, %340 : vector<4x1xf32>
    %342 = vector.broadcast %338 : vector<4x1xf32> to vector<4x1320xf32>
    %343 = arith.mulf %83, %342 : vector<4x1320xf32>
    %344 = vector.broadcast %341 : vector<4x1xf32> to vector<4x1320xf32>
    %345 = arith.addf %343, %344 : vector<4x1320xf32>
    %346 = vector.broadcast %338 : vector<4x1xf32> to vector<4x1320xf32>
    %347 = arith.mulf %162, %346 : vector<4x1320xf32>
    %348 = vector.broadcast %341 : vector<4x1xf32> to vector<4x1320xf32>
    %349 = arith.addf %347, %348 : vector<4x1320xf32>
    %350 = arith.maximumf %345, %349 : vector<4x1320xf32>
    %351 = vector.broadcast %338 : vector<4x1xf32> to vector<4x1320xf32>
    %352 = arith.mulf %241, %351 : vector<4x1320xf32>
    %353 = vector.broadcast %341 : vector<4x1xf32> to vector<4x1320xf32>
    %354 = arith.addf %352, %353 : vector<4x1320xf32>
    %355 = vector.broadcast %338 : vector<4x1xf32> to vector<4x1320xf32>
    %356 = arith.mulf %320, %355 : vector<4x1320xf32>
    %357 = vector.broadcast %341 : vector<4x1xf32> to vector<4x1320xf32>
    %358 = arith.addf %356, %357 : vector<4x1320xf32>
    %359 = arith.maximumf %354, %358 : vector<4x1320xf32>
    %360 = vector.extract_strided_slice %350 {offsets = [0, 0], sizes = [4, 120], strides = [1, 1]} : vector<4x1320xf32> to vector<4x120xf32>
    %361 = vector.extract_strided_slice %350 {offsets = [0, 120], sizes = [4, 120], strides = [1, 1]} : vector<4x1320xf32> to vector<4x120xf32>
    %362 = arith.maximumf %360, %361 : vector<4x120xf32>
    %363 = vector.extract_strided_slice %350 {offsets = [0, 240], sizes = [4, 120], strides = [1, 1]} : vector<4x1320xf32> to vector<4x120xf32>
    %364 = vector.extract_strided_slice %350 {offsets = [0, 360], sizes = [4, 120], strides = [1, 1]} : vector<4x1320xf32> to vector<4x120xf32>
    %365 = arith.maximumf %363, %364 : vector<4x120xf32>
    %366 = vector.extract_strided_slice %350 {offsets = [0, 480], sizes = [4, 120], strides = [1, 1]} : vector<4x1320xf32> to vector<4x120xf32>
    %367 = vector.extract_strided_slice %350 {offsets = [0, 600], sizes = [4, 120], strides = [1, 1]} : vector<4x1320xf32> to vector<4x120xf32>
    %368 = arith.maximumf %366, %367 : vector<4x120xf32>
    %369 = vector.extract_strided_slice %350 {offsets = [0, 720], sizes = [4, 120], strides = [1, 1]} : vector<4x1320xf32> to vector<4x120xf32>
    %370 = vector.extract_strided_slice %350 {offsets = [0, 840], sizes = [4, 120], strides = [1, 1]} : vector<4x1320xf32> to vector<4x120xf32>
    %371 = arith.maximumf %369, %370 : vector<4x120xf32>
    %372 = vector.extract_strided_slice %350 {offsets = [0, 960], sizes = [4, 120], strides = [1, 1]} : vector<4x1320xf32> to vector<4x120xf32>
    %373 = vector.extract_strided_slice %350 {offsets = [0, 1080], sizes = [4, 120], strides = [1, 1]} : vector<4x1320xf32> to vector<4x120xf32>
    %374 = arith.maximumf %372, %373 : vector<4x120xf32>
    %375 = vector.extract_strided_slice %359 {offsets = [0, 0], sizes = [4, 120], strides = [1, 1]} : vector<4x1320xf32> to vector<4x120xf32>
    %376 = vector.extract_strided_slice %359 {offsets = [0, 120], sizes = [4, 120], strides = [1, 1]} : vector<4x1320xf32> to vector<4x120xf32>
    %377 = arith.maximumf %375, %376 : vector<4x120xf32>
    %378 = vector.extract_strided_slice %359 {offsets = [0, 240], sizes = [4, 120], strides = [1, 1]} : vector<4x1320xf32> to vector<4x120xf32>
    %379 = vector.extract_strided_slice %359 {offsets = [0, 360], sizes = [4, 120], strides = [1, 1]} : vector<4x1320xf32> to vector<4x120xf32>
    %380 = arith.maximumf %378, %379 : vector<4x120xf32>
    %381 = vector.extract_strided_slice %359 {offsets = [0, 480], sizes = [4, 120], strides = [1, 1]} : vector<4x1320xf32> to vector<4x120xf32>
    %382 = vector.extract_strided_slice %359 {offsets = [0, 600], sizes = [4, 120], strides = [1, 1]} : vector<4x1320xf32> to vector<4x120xf32>
    %383 = arith.maximumf %381, %382 : vector<4x120xf32>
    %384 = vector.extract_strided_slice %359 {offsets = [0, 720], sizes = [4, 120], strides = [1, 1]} : vector<4x1320xf32> to vector<4x120xf32>
    %385 = vector.extract_strided_slice %359 {offsets = [0, 840], sizes = [4, 120], strides = [1, 1]} : vector<4x1320xf32> to vector<4x120xf32>
    %386 = arith.maximumf %384, %385 : vector<4x120xf32>
    %387 = vector.extract_strided_slice %359 {offsets = [0, 960], sizes = [4, 120], strides = [1, 1]} : vector<4x1320xf32> to vector<4x120xf32>
    %388 = vector.extract_strided_slice %359 {offsets = [0, 1080], sizes = [4, 120], strides = [1, 1]} : vector<4x1320xf32> to vector<4x120xf32>
    %389 = arith.maximumf %387, %388 : vector<4x120xf32>
    %c0_36 = arith.constant 0 : index
    %c0_37 = arith.constant 0 : index
    %390 = vector.load %arg6[%c0_36, %c0_37] : memref<8x36xf32, #tpu.memory_space<vmem>>, vector<8x36xf32>
    %c0_38 = arith.constant 0 : index
    %c0_39 = arith.constant 0 : index
    %391 = vector.load %arg7[%c0_38, %c0_39] : memref<8x1xf32, #tpu.memory_space<vmem>>, vector<8x1xf32>
    %cst_40 = arith.constant 0.000000e+00 : f32
    %392 = vector.broadcast %cst_40 : f32 to vector<8x1xf32>
    %cst_41 = arith.constant 0.000000e+00 : f32
    %393 = vector.broadcast %cst_41 : f32 to vector<8x1xf32>
    %394 = vector.extract_strided_slice %362 {offsets = [0, 0], sizes = [4, 118], strides = [1, 1]} : vector<4x120xf32> to vector<4x118xf32>
    %395 = vector.extract_strided_slice %365 {offsets = [0, 0], sizes = [4, 118], strides = [1, 1]} : vector<4x120xf32> to vector<4x118xf32>
    %396 = vector.extract_strided_slice %368 {offsets = [0, 0], sizes = [4, 118], strides = [1, 1]} : vector<4x120xf32> to vector<4x118xf32>
    %397 = vector.extract_strided_slice %377 {offsets = [0, 0], sizes = [4, 118], strides = [1, 1]} : vector<4x120xf32> to vector<4x118xf32>
    %398 = vector.extract_strided_slice %380 {offsets = [0, 0], sizes = [4, 118], strides = [1, 1]} : vector<4x120xf32> to vector<4x118xf32>
    %399 = vector.extract_strided_slice %383 {offsets = [0, 0], sizes = [4, 118], strides = [1, 1]} : vector<4x120xf32> to vector<4x118xf32>
    %400 = vector.extract_strided_slice %362 {offsets = [0, 2], sizes = [4, 118], strides = [1, 1]} : vector<4x120xf32> to vector<4x118xf32>
    %401 = vector.extract_strided_slice %365 {offsets = [0, 2], sizes = [4, 118], strides = [1, 1]} : vector<4x120xf32> to vector<4x118xf32>
    %402 = vector.extract_strided_slice %368 {offsets = [0, 2], sizes = [4, 118], strides = [1, 1]} : vector<4x120xf32> to vector<4x118xf32>
    %403 = tpu.concatenate %394, %395, %396, %397, %398, %399, %400, %401, %402 in 0 : vector<4x118xf32>, vector<4x118xf32>, vector<4x118xf32>, vector<4x118xf32>, vector<4x118xf32>, vector<4x118xf32>, vector<4x118xf32>, vector<4x118xf32>, vector<4x118xf32> -> vector<36x118xf32>
    %404 = vector.extract_strided_slice %365 {offsets = [0, 0], sizes = [4, 118], strides = [1, 1]} : vector<4x120xf32> to vector<4x118xf32>
    %405 = vector.extract_strided_slice %368 {offsets = [0, 0], sizes = [4, 118], strides = [1, 1]} : vector<4x120xf32> to vector<4x118xf32>
    %406 = vector.extract_strided_slice %371 {offsets = [0, 0], sizes = [4, 118], strides = [1, 1]} : vector<4x120xf32> to vector<4x118xf32>
    %407 = vector.extract_strided_slice %380 {offsets = [0, 0], sizes = [4, 118], strides = [1, 1]} : vector<4x120xf32> to vector<4x118xf32>
    %408 = vector.extract_strided_slice %383 {offsets = [0, 0], sizes = [4, 118], strides = [1, 1]} : vector<4x120xf32> to vector<4x118xf32>
    %409 = vector.extract_strided_slice %386 {offsets = [0, 0], sizes = [4, 118], strides = [1, 1]} : vector<4x120xf32> to vector<4x118xf32>
    %410 = vector.extract_strided_slice %365 {offsets = [0, 2], sizes = [4, 118], strides = [1, 1]} : vector<4x120xf32> to vector<4x118xf32>
    %411 = vector.extract_strided_slice %368 {offsets = [0, 2], sizes = [4, 118], strides = [1, 1]} : vector<4x120xf32> to vector<4x118xf32>
    %412 = vector.extract_strided_slice %371 {offsets = [0, 2], sizes = [4, 118], strides = [1, 1]} : vector<4x120xf32> to vector<4x118xf32>
    %413 = tpu.concatenate %404, %405, %406, %407, %408, %409, %410, %411, %412 in 0 : vector<4x118xf32>, vector<4x118xf32>, vector<4x118xf32>, vector<4x118xf32>, vector<4x118xf32>, vector<4x118xf32>, vector<4x118xf32>, vector<4x118xf32>, vector<4x118xf32> -> vector<36x118xf32>
    %414 = vector.extract_strided_slice %368 {offsets = [0, 0], sizes = [4, 118], strides = [1, 1]} : vector<4x120xf32> to vector<4x118xf32>
    %415 = vector.extract_strided_slice %371 {offsets = [0, 0], sizes = [4, 118], strides = [1, 1]} : vector<4x120xf32> to vector<4x118xf32>
    %416 = vector.extract_strided_slice %374 {offsets = [0, 0], sizes = [4, 118], strides = [1, 1]} : vector<4x120xf32> to vector<4x118xf32>
    %417 = vector.extract_strided_slice %383 {offsets = [0, 0], sizes = [4, 118], strides = [1, 1]} : vector<4x120xf32> to vector<4x118xf32>
    %418 = vector.extract_strided_slice %386 {offsets = [0, 0], sizes = [4, 118], strides = [1, 1]} : vector<4x120xf32> to vector<4x118xf32>
    %419 = vector.extract_strided_slice %389 {offsets = [0, 0], sizes = [4, 118], strides = [1, 1]} : vector<4x120xf32> to vector<4x118xf32>
    %420 = vector.extract_strided_slice %368 {offsets = [0, 2], sizes = [4, 118], strides = [1, 1]} : vector<4x120xf32> to vector<4x118xf32>
    %421 = vector.extract_strided_slice %371 {offsets = [0, 2], sizes = [4, 118], strides = [1, 1]} : vector<4x120xf32> to vector<4x118xf32>
    %422 = vector.extract_strided_slice %374 {offsets = [0, 2], sizes = [4, 118], strides = [1, 1]} : vector<4x120xf32> to vector<4x118xf32>
    %423 = tpu.concatenate %414, %415, %416, %417, %418, %419, %420, %421, %422 in 0 : vector<4x118xf32>, vector<4x118xf32>, vector<4x118xf32>, vector<4x118xf32>, vector<4x118xf32>, vector<4x118xf32>, vector<4x118xf32>, vector<4x118xf32>, vector<4x118xf32> -> vector<36x118xf32>
    %424 = tpu.concatenate %403, %413, %423 in 1 : vector<36x118xf32>, vector<36x118xf32>, vector<36x118xf32> -> vector<36x354xf32>
    %cst_42 = arith.constant dense<0.000000e+00> : vector<8x354xf32>
    %425 = tpu.matmul %390, %424, %cst_42 {dimension_numbers = #tpu.dot_dimension_numbers<[1], [0], [0], [1], [0, 0, 1, 1], [], []>} : vector<8x36xf32>, vector<36x354xf32>, vector<8x354xf32> -> vector<8x354xf32>
    %426 = vector.broadcast %391 : vector<8x1xf32> to vector<8x354xf32>
    %427 = arith.addf %425, %426 : vector<8x354xf32>
    %cst_43 = arith.constant 0.000000e+00 : f32
    %428 = vector.broadcast %cst_43 : f32 to vector<8x354xf32>
    %429 = arith.maximumf %427, %428 : vector<8x354xf32>
    %cst_44 = arith.constant dense<0.000000e+00> : vector<8xf32>
    %430 = vector.multi_reduction <add>, %429, %cst_44 [1] : vector<8x354xf32> to vector<8xf32>
    %431 = vector.shape_cast %430 : vector<8xf32> to vector<8x1xf32>
    %432 = arith.addf %392, %431 : vector<8x1xf32>
    %433 = arith.mulf %429, %429 : vector<8x354xf32>
    %cst_45 = arith.constant dense<0.000000e+00> : vector<8xf32>
    %434 = vector.multi_reduction <add>, %433, %cst_45 [1] : vector<8x354xf32> to vector<8xf32>
    %435 = vector.shape_cast %434 : vector<8xf32> to vector<8x1xf32>
    %436 = arith.addf %393, %435 : vector<8x1xf32>
    %437 = vector.extract_strided_slice %377 {offsets = [0, 0], sizes = [4, 118], strides = [1, 1]} : vector<4x120xf32> to vector<4x118xf32>
    %438 = vector.extract_strided_slice %380 {offsets = [0, 0], sizes = [4, 118], strides = [1, 1]} : vector<4x120xf32> to vector<4x118xf32>
    %439 = vector.extract_strided_slice %383 {offsets = [0, 0], sizes = [4, 118], strides = [1, 1]} : vector<4x120xf32> to vector<4x118xf32>
    %440 = vector.extract_strided_slice %362 {offsets = [0, 2], sizes = [4, 118], strides = [1, 1]} : vector<4x120xf32> to vector<4x118xf32>
    %441 = vector.extract_strided_slice %365 {offsets = [0, 2], sizes = [4, 118], strides = [1, 1]} : vector<4x120xf32> to vector<4x118xf32>
    %442 = vector.extract_strided_slice %368 {offsets = [0, 2], sizes = [4, 118], strides = [1, 1]} : vector<4x120xf32> to vector<4x118xf32>
    %443 = vector.extract_strided_slice %377 {offsets = [0, 2], sizes = [4, 118], strides = [1, 1]} : vector<4x120xf32> to vector<4x118xf32>
    %444 = vector.extract_strided_slice %380 {offsets = [0, 2], sizes = [4, 118], strides = [1, 1]} : vector<4x120xf32> to vector<4x118xf32>
    %445 = vector.extract_strided_slice %383 {offsets = [0, 2], sizes = [4, 118], strides = [1, 1]} : vector<4x120xf32> to vector<4x118xf32>
    %446 = tpu.concatenate %437, %438, %439, %440, %441, %442, %443, %444, %445 in 0 : vector<4x118xf32>, vector<4x118xf32>, vector<4x118xf32>, vector<4x118xf32>, vector<4x118xf32>, vector<4x118xf32>, vector<4x118xf32>, vector<4x118xf32>, vector<4x118xf32> -> vector<36x118xf32>
    %447 = vector.extract_strided_slice %380 {offsets = [0, 0], sizes = [4, 118], strides = [1, 1]} : vector<4x120xf32> to vector<4x118xf32>
    %448 = vector.extract_strided_slice %383 {offsets = [0, 0], sizes = [4, 118], strides = [1, 1]} : vector<4x120xf32> to vector<4x118xf32>
    %449 = vector.extract_strided_slice %386 {offsets = [0, 0], sizes = [4, 118], strides = [1, 1]} : vector<4x120xf32> to vector<4x118xf32>
    %450 = vector.extract_strided_slice %365 {offsets = [0, 2], sizes = [4, 118], strides = [1, 1]} : vector<4x120xf32> to vector<4x118xf32>
    %451 = vector.extract_strided_slice %368 {offsets = [0, 2], sizes = [4, 118], strides = [1, 1]} : vector<4x120xf32> to vector<4x118xf32>
    %452 = vector.extract_strided_slice %371 {offsets = [0, 2], sizes = [4, 118], strides = [1, 1]} : vector<4x120xf32> to vector<4x118xf32>
    %453 = vector.extract_strided_slice %380 {offsets = [0, 2], sizes = [4, 118], strides = [1, 1]} : vector<4x120xf32> to vector<4x118xf32>
    %454 = vector.extract_strided_slice %383 {offsets = [0, 2], sizes = [4, 118], strides = [1, 1]} : vector<4x120xf32> to vector<4x118xf32>
    %455 = vector.extract_strided_slice %386 {offsets = [0, 2], sizes = [4, 118], strides = [1, 1]} : vector<4x120xf32> to vector<4x118xf32>
    %456 = tpu.concatenate %447, %448, %449, %450, %451, %452, %453, %454, %455 in 0 : vector<4x118xf32>, vector<4x118xf32>, vector<4x118xf32>, vector<4x118xf32>, vector<4x118xf32>, vector<4x118xf32>, vector<4x118xf32>, vector<4x118xf32>, vector<4x118xf32> -> vector<36x118xf32>
    %457 = vector.extract_strided_slice %383 {offsets = [0, 0], sizes = [4, 118], strides = [1, 1]} : vector<4x120xf32> to vector<4x118xf32>
    %458 = vector.extract_strided_slice %386 {offsets = [0, 0], sizes = [4, 118], strides = [1, 1]} : vector<4x120xf32> to vector<4x118xf32>
    %459 = vector.extract_strided_slice %389 {offsets = [0, 0], sizes = [4, 118], strides = [1, 1]} : vector<4x120xf32> to vector<4x118xf32>
    %460 = vector.extract_strided_slice %368 {offsets = [0, 2], sizes = [4, 118], strides = [1, 1]} : vector<4x120xf32> to vector<4x118xf32>
    %461 = vector.extract_strided_slice %371 {offsets = [0, 2], sizes = [4, 118], strides = [1, 1]} : vector<4x120xf32> to vector<4x118xf32>
    %462 = vector.extract_strided_slice %374 {offsets = [0, 2], sizes = [4, 118], strides = [1, 1]} : vector<4x120xf32> to vector<4x118xf32>
    %463 = vector.extract_strided_slice %383 {offsets = [0, 2], sizes = [4, 118], strides = [1, 1]} : vector<4x120xf32> to vector<4x118xf32>
    %464 = vector.extract_strided_slice %386 {offsets = [0, 2], sizes = [4, 118], strides = [1, 1]} : vector<4x120xf32> to vector<4x118xf32>
    %465 = vector.extract_strided_slice %389 {offsets = [0, 2], sizes = [4, 118], strides = [1, 1]} : vector<4x120xf32> to vector<4x118xf32>
    %466 = tpu.concatenate %457, %458, %459, %460, %461, %462, %463, %464, %465 in 0 : vector<4x118xf32>, vector<4x118xf32>, vector<4x118xf32>, vector<4x118xf32>, vector<4x118xf32>, vector<4x118xf32>, vector<4x118xf32>, vector<4x118xf32>, vector<4x118xf32> -> vector<36x118xf32>
    %467 = tpu.concatenate %446, %456, %466 in 1 : vector<36x118xf32>, vector<36x118xf32>, vector<36x118xf32> -> vector<36x354xf32>
    %cst_46 = arith.constant dense<0.000000e+00> : vector<8x354xf32>
    %468 = tpu.matmul %390, %467, %cst_46 {dimension_numbers = #tpu.dot_dimension_numbers<[1], [0], [0], [1], [0, 0, 1, 1], [], []>} : vector<8x36xf32>, vector<36x354xf32>, vector<8x354xf32> -> vector<8x354xf32>
    %469 = vector.broadcast %391 : vector<8x1xf32> to vector<8x354xf32>
    %470 = arith.addf %468, %469 : vector<8x354xf32>
    %cst_47 = arith.constant 0.000000e+00 : f32
    %471 = vector.broadcast %cst_47 : f32 to vector<8x354xf32>
    %472 = arith.maximumf %470, %471 : vector<8x354xf32>
    %cst_48 = arith.constant dense<0.000000e+00> : vector<8xf32>
    %473 = vector.multi_reduction <add>, %472, %cst_48 [1] : vector<8x354xf32> to vector<8xf32>
    %474 = vector.shape_cast %473 : vector<8xf32> to vector<8x1xf32>
    %475 = arith.addf %432, %474 : vector<8x1xf32>
    %476 = arith.mulf %472, %472 : vector<8x354xf32>
    %cst_49 = arith.constant dense<0.000000e+00> : vector<8xf32>
    %477 = vector.multi_reduction <add>, %476, %cst_49 [1] : vector<8x354xf32> to vector<8xf32>
    %478 = vector.shape_cast %477 : vector<8xf32> to vector<8x1xf32>
    %479 = arith.addf %436, %478 : vector<8x1xf32>
    %cst_50 = arith.constant 7.080000e+02 : f32
    %480 = vector.broadcast %cst_50 : f32 to vector<8x1xf32>
    %481 = arith.divf %475, %480 : vector<8x1xf32>
    %cst_51 = arith.constant 7.080000e+02 : f32
    %482 = vector.broadcast %cst_51 : f32 to vector<8x1xf32>
    %483 = arith.divf %479, %482 : vector<8x1xf32>
    %484 = arith.mulf %481, %481 : vector<8x1xf32>
    %485 = arith.subf %483, %484 : vector<8x1xf32>
    %c0_52 = arith.constant 0 : index
    %c0_53 = arith.constant 0 : index
    %486 = vector.load %arg8[%c0_52, %c0_53] : memref<8x1xf32, #tpu.memory_space<vmem>>, vector<8x1xf32>
    %cst_54 = arith.constant 9.99999974E-6 : f32
    %487 = vector.broadcast %cst_54 : f32 to vector<8x1xf32>
    %488 = arith.addf %485, %487 : vector<8x1xf32>
    %489 = math.rsqrt %488 : vector<8x1xf32>
    %490 = arith.mulf %486, %489 : vector<8x1xf32>
    %c0_55 = arith.constant 0 : index
    %c0_56 = arith.constant 0 : index
    %491 = vector.load %arg9[%c0_55, %c0_56] : memref<8x1xf32, #tpu.memory_space<vmem>>, vector<8x1xf32>
    %492 = arith.mulf %481, %490 : vector<8x1xf32>
    %493 = arith.subf %491, %492 : vector<8x1xf32>
    %494 = vector.broadcast %490 : vector<8x1xf32> to vector<8x354xf32>
    %495 = arith.mulf %429, %494 : vector<8x354xf32>
    %496 = vector.broadcast %493 : vector<8x1xf32> to vector<8x354xf32>
    %497 = arith.addf %495, %496 : vector<8x354xf32>
    %498 = vector.broadcast %490 : vector<8x1xf32> to vector<8x354xf32>
    %499 = arith.mulf %472, %498 : vector<8x354xf32>
    %500 = vector.broadcast %493 : vector<8x1xf32> to vector<8x354xf32>
    %501 = arith.addf %499, %500 : vector<8x354xf32>
    %502 = arith.maximumf %497, %501 : vector<8x354xf32>
    %503 = vector.extract_strided_slice %502 {offsets = [0, 0], sizes = [8, 118], strides = [1, 1]} : vector<8x354xf32> to vector<8x118xf32>
    %504 = vector.extract_strided_slice %502 {offsets = [0, 118], sizes = [8, 118], strides = [1, 1]} : vector<8x354xf32> to vector<8x118xf32>
    %505 = arith.maximumf %503, %504 : vector<8x118xf32>
    %c0_57 = arith.constant 0 : index
    %c0_58 = arith.constant 0 : index
    %506 = vector.load %arg10[%c0_57, %c0_58] : memref<8x100xf32, #tpu.memory_space<vmem>>, vector<8x100xf32>
    %507 = vector.extract_strided_slice %3 {offsets = [1, 0], sizes = [10, 118], strides = [1, 1]} : vector<15x122xf32> to vector<10x118xf32>
    %508 = vector.extract_strided_slice %5 {offsets = [1, 0], sizes = [10, 118], strides = [1, 1]} : vector<15x122xf32> to vector<10x118xf32>
    %509 = vector.extract_strided_slice %7 {offsets = [1, 0], sizes = [10, 118], strides = [1, 1]} : vector<15x122xf32> to vector<10x118xf32>
    %510 = vector.extract_strided_slice %1 {offsets = [1, 2], sizes = [10, 118], strides = [1, 1]} : vector<15x122xf32> to vector<10x118xf32>
    %511 = vector.extract_strided_slice %3 {offsets = [1, 2], sizes = [10, 118], strides = [1, 1]} : vector<15x122xf32> to vector<10x118xf32>
    %512 = vector.extract_strided_slice %5 {offsets = [1, 2], sizes = [10, 118], strides = [1, 1]} : vector<15x122xf32> to vector<10x118xf32>
    %513 = vector.extract_strided_slice %7 {offsets = [1, 2], sizes = [10, 118], strides = [1, 1]} : vector<15x122xf32> to vector<10x118xf32>
    %514 = vector.extract_strided_slice %1 {offsets = [1, 4], sizes = [10, 118], strides = [1, 1]} : vector<15x122xf32> to vector<10x118xf32>
    %515 = vector.extract_strided_slice %3 {offsets = [1, 4], sizes = [10, 118], strides = [1, 1]} : vector<15x122xf32> to vector<10x118xf32>
    %516 = vector.extract_strided_slice %5 {offsets = [1, 4], sizes = [10, 118], strides = [1, 1]} : vector<15x122xf32> to vector<10x118xf32>
    %517 = tpu.concatenate %507, %508, %509, %510, %511, %512, %513, %514, %515, %516 in 0 : vector<10x118xf32>, vector<10x118xf32>, vector<10x118xf32>, vector<10x118xf32>, vector<10x118xf32>, vector<10x118xf32>, vector<10x118xf32>, vector<10x118xf32>, vector<10x118xf32>, vector<10x118xf32> -> vector<100x118xf32>
    %cst_59 = arith.constant dense<0.000000e+00> : vector<8x118xf32>
    %518 = tpu.matmul %506, %517, %cst_59 {dimension_numbers = #tpu.dot_dimension_numbers<[1], [0], [0], [1], [0, 0, 1, 1], [], []>} : vector<8x100xf32>, vector<100x118xf32>, vector<8x118xf32> -> vector<8x118xf32>
    %c0_60 = arith.constant 0 : index
    %c0_61 = arith.constant 0 : index
    %519 = vector.load %arg11[%c0_60, %c0_61] : memref<8x1xf32, #tpu.memory_space<vmem>>, vector<8x1xf32>
    %520 = vector.broadcast %519 : vector<8x1xf32> to vector<8x118xf32>
    %521 = arith.addf %518, %520 : vector<8x118xf32>
    %cst_62 = arith.constant dense<0.000000e+00> : vector<8xf32>
    %522 = vector.multi_reduction <add>, %521, %cst_62 [1] : vector<8x118xf32> to vector<8xf32>
    %523 = vector.shape_cast %522 : vector<8xf32> to vector<8x1xf32>
    %cst_63 = arith.constant 1.180000e+02 : f32
    %524 = vector.broadcast %cst_63 : f32 to vector<8x1xf32>
    %525 = arith.divf %523, %524 : vector<8x1xf32>
    %526 = arith.mulf %521, %521 : vector<8x118xf32>
    %cst_64 = arith.constant dense<0.000000e+00> : vector<8xf32>
    %527 = vector.multi_reduction <add>, %526, %cst_64 [1] : vector<8x118xf32> to vector<8xf32>
    %528 = vector.shape_cast %527 : vector<8xf32> to vector<8x1xf32>
    %cst_65 = arith.constant 1.180000e+02 : f32
    %529 = vector.broadcast %cst_65 : f32 to vector<8x1xf32>
    %530 = arith.divf %528, %529 : vector<8x1xf32>
    %531 = arith.mulf %525, %525 : vector<8x1xf32>
    %532 = arith.subf %530, %531 : vector<8x1xf32>
    %c0_66 = arith.constant 0 : index
    %c0_67 = arith.constant 0 : index
    %533 = vector.load %arg12[%c0_66, %c0_67] : memref<8x1xf32, #tpu.memory_space<vmem>>, vector<8x1xf32>
    %cst_68 = arith.constant 9.99999974E-6 : f32
    %534 = vector.broadcast %cst_68 : f32 to vector<8x1xf32>
    %535 = arith.addf %532, %534 : vector<8x1xf32>
    %536 = math.rsqrt %535 : vector<8x1xf32>
    %537 = arith.mulf %533, %536 : vector<8x1xf32>
    %538 = vector.broadcast %525 : vector<8x1xf32> to vector<8x118xf32>
    %539 = arith.subf %521, %538 : vector<8x118xf32>
    %540 = vector.broadcast %537 : vector<8x1xf32> to vector<8x118xf32>
    %541 = arith.mulf %539, %540 : vector<8x118xf32>
    %c0_69 = arith.constant 0 : index
    %c0_70 = arith.constant 0 : index
    %542 = vector.load %arg13[%c0_69, %c0_70] : memref<8x1xf32, #tpu.memory_space<vmem>>, vector<8x1xf32>
    %543 = vector.broadcast %542 : vector<8x1xf32> to vector<8x118xf32>
    %544 = arith.addf %541, %543 : vector<8x118xf32>
    %545 = arith.addf %505, %544 : vector<8x118xf32>
    %c0_71 = arith.constant 0 : index
    %c0_72 = arith.constant 0 : index
    %546 = vector.load %arg14[%c0_71, %c0_72] : memref<118x118xf32, #tpu.memory_space<vmem>>, vector<118x118xf32>
    %cst_73 = arith.constant dense<0.000000e+00> : vector<8x118xf32>
    %547 = tpu.matmul %545, %546, %cst_73 {dimension_numbers = #tpu.dot_dimension_numbers<[1], [0], [0], [1], [0, 0, 1, 1], [], []>} : vector<8x118xf32>, vector<118x118xf32>, vector<8x118xf32> -> vector<8x118xf32>
    %548 = vector.extract_strided_slice %547 {offsets = [0, 0], sizes = [1, 59], strides = [1, 1]} : vector<8x118xf32> to vector<1x59xf32>
    %549 = vector.extract_strided_slice %547 {offsets = [1, 0], sizes = [1, 59], strides = [1, 1]} : vector<8x118xf32> to vector<1x59xf32>
    %550 = vector.extract_strided_slice %547 {offsets = [2, 0], sizes = [1, 59], strides = [1, 1]} : vector<8x118xf32> to vector<1x59xf32>
    %551 = vector.extract_strided_slice %547 {offsets = [3, 0], sizes = [1, 59], strides = [1, 1]} : vector<8x118xf32> to vector<1x59xf32>
    %552 = vector.extract_strided_slice %547 {offsets = [4, 0], sizes = [1, 59], strides = [1, 1]} : vector<8x118xf32> to vector<1x59xf32>
    %553 = vector.extract_strided_slice %547 {offsets = [5, 0], sizes = [1, 59], strides = [1, 1]} : vector<8x118xf32> to vector<1x59xf32>
    %554 = vector.extract_strided_slice %547 {offsets = [6, 0], sizes = [1, 59], strides = [1, 1]} : vector<8x118xf32> to vector<1x59xf32>
    %555 = vector.extract_strided_slice %547 {offsets = [7, 0], sizes = [1, 59], strides = [1, 1]} : vector<8x118xf32> to vector<1x59xf32>
    %556 = tpu.concatenate %548, %549, %550, %551, %552, %553, %554, %555 in 1 : vector<1x59xf32>, vector<1x59xf32>, vector<1x59xf32>, vector<1x59xf32>, vector<1x59xf32>, vector<1x59xf32>, vector<1x59xf32>, vector<1x59xf32> -> vector<1x472xf32>
    %557 = vector.extract_strided_slice %547 {offsets = [0, 59], sizes = [1, 59], strides = [1, 1]} : vector<8x118xf32> to vector<1x59xf32>
    %558 = vector.extract_strided_slice %547 {offsets = [1, 59], sizes = [1, 59], strides = [1, 1]} : vector<8x118xf32> to vector<1x59xf32>
    %559 = vector.extract_strided_slice %547 {offsets = [2, 59], sizes = [1, 59], strides = [1, 1]} : vector<8x118xf32> to vector<1x59xf32>
    %560 = vector.extract_strided_slice %547 {offsets = [3, 59], sizes = [1, 59], strides = [1, 1]} : vector<8x118xf32> to vector<1x59xf32>
    %561 = vector.extract_strided_slice %547 {offsets = [4, 59], sizes = [1, 59], strides = [1, 1]} : vector<8x118xf32> to vector<1x59xf32>
    %562 = vector.extract_strided_slice %547 {offsets = [5, 59], sizes = [1, 59], strides = [1, 1]} : vector<8x118xf32> to vector<1x59xf32>
    %563 = vector.extract_strided_slice %547 {offsets = [6, 59], sizes = [1, 59], strides = [1, 1]} : vector<8x118xf32> to vector<1x59xf32>
    %564 = vector.extract_strided_slice %547 {offsets = [7, 59], sizes = [1, 59], strides = [1, 1]} : vector<8x118xf32> to vector<1x59xf32>
    %565 = tpu.concatenate %557, %558, %559, %560, %561, %562, %563, %564 in 1 : vector<1x59xf32>, vector<1x59xf32>, vector<1x59xf32>, vector<1x59xf32>, vector<1x59xf32>, vector<1x59xf32>, vector<1x59xf32>, vector<1x59xf32> -> vector<1x472xf32>
    %566 = tpu.concatenate %556, %565 in 0 : vector<1x472xf32>, vector<1x472xf32> -> vector<2x472xf32>
    %c0_74 = arith.constant 0 : index
    %c0_75 = arith.constant 0 : index
    %567 = vector.load %arg15[%c0_74, %c0_75] : memref<472x120xf32, #tpu.memory_space<vmem>>, vector<472x120xf32>
    %cst_76 = arith.constant dense<0.000000e+00> : vector<2x120xf32>
    %568 = tpu.matmul %566, %567, %cst_76 {dimension_numbers = #tpu.dot_dimension_numbers<[1], [0], [0], [1], [0, 0, 1, 1], [], []>} : vector<2x472xf32>, vector<472x120xf32>, vector<2x120xf32> -> vector<2x120xf32>
    %c0_77 = arith.constant 0 : index
    %c0_78 = arith.constant 0 : index
    %569 = vector.load %arg16[%c0_77, %c0_78] : memref<1x120xf32, #tpu.memory_space<vmem>>, vector<1x120xf32>
    %570 = vector.broadcast %569 : vector<1x120xf32> to vector<2x120xf32>
    %571 = arith.addf %568, %570 : vector<2x120xf32>
    %cst_79 = arith.constant 0.000000e+00 : f32
    %572 = vector.broadcast %cst_79 : f32 to vector<2x120xf32>
    %573 = arith.maximumf %571, %572 : vector<2x120xf32>
    %cst_80 = arith.constant dense<0.000000e+00> : vector<120xf32>
    %574 = vector.multi_reduction <add>, %573, %cst_80 [0] : vector<2x120xf32> to vector<120xf32>
    %575 = vector.shape_cast %574 : vector<120xf32> to vector<1x120xf32>
    %cst_81 = arith.constant 2.000000e+00 : f32
    %576 = vector.broadcast %cst_81 : f32 to vector<1x120xf32>
    %577 = arith.divf %575, %576 : vector<1x120xf32>
    %578 = arith.mulf %573, %573 : vector<2x120xf32>
    %cst_82 = arith.constant dense<0.000000e+00> : vector<120xf32>
    %579 = vector.multi_reduction <add>, %578, %cst_82 [0] : vector<2x120xf32> to vector<120xf32>
    %580 = vector.shape_cast %579 : vector<120xf32> to vector<1x120xf32>
    %cst_83 = arith.constant 2.000000e+00 : f32
    %581 = vector.broadcast %cst_83 : f32 to vector<1x120xf32>
    %582 = arith.divf %580, %581 : vector<1x120xf32>
    %583 = arith.mulf %577, %577 : vector<1x120xf32>
    %584 = arith.subf %582, %583 : vector<1x120xf32>
    %585 = vector.broadcast %577 : vector<1x120xf32> to vector<2x120xf32>
    %586 = arith.subf %573, %585 : vector<2x120xf32>
    %c0_84 = arith.constant 0 : index
    %c0_85 = arith.constant 0 : index
    %587 = vector.load %arg17[%c0_84, %c0_85] : memref<1x120xf32, #tpu.memory_space<vmem>>, vector<1x120xf32>
    %cst_86 = arith.constant 9.99999974E-6 : f32
    %588 = vector.broadcast %cst_86 : f32 to vector<1x120xf32>
    %589 = arith.addf %584, %588 : vector<1x120xf32>
    %590 = math.rsqrt %589 : vector<1x120xf32>
    %591 = arith.mulf %587, %590 : vector<1x120xf32>
    %592 = vector.broadcast %591 : vector<1x120xf32> to vector<2x120xf32>
    %593 = arith.mulf %586, %592 : vector<2x120xf32>
    %c0_87 = arith.constant 0 : index
    %c0_88 = arith.constant 0 : index
    %594 = vector.load %arg18[%c0_87, %c0_88] : memref<1x120xf32, #tpu.memory_space<vmem>>, vector<1x120xf32>
    %595 = vector.broadcast %594 : vector<1x120xf32> to vector<2x120xf32>
    %596 = arith.addf %593, %595 : vector<2x120xf32>
    %c0_89 = arith.constant 0 : index
    %c0_90 = arith.constant 0 : index
    %597 = vector.load %arg19[%c0_89, %c0_90] : memref<120x10xf32, #tpu.memory_space<vmem>>, vector<120x10xf32>
    %cst_91 = arith.constant dense<0.000000e+00> : vector<2x10xf32>
    %598 = tpu.matmul %596, %597, %cst_91 {dimension_numbers = #tpu.dot_dimension_numbers<[1], [0], [0], [1], [0, 0, 1, 1], [], []>} : vector<2x120xf32>, vector<120x10xf32>, vector<2x10xf32> -> vector<2x10xf32>
    %c0_92 = arith.constant 0 : index
    %c0_93 = arith.constant 0 : index
    %599 = vector.load %arg20[%c0_92, %c0_93] : memref<1x10xf32, #tpu.memory_space<vmem>>, vector<1x10xf32>
    %600 = vector.broadcast %599 : vector<1x10xf32> to vector<2x10xf32>
    %601 = arith.addf %598, %600 : vector<2x10xf32>
    %c0_94 = arith.constant 0 : index
    %c0_95 = arith.constant 0 : index
    %602 = vector.load %arg21[%c0_94, %c0_95] : memref<2x10xf32, #tpu.memory_space<vmem>>, vector<2x10xf32>
    tpu.vector_store %arg21[%c0_94, %c0_95], %601 {strides = array<i32>} : memref<2x10xf32, #tpu.memory_space<vmem>>, vector<2x10xf32>,
    return
  }
  func.func @transform_0(%arg0: i32) -> (i32, i32, i32) {
    %c0_i32 = arith.constant 0 : i32
    %c0_i32_0 = arith.constant 0 : i32
    %c0_i32_1 = arith.constant 0 : i32
    %c0_i32_2 = arith.constant 0 : i32
    return %c0_i32, %c0_i32_0, %c0_i32_1 : i32, i32, i32
  }
  func.func @transform_1(%arg0: i32) -> (i32, i32) {
    %c0_i32 = arith.constant 0 : i32
    %c0_i32_0 = arith.constant 0 : i32
    %c0_i32_1 = arith.constant 0 : i32
    return %c0_i32, %c0_i32_0 : i32, i32
  }
  func.func @transform_2(%arg0: i32) -> (i32, i32) {
    %c0_i32 = arith.constant 0 : i32
    %c0_i32_0 = arith.constant 0 : i32
    %c0_i32_1 = arith.constant 0 : i32
    return %c0_i32, %c0_i32_0 : i32, i32
  }
  func.func @transform_3(%arg0: i32) -> (i32, i32) {
    %c0_i32 = arith.constant 0 : i32
    %c0_i32_0 = arith.constant 0 : i32
    %c0_i32_1 = arith.constant 0 : i32
    return %c0_i32, %c0_i32_0 : i32, i32
  }
  func.func @transform_4(%arg0: i32) -> (i32, i32) {
    %c0_i32 = arith.constant 0 : i32
    %c0_i32_0 = arith.constant 0 : i32
    %c0_i32_1 = arith.constant 0 : i32
    return %c0_i32, %c0_i32_0 : i32, i32
  }
  func.func @transform_5(%arg0: i32) -> (i32, i32) {
    %c0_i32 = arith.constant 0 : i32
    %c0_i32_0 = arith.constant 0 : i32
    %c0_i32_1 = arith.constant 0 : i32
    return %c0_i32, %c0_i32_0 : i32, i32
  }
  func.func @transform_6(%arg0: i32) -> (i32, i32) {
    %c0_i32 = arith.constant 0 : i32
    %c0_i32_0 = arith.constant 0 : i32
    %c0_i32_1 = arith.constant 0 : i32
    return %c0_i32, %c0_i32_0 : i32, i32
  }
  func.func @transform_7(%arg0: i32) -> (i32, i32) {
    %c0_i32 = arith.constant 0 : i32
    %c0_i32_0 = arith.constant 0 : i32
    %c0_i32_1 = arith.constant 0 : i32
    return %c0_i32, %c0_i32_0 : i32, i32
  }
  func.func @transform_8(%arg0: i32) -> (i32, i32) {
    %c0_i32 = arith.constant 0 : i32
    %c0_i32_0 = arith.constant 0 : i32
    %c0_i32_1 = arith.constant 0 : i32
    return %c0_i32, %c0_i32_0 : i32, i32
  }
  func.func @transform_9(%arg0: i32) -> (i32, i32) {
    %c0_i32 = arith.constant 0 : i32
    %c0_i32_0 = arith.constant 0 : i32
    %c0_i32_1 = arith.constant 0 : i32
    return %c0_i32, %c0_i32_0 : i32, i32
  }
  func.func @transform_10(%arg0: i32) -> (i32, i32) {
    %c0_i32 = arith.constant 0 : i32
    %c0_i32_0 = arith.constant 0 : i32
    %c0_i32_1 = arith.constant 0 : i32
    return %c0_i32, %c0_i32_0 : i32, i32
  }
  func.func @transform_11(%arg0: i32) -> (i32, i32) {
    %c0_i32 = arith.constant 0 : i32
    %c0_i32_0 = arith.constant 0 : i32
    %c0_i32_1 = arith.constant 0 : i32
    return %c0_i32, %c0_i32_0 : i32, i32
  }
  func.func @transform_12(%arg0: i32) -> (i32, i32) {
    %c0_i32 = arith.constant 0 : i32
    %c0_i32_0 = arith.constant 0 : i32
    %c0_i32_1 = arith.constant 0 : i32
    return %c0_i32, %c0_i32_0 : i32, i32
  }
  func.func @transform_13(%arg0: i32) -> (i32, i32) {
    %c0_i32 = arith.constant 0 : i32
    %c0_i32_0 = arith.constant 0 : i32
    %c0_i32_1 = arith.constant 0 : i32
    return %c0_i32, %c0_i32_0 : i32, i32
  }
  func.func @transform_14(%arg0: i32) -> (i32, i32) {
    %c0_i32 = arith.constant 0 : i32
    %c0_i32_0 = arith.constant 0 : i32
    %c0_i32_1 = arith.constant 0 : i32
    return %c0_i32, %c0_i32_0 : i32, i32
  }
  func.func @transform_15(%arg0: i32) -> (i32, i32) {
    %c0_i32 = arith.constant 0 : i32
    %c0_i32_0 = arith.constant 0 : i32
    %c0_i32_1 = arith.constant 0 : i32
    return %c0_i32, %c0_i32_0 : i32, i32
  }
  func.func @transform_16(%arg0: i32) -> (i32, i32) {
    %c0_i32 = arith.constant 0 : i32
    %c0_i32_0 = arith.constant 0 : i32
    %c0_i32_1 = arith.constant 0 : i32
    return %c0_i32, %c0_i32_0 : i32, i32
  }
  func.func @transform_17(%arg0: i32) -> (i32, i32) {
    %c0_i32 = arith.constant 0 : i32
    %c0_i32_0 = arith.constant 0 : i32
    %c0_i32_1 = arith.constant 0 : i32
    return %c0_i32, %c0_i32_0 : i32, i32
  }
  func.func @transform_18(%arg0: i32) -> (i32, i32) {
    %c0_i32 = arith.constant 0 : i32
    %c0_i32_0 = arith.constant 0 : i32
    %c0_i32_1 = arith.constant 0 : i32
    return %c0_i32, %c0_i32_0 : i32, i32
  }
  func.func @transform_19(%arg0: i32) -> (i32, i32) {
    %c0_i32 = arith.constant 0 : i32
    %c0_i32_0 = arith.constant 0 : i32
    %c0_i32_1 = arith.constant 0 : i32
    return %c0_i32, %c0_i32_0 : i32, i32
  }
  func.func @transform_20(%arg0: i32) -> (i32, i32) {
    %c0_i32 = arith.constant 0 : i32
    %c0_i32_0 = arith.constant 0 : i32
    %c0_i32_1 = arith.constant 0 : i32
    return %c0_i32, %c0_i32_0 : i32, i32
  }
}

</mosaic_0001>

<bundles_post_ra>
// kernel: _lambda_.1
= control target key start
LH: loop header
LB: loop body
LE: loop exit
PB: predicated region body
PF: predicated region fallthrough
CT: control target
= control target key end

     0   :  { %s10720_s0 = inlined_call_operand.vmem [shape: f32[4,15,122], index: 0, kind: input, shape index: {}]   ;;  %s10721_s1 = inlined_call_operand.vmem [shape: f32[4,25], index: 1, kind: input, shape index: {}]   ;;  %s10722_s2 = inlined_call_operand.vmem [shape: f32[4,1], index: 2, kind: input, shape index: {}]   ;;  %s10723_s3 = inlined_call_operand.vmem [shape: f32[4,1], index: 3, kind: input, shape index: {}]   ;;  %s10724_s4 = inlined_call_operand.vmem [shape: f32[4,1], index: 4, kind: input, shape index: {}]   ;;  %s10725_s5 = inlined_call_operand.vmem [shape: f32[8,36], index: 5, kind: input, shape index: {}]   ;;  %s10726_s6 = inlined_call_operand.vmem [shape: f32[8,1], index: 6, kind: input, shape index: {}]   ;;  %s10727_s7 = inlined_call_operand.vmem [shape: f32[8,1], index: 7, kind: input, shape index: {}]   ;;  %s10728_s8 = inlined_call_operand.vmem [shape: f32[8,1], index: 8, kind: input, shape index: {}]   ;;  %s10729_s9 = inlined_call_operand.vmem [shape: f32[8,100], index: 9, kind: input, shape index: {}]   ;;  %s10730_s10 = inlined_call_operand.vmem [shape: f32[8,1], index: 10, kind: input, shape index: {}]   ;;  %s10731_s11 = inlined_call_operand.vmem [shape: f32[8,1], index: 11, kind: input, shape index: {}]   ;;  %s10732_s12 = inlined_call_operand.vmem [shape: f32[8,1], index: 12, kind: input, shape index: {}]   ;;  %s10733_s13 = inlined_call_operand.vmem [shape: f32[118,118], index: 13, kind: input, shape index: {}]   ;;  %s10734_s14 = inlined_call_operand.vmem [shape: f32[472,120], index: 14, kind: input, shape index: {}]   ;;  %s10735_s15 = inlined_call_operand.vmem [shape: f32[1,120], index: 15, kind: input, shape index: {}]   ;;  %s10736_s16 = inlined_call_operand.vmem [shape: f32[1,120], index: 16, kind: input, shape index: {}]   ;;  %s10737_s17 = inlined_call_operand.vmem [shape: f32[1,120], index: 17, kind: input, shape index: {}]   ;;  %s10738_s18 = inlined_call_operand.vmem [shape: f32[120,10], index: 18, kind: input, shape index: {}]   ;;  %s10739_s19 = inlined_call_operand.vmem [shape: f32[1,10], index: 19, kind: input, shape index: {}]   ;;  %s10740_s20 = inlined_call_operand.hbm [shape: f32[2,10], index: 20, kind: output, shape index: {}]  }
   0x1   :  { %10820 = sst [smem:[#allocation49_spill]] %s10720_s0 }
   0x2   :  { %10821 = sst [smem:[#allocation50_spill]] %s10721_s1 }
   0x3   :  { %10822 = sst [smem:[#allocation51_spill]] %s10722_s2 }
   0x4   :  { %10823 = sst [smem:[#allocation52_spill]] %s10723_s3 }
   0x5   :  { %10824 = sst [smem:[#allocation53_spill]] %s10724_s4 }
   0x6   :  { %s10825_s23 = sld [smem:[#allocation49_spill]]  ;;  %vm97_vm0 = vcmask 1046528   ;;  %vm10813_vm1 = vcmask 1045504   ;;  %vm10815_vm2 = vcmask 1044480   ;;  %s7162_s25 = smov 126  }
   0xc   :  { %v7304_v0 = vld [vmem:[%s10825_s23] sm:$0xff]  ;;  %v7309_v1 = vld [vmem:[%s10825_s23 + $0x8] sm:$0x7f] }
   0xd   :  { %10826 = vst [vmem:[#allocation5_spill] sm:$0xff] %v7304_v0  ;;  %v109_v2 = vrot.slane %v7304_v0, 5  ;;  %v123_v3 = vrot.slane %v7304_v0, 6  ;;  %v7314_v4 = vrot.slane %v7304_v0, 1  ;;  %v7317_v5 = vrot.slane %v7309_v1, 1 }
   0xe   :  { %v139_v6 = vrot.slane %v7304_v0, 7  ;;  %v7321_v7 = vrot.slane %v7304_v0, 2  ;;  %v7324_v8 = vrot.slane %v7309_v1, 2  ;;  %v7330_v11 = vrot.slane %v7304_v0, 3 }
   0xf   :  { %v6204_v9 = vpack.i.bf16 %v123_v3, %v109_v2  ;;  %v193_v10 = vsel %vm97_vm0, %v7314_v4, %v7317_v5  ;;  %v243_v12 = vrot.slane %v7309_v1, 3 }
  0x10   :  { %10827 = vst [vmem:[#allocation6_spill] sm:$0xff] %v7330_v11  ;;  %v6214_v13 = vpack.i.bf16 %v193_v10, %v7309_v1  ;;  %v221_v14 = vsel %vm10813_vm1, %v7321_v7, %v7324_v8  ;;  %v6209_v15 = vpack.i.bf16 %v7304_v0, %v139_v6 }
  0x11   :  { %6205 = vrot.lane.b32.xlu0 %v6204_v9, %s7162_s25  ;;  %v7341_v16 = vsel %vm10815_vm2, %v7330_v11, %v243_v12 }
  0x12   :  { %10828 = vst [vmem:[#allocation7_spill] sm:$0xff] %v7341_v16 }
  0x13   :  { %25 = vsyncpa [#allocation3], 0  ;;  %6215 = vrot.lane.b32.xlu1 %v6214_v13, %s7162_s25  ;;  %v6219_v17 = vpack.i.bf16 %v7317_v5, %v221_v14  ;;  %v148_v19 = vrot.slane %v7309_v1, 4  ;;  %v6224_v20 = vpack.i.bf16 %v7341_v16, %v7324_v8  ;;  %v180_v21 = vrot.slane %v7309_v1, 5  ;;  %v7359_v24 = vld [vmem:[%s10825_s23 + $0x10] sm:$0xff]  ;;  %v7452_v56 = vld [vmem:[%s10825_s23 + $0x20] sm:$0xff] }
  0x14   :  { %v203_v22 = vrot.slane %v7309_v1, 6  ;;  %v6239_v26 = vpack.i.bf16 %v7330_v11, %v7321_v7  ;;  %v89_v27 = vrot.slane %v7304_v0, 4  ;;  %v7366_v28 = vrot.slane %v7359_v24, 5  ;;  %v7378_v31 = vld [vmem:[%s10825_s23 + $0x18] sm:$0x7f]  ;;  %v7470_v62 = vld [vmem:[%s10825_s23 + $0x30] sm:$0xff] }
  0x15   :  { %6210 = vrot.lane.b32.xlu0 %v6209_v15, %s7162_s25  ;;  %v6229_v23 = vpack.i.bf16 %v243_v12, %v148_v19  ;;  %v7370_v29 = vrot.slane %v7359_v24, 6  ;;  %v7373_v30 = vrot.slane %v7359_v24, 7  ;;  %vm165_vm3 = vcmask 1042432   ;;  %v7494_v10 = vld [vmem:[%s10825_s23 + $0x28] sm:$0x7f]  ;;  %s7163_s2 = smov 120  }
  0x16   :  { %v6234_v25 = vpack.i.bf16 %v203_v22, %v180_v21  ;;  %vm10814_vm4 = vcmask 1041408   ;;  %v6244_v32 = vpack.i.bf16 %v7366_v28, %v89_v27  ;;  %v7383_v33 = vsel %vm165_vm3, %v109_v2, %v180_v21  ;;  %s7164_s3 = smov 112   ;;  %s7165_s26 = smov 104  }
  0x17   :  { %6220 = vrot.lane.b32.xlu1 %v6219_v17, %s7162_s25  ;;  %v7386_v34 = vsel %vm10814_vm4, %v123_v3, %v203_v22  ;;  %v6249_v35 = vpack.i.bf16 %v7373_v30, %v7370_v29  ;;  %v7392_v36 = vrot.slane %v7359_v24, 1  ;;  %v7395_v37 = vrot.slane %v7378_v31, 1  ;;  %s7166_s27 = smov 96   ;;  %s7167_s28 = smov 88  }
  0x18   :  { %v10744_v38 = vrot.slane %v7309_v1, 7  ;;  %vm10812_vm5 = vcmask 1040384   ;;  %v234_v39 = vrot.slane %v7359_v24, 2  ;;  %v7400_v40 = vrot.slane %v7378_v31, 2  ;;  %s7168_s4 = smov 80   ;;  %s7169_s29 = smov 72  }
  0x19   :  { %6225 = vrot.lane.b32.xlu0 %v6224_v20, %s7162_s25  ;;  %10829 = vst [vmem:[#allocation8_spill] sm:$0xff] %v7395_v37  ;;  %v6254_v41 = vpack.i.bf16 %v7359_v24, %v7383_v33  ;;  %v6259_v42 = vpack.i.bf16 %v7386_v34, %v7378_v31  ;;  %v7411_v43 = vsel %vm97_vm0, %v7392_v36, %v7395_v37  ;;  %v7419_v45 = vrot.slane %v7359_v24, 3  ;;  %s7170_s30 = smov 64   ;;  %s7171_s0 = smov 56  }
  0x1a   :  { %10830 = vst [vmem:[#allocation9_spill] sm:$0xff] %v7411_v43  ;;  %v7416_v44 = vsel %vm10812_vm5, %v139_v6, %v10744_v38  ;;  %v7422_v46 = vrot.slane %v7378_v31, 3  ;;  %v7426_v47 = vsel %vm10813_vm1, %v234_v39, %v7400_v40  ;;  %v7438_v51 = vrot.slane %v7378_v31, 4  ;;  %s7172_s21 = smov 48   ;;  %s10947_s24 = sld [smem:[#allocation50_spill]] }
  0x1b   :  { %6230 = vrot.lane.b32.xlu1 %v6229_v23, %s7162_s25  ;;  %v6264_v48 = vpack.i.bf16 %v7416_v44, %v7411_v43  ;;  %v6269_v49 = vpack.i.bf16 %v7395_v37, %v7426_v47  ;;  %v7443_v53 = vrot.slane %v7378_v31, 5  ;;  %v1106_v54 = vrot.slane %v7378_v31, 6  ;;  %s7186_s22 = smov 10  }
  0x1c   :  { %v1130_v50 = vsel %vm10815_vm2, %v7419_v45, %v7422_v46  ;;  %v6279_v55 = vpack.i.bf16 %v7422_v46, %v7438_v51  ;;  %v7457_v58 = vrot.slane %v7359_v24, 4  ;;  %v6289_v59 = vpack.i.bf16 %v7419_v45, %v234_v39 }
  0x1d   :  { %6235 = vrot.lane.b32.xlu0 %v6234_v25, %s7162_s25  ;;  %v6274_v52 = vpack.i.bf16 %v1130_v50, %v7400_v40  ;;  %v6284_v57 = vpack.i.bf16 %v1106_v54, %v7443_v53  ;;  %v7462_v60 = vrot.slane %v7452_v56, 6  ;;  %v7465_v61 = vrot.slane %v7452_v56, 5 }
  0x1e   :  { %vm99_vm6 = vcmask 1043456   ;;  %v6294_v63 = vpack.i.bf16 %v7457_v58, %v7314_v4  ;;  %v7476_v2 = vrot.slane %v7452_v56, 7  ;;  %v7486_v6 = vsel %vm165_vm3, %v7366_v28, %v7443_v53 }
  0x1f   :  { %6240 = vrot.lane.b32.xlu1 %v6239_v26, %s7162_s25  ;;  %v7481_v3 = vsel %vm99_vm6, %v89_v27, %v148_v19  ;;  %v6299_v9 = vpack.i.bf16 %v7462_v60, %v7465_v61  ;;  %v7497_v12 = vrot.slane %v7470_v62, 2  ;;  %v7500_v13 = vrot.slane %v7452_v56, 4 }
  0x20   :  { %10831 = vst [vmem:[#allocation10_spill] sm:$0xff] %v7476_v2  ;;  %v7503_v14 = vrot.slane %v7470_v62, 7  ;;  %v114_v15 = vsel %vm10814_vm4, %v7457_v58, %v7476_v2  ;;  %v7509_v17 = vrot.slane %v7452_v56, 1  ;;  %v10743_v19 = vrot.slane %v7378_v31, 7 }
  0x21   :  { %6245 = vrot.lane.b32.xlu0 %v6244_v32, %s7162_s25  ;;  %10832 = vst [vmem:[#allocation11_spill] sm:$0xff] %v7497_v12  ;;  %v7513_v20 = vrot.slane %v7494_v10, 1  ;;  %v7516_v21 = vrot.slane %v7452_v56, 2  ;;  %v7519_v22 = vrot.slane %v7494_v10, 2  ;;  %v7524_v23 = vsel %vm10815_vm2, %v7392_v36, %v7500_v13 }
  0x22   :  { %10833 = vst [vmem:[#allocation12_spill] sm:$0xff] %v7509_v17  ;;  %10834 = vst [vmem:[#allocation13_spill] sm:$0xff] %v7524_v23  ;;  %v7529_v25 = vsel %vm10814_vm4, %v7500_v13, %v7503_v14  ;;  %v6304_v26 = vpack.i.bf16 %v7476_v2, %v7481_v3  ;;  %v1107_v27 = vsel %vm10814_vm4, %v7370_v29, %v1106_v54  ;;  %vm443_vm7 = vcmask 982016  }
  0x23   :  { %6250 = vrot.lane.b32.xlu1 %v6249_v35, %s7162_s25  ;;  %v7538_v32 = vsel %vm10815_vm2, %v234_v39, %v7465_v61  ;;  %v6309_v35 = vpack.i.bf16 %v7452_v56, %v7486_v6  ;;  %v115_v39 = vsel %vm97_vm0, %v114_v15, %v7497_v12  ;;  %v1110_v50 = vsel %vm97_vm0, %v7509_v17, %v7513_v20 }
  0x24   :  { %10835 = vst [vmem:[#allocation14_spill] sm:$0xff] %v7538_v32  ;;  %v155_v54 = vsel %vm10812_vm5, %v7373_v30, %v10743_v19  ;;  %v7647_v32 = vrot.slane %v7470_v62, 5  ;;  %vm448_vm8 = vcmask 916480   ;;  %vm458_vm9 = vcmask 785408  }
  0x25   :  { %6255 = vrot.lane.b32.xlu0 %v6254_v41, %s7162_s25  ;;  %v7544_v41 = vrot.slane %v7470_v62, 3  ;;  %vm453_vm10 = vcmask 850944   ;;  %vm463_vm11 = vcmask 719872   ;;  %vm478_vm12 = vcmask 523264  }
  0x26   :  { %10845 = vst [vmem:[#allocation24_spill] sm:$0xff] %v7647_v32  ;;  %vm468_vm13 = vcmask 654336   ;;  %vm473_vm14 = vcmask 588800   ;;  %vm7174_vm15 = vmmov 1  }
  0x27   :  { %6260 = vrot.lane.b32.xlu1 %v6259_v42, %s7162_s25  ;;  %10836 = vst [vmem:[#allocation15_spill] sm:$0xff] %v7544_v41  ;;  %v7549_v42 = vsel %vm10815_vm2, %v7419_v45, %v7462_v60 }
  0x28   :  { %10837 = vst [vmem:[#allocation16_spill] sm:$0xff] %v7549_v42  ;;  %v6329_v42 = vpack.i.bf16 %v155_v54, %v1110_v50 }
  0x29   :  { %6265 = vrot.lane.b32.xlu0 %v6264_v48, %s7162_s25  ;;  %v113_v48 = vsel %vm10815_vm2, %v7314_v4, %v7457_v58  ;;  %v162_v4 = vsel %vm10813_vm1, %v7516_v21, %v7519_v22 }
  0x2a   :  { %v7589_v15 = vsel %vm10815_vm2, %v155_v54, %v162_v4  ;;  %v6319_v18 = vpack.i.bf16 %v115_v39, %v113_v48 }
  0x2b   :  { %6270 = vrot.lane.b32.xlu1 %v6269_v49, %s7162_s25  ;;  %v128_v49 = vsel %vm10814_vm4, %v7366_v28, %v7452_v56  ;;  %10838 = vst [vmem:[#allocation17_spill] sm:$0xff] %v7589_v15 }
  0x2d   :  { %6275 = vrot.lane.b32.xlu0 %v6274_v52, %s7162_s25  ;;  %v6314_v52 = vpack.i.bf16 %v1107_v27, %v7494_v10 }
  0x2f   :  { %6280 = vrot.lane.b32.xlu1 %v6279_v55, %s7162_s25  ;;  %v7573_v55 = vld [vmem:[%s10825_s23 + $0x38] sm:$0x7f] }
  0x30   :  { %v7604_v19 = vrot.slane %v7573_v55, 1 }
  0x31   :  { %6285 = vrot.lane.b32.xlu0 %v6284_v57, %s7162_s25  ;;  %v7576_v57 = vsel %vm10815_vm2, %v1107_v27, %v1110_v50  ;;  %v129_v27 = vsel %vm97_vm0, %v128_v49, %v7544_v41  ;;  %v10846_v50 = vrot.slane %v7309_v1, 7 }
  0x32   :  { %10839 = vst [vmem:[#allocation18_spill] sm:$0xff] %v7604_v19 }
  0x33   :  { %6290 = vrot.lane.b32.xlu1 %v6289_v59, %s7162_s25  ;;  %v127_v59 = vsel %vm10815_vm2, %v7321_v7, %v7366_v28  ;;  %v7598_v7 = vrot.slane %v7494_v10, 5  ;;  %v7601_v28 = vrot.slane %v7494_v10, 6 }
  0x34   :  { %v6324_v49 = vpack.i.bf16 %v129_v27, %v127_v59  ;;  %v144_v27 = vsel %vm10814_vm4, %v7370_v29, %v7509_v17  ;;  %v143_v17 = vsel %vm10815_vm2, %v7330_v11, %v7370_v29 }
  0x35   :  { %6295 = vrot.lane.b32.xlu0 %v6294_v63, %s7162_s25  ;;  %v7583_v63 = vrot.slane %v7494_v10, 3  ;;  %v7617_v39 = vsel %vm10815_vm2, %v7400_v40, %v7598_v7  ;;  %v7623_v38 = vsel %vm10814_vm4, %v7462_v60, %v7601_v28 }
  0x36   :  { %10841 = vst [vmem:[#allocation20_spill] sm:$0xff] %v7617_v39 }
  0x37   :  { %6300 = vrot.lane.b32.xlu1 %v6299_v9, %s7162_s25  ;;  %v7586_v9 = vrot.slane %v7470_v62, 1 }
  0x39   :  { %6305 = vrot.lane.b32.xlu0 %v6304_v26, %s7162_s25  ;;  %v7595_v26 = vrot.slane %v7494_v10, 4  ;;  %v7628_v16 = vsel %vm97_vm0, %v7586_v9, %v7604_v19 }
  0x3a   :  { %v7641_v59 = vsel %vm10815_vm2, %v7623_v38, %v7628_v16 }
  0x3b   :  { %6310 = vrot.lane.b32.xlu1 %v6309_v35, %s7162_s25  ;;  %v7609_v35 = vsel %vm10815_vm2, %v7378_v31, %v7583_v63  ;;  %v213_v48 = vsel %vm99_vm6, %v7500_v13, %v7595_v26  ;;  %10844 = vst [vmem:[#allocation23_spill] sm:$0xff] %v7641_v59  ;;  %v6339_v59 = vpack.i.bf16 %v10846_v50, %v7519_v22 }
  0x3c   :  { %10840 = vst [vmem:[#allocation19_spill] sm:$0xff] %v7609_v35  ;;  %v7632_v0 = vsel %vm10815_vm2, %v213_v48, %v7503_v14 }
  0x3d   :  { %6315 = vrot.lane.b32.xlu0 %v6314_v52, %s7162_s25  ;;  %10842 = vst [vmem:[#allocation21_spill] sm:$0xff] %v7632_v0  ;;  %v7636_v52 = vrot.slane %v7470_v62, 4  ;;  %v177_v0 = vsel %vm10814_vm4, %v155_v54, %v162_v4  ;;  %v7662_v54 = vrot.slane %v7452_v56, 3 }
  0x3f   :  { %6320 = vrot.lane.b32.xlu1 %v6319_v18, %s7163_s2  ;;  %10843 = vst [vmem:[#allocation22_spill] sm:$0xff] %v7636_v52  ;;  %v6334_v18 = vpack.i.bf16 %v7513_v20, %v162_v4  ;;  %v145_v23 = vsel %vm97_vm0, %v144_v27, %v7636_v52  ;;  %10847 = vst [vmem:[#allocation25_spill] sm:$0xff] %v7662_v54  ;;  %v176_v4 = vsel %vm10815_vm2, %v7481_v3, %v7373_v30 }
  0x40   :  { %v185_v29 = vsel %vm10815_vm2, %v7662_v54, %v7583_v63  ;;  %v7675_v27 = vrot.slane %v7470_v62, 6  ;;  %v7680_v30 = vrot.slane %v7573_v55, 4 }
  0x41   :  { %6325 = vrot.lane.b32.xlu0 %v6324_v49, %s7164_s3  ;;  %v6344_v49 = vpack.i.bf16 %v145_v23, %v143_v17  ;;  %v200_v11 = vsel %vm10814_vm4, %v7378_v31, %v185_v29  ;;  %v6354_v3 = vpack.i.bf16 %v7595_v26, %v185_v29  ;;  %v7689_v17 = vsel %vm165_vm3, %v7465_v61, %v7598_v7 }
  0x42   :  { %10848 = vst [vmem:[#allocation26_spill] sm:$0xff] %v7675_v27  ;;  %v7694_v23 = vsel %vm10815_vm2, %v7513_v20, %v7680_v30  ;;  %v270_v29 = vrot.slane %v7494_v10, 7 }
  0x43   :  { %6330 = vrot.lane.b32.xlu1 %v6329_v42, %s7162_s25  ;;  %v178_v42 = vsel %vm97_vm0, %v177_v0, %v7647_v32  ;;  %v228_v0 = vsel %vm10814_vm4, %v7395_v37, %v213_v48  ;;  %10849 = vst [vmem:[#allocation27_spill] sm:$0xff] %v7694_v23  ;;  %v6359_v48 = vpack.i.bf16 %v7598_v7, %v7583_v63 }
  0x44   :  { %v6349_v50 = vpack.i.bf16 %v178_v42, %v176_v4  ;;  %v227_v4 = vsel %vm10815_vm2, %v7386_v34, %v7411_v43  ;;  %v229_v42 = vsel %vm97_vm0, %v228_v0, %v7503_v14  ;;  %v264_v34 = vsel %vm10814_vm4, %v7422_v46, %v7601_v28 }
  0x45   :  { %6335 = vrot.lane.b32.xlu0 %v6334_v18, %s7162_s25  ;;  %v201_v18 = vsel %vm97_vm0, %v200_v11, %v7675_v27  ;;  %v250_v11 = vsel %vm10815_vm2, %v7416_v44, %v7426_v47  ;;  %v263_v44 = vsel %vm10815_vm2, %v7309_v1, %v7422_v46  ;;  %v265_v47 = vsel %vm97_vm0, %v264_v34, %v7604_v19 }
  0x46   :  { %v6389_v1 = vpack.i.bf16 %v7392_v36, %v7662_v54  ;;  %v277_v46 = vsel %vm10815_vm2, %v7317_v5, %v7438_v51  ;;  %v1166_v43 = vsel %vm10814_vm4, %v7598_v7, %v7573_v55 }
  0x47   :  { %6340 = vrot.lane.b32.xlu1 %v6339_v59, %s7162_s25  ;;  %v199_v59 = vsel %vm10815_vm2, %v7383_v33, %v7359_v24  ;;  %v6369_v24 = vpack.i.bf16 %v229_v42, %v227_v4  ;;  %v289_v42 = vsel %vm10815_vm2, %v7324_v8, %v7443_v53  ;;  %v6404_v8 = vpack.i.bf16 %v7647_v32, %v7500_v13 }
  0x49   :  { %6345 = vrot.lane.b32.xlu0 %v6344_v49, %s7165_s26  ;;  %v251_v49 = vsel %vm10814_vm4, %v7400_v40, %v7689_v17  ;;  %v6374_v40 = vpack.i.bf16 %v7516_v21, %v7601_v28  ;;  %v290_v28 = vsel %vm10814_vm4, %v7443_v53, %v7494_v10 }
  0x4a   :  { %v252_v33 = vsel %vm97_vm0, %v251_v49, %v7470_v62 }
  0x4b   :  { %6350 = vrot.lane.b32.xlu1 %v6349_v50, %s7166_s27  ;;  %v6364_v50 = vpack.i.bf16 %v201_v18, %v199_v59  ;;  %v6379_v0 = vpack.i.bf16 %v252_v33, %v250_v11  ;;  %v7738_v59 = vrot.slane %v7573_v55, 3  ;;  %v6384_v18 = vpack.i.bf16 %v265_v47, %v263_v44 }
  0x4c   :  { %v6414_v11 = vpack.i.bf16 %v7689_v17, %v7503_v14  ;;  %v6424_v33 = vpack.i.bf16 %v7628_v16, %v7623_v38 }
  0x4d   :  { %6355 = vrot.lane.b32.xlu0 %v6354_v3, %s7162_s25  ;;  %v7733_v3 = vrot.slane %v7573_v55, 2  ;;  %v291_v49 = vsel %vm97_vm0, %v290_v28, %v7738_v59  ;;  %v7807_v16 = vsel %vm10815_vm2, %v7544_v41, %v7738_v59 }
  0x4e   :  { %v6399_v5 = vpack.i.bf16 %v291_v49, %v289_v42 }
  0x4f   :  { %6360 = vrot.lane.b32.xlu1 %v6359_v48, %s7162_s25  ;;  %10850 = vst [vmem:[#allocation28_spill] sm:$0xff] %v7733_v3  ;;  %v278_v48 = vsel %vm10814_vm4, %v7438_v51, %v270_v29  ;;  %v7788_v13 = vsel %vm10813_vm1, %v7497_v12, %v7733_v3  ;;  %vm488_vm1 = vcmask 392192  }
  0x50   :  { %v279_v4 = vsel %vm97_vm0, %v278_v48, %v7733_v3 }
  0x51   :  { %6365 = vrot.lane.b32.xlu0 %v6364_v50, %s7167_s28  ;;  %v7760_v50 = vsel %vm10814_vm4, %v7419_v45, %v7462_v60  ;;  %v6394_v36 = vpack.i.bf16 %v279_v4, %v277_v46  ;;  %v7837_v4 = vrot.slane %v7573_v55, 6 }
  0x53   :  { %6370 = vrot.lane.b32.xlu1 %v6369_v24, %s7168_s4  ;;  %v7767_v24 = vsel %vm99_vm6, %v7457_v58, %v7438_v51  ;;  %v6419_v51 = vpack.i.bf16 %v7573_v55, %v7470_v62  ;;  %v7783_v58 = vsel %vm10812_vm5, %v7476_v2, %v270_v29  ;;  %v6434_v29 = vpack.i.bf16 %v7733_v3, %v7604_v19 }
  0x54   :  { %v6409_v53 = vpack.i.bf16 %v7767_v24, %v7675_v27  ;;  %v6429_v34 = vpack.i.bf16 %v7788_v13, %v7783_v58 }
  0x55   :  { %6375 = vrot.lane.b32.xlu0 %v6374_v40, %s7162_s25  ;;  %v7802_v40 = vrot.slane %v7573_v55, 5 }
  0x57   :  { %6380 = vrot.lane.b32.xlu1 %v6379_v0, %s7169_s29  ;;  %v1103_v0 = vsel %vm10814_vm4, %v7494_v10, %v7807_v16  ;;  %v7821_v28 = vsel %vm165_vm3, %v7647_v32, %v7802_v40  ;;  %vm8619_vm3 = vmpackc.low %vm10812_vm5, %vm7174_vm15  ;;  %vm498_vm15 = vcmask 203776  }
  0x58   :  { %10852 = vst [vmem:[#allocation30_spill] sm:$0xff] %v7821_v28 }
  0x59   :  { %6385 = vrot.lane.b32.xlu0 %v6384_v18, %s7170_s30  ;;  %v7826_v18 = vsel %vm99_vm6, %v7636_v52, %v7680_v30 }
  0x5b   :  { %6390 = vrot.lane.b32.xlu1 %v6389_v1, %s7162_s25  ;;  %v7831_v1 = vsel %vm10815_vm2, %v7486_v6, %v7452_v56  ;;  %v1125_v56 = vsel %vm10814_vm4, %v7513_v20, %v7826_v18  ;;  %v1137_v6 = vsel %vm10814_vm4, %v7519_v22, %v7821_v28 }
  0x5d   :  { %6395 = vrot.lane.b32.xlu0 %v6394_v36, %s7171_s0 }
  0x5f   :  { %6400 = vrot.lane.b32.xlu1 %v6399_v5, %s7172_s21 }
  0x61   :  { %6405 = vrot.lane.b32.xlu0 %v6404_v8, %s7162_s25 }
  0x63   :  { %6410 = vrot.lane.b32.xlu1 %v6409_v53, %s7162_s25 }
  0x65   :  { %6415 = vrot.lane.b32.xlu0 %v6414_v11, %s7162_s25 }
  0x67   :  { %6420 = vrot.lane.b32.xlu1 %v6419_v51, %s7162_s25 }
  0x69   :  { %6425 = vrot.lane.b32.xlu0 %v6424_v33, %s7162_s25  ;;  %v1147_v33 = vsel %vm10814_vm4, %v7583_v63, %v7837_v4 }
  0x6b   :  { %6430 = vrot.lane.b32.xlu1 %v6429_v34, %s7162_s25 }
  0x6d   :  { %6435 = vrot.lane.b32.xlu0 %v6434_v29, %s7162_s25 }
  0x83   :  { %v6206_v38 = vpop.permute.xlu0 %6205 }
  0x84   :  { %v7812_v44 = vunpack.i.h.bf16 %v6206_v38  ;;  %v7814_v47 = vunpack.i.l.bf16 %v6206_v38 }
  0x85   :  { %v7816_v48 = vpop.permute.xlu1 %6215 }
  0x86   :  { %10851 = vst [vmem:[#allocation29_spill] sm:$0xff] %v7812_v44  ;;  %v116_v46 = vsel %vm99_vm6, %v7497_v12, %v7814_v47  ;;  %v7841_v42 = vsel %vm97_vm0, %v1103_v0, %v7812_v44  ;;  %v7844_v49 = vunpack.i.l.bf16 %v7816_v48  ;;  %v130_v51 = vsel %vm99_vm6, %v7544_v41, %v7812_v44 }
  0x87   :  { %v6211_v36 = vpop.permute.xlu0 %6210  ;;  %v6444_v5 = vpack.i.bf16 %v7814_v47, %v116_v46  ;;  %v6449_v7 = vpack.i.bf16 %v7812_v44, %v130_v51  ;;  %v10859_v12 = vrot.slane %v7573_v55, 7 }
  0x88   :  { %v7853_v8 = vunpack.i.h.bf16 %v6211_v36  ;;  %v7855_v53 = vunpack.i.l.bf16 %v6211_v36 }
  0x89   :  { %v6221_v11 = vpop.permute.xlu1 %6220  ;;  %6445 = vrot.lane.b32.xlu0 %v6444_v5, %s7163_s2 }
  0x8a   :  { %v146_v20 = vsel %vm99_vm6, %v7636_v52, %v7855_v53  ;;  %v179_v34 = vsel %vm99_vm6, %v7821_v28, %v7853_v8  ;;  %v7871_v29 = vsel %vm97_vm0, %v1125_v56, %v7855_v53  ;;  %v7875_v38 = vsel %vm97_vm0, %v1137_v6, %v7853_v8 }
  0x8b   :  { %10853 = vst [vmem:[#allocation31_spill] sm:$0xff] %v7875_v38  ;;  %v7877_v0 = vunpack.i.h.bf16 %v6221_v11  ;;  %v7879_v46 = vpop.permute.xlu0 %6225  ;;  %v6454_v63 = vpack.i.bf16 %v7855_v53, %v146_v20  ;;  %v6439_v36 = vpack.i.bf16 %v7844_v49, %v179_v34  ;;  %v1062_v6 = vsel %vm10814_vm4, %v7465_v61, %v7470_v62 }
  0x8c   :  { %v7923_v56 = vunpack.i.l.bf16 %v6221_v11  ;;  %v7939_v11 = vsel %vm10812_vm5, %v7503_v14, %v10859_v12  ;;  %v10860_v12 = vld [vmem:[#allocation13_spill] sm:$0xff]  ;;  %vm483_vm5 = vcmask 457728  }
  0x8d   :  { %v6231_v5 = vpop.permute.xlu1 %6230  ;;  %6455 = vrot.lane.b32.xlu0 %v6454_v63, %s7165_s26  ;;  %6440 = vrot.lane.b32.xlu1 %v6439_v36, %s7166_s27  ;;  %v7901_v34 = vsel %vm97_vm0, %v1147_v33, %v7877_v0 }
  0x8e   :  { %v7893_v23 = vunpack.i.h.bf16 %v6231_v5  ;;  %v7895_v20 = vunpack.i.l.bf16 %v6231_v5  ;;  %10855 = vst [vmem:[#allocation33_spill] sm:$0xff] %v7901_v34 }
  0x8f   :  { %v6236_v41 = vpop.permute.xlu0 %6235 }
  0x90   :  { %10854 = vst [vmem:[#allocation32_spill] sm:$0xff] %v7895_v20  ;;  %v266_v5 = vsel %vm99_vm6, %v7604_v19, %v7895_v20  ;;  %v7912_v63 = vsel %vm97_vm0, %v1166_v43, %v7893_v23  ;;  %v7914_v36 = vunpack.i.h.bf16 %v6236_v41  ;;  %v7916_v33 = vunpack.i.l.bf16 %v6236_v41 }
  0x91   :  { %10856 = vst [vmem:[#allocation34_spill] sm:$0xff] %v7912_v63  ;;  %v6241_v54 = vpop.permute.xlu1 %6240  ;;  %6450 = vrot.lane.b32.xlu1 %v6449_v7, %s7164_s3  ;;  %v6459_v43 = vpack.i.bf16 %v7895_v20, %v266_v5  ;;  %v1069_v20 = vsel %vm10814_vm4, %v7462_v60, %v7586_v9 }
  0x92   :  { %10857 = vst [vmem:[#allocation35_spill] sm:$0xff] %v7916_v33  ;;  %v7925_v44 = vunpack.i.h.bf16 %v6241_v54  ;;  %v6242_v19 = vunpack.i.l.bf16 %v6241_v54  ;;  %v280_v41 = vsel %vm99_vm6, %v7733_v3, %v7916_v33  ;;  %v292_v61 = vsel %vm99_vm6, %v7738_v59, %v7914_v36  ;;  %v10861_v3 = vld [vmem:[#allocation14_spill] sm:$0xff] }
  0x93   :  { %v6246_v51 = vpop.permute.xlu0 %6245  ;;  %v6464_v54 = vpack.i.bf16 %v7916_v33, %v280_v41  ;;  %v6228_v41 = vunpack.i.h.bf16 %v7879_v46  ;;  %v6469_v60 = vpack.i.bf16 %v7914_v36, %v292_v61 }
  0x94   :  { %10858 = vst [vmem:[#allocation36_spill] sm:$0xff] %v7925_v44  ;;  %v1051_v7 = vsel %vm97_vm0, %v7529_v25, %v6242_v19  ;;  %v1063_v5 = vsel %vm97_vm0, %v1062_v6, %v7925_v44  ;;  %v6248_v39 = vunpack.i.h.bf16 %v6246_v51  ;;  %v7949_v63 = vunpack.i.l.bf16 %v6246_v51 }
  0x95   :  { %v7951_v52 = vpop.permute.xlu1 %6250  ;;  %v6474_v14 = vpack.i.bf16 %v1051_v7, %v10860_v12  ;;  %v6479_v35 = vpack.i.bf16 %v1063_v5, %v10861_v3  ;;  %6465 = vrot.lane.b32.xlu0 %v6464_v54, %s7171_s0  ;;  %6460 = vrot.lane.b32.xlu1 %v6459_v43, %s7170_s30  ;;  %v1933_v6 = vsel %vm10814_vm4, %v7939_v11, %v7923_v56  ;;  %v10863_v43 = vld [vmem:[#allocation16_spill] sm:$0xff]  ;;  %v6218_v5 = vunpack.i.h.bf16 %v7816_v48 }
  0x96   :  { %v7957_v25 = vunpack.i.l.bf16 %v7951_v52  ;;  %v7967_v51 = vsel %vm97_vm0, %v1069_v20, %v7949_v63  ;;  %v7970_v3 = vsel %vm97_vm0, %v1933_v6, %v6248_v39  ;;  %v7988_v20 = vsel %vm10815_vm2, %v7689_v17, %v7470_v62 }
  0x97   :  { %10862 = vst [vmem:[#allocation13_spill] sm:$0xff] %v7970_v3  ;;  %v7972_v7 = vpop.permute.xlu0 %6255  ;;  %v6494_v61 = vpack.i.bf16 %v7967_v51, %v10863_v43  ;;  %10864 = vst [vmem:[#allocation14_spill] sm:$0xff] %v7988_v20  ;;  %v1945_v37 = vsel %vm10814_vm4, %v7573_v55, %v6228_v41  ;;  %v189_v17 = vsel %vm10814_vm4, %v7675_v27, %v7837_v4 }
  0x98   :  { %v1064_v54 = vsel %vm99_vm6, %v7925_v44, %v7957_v25  ;;  %v7981_v12 = vunpack.i.h.bf16 %v7972_v7  ;;  %v8041_v48 = vsel %vm10815_vm2, %v7494_v10, %v7738_v59  ;;  %v8044_v3 = vsel %vm10815_vm2, %v189_v17, %v6218_v5 }
  0x99   :  { %v7983_v34 = vpop.permute.xlu1 %6260  ;;  %6475 = vrot.lane.b32.xlu0 %v6474_v14, %s7163_s2  ;;  %6470 = vrot.lane.b32.xlu1 %v6469_v60, %s7172_s21  ;;  %v6489_v51 = vpack.i.bf16 %v7957_v25, %v1064_v54  ;;  %v8010_v14 = vsel %vm97_vm0, %v1945_v37, %v7957_v25  ;;  %v8013_v60 = vunpack.i.l.bf16 %v7879_v46  ;;  %v230_v37 = vsel %vm99_vm6, %v7939_v11, %v7923_v56 }
  0x9a   :  { %v7991_v6 = vunpack.i.l.bf16 %v7983_v34  ;;  %v8003_v62 = vsel %vm10814_vm4, %v7814_v47, %v7981_v12  ;;  %10867 = vst [vmem:[#allocation37_spill] sm:$0xff] %v8010_v14  ;;  %v1052_v46 = vsel %vm99_vm6, %v6242_v19, %v6248_v39  ;;  %10869 = vst [vmem:[#allocation39_spill] sm:$0xff] %v8041_v48  ;;  %v253_v38 = vsel %vm99_vm6, %v7573_v55, %v6228_v41 }
  0x9b   :  { %10866 = vst [vmem:[#allocation16_spill] sm:$0xff] %v8003_v62  ;;  %v8020_v43 = vpop.permute.xlu0 %6265  ;;  %10870 = vst [vmem:[#allocation40_spill] sm:$0xff] %v8044_v3  ;;  %v6504_v10 = vpack.i.bf16 %v8013_v60, %v230_v37  ;;  %v6484_v15 = vpack.i.bf16 %v6248_v39, %v1052_v46  ;;  %v8090_v37 = vsel %vm10815_vm2, %v7939_v11, %v7923_v56 }
  0x9c   :  { %v8018_v54 = vsel %vm10814_vm4, %v7916_v33, %v7991_v6  ;;  %v10781_v62 = vunpack.i.l.bf16 %v8020_v43  ;;  %10874 = vst [vmem:[#allocation42_spill] sm:$0xff] %v8090_v37 }
  0x9d   :  { %10868 = vst [vmem:[#allocation38_spill] sm:$0xff] %v8018_v54  ;;  %v8026_v27 = vpop.permute.xlu1 %6270  ;;  %6490 = vrot.lane.b32.xlu0 %v6489_v51, %s7164_s3  ;;  %6480 = vrot.lane.b32.xlu1 %v6479_v35, %s7164_s3  ;;  %v1982_v54 = vsel %vm10814_vm4, %v7738_v59, %v7914_v36  ;;  %v10873_v35 = vunpack.i.h.bf16 %v8020_v43 }
  0x9e   :  { %v8033_v33 = vunpack.i.h.bf16 %v8026_v27  ;;  %v8048_v19 = vpack.c.bf16 %v10781_v62, %v6228_v41  ;;  %v10872_v51 = vunpack.i.l.bf16 %v8026_v27  ;;  %v10783_v62 = vmov 0.0  }
  0x9f   :  { %v8058_v14 = vpop.permute.xlu0 %6275  ;;  %669 = vmatprep.mubr.f32.mxu1 %v10783_v62  ;;  %598 = vmatprep.mubr.f32.mxu0 %v10783_v62  ;;  %v8085_v41 = vsel %vm10815_vm2, %v7519_v22, %v7802_v40  ;;  %v1086_v22 = vsel %vm10815_vm2, %v7767_v24, %v7476_v2  ;;  %v10876_v2 = vrot.slane %v7378_v31, 7 }
  0xa0   :  { %10871 = vst [vmem:[#allocation41_spill] sm:$0xff] %v8048_v19  ;;  %v2769_v20 = vsel %vm10814_vm4, %v10873_v35, %v10872_v51  ;;  %v8063_v3 = vsel %vm97_vm0, %v1982_v54, %v8033_v33  ;;  %v10785_v36 = vunpack.i.h.bf16 %v8058_v14  ;;  %v1087_v54 = vsel %vm10814_vm4, %v7783_v58, %v7788_v13 }
  0xa1   :  { %v8067_v19 = vpop.permute.xlu1 %6280  ;;  %6505 = vrot.lane.b32.xlu0 %v6504_v10, %s7168_s4  ;;  %6485 = vrot.lane.b32.xlu1 %v6484_v15, %s7163_s2  ;;  %v2003_v15 = vsel %vm10814_vm4, %v7802_v40, %v7844_v49  ;;  %v6509_v10 = vpack.i.bf16 %v7893_v23, %v253_v38  ;;  %v1088_v51 = vsel %vm97_vm0, %v1087_v54, %v7814_v47  ;;  %v8242_v37 = vunpack.i.l.bf16 %v8058_v14 }
  0xa2   :  { %v8075_v39 = vunpack.i.h.bf16 %v8067_v19  ;;  %v2781_v46 = vsel %vm10814_vm4, %v7844_v49, %v10785_v36  ;;  %v202_v36 = vsel %vm99_vm6, %v189_v17, %v6218_v5  ;;  %v8131_v5 = vsel %vm10814_vm4, %v7925_v44, %v7957_v25 }
  0xa3   :  { %v8099_v35 = vpop.permute.xlu0 %6285  ;;  %10875 = vst [vmem:[#allocation43_spill] sm:$0xff] %v8131_v5  ;;  %v1914_v54 = vsel %vm10814_vm4, %v7647_v32, %v7853_v8  ;;  %v8150_v25 = vunpack.i.h.bf16 %v7951_v52  ;;  %v6519_v44 = vpack.i.bf16 %v7807_v16, %v10876_v2  ;;  %v6524_v52 = vpack.i.bf16 %v7738_v59, %v7680_v30 }
  0xa4   :  { %v8107_v56 = vsel %vm97_vm0, %v2003_v15, %v8075_v39  ;;  %v8110_v11 = vunpack.i.h.bf16 %v8099_v35  ;;  %v8126_v15 = vsel %vm10815_vm2, %v7516_v21, %v7647_v32  ;;  %v6499_v21 = vpack.i.bf16 %v7877_v0, %v202_v36 }
  0xa5   :  { %v8112_v62 = vpop.permute.xlu1 %6290  ;;  %6510 = vrot.lane.b32.xlu0 %v6509_v10, %s7169_s29  ;;  %6495 = vrot.lane.b32.xlu1 %v6494_v61, %s7165_s26  ;;  %v6514_v10 = vpack.i.bf16 %v1088_v51, %v1086_v22  ;;  %v10877_v36 = vunpack.i.l.bf16 %v7972_v7  ;;  %v1071_v59 = vsel %vm99_vm6, %v7949_v63, %v8150_v25  ;;  %v98_v32 = vsel %vm97_vm0, %v7760_v50, %v7586_v9 }
  0xa6   :  { %v10792_v24 = vunpack.i.h.bf16 %v8112_v62  ;;  %v8136_v17 = vsel %vm10814_vm4, %v7893_v23, %v8110_v11 }
  0xa7   :  { %v8141_v61 = vpop.permute.xlu0 %6295  ;;  %v1089_v31 = vsel %vm99_vm6, %v10877_v36, %v7981_v12  ;;  %v8199_v36 = vsel %vm10815_vm2, %v7821_v28, %v7853_v8 }
  0xa8   :  { %v8147_v38 = vsel %vm97_vm0, %v1914_v54, %v10792_v24  ;;  %v6534_v54 = vpack.i.bf16 %v7991_v6, %v1089_v31  ;;  %10879 = vst [vmem:[#allocation45_spill] sm:$0xff] %v8199_v36  ;;  %v6263_v31 = vunpack.i.h.bf16 %v7983_v34  ;;  %v10881_v24 = vld [vmem:[#allocation5_spill] sm:$0xff] }
  0xa9   :  { %v6301_v48 = vpop.permute.xlu1 %6300  ;;  %6515 = vrot.lane.b32.xlu0 %v6514_v10, %s7166_s27  ;;  %6500 = vrot.lane.b32.xlu1 %v6499_v21, %s7167_s28  ;;  %v8188_v10 = vsel %vm10815_vm2, %v7826_v18, %v7855_v53  ;;  %v6529_v21 = vpack.i.bf16 %v8150_v25, %v1071_v59  ;;  %v94_v28 = vsel %vm10815_vm2, %v10881_v24, %v7419_v45 }
  0xaa   :  { %v8157_v5 = vunpack.i.h.bf16 %v6301_v48  ;;  %v8159_v51 = vunpack.i.l.bf16 %v6301_v48 }
  0xab   :  { %v8177_v48 = vpop.permute.xlu0 %6305 }
  0xac   :  { %v8171_v2 = vsel %vm97_vm0, %v2769_v20, %v8159_v51  ;;  %v8175_v16 = vsel %vm97_vm0, %v2781_v46, %v8157_v5  ;;  %v8203_v18 = vunpack.i.h.bf16 %v8177_v48 }
  0xad   :  { %10878 = vst [vmem:[#allocation44_spill] sm:$0xff] %v8175_v16  ;;  %v8179_v22 = vpop.permute.xlu1 %6310  ;;  %6525 = vrot.lane.b32.xlu0 %v6524_v52, %s7162_s25  ;;  %6520 = vrot.lane.b32.xlu1 %v6519_v44, %s7162_s25 }
  0xae   :  { %v10797_v20 = vunpack.i.h.bf16 %v8179_v22  ;;  %v10795_v46 = vunpack.i.l.bf16 %v8179_v22  ;;  %v8235_v45 = vsel %vm10814_vm4, %v8033_v33, %v8203_v18 }
  0xaf   :  { %v8211_v52 = vpop.permute.xlu0 %6315  ;;  %10883 = vst [vmem:[#allocation5_spill] sm:$0xff] %v8235_v45 }
  0xb0   :  { %v2806_v44 = vsel %vm10814_vm4, %v8013_v60, %v10795_v46 }
  0xb1   :  { %v8217_v8 = vsel %vm97_vm0, %v2806_v44, %v10797_v20  ;;  %v6321_v34 = vpop.permute.xlu1 %6320  ;;  %6535 = vrot.lane.b32.xlu0 %v6534_v54, %s7166_s27  ;;  %6530 = vrot.lane.b32.xlu1 %v6529_v21, %s7165_s26  ;;  %v10882_v44 = vunpack.i.l.bf16 %v8020_v43 }
  0xb2   :  { %10880 = vst [vmem:[#allocation46_spill] sm:$0xff] %v8217_v8  ;;  %v6323_v46 = vunpack.i.h.bf16 %v6321_v34  ;;  %v6322_v36 = vunpack.i.l.bf16 %v6321_v34 }
  0xb3   :  { %v1105_v20 = vsel %vm99_vm6, %v6263_v31, %v10882_v44  ;;  %v6326_v50 = vpop.permute.xlu0 %6325  ;;  %v10884_v31 = vpack.i.bf16 %v7871_v29, %v7576_v57  ;;  %v10885_v44 = vpack.i.bf16 %v7841_v42, %v7831_v1 }
  0xb4   :  { %v444_v24 = vsel %vm443_vm7, %v94_v28, %v6322_v36  ;;  %v445_v54 = vsel %vm443_vm7, %v98_v32, %v6323_v46  ;;  %v6328_v34 = vunpack.i.h.bf16 %v6326_v50  ;;  %v6327_v21 = vunpack.i.l.bf16 %v6326_v50 }
  0xb5   :  { %v8239_v16 = vpop.permute.xlu1 %6330  ;;  %v5785_v59 = vpack.c.bf16 %v445_v54, %v444_v24  ;;  %6545 = vrot.lane.b32.xlu0 %v10884_v31, %s7168_s4  ;;  %6540 = vrot.lane.b32.xlu1 %v10885_v44, %s7167_s28  ;;  %v6554_v32 = vpack.i.bf16 %v8033_v33, %v1105_v20  ;;  %v6549_v28 = vpack.i.bf16 %v7837_v4, %v7802_v40  ;;  %v10886_v50 = vunpack.i.l.bf16 %v8026_v27 }
  0xb6   :  { %v10887_v24 = vunpack.i.h.bf16 %v8020_v43  ;;  %v449_v8 = vsel %vm448_vm8, %v6322_v36, %v6327_v21  ;;  %v450_v57 = vsel %vm448_vm8, %v6323_v46, %v6328_v34  ;;  %v8280_v4 = vsel %vm10815_vm2, %v7573_v55, %v7893_v23  ;;  %v10902_v36 = vld [vmem:[#allocation28_spill] sm:$0xff] }
  0xb7   :  { %v8262_v29 = vpop.permute.xlu0 %6335  ;;  %v5783_v31 = vpack.c.bf16 %v450_v57, %v449_v8  ;;  %10889 = vst [vmem:[#allocation48_spill] sm:$0xff] %v8280_v4  ;;  %v10890_v20 = vrot.slane %v7573_v55, 7  ;;  %v10923_v4 = vunpack.i.l.bf16 %v8211_v52 }
  0xb8   :  { %v1127_v54 = vsel %vm99_vm6, %v10887_v24, %v10886_v50  ;;  %v8265_v1 = vunpack.i.h.bf16 %v8262_v29 }
  0xb9   :  { %v8267_v42 = vpop.permute.xlu1 %6340  ;;  %6555 = vrot.lane.b32.xlu0 %v6554_v32, %s7167_s28  ;;  %6550 = vrot.lane.b32.xlu1 %v6549_v28, %s7162_s25  ;;  %v6559_v27 = vpack.i.bf16 %v8242_v37, %v1127_v54  ;;  %v1157_v46 = vsel %vm10814_vm4, %v7595_v26, %v10890_v20  ;;  %v10891_v28 = vunpack.i.h.bf16 %v8058_v14  ;;  %v10892_v54 = vld [vmem:[#allocation31_spill] sm:$0xff] }
  0xba   :  { %v8275_v40 = vsel %vm97_vm0, %v8136_v17, %v8265_v1  ;;  %5784 = vmatprep.subr.bf16.mxu0 %v5783_v31  ;;  %v6282_v17 = vunpack.i.l.bf16 %v8067_v19  ;;  %v10895_v31 = vld [vmem:[#allocation8_spill] sm:$0xff] }
  0xbb   :  { %10888 = vst [vmem:[#allocation47_spill] sm:$0xff] %v8275_v40  ;;  %v6346_v43 = vpop.permute.xlu0 %6345  ;;  %5786 = vmatpush1.bf16.msra.mxu0 %v5785_v59  ;;  %v1139_v50 = vsel %vm99_vm6, %v7844_v49, %v10891_v28  ;;  %v10893_v59 = vld [vmem:[#allocation17_spill] sm:$0xff]  ;;  %v1156_v19 = vsel %vm10815_vm2, %v10895_v31, %v7595_v26 }
  0xbc   :  { %v6348_v8 = vunpack.i.h.bf16 %v6346_v43  ;;  %v6347_v44 = vunpack.i.l.bf16 %v6346_v43  ;;  %v10894_v57 = vpack.i.bf16 %v10892_v54, %v10893_v59  ;;  %v1158_v43 = vsel %vm97_vm0, %v1157_v46, %v8013_v60 }
  0xbd   :  { %v6351_v32 = vpop.permute.xlu1 %6350  ;;  %6560 = vrot.lane.b32.xlu1 %v6559_v27, %s7168_s4  ;;  %v6287_v59 = vunpack.i.l.bf16 %v8099_v35  ;;  %v1149_v26 = vsel %vm99_vm6, %v7877_v0, %v6282_v17  ;;  %v6292_v35 = vunpack.i.l.bf16 %v8112_v62 }
  0xbe   :  { %v6353_v55 = vunpack.i.h.bf16 %v6351_v32  ;;  %v6352_v24 = vunpack.i.l.bf16 %v6351_v32  ;;  %6565 = vrot.lane.b32.xlu0 %v10894_v57, %s7169_s29  ;;  %v454_v14 = vsel %vm453_vm10, %v6327_v21, %v6347_v44  ;;  %v455_v49 = vsel %vm453_vm10, %v6328_v34, %v6348_v8  ;;  %v10896_v34 = vld [vmem:[#allocation33_spill] sm:$0xff] }
  0xbf   :  { %v8305_v20 = vpop.permute.xlu0 %6355  ;;  %v6574_v32 = vpack.i.bf16 %v8075_v39, %v1139_v50  ;;  %v5795_v27 = vpack.c.bf16 %v455_v49, %v454_v14  ;;  %v10897_v50 = vld [vmem:[#allocation19_spill] sm:$0xff]  ;;  %v10899_v14 = vld [vmem:[#allocation38_spill] sm:$0xff] }
  0xc0   :  { %v459_v28 = vsel %vm458_vm9, %v6347_v44, %v6352_v24  ;;  %v460_v54 = vsel %vm458_vm9, %v6348_v8, %v6353_v55  ;;  %v10898_v44 = vpack.i.bf16 %v10896_v34, %v10897_v50  ;;  %v6584_v8 = vpack.i.bf16 %v1158_v43, %v1156_v19 }
  0xc1   :  { %v8311_v57 = vpop.permute.xlu1 %6360  ;;  %v5793_v46 = vpack.c.bf16 %v460_v54, %v459_v28  ;;  %v6579_v54 = vpack.i.bf16 %v6282_v17, %v1149_v26 }
  0xc2   :  { %v8316_v21 = vunpack.i.l.bf16 %v8311_v57  ;;  %6575 = vrot.lane.b32.xlu0 %v6574_v32, %s7169_s29  ;;  %6570 = vrot.lane.b32.xlu1 %v10898_v44, %s7170_s30  ;;  %v10901_v32 = vld [vmem:[#allocation35_spill] sm:$0xff] }
  0xc3   :  { %5794 = vmatprep.subr.bf16.mxu1 %v5793_v46  ;;  %v8329_v28 = vpop.permute.xlu0 %6365  ;;  %v8334_v31 = vsel %vm10815_vm2, %v10902_v36, %v10901_v32  ;;  %v1159_v46 = vsel %vm99_vm6, %v8013_v60, %v6287_v59  ;;  %v10904_v60 = vld [vmem:[#allocation22_spill] sm:$0xff] }
  0xc4   :  { %v8327_v49 = vsel %vm97_vm0, %v10899_v14, %v8316_v21  ;;  %5796 = vmatpush1.bf16.msra.mxu1 %v5795_v27  ;;  %10903 = vst [vmem:[#allocation17_spill] sm:$0xff] %v8334_v31  ;;  %v10801_v34 = vunpack.i.h.bf16 %v8329_v28  ;;  %v10802_v19 = vunpack.i.l.bf16 %v8329_v28  ;;  %v6594_v26 = vpack.i.bf16 %v6287_v59, %v1159_v46  ;;  %v10908_v46 = vld [vmem:[#allocation20_spill] sm:$0xff] }
  0xc5   :  { %10900 = vst [vmem:[#allocation31_spill] sm:$0xff] %v8327_v49  ;;  %v8338_v43 = vpop.permute.xlu1 %6370  ;;  %v1903_v44 = vsel %vm10814_vm4, %v10904_v60, %v7855_v53  ;;  %v8373_v59 = vunpack.i.l.bf16 %v8141_v61  ;;  %v10907_v53 = vld [vmem:[#allocation34_spill] sm:$0xff]  ;;  %v8382_v31 = vunpack.i.h.bf16 %v8141_v61 }
  0xc6   :  { %6585 = vrot.lane.b32.xlu0 %v6584_v8, %s7171_s0  ;;  %6580 = vrot.lane.b32.xlu1 %v6579_v54, %s7170_s30  ;;  %v8349_v17 = vsel %vm463_vm11, %v6352_v24, %v10802_v19  ;;  %v8354_v27 = vsel %vm463_vm11, %v6353_v55, %v10801_v34  ;;  %v10905_v24 = vld [vmem:[#allocation12_spill] sm:$0xff]  ;;  %v1904_v50 = vsel %vm97_vm0, %v1903_v44, %v6292_v35 }
  0xc7   :  { %v8361_v14 = vpop.permute.xlu0 %6375  ;;  %v1902_v32 = vsel %vm10815_vm2, %v10905_v24, %v10904_v60  ;;  %v1168_v55 = vsel %vm99_vm6, %v7893_v23, %v8110_v11  ;;  %10906 = vst [vmem:[#allocation33_spill] sm:$0xff] %v8373_v59  ;;  %v10909_v8 = vpack.i.bf16 %v10907_v53, %v10908_v46  ;;  %10910 = vst [vmem:[#allocation19_spill] sm:$0xff] %v8382_v31 }
  0xc8   :  { %v6604_v34 = vpack.i.bf16 %v1904_v50, %v1902_v32  ;;  %v6599_v19 = vpack.i.bf16 %v8110_v11, %v1168_v55  ;;  %v1905_v23 = vsel %vm99_vm6, %v6292_v35, %v8159_v51  ;;  %v10912_v11 = vld [vmem:[#allocation16_spill] sm:$0xff]  ;;  %v10913_v32 = vld [vmem:[#allocation11_spill] sm:$0xff]  ;;  %v10914_v55 = vld [vmem:[#allocation25_spill] sm:$0xff] }
  0xc9   :  { %v8363_v54 = vpop.permute.xlu1 %6380  ;;  %v6614_v35 = vpack.i.bf16 %v8159_v51, %v1905_v23 }
  0xca   :  { %6595 = vrot.lane.b32.xlu0 %v6594_v26, %s7171_s0  ;;  %6590 = vrot.lane.b32.xlu1 %v10909_v8, %s7172_s21  ;;  %v10911_v26 = vld [vmem:[#allocation26_spill] sm:$0xff] }
  0xcb   :  { %v1921_v50 = vsel %vm10814_vm4, %v10911_v26, %v8373_v59  ;;  %v8394_v8 = vpop.permute.xlu0 %6385  ;;  %v1920_v53 = vsel %vm10815_vm2, %v10914_v55, %v10911_v26 }
  0xcc   :  { %v1922_v46 = vsel %vm97_vm0, %v1921_v50, %v8382_v31 }
  0xcd   :  { %v8384_v44 = vpop.permute.xlu1 %6390  ;;  %v6624_v23 = vpack.i.bf16 %v1922_v46, %v1920_v53  ;;  %v10917_v53 = vunpack.i.h.bf16 %v8179_v22  ;;  %v10918_v46 = vunpack.i.l.bf16 %v8179_v22  ;;  %v6333_v22 = vunpack.i.h.bf16 %v8239_v16 }
  0xce   :  { %v10805_v49 = vunpack.i.l.bf16 %v8384_v44  ;;  %6605 = vrot.lane.b32.xlu0 %v6604_v34, %s7163_s2  ;;  %6600 = vrot.lane.b32.xlu1 %v6599_v19, %s7172_s21  ;;  %v8406_v34 = vsel %vm10815_vm2, %v10913_v32, %v7814_v47  ;;  %v10916_v47 = vpack.i.bf16 %v8147_v38, %v8126_v15 }
  0xcf   :  { %v8427_v59 = vpop.permute.xlu0 %6395 }
  0xd0   :  { %v8400_v61 = vsel %vm97_vm0, %v10912_v11, %v10805_v49  ;;  %v10915_v11 = vunpack.i.h.bf16 %v8112_v62  ;;  %v1923_v62 = vsel %vm99_vm6, %v8382_v31, %v8203_v18 }
  0xd1   :  { %v8408_v19 = vpop.permute.xlu1 %6400  ;;  %v6634_v15 = vpack.i.bf16 %v8203_v18, %v1923_v62  ;;  %v10922_v62 = vld [vmem:[#allocation18_spill] sm:$0xff] }
  0xd2   :  { %v1916_v49 = vsel %vm99_vm6, %v10915_v11, %v8157_v5  ;;  %6615 = vrot.lane.b32.xlu0 %v6614_v35, %s7163_s2  ;;  %6610 = vrot.lane.b32.xlu1 %v10916_v47, %s7164_s3  ;;  %v6307_v11 = vunpack.i.l.bf16 %v8177_v48  ;;  %v1935_v48 = vsel %vm99_vm6, %v10918_v46, %v10917_v53  ;;  %v10919_v47 = vld [vmem:[#allocation13_spill] sm:$0xff]  ;;  %v6337_v53 = vunpack.i.l.bf16 %v8262_v29 }
  0xd3   :  { %v6619_v32 = vpack.i.bf16 %v8157_v5, %v1916_v49  ;;  %v6318_v5 = vunpack.i.h.bf16 %v8211_v52  ;;  %v6332_v49 = vunpack.i.l.bf16 %v8239_v16  ;;  %v6406_v38 = vpop.permute.xlu0 %6405  ;;  %v6639_v40 = vpack.i.bf16 %v10923_v4, %v1935_v48 }
  0xd4   :  { %v1964_v51 = vsel %vm10814_vm4, %v10922_v62, %v6307_v11  ;;  %v8455_v31 = vunpack.i.h.bf16 %v6406_v38  ;;  %v10924_v11 = vld [vmem:[#allocation37_spill] sm:$0xff]  ;;  %v10927_v16 = vunpack.i.l.bf16 %v7972_v7  ;;  %v1973_v4 = vsel %vm10815_vm2, %v7783_v58, %v7788_v13 }
  0xd5   :  { %v8429_v50 = vpop.permute.xlu1 %6410  ;;  %v6357_v48 = vunpack.i.l.bf16 %v8305_v20  ;;  %v1966_v13 = vsel %vm99_vm6, %v6333_v22, %v6337_v53  ;;  %v6363_v22 = vunpack.i.h.bf16 %v8311_v57 }
  0xd6   :  { %6625 = vrot.lane.b32.xlu0 %v6624_v23, %s7165_s26  ;;  %6620 = vrot.lane.b32.xlu1 %v6619_v32, %s7164_s3  ;;  %v10920_v23 = vld [vmem:[#allocation21_spill] sm:$0xff]  ;;  %v1974_v29 = vsel %vm10814_vm4, %v10902_v36, %v10927_v16 }
  0xd7   :  { %v10921_v32 = vpack.i.bf16 %v10919_v47, %v10920_v23  ;;  %v1965_v47 = vsel %vm97_vm0, %v1964_v51, %v8150_v25  ;;  %v8480_v51 = vunpack.i.l.bf16 %v8267_v42  ;;  %v1975_v36 = vsel %vm97_vm0, %v1974_v29, %v7981_v12 }
  0xd8   :  { %v1976_v16 = vsel %vm99_vm6, %v7991_v6, %v6357_v48  ;;  %v10930_v6 = vld [vmem:[#allocation39_spill] sm:$0xff]  ;;  %v1996_v57 = vsel %vm99_vm6, %v8242_v37, %v6363_v22 }
  0xd9   :  { %v8441_v35 = vpop.permute.xlu1 %6420  ;;  %v10931_v29 = vpack.i.bf16 %v8063_v3, %v10930_v6  ;;  %v6378_v3 = vunpack.i.h.bf16 %v8361_v14 }
  0xda   :  { %6635 = vrot.lane.b32.xlu0 %v6634_v15, %s7165_s26  ;;  %6630 = vrot.lane.b32.xlu1 %v10921_v32, %s7166_s27  ;;  %v1947_v15 = vsel %vm99_vm6, %v6318_v5, %v6332_v49  ;;  %v10925_v32 = vld [vmem:[#allocation14_spill] sm:$0xff]  ;;  %v10929_v49 = vld [vmem:[#allocation23_spill] sm:$0xff] }
  0xdb   :  { %v10926_v62 = vpack.i.bf16 %v10924_v11, %v10925_v32  ;;  %v6649_v7 = vpack.i.bf16 %v1965_v47, %v10929_v49  ;;  %v6343_v11 = vunpack.i.h.bf16 %v8267_v42  ;;  %v6664_v32 = vpack.i.bf16 %v1975_v36, %v1973_v4  ;;  %v8518_v4 = vpop.permute.xlu0 %6415 }
  0xdc   :  { %v6358_v47 = vunpack.i.h.bf16 %v8305_v20  ;;  %v6674_v42 = vpack.i.bf16 %v8316_v21, %v1976_v16  ;;  %v6417_v6 = vunpack.i.l.bf16 %v8518_v4 }
  0xdd   :  { %v8461_v46 = vpop.permute.xlu1 %6430  ;;  %v1994_v12 = vsel %vm10814_vm4, %v7680_v30, %v6343_v11  ;;  %v2740_v11 = vsel %vm10814_vm4, %v7949_v63, %v8150_v25  ;;  %v2742_v25 = vsel %vm99_vm6, %v6378_v3, %v8455_v31 }
  0xde   :  { %v6432_v23 = vunpack.i.l.bf16 %v8461_v46  ;;  %6645 = vrot.lane.b32.xlu0 %v10926_v62, %s7167_s28  ;;  %6640 = vrot.lane.b32.xlu1 %v6639_v40, %s7166_s27  ;;  %v6654_v40 = vpack.i.bf16 %v8265_v1, %v1947_v15  ;;  %v6659_v15 = vpack.i.bf16 %v8480_v51, %v1966_v13  ;;  %v1984_v53 = vsel %vm99_vm6, %v8033_v33, %v6358_v47 }
  0xdf   :  { %v1995_v20 = vsel %vm97_vm0, %v1994_v12, %v8242_v37  ;;  %v6679_v30 = vpack.i.bf16 %v6358_v47, %v1984_v53  ;;  %v6377_v33 = vunpack.i.l.bf16 %v8361_v14  ;;  %v8526_v48 = vpop.permute.xlu0 %6425  ;;  %v10933_v13 = vpack.i.bf16 %v8107_v56, %v8085_v41 }
  0xe0   :  { %v8486_v5 = vsel %vm99_vm6, %v6432_v23, %v8455_v31  ;;  %v6704_v37 = vpack.i.bf16 %v10904_v60, %v10905_v24  ;;  %v2741_v14 = vsel %vm97_vm0, %v2740_v11, %v6378_v3  ;;  %v8548_v41 = vunpack.i.h.bf16 %v8384_v44 }
  0xe1   :  { %10928 = vst [vmem:[#allocation38_spill] sm:$0xff] %v8486_v5  ;;  %v2005_v36 = vsel %vm99_vm6, %v8075_v39, %v6377_v33  ;;  %v2739_v56 = vsel %vm10815_vm2, %v7586_v9, %v7949_v63  ;;  %v8555_v24 = vunpack.i.l.bf16 %v6406_v38  ;;  %v10934_v47 = vunpack.i.l.bf16 %v8384_v44 }
  0xe2   :  { %6655 = vrot.lane.b32.xlu0 %v6654_v40, %s7167_s28  ;;  %6650 = vrot.lane.b32.xlu1 %v6649_v7, %s7168_s4  ;;  %v10932_v40 = vld [vmem:[#allocation27_spill] sm:$0xff]  ;;  %v6694_v7 = vpack.i.bf16 %v6363_v22, %v1996_v57  ;;  %v6709_v60 = vpack.i.bf16 %v2741_v14, %v2739_v56  ;;  %v10935_v12 = vpack.i.bf16 %v8400_v61, %v8406_v34  ;;  %v6422_v38 = vunpack.i.l.bf16 %v8441_v35 }
  0xe3   :  { %v6684_v49 = vpack.i.bf16 %v1995_v20, %v10932_v40  ;;  %v8545_v39 = vpop.permute.xlu0 %6435  ;;  %v6719_v53 = vpack.i.bf16 %v8455_v31, %v2742_v25  ;;  %v6418_v44 = vunpack.i.h.bf16 %v8518_v4  ;;  %v6373_v61 = vunpack.i.h.bf16 %v8338_v43  ;;  %v10937_v4 = vld [vmem:[#allocation15_spill] sm:$0xff] }
  0xe4   :  { %v6372_v34 = vunpack.i.l.bf16 %v8338_v43  ;;  %v100_v31 = vsel %vm99_vm6, %v7586_v9, %v7949_v63  ;;  %v6388_v57 = vunpack.i.h.bf16 %v8394_v8  ;;  %v6423_v3 = vunpack.i.h.bf16 %v8441_v35 }
  0xe5   :  { %v2759_v9 = vsel %vm99_vm6, %v8555_v24, %v6417_v6  ;;  %v10938_v35 = vpack.i.bf16 %v8171_v2, %v8188_v10 }
  0xe6   :  { %6665 = vrot.lane.b32.xlu0 %v6664_v32, %s7169_s29  ;;  %6660 = vrot.lane.b32.xlu1 %v6659_v15, %s7168_s4  ;;  %v6699_v32 = vpack.i.bf16 %v6377_v33, %v2005_v36  ;;  %v6412_v15 = vunpack.i.l.bf16 %v8429_v50  ;;  %v6387_v33 = vunpack.i.l.bf16 %v8394_v8  ;;  %v2771_v36 = vsel %vm99_vm6, %v6418_v44, %v6422_v38 }
  0xe8   :  { %v2752_v16 = vsel %vm99_vm6, %v10934_v47, %v6412_v15  ;;  %v10939_v47 = vunpack.i.l.bf16 %v8329_v28 }
  0xe9   :  { %v6724_v20 = vpack.i.bf16 %v6412_v15, %v2752_v16 }
  0xea   :  { %6670 = vrot.lane.b32.xlu1 %v10931_v29, %s7170_s30  ;;  %6675 = vrot.lane.b32.xlu0 %v6674_v42, %s7169_s29  ;;  %v10936_v42 = vld [vmem:[#allocation29_spill] sm:$0xff]  ;;  %v469_v16 = vsel %vm468_vm13, %v10939_v47, %v6372_v34 }
  0xeb   :  { %v2757_v22 = vsel %vm10814_vm4, %v10936_v42, %v8548_v41  ;;  %v2756_v40 = vsel %vm10815_vm2, %v10937_v4, %v10936_v42 }
  0xee   :  { %6680 = vrot.lane.b32.xlu1 %v6679_v30, %s7170_s30  ;;  %6685 = vrot.lane.b32.xlu0 %v6684_v49, %s7171_s0  ;;  %v2758_v30 = vsel %vm97_vm0, %v2757_v22, %v8555_v24  ;;  %v6382_v49 = vunpack.i.l.bf16 %v8363_v54 }
  0xef   :  { %v6729_v11 = vpack.i.bf16 %v2758_v30, %v2756_v40  ;;  %v6427_v30 = vunpack.i.l.bf16 %v8526_v48 }
  0xf0   :  { %v479_v2 = vsel %vm478_vm12, %v6382_v49, %v6387_v33 }
  0xf2   :  { %6690 = vrot.lane.b32.xlu1 %v10933_v13, %s7172_s21  ;;  %6695 = vrot.lane.b32.xlu0 %v6694_v7, %s7171_s0  ;;  %v6413_v7 = vunpack.i.h.bf16 %v8429_v50  ;;  %v6383_v50 = vunpack.i.h.bf16 %v8363_v54 }
  0xf4   :  { %v480_v44 = vsel %vm478_vm12, %v6383_v50, %v6388_v57 }
  0xf6   :  { %6700 = vrot.lane.b32.xlu1 %v6699_v32, %s7172_s21  ;;  %6705 = vrot.lane.b32.xlu0 %v6704_v37, %s7162_s25 }
  0xfa   :  { %6710 = vrot.lane.b32.xlu1 %v6709_v60, %s7163_s2  ;;  %6715 = vrot.lane.b32.xlu0 %v10935_v12, %s7164_s3  ;;  %v2796_v12 = vsel %vm10814_vm4, %v7877_v0, %v6413_v7 }
  0xfb   :  { %v6446_v29 = vpop.permute.xlu0 %6445 }
  0xfc   :  { %v6448_v25 = vunpack.i.h.bf16 %v6446_v29  ;;  %v6447_v60 = vunpack.i.l.bf16 %v6446_v29  ;;  %v6428_v29 = vunpack.i.h.bf16 %v8526_v48 }
  0xfe   :  { %6720 = vrot.lane.b32.xlu1 %v6719_v53, %s7163_s2  ;;  %6725 = vrot.lane.b32.xlu0 %v6724_v20, %s7164_s3  ;;  %v6739_v53 = vpack.i.bf16 %v6417_v6, %v2759_v9  ;;  %v6744_v20 = vpack.i.bf16 %v6423_v3, %v2771_v36  ;;  %v446_v6 = vsel %vm443_vm7, %v100_v31, %v6447_v60  ;;  %s7192_s2 = smov 39  }
  0xff   :  { %v6456_v13 = vpop.permute.xlu0 %6455  ;;  %v8592_v37 = vpop.permute.xlu1 %6440  ;;  %v2797_v3 = vsel %vm97_vm0, %v2796_v12, %v8203_v18  ;;  %v10942_v18 = vunpack.i.h.bf16 %v8329_v28 }
 0x100   :  { %v6458_v32 = vunpack.i.h.bf16 %v6456_v13  ;;  %v6457_v14 = vunpack.i.l.bf16 %v6456_v13  ;;  %v6443_v15 = vunpack.i.h.bf16 %v8592_v37  ;;  %v6442_v56 = vunpack.i.l.bf16 %v8592_v37 }
 0x101   :  { %v6433_v13 = vunpack.i.h.bf16 %v8461_v46  ;;  %v475_v46 = vsel %vm473_vm14, %v6373_v61, %v6383_v50 }
 0x102   :  { %6730 = vrot.lane.b32.xlu1 %v6729_v11, %s7165_s26  ;;  %6735 = vrot.lane.b32.xlu0 %v10938_v35, %s7166_s27  ;;  %v462_v54 = vsel %vm458_vm9, %v6458_v32, %v6443_v15  ;;  %v461_v22 = vsel %vm458_vm9, %v6457_v14, %v6442_v56  ;;  %v447_v11 = vsel %vm443_vm7, %v7949_v63, %v6448_v25  ;;  %v6437_v63 = vunpack.i.l.bf16 %v8545_v39 }
 0x103   :  { %v6451_v0 = vpop.permute.xlu1 %6450  ;;  %v5797_v38 = vpack.c.bf16 %v462_v54, %v461_v22  ;;  %v5790_v28 = vpack.c.bf16 %v447_v11, %v446_v6  ;;  %v1038_v11 = vsel %vm10814_vm4, %v10914_v55, %v10911_v26  ;;  %v6403_v6 = vunpack.i.h.bf16 %v8408_v19 }
 0x104   :  { %v6453_v40 = vunpack.i.h.bf16 %v6451_v0  ;;  %v6452_v7 = vunpack.i.l.bf16 %v6451_v0  ;;  %v10944_v0 = vld [vmem:[#allocation44_spill] sm:$0xff] }
 0x105   :  { %5799 = vmatprep.subr.msk.bf16.mxu1 %vm8619_vm3, %v5797_v38 }
 0x106   :  { %6740 = vrot.lane.b32.xlu1 %v6739_v53, %s7165_s26  ;;  %6745 = vrot.lane.b32.xlu0 %v6744_v20, %s7166_s27  ;;  %v452_v9 = vsel %vm448_vm8, %v6448_v25, %v6453_v40  ;;  %v457_v48 = vsel %vm453_vm10, %v6453_v40, %v6458_v32  ;;  %v451_v36 = vsel %vm448_vm8, %v6447_v60, %v6452_v7  ;;  %v6438_v25 = vunpack.i.h.bf16 %v8545_v39  ;;  %v10943_v60 = vld [vmem:[#allocation40_spill] sm:$0xff]  ;;  %v10945_v20 = vld [vmem:[#allocation45_spill] sm:$0xff]  ;;  %s10970_s26 = sld [smem:[#allocation53_spill]]  ;;  %s7178_s27 = smov 8  }
 0x107   :  { %v456_v35 = vsel %vm453_vm10, %v6452_v7, %v6457_v14  ;;  %v8643_v31 = vpop.permute.xlu0 %6465  ;;  %v8645_v47 = vpop.permute.xlu1 %6460  ;;  %v5787_v54 = vpack.c.bf16 %v452_v9, %v451_v36  ;;  %v470_v32 = vsel %vm468_vm13, %v10942_v18, %v6373_v61  ;;  %v2783_v14 = vsel %vm99_vm6, %v6427_v30, %v6428_v29  ;;  %v8676_v29 = vld [vmem:[%s10947_s24] sm:$0xf]  ;;  %v10950_v9 = vld [vmem:[#allocation46_spill] sm:$0xff] }
 0x108   :  { %v5800_v22 = vpack.c.bf16 %v457_v48, %v456_v35  ;;  %v6754_v12 = vpack.i.bf16 %v2797_v3, %v10943_v60  ;;  %v2798_v53 = vsel %vm99_vm6, %v6432_v23, %v6433_v13  ;;  %v10946_v38 = vpack.i.bf16 %v10944_v0, %v10945_v20  ;;  %v10951_v48 = vld [vmem:[#allocation42_spill] sm:$0xff]  ;;  %v10953_v35 = vld [vmem:[#allocation47_spill] sm:$0xff] }
 0x109   :  { %5789 = vmatprep.subr.msk.bf16.mxu0 %vm8619_vm3, %v5787_v54  ;;  %v5813_v40 = vpack.c.bf16 %v480_v44, %v479_v2  ;;  %v474_v39 = vsel %vm473_vm14, %v6372_v34, %v6382_v49  ;;  %v5803_v23 = vpack.c.bf16 %v470_v32, %v469_v16  ;;  %v6759_v2 = vpack.i.bf16 %v6437_v63, %v2783_v14  ;;  %v10954_v63 = vld [vmem:[#allocation48_spill] sm:$0xff] }
 0x10a   :  { %6750 = vrot.lane.b32.xlu1 %v10946_v38, %s7167_s28  ;;  %6755 = vrot.lane.b32.xlu0 %v6754_v12, %s7168_s4  ;;  %v6764_v34 = vpack.i.bf16 %v6438_v25, %v2798_v53  ;;  %v5815_v49 = vpack.c.bf16 %v475_v46, %v474_v39  ;;  %v6398_v44 = vunpack.i.h.bf16 %v8427_v59  ;;  %v6397_v30 = vunpack.i.l.bf16 %v8427_v59  ;;  %v10956_v25 = vld [vmem:[#allocation33_spill] sm:$0xff]  ;;  %v10958_v12 = vld [vmem:[#allocation18_spill] sm:$0xff] }
 0x10b   :  { %5802 = vmatpush1.bf16.msk.msra.mxu1 %vm8619_vm3, %v5800_v22  ;;  %5792 = vmatpush1.bf16.msk.msra.mxu0 %vm8619_vm3, %v5790_v28  ;;  %v8680_v43 = vpop.permute.xlu0 %6475  ;;  %v8682_v61 = vpop.permute.xlu1 %6470  ;;  %v10948_v7 = vpack.c.bf16 %v8354_v27, %v8349_v17  ;;  %v10949_v13 = vmov 0.0   ;;  %v6402_v3 = vunpack.i.l.bf16 %v8408_v19  ;;  %v10952_v36 = vpack.i.bf16 %v10950_v9, %v10951_v48 }
 0x10c   :  { %5814 = vmatprep.subr.bf16.mxu1 %v5813_v40  ;;  %5804 = vmatprep.subr.bf16.mxu0 %v5803_v23  ;;  %v6468_v17 = vunpack.i.h.bf16 %v8643_v31  ;;  %v6467_v27 = vunpack.i.l.bf16 %v8643_v31  ;;  %v6463_v59 = vunpack.i.h.bf16 %v8645_v47  ;;  %v6462_v26 = vunpack.i.l.bf16 %v8645_v47  ;;  %v7134_v47 = vld [vmem:[%s10825_s23 + $0x10] sm:$0xff] }
 0x10d   :  { %v10955_v54 = vpack.i.bf16 %v10953_v35, %v10954_v63  ;;  %v8723_v18 = vsel %vm483_vm5, %v6387_v33, %v6397_v30  ;;  %v8728_v31 = vsel %vm483_vm5, %v6388_v57, %v6398_v44  ;;  %v8735_v32 = vsel %vm10815_vm2, %v7134_v47, %v10914_v55  ;;  %v10957_v33 = vld [vmem:[#allocation32_spill] sm:$0xff] }
 0x10e   :  { %6760 = vrot.lane.b32.xlu1 %v6759_v2, %s7167_s28  ;;  %5423 = vmatmul.mubr.msk.f32.vlgmr.msra.gmra.mrb[0].mxu1 %vm498_vm15, %v8676_v29  ;;  %v1039_v14 = vsel %vm97_vm0, %v1038_v11, %v10956_v25  ;;  %v8739_v60 = vpack.c.bf16 %v6403_v6, %v6402_v3  ;;  %v8744_v8 = vsel %vm10815_vm2, %v10958_v12, %v10957_v33  ;;  %v6478_v20 = vunpack.i.h.bf16 %v8680_v43  ;;  %s10964_s28 = sld [smem:[#allocation51_spill]] }
 0x10f   :  { %6765 = vrot.lane.b32.xlu0 %v6764_v34, %s7168_s4  ;;  %5816 = vmatpush1.bf16.msra.mxu1 %v5815_v49  ;;  %v8690_v50 = vpop.permute.xlu0 %6490  ;;  %v8692_v16 = vpop.permute.xlu1 %6480  ;;  %v8747_v57 = vsel %vm483_vm5, %v6463_v59, %v6468_v17  ;;  %v8750_v53 = vsel %vm483_vm5, %v6462_v26, %v6467_v27  ;;  %v8753_v0 = vsel %vm488_vm1, %v6397_v30, %v6402_v3  ;;  %v6473_v38 = vunpack.i.h.bf16 %v8682_v61  ;;  %s7180_s4 = smov 32  }
 0x110   :  { %5420 = vmatmul.mubr.msk.f32.vlgmr.msra.gmra.mrb[0].mxu0 %vm498_vm15, %v8676_v29  ;;  %811 = vmatprep.mubr.f32.mxu1 %v10949_v13  ;;  %v8756_v55 = vsel %vm488_vm1, %v6398_v44, %v6403_v6  ;;  %v6472_v28 = vunpack.i.l.bf16 %v8682_v61  ;;  %v5825_v46 = vpack.c.bf16 %v8728_v31, %v8723_v18  ;;  %v5830_v44 = vpack.c.bf16 %v8747_v57, %v8750_v53 }
 0x111   :  { %5806 = vmatpush1.bf16.msra.mxu0 %v10948_v7  ;;  %740 = vmatprep.mubr.f32.mxu0 %v10949_v13  ;;  %v6477_v30 = vunpack.i.l.bf16 %v8680_v43  ;;  %v6482_v7 = vunpack.i.l.bf16 %v8692_v16  ;;  %v5823_v61 = vpack.c.bf16 %v8756_v55, %v8753_v0  ;;  %v8776_v48 = vsel %vm443_vm7, %v1039_v14, %v6478_v20 }
 0x112   :  { %6770 = vrot.lane.b32.xlu1 %v10952_v36, %s7169_s29  ;;  %v8779_v36 = vsel %vm488_vm1, %v6468_v17, %v6473_v38  ;;  %v8784_v47 = vsel %vm488_vm1, %v6467_v27, %v6472_v28  ;;  %v8786_v12 = vpack.c.bf16 %v6473_v38, %v6472_v28 }
 0x113   :  { %6775 = vrot.lane.b32.xlu0 %v10955_v54, %s7170_s30  ;;  %v6506_v19 = vpop.permute.xlu0 %6505  ;;  %v8718_v22 = vpop.permute.xlu1 %6485  ;;  %v8798_v17 = vsel %vm448_vm8, %v6477_v30, %v6482_v7 }
 0x114   :  { %v6508_v23 = vunpack.i.h.bf16 %v6506_v19  ;;  %v6507_v2 = vunpack.i.l.bf16 %v6506_v19 }
 0x117   :  { %v6511_v40 = vpop.permute.xlu0 %6510  ;;  %v8761_v39 = vpop.permute.xlu1 %6495 }
 0x118   :  { %v6513_v34 = vunpack.i.h.bf16 %v6511_v40  ;;  %v6512_v49 = vunpack.i.l.bf16 %v6511_v40 }
 0x11a   :  { %v476_v11 = vsel %vm473_vm14, %v6507_v2, %v6512_v49  ;;  %v477_v6 = vsel %vm473_vm14, %v6508_v23, %v6513_v34  ;;  %v481_v3 = vsel %vm478_vm12, %v6512_v49, %v6462_v26  ;;  %v482_v9 = vsel %vm478_vm12, %v6513_v34, %v6463_v59 }
 0x11b   :  { %v5820_v35 = vpack.c.bf16 %v477_v6, %v476_v11  ;;  %v8781_v63 = vpop.permute.xlu0 %6515  ;;  %v6501_v54 = vpop.permute.xlu1 %6500  ;;  %v5817_v19 = vpack.c.bf16 %v482_v9, %v481_v3  ;;  %v6483_v59 = vunpack.i.h.bf16 %v8692_v16  ;;  %v6498_v34 = vunpack.i.h.bf16 %v8761_v39 }
 0x11c   :  { %v6503_v0 = vunpack.i.h.bf16 %v6501_v54  ;;  %v6502_v26 = vunpack.i.l.bf16 %v6501_v54  ;;  %v6518_v14 = vunpack.i.h.bf16 %v8781_v63  ;;  %v6517_v55 = vunpack.i.l.bf16 %v8781_v63 }
 0x11d   :  { %5819 = vmatprep.subr.msk.bf16.mxu1 %vm8619_vm3, %v5817_v19  ;;  %v6497_v49 = vunpack.i.l.bf16 %v8761_v39  ;;  %v10816_v9 = vmov 0.0|0.0   ;;  %v8825_v19 = vsel %vm448_vm8, %v6478_v20, %v6483_v59 }
 0x11e   :  { %v472_v27 = vsel %vm468_vm13, %v6503_v0, %v6508_v23  ;;  %v466_v38 = vsel %vm463_vm11, %v6442_v56, %v6502_v26  ;;  %v467_v28 = vsel %vm463_vm11, %v6443_v15, %v6503_v0  ;;  %v471_v40 = vsel %vm468_vm13, %v6502_v26, %v6507_v2  ;;  %5822 = vmatpush1.bf16.msk.msra.mxu1 %vm8619_vm3, %v5820_v35 }
 0x11f   :  { %v5810_v11 = vpack.c.bf16 %v467_v28, %v466_v38  ;;  %v6526_v6 = vpop.permute.xlu0 %6525  ;;  %v6521_v23 = vpop.permute.xlu1 %6520  ;;  %v5807_v3 = vpack.c.bf16 %v472_v27, %v471_v40  ;;  %5833 = vmatprep.subr.bf16.mxu1 %v10816_v9  ;;  %v6488_v2 = vunpack.i.h.bf16 %v8718_v22  ;;  %v1331_v39 = vsel %vm458_vm9, %v6497_v49, %v6517_v55 }
 0x120   :  { %v6528_v56 = vunpack.i.h.bf16 %v6526_v6  ;;  %v6527_v37 = vunpack.i.l.bf16 %v6526_v6  ;;  %v6523_v54 = vunpack.i.h.bf16 %v6521_v23  ;;  %v6522_v15 = vunpack.i.l.bf16 %v6521_v23 }
 0x121   :  { %5809 = vmatprep.subr.msk.bf16.mxu0 %vm8619_vm3, %v5807_v3  ;;  %5429 = vmatmul.mubr.msk.f32.vlgmr.msra.gmra.mrb[2].mxu1 %vm498_vm15, %v8676_v29  ;;  %v1332_v35 = vsel %vm458_vm9, %v6498_v34, %v6518_v14  ;;  %v6487_v0 = vunpack.i.l.bf16 %v8718_v22  ;;  %v10959_v27 = vunpack.i.l.bf16 %v8211_v52 }
 0x122   :  { %v2816_v26 = vsel %vm99_vm6, %v8265_v1, %v6527_v37  ;;  %v2825_v28 = vsel %vm10814_vm4, %v10957_v33, %v6522_v15  ;;  %5812 = vmatpush1.bf16.msk.msra.mxu0 %vm8619_vm3, %v5810_v11  ;;  %5835 = vmatpush3.bf16.msra.mxu1 %v8739_v60  ;;  %vm7176_vm4 = vmmov 0   ;;  %v7177_v60 = vmov 0  }
 0x123   :  { %v2808_v38 = vsel %vm99_vm6, %v10959_v27, %v6523_v54  ;;  %v6784_v40 = vpack.i.bf16 %v6527_v37, %v2816_v26  ;;  %v8838_v20 = vpop.permute.xlu0 %6535  ;;  %v6531_v6 = vpop.permute.xlu1 %6530  ;;  %5824 = vmatprep.subr.bf16.mxu0 %v5823_v61  ;;  %5836 = vmatprep.subr.bf16.mxu1 %v10816_v9  ;;  %v2826_v52 = vsel %vm97_vm0, %v2825_v28, %v8480_v51  ;;  %v6493_v61 = vunpack.i.h.bf16 %v8690_v50  ;;  %v10963_v27 = vld [vmem:[#allocation19_spill] sm:$0xff] }
 0x124   :  { %v6779_v23 = vpack.i.bf16 %v6528_v56, %v2808_v38  ;;  %v6538_v1 = vunpack.i.h.bf16 %v8838_v20  ;;  %v6537_v33 = vunpack.i.l.bf16 %v8838_v20  ;;  %v6533_v3 = vunpack.i.h.bf16 %v6531_v6  ;;  %5626 = vmatprep.mubr.msk.f32.mxu1 %vm7176_vm4, %v10949_v13  ;;  %6809 = vset.pattern.permute.xlu1 %v7177_v60 }
 0x125   :  { %v6532_v54 = vunpack.i.l.bf16 %v6531_v6  ;;  %v1327_v11 = vsel %vm453_vm10, %v6482_v7, %v6497_v49  ;;  %v1328_v56 = vsel %vm453_vm10, %v6483_v59, %v6498_v34  ;;  %6785 = vrot.lane.b32.xlu0 %v6784_v40, %s7170_s30  ;;  %v5827_v37 = vpack.c.bf16 %v8779_v36, %v8784_v47  ;;  %5426 = vmatmul.mubr.msk.f32.vlgmr.msra.gmra.mrb[2].mxu0 %vm498_vm15, %v8676_v29  ;;  %s7182_s30 = smov 14  }
 0x126   :  { %6780 = vrot.lane.b32.xlu1 %v6779_v23, %s7169_s29  ;;  %v6492_v15 = vunpack.i.l.bf16 %v8690_v50  ;;  %v1334_v26 = vsel %vm458_vm9, %v6533_v3, %v6538_v1  ;;  %v5850_v7 = vpack.c.bf16 %v1332_v35, %v1331_v39  ;;  %v1319_v59 = vsel %vm443_vm7, %v8735_v32, %v6477_v30  ;;  %5826 = vmatpush1.bf16.msra.mxu0 %v5825_v46  ;;  %v10960_v46 = vld [vmem:[#allocation31_spill] sm:$0xff]  ;;  %v10961_v30 = vld [vmem:[#allocation17_spill] sm:$0xff]  ;;  %s7181_s29 = smov 16  }
 0x127   :  { %v1333_v16 = vsel %vm458_vm9, %v6532_v54, %v6537_v33  ;;  %5839 = vmatpush3.bf16.msk.msra.mxu1 %vm8619_vm3, %v8786_v12  ;;  %v8875_v50 = vpop.permute.xlu0 %6545  ;;  %v6541_v36 = vpop.permute.xlu1 %6540  ;;  %v6789_v47 = vpack.i.bf16 %v2826_v52, %v8744_v8  ;;  %v5840_v34 = vpack.c.bf16 %v8825_v19, %v8798_v17  ;;  %v1326_v43 = vsel %vm448_vm8, %v6488_v2, %v6493_v61 }
 0x128   :  { %v1325_v18 = vsel %vm448_vm8, %v6487_v0, %v6492_v15  ;;  %5829 = vmatprep.subr.msk.bf16.mxu0 %vm8619_vm3, %v5827_v37  ;;  %5851 = vmatprep.subr.bf16.mxu1 %v5850_v7  ;;  %v5852_v31 = vpack.c.bf16 %v1328_v56, %v1327_v11  ;;  %v1330_v32 = vsel %vm453_vm10, %v6493_v61, %v6533_v3  ;;  %v6548_v49 = vunpack.i.h.bf16 %v8875_v50 }
 0x129   :  { %v1329_v8 = vsel %vm453_vm10, %v6492_v15, %v6532_v54  ;;  %v10962_v12 = vpack.i.bf16 %v10960_v46, %v10961_v30  ;;  %v5854_v17 = vpack.c.bf16 %v1334_v26, %v1333_v16  ;;  %v6547_v39 = vunpack.i.l.bf16 %v8875_v50  ;;  %882 = vmatprep.mubr.f32.mxu0 %v10949_v13  ;;  %6810 = vset.pattern.permute.xlu0 %v7177_v60  ;;  %v78_v50 = vld [vmem:[%s10964_s28] sm:$0xf]  ;;  %s7179_s28 = smov 30  }
 0x12a   :  { %6790 = vrot.lane.b32.xlu1 %v6789_v47, %s7171_s0  ;;  %v6543_v35 = vunpack.i.h.bf16 %v6541_v36  ;;  %v6542_v19 = vunpack.i.l.bf16 %v6541_v36  ;;  %5627 = vmatmul.mubr.msk.f32.vlgmr.msra.gmra.mrb[4].mxu1 %vm498_vm15, %v8676_v29  ;;  %v1040_v38 = vsel %vm99_vm6, %v10956_v25, %v10963_v27  ;;  %v1322_v6 = vsel %vm443_vm7, %v10963_v27, %v6488_v2 }
 0x12b   :  { %6795 = vrot.lane.b32.xlu0 %v10962_v12, %s7172_s21  ;;  %5832 = vmatpush1.bf16.msk.msra.mxu0 %vm8619_vm3, %v5830_v44  ;;  %v6556_v28 = vpop.permute.xlu0 %6555  ;;  %v6551_v40 = vpop.permute.xlu1 %6550  ;;  %v5842_v25 = vpack.c.bf16 %v8776_v48, %v1319_v59  ;;  %v1321_v57 = vsel %vm443_vm7, %v1040_v38, %v6487_v0  ;;  %v5857_v53 = vpack.c.bf16 %v1330_v32, %v1329_v8 }
 0x12c   :  { %5853 = vmatpush1.bf16.msra.mxu1 %v5852_v31  ;;  %v6553_v23 = vunpack.i.h.bf16 %v6551_v40  ;;  %v6552_v52 = vunpack.i.l.bf16 %v6551_v40  ;;  %5841 = vmatprep.subr.bf16.mxu0 %v5840_v34  ;;  %v5844_v44 = vpack.c.bf16 %v1326_v43, %v1325_v18  ;;  %v1339_v48 = vsel %vm468_vm13, %v6542_v19, %v6547_v39 }
 0x12d   :  { %5856 = vmatprep.subr.msk.bf16.mxu1 %vm8619_vm3, %v5854_v17  ;;  %1526 = vmatprep.mubr.f32.mxu1 %v10949_v13  ;;  %v1340_v22 = vsel %vm468_vm13, %v6543_v35, %v6548_v49  ;;  %v6558_v54 = vunpack.i.h.bf16 %v6556_v28  ;;  %v6557_v0 = vunpack.i.l.bf16 %v6556_v28  ;;  %v5847_v56 = vpack.c.bf16 %v1322_v6, %v1321_v57 }
 0x12e   :  { %v2827_v2 = vsel %vm99_vm6, %v8480_v51, %v6552_v52  ;;  %v2835_v3 = vsel %vm99_vm6, %v8316_v21, %v6553_v23  ;;  %5432 = vmatmul.mubr.msk.f32.vlgmr.msra.gmra.mrb[4].mxu0 %vm498_vm15, %v8676_v29  ;;  %v1336_v15 = vsel %vm463_vm11, %v6518_v14, %v6543_v35  ;;  %v1335_v26 = vsel %vm463_vm11, %v6517_v55, %v6542_v19 }
 0x12f   :  { %v6799_v61 = vpack.i.bf16 %v6552_v52, %v2827_v2  ;;  %v6804_v11 = vpack.i.bf16 %v6553_v23, %v2835_v3  ;;  %5843 = vmatpush1.bf16.msra.mxu0 %v5842_v25  ;;  %v6561_v51 = vpop.permute.xlu1 %6560  ;;  %1455 = vmatprep.mubr.f32.mxu0 %v10949_v13  ;;  %v5860_v59 = vpack.c.bf16 %v1340_v22, %v1339_v48 }
 0x130   :  { %5859 = vmatpush1.bf16.msk.msra.mxu1 %vm8619_vm3, %v5857_v53  ;;  %v6566_v60 = vpop.permute.xlu0 %6565  ;;  %v6563_v37 = vunpack.i.h.bf16 %v6561_v51  ;;  %v6562_v21 = vunpack.i.l.bf16 %v6561_v51  ;;  %5846 = vmatprep.subr.msk.bf16.mxu0 %vm8619_vm3, %v5844_v44  ;;  %v1337_v47 = vsel %vm463_vm11, %v6537_v33, %v6557_v0  ;;  %v5862_v18 = vpack.c.bf16 %v1336_v15, %v1335_v26  ;;  %v7135_v15 = vld [vmem:[%s10825_s23 + $0x20] sm:$0xff] }
 0x131   :  { %v6568_v16 = vunpack.i.h.bf16 %v6566_v60  ;;  %v6567_v7 = vunpack.i.l.bf16 %v6566_v60  ;;  %6800 = vrot.lane.b32.xlu1 %v6799_v61, %s7171_s0  ;;  %6805 = vrot.lane.b32.xlu0 %v6804_v11, %s7172_s21  ;;  %v1338_v30 = vsel %vm463_vm11, %v6538_v1, %v6558_v54  ;;  %v1892_v26 = vsel %vm10815_vm2, %v7135_v15, %v10937_v4  ;;  %s7183_s0 = smov 6   ;;  %s7185_s21 = smov 124  }
 0x132   :  { %v1342_v14 = vsel %vm468_vm13, %v6558_v54, %v6563_v37  ;;  %v1341_v63 = vsel %vm468_vm13, %v6557_v0, %v6562_v21  ;;  %v5867_v1 = vpack.c.bf16 %v1338_v30, %v1337_v47  ;;  %vm10965_vm2 = vcmask 1041408  }
 0x133   :  { %5440 = vmatmul.mubr.msk.f32.vlgmr.msra.gmra.mrb[6].mxu1 %vm498_vm15, %v8676_v29  ;;  %5849 = vmatpush1.bf16.msk.msra.mxu0 %vm8619_vm3, %v5847_v56  ;;  %v1343_v31 = vsel %vm473_vm14, %v6547_v39, %v6567_v7  ;;  %v1344_v32 = vsel %vm473_vm14, %v6548_v49, %v6568_v16  ;;  %v5864_v12 = vpack.c.bf16 %v1342_v14, %v1341_v63 }
 0x134   :  { %v6576_v55 = vpop.permute.xlu0 %6575  ;;  %v6571_v36 = vpop.permute.xlu1 %6570  ;;  %1668 = vmatprep.mubr.f32.mxu1 %v10949_v13  ;;  %5861 = vmatprep.subr.bf16.mxu0 %v5860_v59  ;;  %v5872_v20 = vpack.c.bf16 %v1344_v32, %v1343_v31 }
 0x135   :  { %v6573_v34 = vunpack.i.h.bf16 %v6571_v36  ;;  %v6572_v43 = vunpack.i.l.bf16 %v6571_v36  ;;  %v6578_v8 = vunpack.i.h.bf16 %v6576_v55  ;;  %v6577_v46 = vunpack.i.l.bf16 %v6576_v55  ;;  %495 = vperm.xlu1 %6809, %v78_v50  }
 0x136   :  { %5437 = vmatmul.mubr.msk.f32.vlgmr.msra.gmra.mrb[6].mxu0 %vm498_vm15, %v8676_v29 }
 0x137   :  { %v1347_v33 = vsel %vm478_vm12, %v6567_v7, %v6572_v43  ;;  %v1348_v17 = vsel %vm478_vm12, %v6568_v16, %v6573_v34  ;;  %5863 = vmatpush1.bf16.msra.mxu0 %v5862_v18  ;;  %1597 = vmatprep.mubr.f32.mxu0 %v10949_v13  ;;  %v1345_v38 = vsel %vm473_vm14, %v6562_v21, %v6577_v46 }
 0x138   :  { %v6586_v35 = vpop.permute.xlu0 %6585  ;;  %v6581_v39 = vpop.permute.xlu1 %6580  ;;  %v5870_v19 = vpack.c.bf16 %v1348_v17, %v1347_v33  ;;  %5866 = vmatprep.subr.msk.bf16.mxu0 %vm8619_vm3, %v5864_v12  ;;  %v1346_v28 = vsel %vm473_vm14, %v6563_v37, %v6578_v8  ;;  %v1893_v18 = vsel %vm10965_vm2, %v10937_v4, %v10936_v42  ;;  %vm10968_vm2 = vcmask 1044480  }
 0x139   :  { %v6583_v49 = vunpack.i.h.bf16 %v6581_v39  ;;  %v6582_v27 = vunpack.i.l.bf16 %v6581_v39  ;;  %v6587_v40 = vunpack.i.l.bf16 %v6586_v35  ;;  %v6588_v52 = vunpack.i.h.bf16 %v6586_v35 }
 0x13a   :  { %5871 = vmatprep.subr.bf16.mxu1 %v5870_v19  ;;  %v5877_v44 = vpack.c.bf16 %v1346_v28, %v1345_v38  ;;  %v1895_v28 = vsel %vm99_vm6, %v8548_v41, %v8555_v24 }
 0x13b   :  { %v1350_v6 = vsel %vm478_vm12, %v6578_v8, %v6583_v49  ;;  %v1349_v23 = vsel %vm478_vm12, %v6577_v46, %v6582_v27  ;;  %5873 = vmatpush1.bf16.msra.mxu1 %v5872_v20  ;;  %5869 = vmatpush1.bf16.msk.msra.mxu0 %vm8619_vm3, %v5867_v1  ;;  %v1351_v48 = vsel %vm483_vm5, %v6572_v43, %v6587_v40 }
 0x13c   :  { %v6596_v25 = vpop.permute.xlu0 %6595  ;;  %v6591_v57 = vpop.permute.xlu1 %6590  ;;  %v5874_v53 = vpack.c.bf16 %v1350_v6, %v1349_v23  ;;  %v1352_v54 = vsel %vm483_vm5, %v6573_v34, %v6588_v52  ;;  %v1894_v46 = vsel %vm97_vm0, %v1893_v18, %v8548_v41 }
 0x13d   :  { %v6593_v2 = vunpack.i.h.bf16 %v6591_v57  ;;  %v6592_v3 = vunpack.i.l.bf16 %v6591_v57  ;;  %v6598_v0 = vunpack.i.h.bf16 %v6596_v25  ;;  %v6597_v61 = vunpack.i.l.bf16 %v6596_v25 }
 0x13e   :  { %5876 = vmatprep.subr.msk.bf16.mxu1 %vm8619_vm3, %v5874_v53  ;;  %5443 = vmatmul.mubr.msk.f32.vlgmr.msra.gmra.mrb[8].mxu0 %vm498_vm15, %v8676_v29  ;;  %v5882_v14 = vpack.c.bf16 %v1352_v54, %v1351_v48 }
 0x13f   :  { %5879 = vmatpush1.bf16.msk.msra.mxu1 %vm8619_vm3, %v5877_v44  ;;  %v1355_v22 = vsel %vm488_vm1, %v6587_v40, %v6592_v3  ;;  %v1356_v51 = vsel %vm488_vm1, %v6588_v52, %v6593_v2  ;;  %v5891_v56 = vpack.c.bf16 %v6593_v2, %v6592_v3  ;;  %1739 = vmatprep.mubr.f32.mxu0 %v10949_v13 }
 0x140   :  { %v6606_v11 = vpop.permute.xlu0 %6605  ;;  %v6601_v60 = vpop.permute.xlu1 %6600  ;;  %5890 = vmatprep.subr.bf16.mxu1 %v10816_v9  ;;  %v5880_v16 = vpack.c.bf16 %v1356_v51, %v1355_v22  ;;  %v1353_v63 = vsel %vm483_vm5, %v6582_v27, %v6597_v61  ;;  %v1354_v55 = vsel %vm483_vm5, %v6583_v49, %v6598_v0 }
 0x141   :  { %v6603_v37 = vunpack.i.h.bf16 %v6601_v60  ;;  %v6602_v21 = vunpack.i.l.bf16 %v6601_v60  ;;  %v6607_v7 = vunpack.i.l.bf16 %v6606_v11  ;;  %v6608_v36 = vunpack.i.h.bf16 %v6606_v11 }
 0x142   :  { %5446 = vmatmul.mubr.msk.f32.vlgmr.msra.gmra.mrb[8].mxu1 %vm498_vm15, %v8676_v29  ;;  %5881 = vmatprep.subr.bf16.mxu0 %v5880_v16  ;;  %v5887_v30 = vpack.c.bf16 %v1354_v55, %v1353_v63 }
 0x143   :  { %v1358_v59 = vsel %vm488_vm1, %v6598_v0, %v6603_v37  ;;  %v1357_v50 = vsel %vm488_vm1, %v6597_v61, %v6602_v21  ;;  %5892 = vmatpush3.bf16.msra.mxu1 %v5891_v56  ;;  %v5894_v31 = vpack.c.bf16 %v6603_v37, %v6602_v21  ;;  %5883 = vmatpush1.bf16.msra.mxu0 %v5882_v14 }
 0x144   :  { %v6616_v47 = vpop.permute.xlu0 %6615  ;;  %v6611_v34 = vpop.permute.xlu1 %6610  ;;  %v5884_v43 = vpack.c.bf16 %v1358_v59, %v1357_v50  ;;  %5893 = vmatprep.subr.bf16.mxu1 %v10816_v9  ;;  %5637 = vmatprep.mubr.msk.f32.mxu1 %vm7176_vm4, %v10949_v13  ;;  %v2156_v12 = vsel %vm443_vm7, %v1892_v26, %v6607_v7  ;;  %v2157_v33 = vsel %vm443_vm7, %v1894_v46, %v6608_v36 }
 0x145   :  { %v6613_v32 = vunpack.i.h.bf16 %v6611_v34  ;;  %v6612_v8 = vunpack.i.l.bf16 %v6611_v34  ;;  %v6618_v17 = vunpack.i.h.bf16 %v6616_v47  ;;  %v6617_v35 = vunpack.i.l.bf16 %v6616_v47 }
 0x146   :  { %5886 = vmatprep.subr.msk.bf16.mxu0 %vm8619_vm3, %v5884_v43  ;;  %v5899_v23 = vpack.c.bf16 %v2157_v33, %v2156_v12 }
 0x147   :  { %5896 = vmatpush3.bf16.msk.msra.mxu1 %vm8619_vm3, %v5894_v31  ;;  %v2160_v42 = vsel %vm448_vm8, %v6607_v7, %v6612_v8  ;;  %v2161_v4 = vsel %vm448_vm8, %v6608_v36, %v6613_v32  ;;  %5889 = vmatpush1.bf16.msk.msra.mxu0 %vm8619_vm3, %v5887_v30  ;;  %v2158_v52 = vsel %vm443_vm7, %v1895_v28, %v6617_v35 }
 0x148   :  { %v6626_v39 = vpop.permute.xlu0 %6625  ;;  %v6621_v19 = vpop.permute.xlu1 %6620  ;;  %v5897_v49 = vpack.c.bf16 %v2161_v4, %v2160_v42  ;;  %v2159_v25 = vsel %vm443_vm7, %v8555_v24, %v6618_v17 }
 0x149   :  { %v6623_v27 = vunpack.i.h.bf16 %v6621_v19  ;;  %v6622_v20 = vunpack.i.l.bf16 %v6621_v19  ;;  %v6628_v1 = vunpack.i.h.bf16 %v6626_v39  ;;  %v6627_v38 = vunpack.i.l.bf16 %v6626_v39 }
 0x14a   :  { %5898 = vmatprep.subr.bf16.mxu0 %v5897_v49  ;;  %5638 = vmatmul.mubr.msk.f32.vlgmr.msra.gmra.mrb[10].mxu1 %vm498_vm15, %v8676_v29  ;;  %v5904_v24 = vpack.c.bf16 %v2159_v25, %v2158_v52 }
 0x14b   :  { %v2163_v40 = vsel %vm448_vm8, %v6618_v17, %v6623_v27  ;;  %v2162_v6 = vsel %vm448_vm8, %v6617_v35, %v6622_v20  ;;  %2363 = vmatprep.mubr.f32.mxu1 %v10949_v13  ;;  %5449 = vmatmul.mubr.msk.f32.vlgmr.msra.gmra.mrb[10].mxu0 %vm498_vm15, %v8676_v29  ;;  %v2164_v3 = vsel %vm453_vm10, %v6612_v8, %v6627_v38 }
 0x14c   :  { %v6636_v57 = vpop.permute.xlu0 %6635  ;;  %v6631_v53 = vpop.permute.xlu1 %6630  ;;  %v5901_v44 = vpack.c.bf16 %v2163_v40, %v2162_v6  ;;  %5900 = vmatpush1.bf16.msra.mxu0 %v5899_v23  ;;  %2292 = vmatprep.mubr.f32.mxu0 %v10949_v13  ;;  %v2165_v48 = vsel %vm453_vm10, %v6613_v32, %v6628_v1 }
 0x14d   :  { %v6633_v41 = vunpack.i.h.bf16 %v6631_v53  ;;  %v6632_v2 = vunpack.i.l.bf16 %v6631_v53  ;;  %v6638_v22 = vunpack.i.h.bf16 %v6636_v57  ;;  %v6637_v54 = vunpack.i.l.bf16 %v6636_v57 }
 0x14e   :  { %5903 = vmatprep.subr.msk.bf16.mxu0 %vm8619_vm3, %v5901_v44  ;;  %v5909_v21 = vpack.c.bf16 %v2165_v48, %v2164_v3 }
 0x14f   :  { %v2168_v0 = vsel %vm458_vm9, %v6627_v38, %v6632_v2  ;;  %v2169_v61 = vsel %vm458_vm9, %v6628_v1, %v6633_v41  ;;  %v2166_v15 = vsel %vm453_vm10, %v6622_v20, %v6637_v54  ;;  %v2167_v26 = vsel %vm453_vm10, %v6623_v27, %v6638_v22 }
 0x150   :  { %v6646_v11 = vpop.permute.xlu0 %6645  ;;  %v6641_v60 = vpop.permute.xlu1 %6640  ;;  %v5907_v51 = vpack.c.bf16 %v2169_v61, %v2168_v0  ;;  %5906 = vmatpush1.bf16.msk.msra.mxu0 %vm8619_vm3, %v5904_v24  ;;  %v5914_v36 = vpack.c.bf16 %v2167_v26, %v2166_v15 }
 0x151   :  { %v6643_v56 = vunpack.i.h.bf16 %v6641_v60  ;;  %v6642_v37 = vunpack.i.l.bf16 %v6641_v60  ;;  %v6648_v16 = vunpack.i.h.bf16 %v6646_v11  ;;  %v6647_v7 = vunpack.i.l.bf16 %v6646_v11 }
 0x152   :  { %5908 = vmatprep.subr.bf16.mxu1 %v5907_v51 }
 0x153   :  { %v2171_v59 = vsel %vm458_vm9, %v6638_v22, %v6643_v56  ;;  %v2170_v50 = vsel %vm458_vm9, %v6637_v54, %v6642_v37  ;;  %5910 = vmatpush1.bf16.msra.mxu1 %v5909_v21  ;;  %5454 = vmatmul.mubr.msk.f32.vlgmr.msra.gmra.mrb[12].mxu0 %vm498_vm15, %v8676_v29  ;;  %v2172_v43 = vsel %vm463_vm11, %v6632_v2, %v6647_v7 }
 0x154   :  { %v6656_v14 = vpop.permute.xlu0 %6655  ;;  %v6651_v63 = vpop.permute.xlu1 %6650  ;;  %v5911_v55 = vpack.c.bf16 %v2171_v59, %v2170_v50  ;;  %2434 = vmatprep.mubr.f32.mxu0 %v10949_v13  ;;  %v2173_v18 = vsel %vm463_vm11, %v6633_v41, %v6648_v16 }
 0x155   :  { %v6653_v47 = vunpack.i.h.bf16 %v6651_v63  ;;  %v6652_v34 = vunpack.i.l.bf16 %v6651_v63  ;;  %v6658_v31 = vunpack.i.h.bf16 %v6656_v14  ;;  %v6657_v32 = vunpack.i.l.bf16 %v6656_v14 }
 0x156   :  { %5913 = vmatprep.subr.msk.bf16.mxu1 %vm8619_vm3, %v5911_v55  ;;  %v5919_v17 = vpack.c.bf16 %v2173_v18, %v2172_v43 }
 0x157   :  { %5916 = vmatpush1.bf16.msk.msra.mxu1 %vm8619_vm3, %v5914_v36  ;;  %v2176_v8 = vsel %vm468_vm13, %v6647_v7, %v6652_v34  ;;  %v2177_v46 = vsel %vm468_vm13, %v6648_v16, %v6653_v47  ;;  %v2174_v35 = vsel %vm463_vm11, %v6642_v37, %v6657_v32  ;;  %v2175_v39 = vsel %vm463_vm11, %v6643_v56, %v6658_v31 }
 0x158   :  { %v6666_v30 = vpop.permute.xlu0 %6665  ;;  %v6661_v12 = vpop.permute.xlu1 %6660  ;;  %v5917_v42 = vpack.c.bf16 %v2177_v46, %v2176_v8  ;;  %v5924_v40 = vpack.c.bf16 %v2175_v39, %v2174_v35 }
 0x159   :  { %v6663_v4 = vunpack.i.h.bf16 %v6661_v12  ;;  %v6662_v33 = vunpack.i.l.bf16 %v6661_v12  ;;  %v6668_v19 = vunpack.i.h.bf16 %v6666_v30  ;;  %v6667_v49 = vunpack.i.l.bf16 %v6666_v30 }
 0x15a   :  { %5918 = vmatprep.subr.bf16.mxu0 %v5917_v42  ;;  %5457 = vmatmul.mubr.msk.f32.vlgmr.msra.gmra.mrb[12].mxu1 %vm498_vm15, %v8676_v29 }
 0x15b   :  { %v2179_v27 = vsel %vm468_vm13, %v6658_v31, %v6663_v4  ;;  %v2178_v20 = vsel %vm468_vm13, %v6657_v32, %v6662_v33  ;;  %5920 = vmatpush1.bf16.msra.mxu0 %v5919_v17  ;;  %2505 = vmatprep.mubr.f32.mxu1 %v10949_v13  ;;  %v2180_v52 = vsel %vm473_vm14, %v6652_v34, %v6667_v49 }
 0x15c   :  { %v6671_v1 = vpop.permute.xlu1 %6670  ;;  %v6676_v38 = vpop.permute.xlu0 %6675  ;;  %v5921_v28 = vpack.c.bf16 %v2179_v27, %v2178_v20  ;;  %v2181_v25 = vsel %vm473_vm14, %v6653_v47, %v6668_v19 }
 0x15d   :  { %v6673_v6 = vunpack.i.h.bf16 %v6671_v1  ;;  %v6672_v23 = vunpack.i.l.bf16 %v6671_v1  ;;  %v6678_v57 = vunpack.i.h.bf16 %v6676_v38  ;;  %v6677_v53 = vunpack.i.l.bf16 %v6676_v38 }
 0x15e   :  { %5923 = vmatprep.subr.msk.bf16.mxu0 %vm8619_vm3, %v5921_v28  ;;  %v5929_v24 = vpack.c.bf16 %v2181_v25, %v2180_v52  ;;  %v10966_v28 = vld [vmem:[#allocation43_spill] sm:$0xff] }
 0x15f   :  { %5926 = vmatpush1.bf16.msk.msra.mxu0 %vm8619_vm3, %v5924_v40  ;;  %v2184_v44 = vsel %vm478_vm12, %v6667_v49, %v6672_v23  ;;  %v2185_v41 = vsel %vm478_vm12, %v6668_v19, %v6673_v6  ;;  %v2183_v0 = vsel %vm473_vm14, %v6663_v4, %v6678_v57  ;;  %v2182_v61 = vsel %vm473_vm14, %v6662_v33, %v6677_v53 }
 0x160   :  { %v6681_v2 = vpop.permute.xlu1 %6680  ;;  %v6686_v3 = vpop.permute.xlu0 %6685  ;;  %v5927_v48 = vpack.c.bf16 %v2185_v41, %v2184_v44  ;;  %v5934_v26 = vpack.c.bf16 %v2183_v0, %v2182_v61 }
 0x161   :  { %v6683_v22 = vunpack.i.h.bf16 %v6681_v2  ;;  %v6682_v54 = vunpack.i.l.bf16 %v6681_v2  ;;  %v6688_v11 = vunpack.i.h.bf16 %v6686_v3  ;;  %v6687_v56 = vunpack.i.l.bf16 %v6686_v3 }
 0x162   :  { %5928 = vmatprep.subr.bf16.mxu1 %v5927_v48  ;;  %5460 = vmatmul.mubr.msk.f32.vlgmr.msra.gmra.mrb[14].mxu0 %vm498_vm15, %v8676_v29 }
 0x163   :  { %v2186_v60 = vsel %vm478_vm12, %v6677_v53, %v6682_v54  ;;  %v2187_v51 = vsel %vm478_vm12, %v6678_v57, %v6683_v22  ;;  %5930 = vmatpush1.bf16.msra.mxu1 %v5929_v24  ;;  %2576 = vmatprep.mubr.f32.mxu0 %v10949_v13  ;;  %v2189_v59 = vsel %vm483_vm5, %v6673_v6, %v6688_v11  ;;  %v7136_v6 = vld [vmem:[%s10825_s23 + $0x30] sm:$0xff]  ;;  %s7184_s23 = smov 12  }
 0x164   :  { %v6691_v37 = vpop.permute.xlu1 %6690  ;;  %v6696_v21 = vpop.permute.xlu0 %6695  ;;  %v5931_v15 = vpack.c.bf16 %v2187_v51, %v2186_v60  ;;  %v2188_v50 = vsel %vm483_vm5, %v6672_v23, %v6687_v56  ;;  %v10967_v23 = vld [vmem:[#allocation36_spill] sm:$0xff] }
 0x165   :  { %v6693_v16 = vunpack.i.h.bf16 %v6691_v37  ;;  %v6692_v7 = vunpack.i.l.bf16 %v6691_v37  ;;  %v6698_v14 = vunpack.i.h.bf16 %v6696_v21  ;;  %v6697_v63 = vunpack.i.l.bf16 %v6696_v21 }
 0x166   :  { %5933 = vmatprep.subr.msk.bf16.mxu1 %vm8619_vm3, %v5931_v15  ;;  %v5939_v46 = vpack.c.bf16 %v2189_v59, %v2188_v50  ;;  %v2729_v52 = vsel %vm10968_vm2, %v7136_v6, %v10967_v23  ;;  %vm4084_vm2 = vcmask 293888  }
 0x167   :  { %5936 = vmatpush1.bf16.msk.msra.mxu1 %vm8619_vm3, %v5934_v26  ;;  %v2192_v55 = vsel %vm488_vm1, %v6687_v56, %v6692_v7  ;;  %v2193_v34 = vsel %vm488_vm1, %v6688_v11, %v6693_v16  ;;  %v5948_v43 = vpack.c.bf16 %v6693_v16, %v6692_v7  ;;  %v2191_v30 = vsel %vm483_vm5, %v6683_v22, %v6698_v14 }
 0x168   :  { %v6701_v36 = vpop.permute.xlu1 %6700  ;;  %v6706_v47 = vpop.permute.xlu0 %6705  ;;  %5947 = vmatprep.subr.bf16.mxu1 %v10816_v9  ;;  %v5937_v8 = vpack.c.bf16 %v2193_v34, %v2192_v55  ;;  %v2190_v12 = vsel %vm483_vm5, %v6682_v54, %v6697_v63 }
 0x169   :  { %v6703_v18 = vunpack.i.h.bf16 %v6701_v36  ;;  %v6702_v31 = vunpack.i.l.bf16 %v6701_v36  ;;  %v6707_v32 = vunpack.i.l.bf16 %v6706_v47  ;;  %v6708_v17 = vunpack.i.h.bf16 %v6706_v47 }
 0x16a   :  { %5463 = vmatmul.mubr.msk.f32.vlgmr.msra.gmra.mrb[14].mxu1 %vm498_vm15, %v8676_v29  ;;  %5938 = vmatprep.subr.bf16.mxu0 %v5937_v8  ;;  %v5944_v38 = vpack.c.bf16 %v2191_v30, %v2190_v12 }
 0x16b   :  { %v2194_v42 = vsel %vm488_vm1, %v6697_v63, %v6702_v31  ;;  %v2195_v4 = vsel %vm488_vm1, %v6698_v14, %v6703_v18  ;;  %5949 = vmatpush3.bf16.msra.mxu1 %v5948_v43  ;;  %v5951_v33 = vpack.c.bf16 %v6703_v18, %v6702_v31  ;;  %5940 = vmatpush1.bf16.msra.mxu0 %v5939_v46 }
 0x16c   :  { %v6711_v35 = vpop.permute.xlu1 %6710  ;;  %v6716_v39 = vpop.permute.xlu0 %6715  ;;  %v5941_v19 = vpack.c.bf16 %v2195_v4, %v2194_v42  ;;  %5950 = vmatprep.subr.bf16.mxu1 %v10816_v9  ;;  %5648 = vmatprep.mubr.msk.f32.mxu1 %vm7176_vm4, %v10949_v13  ;;  %v2731_v40 = vsel %vm97_vm0, %v10966_v28, %v6707_v32  ;;  %v2732_v41 = vsel %vm99_vm6, %v6707_v32, %v6708_v17  ;;  %vm989_vm0 = vcmask 322560  }
 0x16d   :  { %v6713_v49 = vunpack.i.h.bf16 %v6711_v35  ;;  %v6712_v27 = vunpack.i.l.bf16 %v6711_v35  ;;  %v6718_v20 = vunpack.i.h.bf16 %v6716_v39  ;;  %v6717_v1 = vunpack.i.l.bf16 %v6716_v39 }
 0x16e   :  { %5943 = vmatprep.subr.msk.bf16.mxu0 %vm8619_vm3, %v5941_v19 }
 0x16f   :  { %v2986_v25 = vsel %vm443_vm7, %v2729_v52, %v6712_v27  ;;  %v2987_v57 = vsel %vm443_vm7, %v2731_v40, %v6713_v49  ;;  %5953 = vmatpush3.bf16.msk.msra.mxu1 %vm8619_vm3, %v5951_v33  ;;  %v2990_v53 = vsel %vm448_vm8, %v6712_v27, %v6717_v1  ;;  %v2991_v44 = vsel %vm448_vm8, %v6713_v49, %v6718_v20 }
 0x170   :  { %v6721_v2 = vpop.permute.xlu1 %6720  ;;  %v6726_v3 = vpop.permute.xlu0 %6725  ;;  %v5954_v48 = vpack.c.bf16 %v2991_v44, %v2990_v53  ;;  %v5956_v22 = vpack.c.bf16 %v2987_v57, %v2986_v25  ;;  %5946 = vmatpush1.bf16.msk.msra.mxu0 %vm8619_vm3, %v5944_v38 }
 0x171   :  { %v6723_v54 = vunpack.i.h.bf16 %v6721_v2  ;;  %v6722_v24 = vunpack.i.l.bf16 %v6721_v2  ;;  %v6728_v0 = vunpack.i.h.bf16 %v6726_v3  ;;  %v6727_v61 = vunpack.i.l.bf16 %v6726_v3  ;;  %v9143_v2 = vld [vmem:[%s10947_s24] sm:$0xf]  ;;  %s10969_s24 = sld [smem:[#allocation52_spill]] }
 0x172   :  { %5955 = vmatprep.subr.bf16.mxu0 %v5954_v48  ;;  %5649 = vmatmul.mubr.msk.f32.vlgmr.msra.gmra.mrb[16].mxu1 %vm498_vm15, %v8676_v29 }
 0x173   :  { %v2988_v11 = vsel %vm443_vm7, %v2732_v41, %v6722_v24  ;;  %v2989_v60 = vsel %vm443_vm7, %v6708_v17, %v6723_v54  ;;  %v2993_v51 = vsel %vm448_vm8, %v6723_v54, %v6728_v0  ;;  %v2992_v56 = vsel %vm448_vm8, %v6722_v24, %v6727_v61  ;;  %3193 = vmatprep.mubr.f32.mxu1 %v10949_v13 }
 0x174   :  { %v5961_v37 = vpack.c.bf16 %v2989_v60, %v2988_v11  ;;  %5466 = vmatmul.mubr.msk.f32.vlgmr.msra.gmra.mrb[16].mxu0 %vm498_vm15, %v8676_v29  ;;  %v6731_v21 = vpop.permute.xlu1 %6730  ;;  %v6736_v15 = vpop.permute.xlu0 %6735  ;;  %v5958_v26 = vpack.c.bf16 %v2993_v51, %v2992_v56  ;;  %vm3801_vm8 = vcmask 261120  }
 0x175   :  { %5957 = vmatpush1.bf16.msra.mxu0 %v5956_v22  ;;  %v6733_v16 = vunpack.i.h.bf16 %v6731_v21  ;;  %v6732_v7 = vunpack.i.l.bf16 %v6731_v21  ;;  %v6738_v59 = vunpack.i.h.bf16 %v6736_v15  ;;  %v6737_v50 = vunpack.i.l.bf16 %v6736_v15  ;;  %3122 = vmatprep.mubr.f32.mxu0 %v10949_v13 }
 0x176   :  { %5960 = vmatprep.subr.msk.bf16.mxu0 %vm8619_vm3, %v5958_v26 }
 0x177   :  { %v2994_v14 = vsel %vm453_vm10, %v6717_v1, %v6732_v7  ;;  %v2995_v63 = vsel %vm453_vm10, %v6718_v20, %v6733_v16  ;;  %v2998_v55 = vsel %vm458_vm9, %v6732_v7, %v6737_v50  ;;  %v2999_v36 = vsel %vm458_vm9, %v6733_v16, %v6738_v59 }
 0x178   :  { %v6741_v47 = vpop.permute.xlu1 %6740  ;;  %v6746_v34 = vpop.permute.xlu0 %6745  ;;  %v5964_v43 = vpack.c.bf16 %v2999_v36, %v2998_v55  ;;  %v5966_v18 = vpack.c.bf16 %v2995_v63, %v2994_v14 }
 0x179   :  { %5963 = vmatpush1.bf16.msk.msra.mxu0 %vm8619_vm3, %v5961_v37  ;;  %v6743_v31 = vunpack.i.h.bf16 %v6741_v47  ;;  %v6742_v32 = vunpack.i.l.bf16 %v6741_v47  ;;  %v6748_v8 = vunpack.i.h.bf16 %v6746_v34  ;;  %v6747_v46 = vunpack.i.l.bf16 %v6746_v34 }
 0x17a   :  { %5965 = vmatprep.subr.bf16.mxu1 %v5964_v43 }
 0x17b   :  { %v2996_v30 = vsel %vm453_vm10, %v6727_v61, %v6742_v32  ;;  %v2997_v12 = vsel %vm453_vm10, %v6728_v0, %v6743_v31  ;;  %v3001_v42 = vsel %vm458_vm9, %v6743_v31, %v6748_v8  ;;  %v3000_v4 = vsel %vm458_vm9, %v6742_v32, %v6747_v46  ;;  %5967 = vmatpush1.bf16.msra.mxu1 %v5966_v18 }
 0x17c   :  { %v5971_v33 = vpack.c.bf16 %v2997_v12, %v2996_v30  ;;  %v6751_v17 = vpop.permute.xlu1 %6750  ;;  %v5968_v35 = vpack.c.bf16 %v3001_v42, %v3000_v4  ;;  %5471 = vmatmul.mubr.msk.f32.vlgmr.msra.gmra.mrb[18].mxu0 %vm498_vm15, %v8676_v29  ;;  %v6756_v49 = vpop.permute.xlu0 %6755  ;;  %vm3891_vm9 = vcmask 1031168   ;;  %vm3792_vm10 = vcmask 130048  }
 0x17d   :  { %v6753_v39 = vunpack.i.h.bf16 %v6751_v17  ;;  %v6752_v19 = vunpack.i.l.bf16 %v6751_v17  ;;  %3264 = vmatprep.mubr.f32.mxu0 %v10949_v13  ;;  %v6758_v27 = vunpack.i.h.bf16 %v6756_v49  ;;  %v6757_v20 = vunpack.i.l.bf16 %v6756_v49 }
 0x17e   :  { %5970 = vmatprep.subr.msk.bf16.mxu1 %vm8619_vm3, %v5968_v35 }
 0x17f   :  { %v3002_v1 = vsel %vm463_vm11, %v6737_v50, %v6752_v19  ;;  %v3003_v38 = vsel %vm463_vm11, %v6738_v59, %v6753_v39  ;;  %5973 = vmatpush1.bf16.msk.msra.mxu1 %vm8619_vm3, %v5971_v33  ;;  %v3006_v29 = vsel %vm468_vm13, %v6752_v19, %v6757_v20  ;;  %v3007_v40 = vsel %vm468_vm13, %v6753_v39, %v6758_v27 }
 0x180   :  { %v6761_v28 = vpop.permute.xlu1 %6760  ;;  %v5976_v6 = vpack.c.bf16 %v3003_v38, %v3002_v1  ;;  %v5974_v53 = vpack.c.bf16 %v3007_v40, %v3006_v29 }
 0x181   :  { %v6763_v52 = vunpack.i.h.bf16 %v6761_v28  ;;  %v6762_v25 = vunpack.i.l.bf16 %v6761_v28  ;;  %v6766_v57 = vpop.permute.xlu0 %6765 }
 0x182   :  { %v6768_v44 = vunpack.i.h.bf16 %v6766_v57  ;;  %v6767_v41 = vunpack.i.l.bf16 %v6766_v57  ;;  %5474 = vmatmul.mubr.msk.f32.vlgmr.msra.gmra.mrb[18].mxu1 %vm498_vm15, %v9143_v2  ;;  %5975 = vmatprep.subr.bf16.mxu0 %v5974_v53 }
 0x183   :  { %v3004_v3 = vsel %vm463_vm11, %v6747_v46, %v6762_v25  ;;  %v3005_v48 = vsel %vm463_vm11, %v6748_v8, %v6763_v52  ;;  %3335 = vmatprep.mubr.f32.mxu1 %v10949_v13  ;;  %5977 = vmatpush1.bf16.msra.mxu0 %v5976_v6 }
 0x184   :  { %v5981_v22 = vpack.c.bf16 %v3005_v48, %v3004_v3  ;;  %v3009_v54 = vsel %vm468_vm13, %v6763_v52, %v6768_v44  ;;  %v3008_v24 = vsel %vm468_vm13, %v6762_v25, %v6767_v41  ;;  %v6771_v0 = vpop.permute.xlu1 %6770  ;;  %vm4067_vm13 = vcmask 965632  }
 0x185   :  { %v6773_v61 = vunpack.i.h.bf16 %v6771_v0  ;;  %v6772_v11 = vunpack.i.l.bf16 %v6771_v0  ;;  %v6776_v60 = vpop.permute.xlu0 %6775  ;;  %v5978_v51 = vpack.c.bf16 %v3009_v54, %v3008_v24 }
 0x186   :  { %v6778_v56 = vunpack.i.h.bf16 %v6776_v60  ;;  %v6777_v37 = vunpack.i.l.bf16 %v6776_v60 }
 0x187   :  { %v3010_v21 = vsel %vm473_vm14, %v6757_v20, %v6772_v11  ;;  %v3011_v15 = vsel %vm473_vm14, %v6758_v27, %v6773_v61  ;;  %5980 = vmatprep.subr.msk.bf16.mxu0 %vm8619_vm3, %v5978_v51 }
 0x188   :  { %5983 = vmatpush1.bf16.msk.msra.mxu0 %vm8619_vm3, %v5981_v22  ;;  %v3014_v26 = vsel %vm478_vm12, %v6772_v11, %v6777_v37  ;;  %v3015_v16 = vsel %vm478_vm12, %v6773_v61, %v6778_v56  ;;  %v5986_v7 = vpack.c.bf16 %v3011_v15, %v3010_v21 }
 0x189   :  { %v5984_v59 = vpack.c.bf16 %v3015_v16, %v3014_v26 }
 0x18b   :  { %5985 = vmatprep.subr.bf16.mxu1 %v5984_v59  ;;  %5477 = vmatmul.mubr.msk.f32.vlgmr.msra.gmra.mrb[20].mxu0 %vm498_vm15, %v9143_v2 }
 0x18c   :  { %5987 = vmatpush1.bf16.msra.mxu1 %v5986_v7  ;;  %3406 = vmatprep.mubr.f32.mxu0 %v10949_v13 }
 0x197   :  { %v6786_v14 = vpop.permute.xlu0 %6785 }
 0x198   :  { %v6781_v50 = vpop.permute.xlu1 %6780  ;;  %v6788_v36 = vunpack.i.h.bf16 %v6786_v14  ;;  %v6787_v47 = vunpack.i.l.bf16 %v6786_v14 }
 0x199   :  { %v6783_v63 = vunpack.i.h.bf16 %v6781_v50  ;;  %v6782_v55 = vunpack.i.l.bf16 %v6781_v50 }
 0x19b   :  { %v3012_v34 = vsel %vm473_vm14, %v6767_v41, %v6782_v55  ;;  %v3013_v43 = vsel %vm473_vm14, %v6768_v44, %v6783_v63  ;;  %v3017_v18 = vsel %vm478_vm12, %v6783_v63, %v6788_v36  ;;  %v3016_v31 = vsel %vm478_vm12, %v6782_v55, %v6787_v47 }
 0x19c   :  { %v5991_v32 = vpack.c.bf16 %v3013_v43, %v3012_v34  ;;  %v6791_v8 = vpop.permute.xlu1 %6790  ;;  %v5988_v30 = vpack.c.bf16 %v3017_v18, %v3016_v31  ;;  %vm3833_vm12 = vcmask 113664   ;;  %vm4008_vm14 = vcmask 48128  }
 0x19d   :  { %v6796_v46 = vpop.permute.xlu0 %6795  ;;  %v6793_v12 = vunpack.i.h.bf16 %v6791_v8  ;;  %v6792_v42 = vunpack.i.l.bf16 %v6791_v8 }
 0x19e   :  { %v6798_v4 = vunpack.i.h.bf16 %v6796_v46  ;;  %v6797_v33 = vunpack.i.l.bf16 %v6796_v46  ;;  %5990 = vmatprep.subr.msk.bf16.mxu1 %vm8619_vm3, %v5988_v30 }
 0x19f   :  { %v3018_v17 = vsel %vm483_vm5, %v6777_v37, %v6792_v42  ;;  %v3019_v35 = vsel %vm483_vm5, %v6778_v56, %v6793_v12  ;;  %5993 = vmatpush1.bf16.msk.msra.mxu1 %vm8619_vm3, %v5991_v32 }
 0x1a0   :  { %v3022_v39 = vsel %vm488_vm1, %v6792_v42, %v6797_v33  ;;  %v3023_v19 = vsel %vm488_vm1, %v6793_v12, %v6798_v4  ;;  %6004 = vmatprep.subr.bf16.mxu1 %v10816_v9  ;;  %v5996_v49 = vpack.c.bf16 %v3019_v35, %v3018_v17  ;;  %v6005_v27 = vpack.c.bf16 %v6798_v4, %v6797_v33 }
 0x1a1   :  { %v5994_v20 = vpack.c.bf16 %v3023_v19, %v3022_v39 }
 0x1a2   :  { %5480 = vmatmul.mubr.msk.f32.vlgmr.msra.gmra.mrb[20].mxu1 %vm498_vm15, %v9143_v2 }
 0x1a3   :  { %5995 = vmatprep.subr.bf16.mxu0 %v5994_v20  ;;  %6006 = vmatpush3.bf16.msra.mxu1 %v6005_v27  ;;  %v6801_v1 = vpop.permute.xlu1 %6800  ;;  %v6806_v38 = vpop.permute.xlu0 %6805 }
 0x1a4   :  { %5997 = vmatpush1.bf16.msra.mxu0 %v5996_v49  ;;  %6007 = vmatprep.subr.bf16.mxu1 %v10816_v9  ;;  %v6803_v28 = vunpack.i.h.bf16 %v6801_v1  ;;  %v6802_v29 = vunpack.i.l.bf16 %v6801_v1  ;;  %v6808_v40 = vunpack.i.h.bf16 %v6806_v38  ;;  %v6807_v6 = vunpack.i.l.bf16 %v6806_v38 }
 0x1a5   :  { %5659 = vmatprep.mubr.msk.f32.mxu1 %vm7176_vm4, %v10949_v13 }
 0x1a6   :  { %v3020_v52 = vsel %vm483_vm5, %v6787_v47, %v6802_v29  ;;  %v3021_v25 = vsel %vm483_vm5, %v6788_v36, %v6803_v28  ;;  %v3025_v57 = vsel %vm488_vm1, %v6803_v28, %v6808_v40  ;;  %v3024_v53 = vsel %vm488_vm1, %v6802_v29, %v6807_v6 }
 0x1a7   :  { %v6001_v44 = vpack.c.bf16 %v3021_v25, %v3020_v52  ;;  %v6008_v41 = vpack.c.bf16 %v6808_v40, %v6807_v6  ;;  %v5998_v3 = vpack.c.bf16 %v3025_v57, %v3024_v53  ;;  %vm3681_vm1 = vcmask 64512  }
 0x1a8   :  { %vm3840_vm5 = vcmask 244736  }
 0x1a9   :  { %6010 = vmatpush3.bf16.msk.msra.mxu1 %vm8619_vm3, %v6008_v41  ;;  %6000 = vmatprep.subr.msk.bf16.mxu0 %vm8619_vm3, %v5998_v3 }
 0x1aa   :  { %6003 = vmatpush1.bf16.msk.msra.mxu0 %vm8619_vm3, %v6001_v44  ;;  %6019 = vmatprep.subr.bf16.mxu1 %v10816_v9  ;;  %vm4073_vm3 = vcmask 883712  }
 0x1ac   :  { %5660 = vmatmul.mubr.msk.f32.vlgmr.msra.gmra.mrb[22].mxu1 %vm498_vm15, %v9143_v2 }
 0x1ad   :  { %5483 = vmatmul.mubr.msk.f32.vlgmr.msra.gmra.mrb[22].mxu0 %vm498_vm15, %v9143_v2  ;;  %5672 = vmatprep.mubr.msk.f32.mxu1 %vm7176_vm4, %v10949_v13  ;;  %vm4052_vm15 = vcmask 97280  }
 0x1ae   :  { %4160 = vmatprep.mubr.f32.mxu0 %v10949_v13 }
 0x1b4   :  { %v9199_v0 = vpop.permute.xlu1 %495 }
 0x1e1   :  { %v671_v48 = vpop.f32.mrb[0].mxu1 }
 0x1e2   :  { %v673_v22 = vpop.f32.mrb[1].mxu1  ;;  %v672_v11 = vadd.f32 %v671_v48, %v9199_v0 }
 0x1e3   :  { %v600_v54 = vpop.f32.mrb[0].mxu0  ;;  %v674_v26 = vadd.f32 %v673_v22, %v9199_v0 }
 0x1e4   :  { %v602_v24 = vpop.f32.mrb[1].mxu0  ;;  %v601_v10 = vadd.f32 %v600_v54, %v9199_v0  ;;  %v9212_v37 = vmax.f32 %v672_v11, 0.0 }
 0x1e5   :  { %v603_v61 = vadd.f32 %v602_v24, %v9199_v0  ;;  %v9225_v63 = vmax.f32 %v674_v26, 0.0 }
 0x1e6   :  { %v9204_v60 = vmax.f32 %v601_v10, 0.0  ;;  %v997_v16 = vmul.f32 %v9212_v37, %v9212_v37  ;;  %v973_v14 = vsel %vm99_vm6, %v9212_v37, 0.0 }
 0x1e7   :  { %v9206_v2 = vmax.f32 %v603_v61, 0.0  ;;  %v998_v43 = vmul.f32 %v9225_v63, %v9225_v63  ;;  %v975_v31 = vsel %vm99_vm6, %v9225_v63, 0.0 }
 0x1e8   :  { %v995_v51 = vmul.f32 %v9204_v60, %v9204_v60  ;;  %v970_v21 = vsel %vm99_vm6, %v9204_v60, 0.0  ;;  %v1009_v34 = vsel %vm99_vm6, %v997_v16, 0.0 }
 0x1e9   :  { %v996_v56 = vmul.f32 %v9206_v2, %v9206_v2  ;;  %v971_v15 = vsel %vm99_vm6, %v9206_v2, 0.0  ;;  %v1011_v42 = vsel %vm99_vm6, %v998_v43, 0.0 }
 0x1ea   :  { %v1006_v7 = vsel %vm99_vm6, %v995_v51, 0.0  ;;  %v972_v50 = vadd.f32 %v971_v15, %v970_v21 }
 0x1eb   :  { %v1007_v59 = vsel %vm99_vm6, %v996_v56, 0.0 }
 0x1ec   :  { %v1008_v36 = vadd.f32 %v1007_v59, %v1006_v7  ;;  %v974_v18 = vadd.f32 %v973_v14, %v972_v50 }
 0x1ee   :  { %v1010_v46 = vadd.f32 %v1009_v34, %v1008_v36  ;;  %v976_v17 = vadd.f32 %v975_v31, %v974_v18 }
 0x1f0   :  { %v1012_v49 = vadd.f32 %v1011_v42, %v1010_v46 }
 0x1f4   :  { %v813_v55 = vpop.f32.mrb[2].mxu1 }
 0x1f5   :  { %v815_v47 = vpop.f32.mrb[3].mxu1  ;;  %v814_v32 = vadd.f32 %v813_v55, %v9199_v0 }
 0x1f6   :  { %v816_v4 = vadd.f32 %v815_v47, %v9199_v0 }
 0x1f7   :  { %v9239_v39 = vmax.f32 %v814_v32, 0.0 }
 0x1f8   :  { %v742_v8 = vpop.f32.mrb[2].mxu0  ;;  %v9249_v28 = vmax.f32 %v816_v4, 0.0 }
 0x1f9   :  { %v743_v30 = vadd.f32 %v742_v8, %v9199_v0  ;;  %v744_v12 = vpop.f32.mrb[3].mxu0  ;;  %v1001_v38 = vmul.f32 %v9239_v39, %v9239_v39  ;;  %v981_v57 = vsel %vm99_vm6, %v9239_v39, 0.0 }
 0x1fa   :  { %v745_v33 = vadd.f32 %v744_v12, %v9199_v0  ;;  %v1002_v53 = vmul.f32 %v9249_v28, %v9249_v28  ;;  %v983_v61 = vsel %vm99_vm6, %v9249_v28, 0.0 }
 0x1fb   :  { %v9237_v35 = vmax.f32 %v743_v30, 0.0  ;;  %v1017_v24 = vsel %vm99_vm6, %v1001_v38, 0.0 }
 0x1fc   :  { %v9241_v19 = vmax.f32 %v745_v33, 0.0  ;;  %v1019_v15 = vsel %vm99_vm6, %v1002_v53, 0.0 }
 0x1fd   :  { %v955_v27 = vpop.f32.mrb[4].mxu1  ;;  %v977_v20 = vsel %vm99_vm6, %v9237_v35, 0.0  ;;  %v999_v1 = vmul.f32 %v9237_v35, %v9237_v35 }
 0x1fe   :  { %v5628_v29 = vpop.f32.mrb[5].mxu1  ;;  %v979_v40 = vsel %vm99_vm6, %v9241_v19, 0.0  ;;  %v1000_v6 = vmul.f32 %v9241_v19, %v9241_v19  ;;  %v978_v52 = vadd.f32 %v977_v20, %v976_v17  ;;  %v956_v44 = vadd.f32 %v955_v27, %v9199_v0 }
 0x1ff   :  { %v1013_v25 = vsel %vm99_vm6, %v999_v1, 0.0 }
 0x200   :  { %v1015_v41 = vsel %vm99_vm6, %v1000_v6, 0.0  ;;  %v1014_v3 = vadd.f32 %v1013_v25, %v1012_v49  ;;  %v980_v22 = vadd.f32 %v979_v40, %v978_v52  ;;  %v969_v26 = vmax.f32 %v956_v44, 0.0 }
 0x201   :  { %v884_v48 = vpop.f32.mrb[4].mxu0 }
 0x202   :  { %v885_v54 = vadd.f32 %v884_v48, %v9199_v0  ;;  %v886_v10 = vpop.f32.mrb[5].mxu0  ;;  %v982_v11 = vadd.f32 %v981_v57, %v980_v22  ;;  %v1016_v51 = vadd.f32 %v1015_v41, %v1014_v3  ;;  %v1005_v36 = vmul.f32 %v969_v26, %v969_v26 }
 0x203   :  { %v887_v56 = vadd.f32 %v886_v10, %v9199_v0  ;;  %v990_v12 = vsel %vm989_vm0, %v969_v26, 0.0 }
 0x204   :  { %v9267_v21 = vmax.f32 %v885_v54, 0.0  ;;  %v1018_v16 = vadd.f32 %v1017_v24, %v1016_v51  ;;  %v984_v59 = vadd.f32 %v983_v61, %v982_v11  ;;  %v1025_v29 = vsel %vm989_vm0, %v1005_v36, 0.0 }
 0x205   :  { %v9270_v7 = vmax.f32 %v887_v56, 0.0 }
 0x206   :  { %v1528_v50 = vpop.f32.mrb[6].mxu1  ;;  %v985_v14 = vsel %vm99_vm6, %v9267_v21, 0.0  ;;  %v1003_v55 = vmul.f32 %v9267_v21, %v9267_v21  ;;  %v1020_v31 = vadd.f32 %v1019_v15, %v1018_v16 }
 0x207   :  { %v1529_v47 = vadd.f32 %v1528_v50, %v9199_v0  ;;  %v1530_v34 = vpop.f32.mrb[7].mxu1  ;;  %v987_v43 = vsel %vm99_vm6, %v9270_v7, 0.0  ;;  %v1004_v18 = vmul.f32 %v9270_v7, %v9270_v7  ;;  %v986_v46 = vadd.f32 %v985_v14, %v984_v59 }
 0x208   :  { %v1531_v32 = vadd.f32 %v1530_v34, %v9199_v0  ;;  %v1021_v8 = vsel %vm99_vm6, %v1003_v55, 0.0 }
 0x209   :  { %v1457_v30 = vpop.f32.mrb[6].mxu0  ;;  %v9284_v42 = vmax.f32 %v1529_v47, 0.0  ;;  %v1022_v4 = vadd.f32 %v1021_v8, %v1020_v31  ;;  %v1023_v33 = vsel %vm99_vm6, %v1004_v18, 0.0  ;;  %v988_v27 = vadd.f32 %v987_v43, %v986_v46 }
 0x20a   :  { %v1458_v17 = vadd.f32 %v1457_v30, %v9199_v0  ;;  %v1459_v49 = vpop.f32.mrb[7].mxu0  ;;  %v9289_v1 = vmax.f32 %v1531_v32, 0.0 }
 0x20b   :  { %v1460_v20 = vadd.f32 %v1459_v49, %v9199_v0  ;;  %v1024_v38 = vadd.f32 %v1023_v33, %v1022_v4  ;;  %v991_v6 = vadd.f32 %v990_v12, %v988_v27  ;;  %v1853_v25 = vmul.f32 %v9284_v42, %v9284_v42 }
 0x20c   :  { %v9292_v40 = vmax.f32 %v1458_v17, 0.0  ;;  %v1830_v48 = vsel %vm99_vm6, %v9284_v42, 0.0  ;;  %v1854_v22 = vmul.f32 %v9289_v1, %v9289_v1  ;;  %v1832_v11 = vsel %vm99_vm6, %v9289_v1, 0.0 }
 0x20d   :  { %v9294_v52 = vmax.f32 %v1460_v20, 0.0  ;;  %992 = vadd.xlane.f32.xlu0 %v991_v6  ;;  %v1026_v44 = vadd.f32 %v1025_v29, %v1024_v38  ;;  %v1865_v61 = vsel %vm99_vm6, %v1853_v25, 0.0 }
 0x20e   :  { %v1827_v57 = vsel %vm99_vm6, %v9292_v40, 0.0  ;;  %v1851_v53 = vmul.f32 %v9292_v40, %v9292_v40  ;;  %v1867_v26 = vsel %vm99_vm6, %v1854_v22, 0.0 }
 0x20f   :  { %v1828_v41 = vsel %vm99_vm6, %v9294_v52, 0.0  ;;  %v1852_v3 = vmul.f32 %v9294_v52, %v9294_v52 }
 0x210   :  { %v1862_v54 = vsel %vm99_vm6, %v1851_v53, 0.0  ;;  %v1829_v24 = vadd.f32 %v1828_v41, %v1827_v57 }
 0x211   :  { %v1863_v10 = vsel %vm99_vm6, %v1852_v3, 0.0  ;;  %v1599_v15 = vpop.f32.mrb[8].mxu0  ;;  %1027 = vadd.xlane.f32.xlu0 %v1026_v44 }
 0x212   :  { %v1864_v51 = vadd.f32 %v1863_v10, %v1862_v54  ;;  %v1831_v56 = vadd.f32 %v1830_v48, %v1829_v24  ;;  %v1600_v16 = vadd.f32 %v1599_v15, %v9199_v0  ;;  %v1601_v59 = vpop.f32.mrb[9].mxu0 }
 0x213   :  { %v1602_v55 = vadd.f32 %v1601_v59, %v9199_v0 }
 0x214   :  { %v1866_v50 = vadd.f32 %v1865_v61, %v1864_v51  ;;  %v1833_v14 = vadd.f32 %v1832_v11, %v1831_v56  ;;  %v9318_v47 = vmax.f32 %v1600_v16, 0.0 }
 0x215   :  { %v1670_v36 = vpop.f32.mrb[8].mxu1  ;;  %v9321_v31 = vmax.f32 %v1602_v55, 0.0 }
 0x216   :  { %v1671_v34 = vadd.f32 %v1670_v36, %v9199_v0  ;;  %v1672_v43 = vpop.f32.mrb[9].mxu1  ;;  %v1868_v18 = vadd.f32 %v1867_v26, %v1866_v50  ;;  %v1834_v8 = vsel %vm99_vm6, %v9318_v47, 0.0  ;;  %v1855_v46 = vmul.f32 %v9318_v47, %v9318_v47 }
 0x217   :  { %v1673_v32 = vadd.f32 %v1672_v43, %v9199_v0  ;;  %v1835_v12 = vadd.f32 %v1834_v8, %v1833_v14  ;;  %v1836_v4 = vsel %vm99_vm6, %v9321_v31, 0.0  ;;  %v1856_v33 = vmul.f32 %v9321_v31, %v9321_v31 }
 0x218   :  { %v9328_v30 = vmax.f32 %v1671_v34, 0.0  ;;  %v1869_v49 = vsel %vm99_vm6, %v1855_v46, 0.0 }
 0x219   :  { %v9334_v17 = vmax.f32 %v1673_v32, 0.0  ;;  %v1870_v38 = vadd.f32 %v1869_v49, %v1868_v18  ;;  %v1837_v29 = vadd.f32 %v1836_v4, %v1835_v12  ;;  %v1871_v6 = vsel %vm99_vm6, %v1856_v33, 0.0 }
 0x21a   :  { %v1838_v27 = vsel %vm99_vm6, %v9328_v30, 0.0  ;;  %v1857_v20 = vmul.f32 %v9328_v30, %v9328_v30 }
 0x21b   :  { %v1858_v57 = vmul.f32 %v9334_v17, %v9334_v17  ;;  %v1872_v53 = vadd.f32 %v1871_v6, %v1870_v38  ;;  %v1839_v44 = vadd.f32 %v1838_v27, %v1837_v29  ;;  %v1840_v3 = vsel %vm99_vm6, %v9334_v17, 0.0 }
 0x21c   :  { %v1873_v25 = vsel %vm99_vm6, %v1857_v20, 0.0 }
 0x21d   :  { %v1812_v41 = vpop.f32.mrb[10].mxu1  ;;  %v1874_v54 = vadd.f32 %v1873_v25, %v1872_v53  ;;  %v1875_v11 = vsel %vm99_vm6, %v1858_v57, 0.0  ;;  %v1841_v15 = vadd.f32 %v1840_v3, %v1839_v44 }
 0x21e   :  { %v1813_v48 = vadd.f32 %v1812_v41, %v9199_v0  ;;  %v5639_v22 = vpop.f32.mrb[11].mxu1  ;;  %v1741_v24 = vpop.f32.mrb[10].mxu0 }
 0x21f   :  { %v1742_v10 = vadd.f32 %v1741_v24, %v9199_v0  ;;  %v1743_v61 = vpop.f32.mrb[11].mxu0  ;;  %v1876_v59 = vadd.f32 %v1875_v11, %v1874_v54 }
 0x220   :  { %v1826_v51 = vmax.f32 %v1813_v48, 0.0  ;;  %v1744_v56 = vadd.f32 %v1743_v61, %v9199_v0 }
 0x221   :  { %v9351_v26 = vmax.f32 %v1742_v10, 0.0 }
 0x222   :  { %v9353_v16 = vmax.f32 %v1744_v56, 0.0  ;;  %v1861_v55 = vmul.f32 %v1826_v51, %v1826_v51  ;;  %v1846_v32 = vsel %vm989_vm0, %v1826_v51, 0.0 }
 0x223   :  { %v1842_v50 = vsel %vm99_vm6, %v9351_v26, 0.0  ;;  %v1859_v14 = vmul.f32 %v9351_v26, %v9351_v26 }
 0x224   :  { %v1844_v36 = vsel %vm99_vm6, %v9353_v16, 0.0  ;;  %v1860_v34 = vmul.f32 %v9353_v16, %v9353_v16  ;;  %v1843_v43 = vadd.f32 %v1842_v50, %v1841_v15  ;;  %v1881_v27 = vsel %vm989_vm0, %v1861_v55, 0.0 }
 0x225   :  { %v1877_v18 = vsel %vm99_vm6, %v1859_v14, 0.0 }
 0x226   :  { %v2294_v8 = vpop.f32.mrb[12].mxu0  ;;  %v1845_v46 = vadd.f32 %v1844_v36, %v1843_v43  ;;  %v1878_v12 = vadd.f32 %v1877_v18, %v1876_v59  ;;  %v1879_v4 = vsel %vm99_vm6, %v1860_v34, 0.0 }
 0x227   :  { %v2295_v33 = vadd.f32 %v2294_v8, %v9199_v0  ;;  %v2296_v49 = vpop.f32.mrb[13].mxu0 }
 0x228   :  { %v2297_v20 = vadd.f32 %v2296_v49, %v9199_v0  ;;  %v1847_v38 = vadd.f32 %v1846_v32, %v1845_v46  ;;  %v1880_v29 = vadd.f32 %v1879_v4, %v1878_v12 }
 0x229   :  { %v9369_v6 = vmax.f32 %v2295_v33, 0.0 }
 0x22a   :  { %v9371_v25 = vmax.f32 %v2297_v20, 0.0  ;;  %1848 = vadd.xlane.f32.xlu1 %v1847_v38  ;;  %v1882_v57 = vadd.f32 %v1881_v27, %v1880_v29 }
 0x22b   :  { %v2688_v53 = vmul.f32 %v9369_v6, %v9369_v6  ;;  %v2664_v3 = vsel %vm99_vm6, %v9369_v6, 0.0 }
 0x22c   :  { %v2689_v44 = vmul.f32 %v9371_v25, %v9371_v25  ;;  %1883 = vadd.xlane.f32.xlu0 %v1882_v57  ;;  %v2665_v48 = vsel %vm99_vm6, %v9371_v25, 0.0 }
 0x22d   :  { %v2365_v41 = vpop.f32.mrb[12].mxu1  ;;  %v2699_v10 = vsel %vm99_vm6, %v2688_v53, 0.0  ;;  %v2666_v51 = vadd.f32 %v2665_v48, %v2664_v3 }
 0x22e   :  { %v2366_v22 = vadd.f32 %v2365_v41, %v9199_v0  ;;  %v2367_v54 = vpop.f32.mrb[13].mxu1  ;;  %v2700_v61 = vsel %vm99_vm6, %v2689_v44, 0.0 }
 0x22f   :  { %v2368_v24 = vadd.f32 %v2367_v54, %v9199_v0  ;;  %v2701_v50 = vadd.f32 %v2700_v61, %v2699_v10 }
 0x230   :  { %v9385_v11 = vmax.f32 %v2366_v22, 0.0 }
 0x231   :  { %v9387_v56 = vmax.f32 %v2368_v24, 0.0 }
 0x232   :  { %v2667_v15 = vsel %vm99_vm6, %v9385_v11, 0.0  ;;  %v2690_v59 = vmul.f32 %v9385_v11, %v9385_v11 }
 0x233   :  { %v2691_v55 = vmul.f32 %v9387_v56, %v9387_v56  ;;  %v2668_v36 = vadd.f32 %v2667_v15, %v2666_v51  ;;  %v2669_v43 = vsel %vm99_vm6, %v9387_v56, 0.0 }
 0x234   :  { %v2702_v14 = vsel %vm99_vm6, %v2690_v59, 0.0 }
 0x235   :  { %v2436_v34 = vpop.f32.mrb[14].mxu0  ;;  %v2703_v8 = vadd.f32 %v2702_v14, %v2701_v50  ;;  %v2704_v12 = vsel %vm99_vm6, %v2691_v55, 0.0  ;;  %v2670_v33 = vadd.f32 %v2669_v43, %v2668_v36 }
 0x236   :  { %v2437_v18 = vadd.f32 %v2436_v34, %v9199_v0  ;;  %v2438_v32 = vpop.f32.mrb[15].mxu0 }
 0x237   :  { %v2439_v46 = vadd.f32 %v2438_v32, %v9199_v0  ;;  %v2705_v38 = vadd.f32 %v2704_v12, %v2703_v8 }
 0x238   :  { %v9401_v4 = vmax.f32 %v2437_v18, 0.0 }
 0x239   :  { %v9403_v49 = vmax.f32 %v2439_v46, 0.0 }
 0x23a   :  { %v2671_v27 = vsel %vm99_vm6, %v9401_v4, 0.0  ;;  %v2692_v20 = vmul.f32 %v9401_v4, %v9401_v4 }
 0x23b   :  { %v2693_v57 = vmul.f32 %v9403_v49, %v9403_v49  ;;  %v2672_v53 = vadd.f32 %v2671_v27, %v2670_v33  ;;  %v2673_v41 = vsel %vm99_vm6, %v9403_v49, 0.0 }
 0x23c   :  { %v2706_v29 = vsel %vm99_vm6, %v2692_v20, 0.0 }
 0x23d   :  { %v2507_v44 = vpop.f32.mrb[14].mxu1  ;;  %v2707_v22 = vadd.f32 %v2706_v29, %v2705_v38  ;;  %v2708_v24 = vsel %vm99_vm6, %v2693_v57, 0.0  ;;  %v2674_v61 = vadd.f32 %v2673_v41, %v2672_v53 }
 0x23e   :  { %v2508_v3 = vadd.f32 %v2507_v44, %v9199_v0  ;;  %v2509_v48 = vpop.f32.mrb[15].mxu1 }
 0x23f   :  { %v2510_v54 = vadd.f32 %v2509_v48, %v9199_v0  ;;  %v2709_v50 = vadd.f32 %v2708_v24, %v2707_v22 }
 0x240   :  { %v9417_v10 = vmax.f32 %v2508_v3, 0.0 }
 0x241   :  { %v9419_v51 = vmax.f32 %v2510_v54, 0.0 }
 0x242   :  { %v2675_v15 = vsel %vm99_vm6, %v9417_v10, 0.0  ;;  %v2694_v59 = vmul.f32 %v9417_v10, %v9417_v10 }
 0x243   :  { %v2695_v55 = vmul.f32 %v9419_v51, %v9419_v51  ;;  %v2676_v36 = vadd.f32 %v2675_v15, %v2674_v61  ;;  %v2677_v43 = vsel %vm99_vm6, %v9419_v51, 0.0 }
 0x244   :  { %v2710_v14 = vsel %vm99_vm6, %v2694_v59, 0.0 }
 0x245   :  { %v2649_v34 = vpop.f32.mrb[16].mxu1  ;;  %v2711_v8 = vadd.f32 %v2710_v14, %v2709_v50  ;;  %v2712_v12 = vsel %vm99_vm6, %v2695_v55, 0.0  ;;  %v2678_v38 = vadd.f32 %v2677_v43, %v2676_v36 }
 0x246   :  { %v2650_v18 = vadd.f32 %v2649_v34, %v9199_v0  ;;  %v5650_v32 = vpop.f32.mrb[17].mxu1 }
 0x247   :  { %v2578_v46 = vpop.f32.mrb[16].mxu0  ;;  %v2713_v53 = vadd.f32 %v2712_v12, %v2711_v8 }
 0x248   :  { %v2579_v33 = vadd.f32 %v2578_v46, %v9199_v0  ;;  %v2580_v27 = vpop.f32.mrb[17].mxu0  ;;  %v2663_v20 = vmax.f32 %v2650_v18, 0.0 }
 0x249   :  { %v2581_v29 = vadd.f32 %v2580_v27, %v9199_v0 }
 0x24a   :  { %v9434_v57 = vmax.f32 %v2579_v33, 0.0  ;;  %v2698_v48 = vmul.f32 %v2663_v20, %v2663_v20  ;;  %v2683_v15 = vsel %vm989_vm0, %v2663_v20, 0.0 }
 0x24b   :  { %v9436_v44 = vmax.f32 %v2581_v29, 0.0 }
 0x24c   :  { %v2679_v41 = vsel %vm99_vm6, %v9434_v57, 0.0  ;;  %v2696_v3 = vmul.f32 %v9434_v57, %v9434_v57  ;;  %v2718_v36 = vsel %vm989_vm0, %v2698_v48, 0.0 }
 0x24d   :  { %v2680_v22 = vadd.f32 %v2679_v41, %v2678_v38  ;;  %v2681_v54 = vsel %vm99_vm6, %v9436_v44, 0.0  ;;  %v2697_v24 = vmul.f32 %v9436_v44, %v9436_v44 }
 0x24e   :  { %v2714_v61 = vsel %vm99_vm6, %v2696_v3, 0.0 }
 0x24f   :  { %v2682_v59 = vadd.f32 %v2681_v54, %v2680_v22  ;;  %v2715_v50 = vadd.f32 %v2714_v61, %v2713_v53  ;;  %v2716_v14 = vsel %vm99_vm6, %v2697_v24, 0.0  ;;  %v3124_v55 = vpop.f32.mrb[18].mxu0 }
 0x250   :  { %v3126_v34 = vpop.f32.mrb[19].mxu0  ;;  %v3125_v27 = vadd.f32 %v3124_v55, %v9199_v0 }
 0x251   :  { %v2684_v43 = vadd.f32 %v2683_v15, %v2682_v59  ;;  %v2717_v18 = vadd.f32 %v2716_v14, %v2715_v50  ;;  %v3127_v20 = vadd.f32 %v3126_v34, %v9199_v0 }
 0x252   :  { %v9452_v38 = vmax.f32 %v3125_v27, 0.0 }
 0x253   :  { %2685 = vadd.xlane.f32.xlu1 %v2684_v43  ;;  %v2719_v32 = vadd.f32 %v2718_v36, %v2717_v18  ;;  %v9454_v29 = vmax.f32 %v3127_v20, 0.0 }
 0x254   :  { %v3518_v41 = vmul.f32 %v9452_v38, %v9452_v38  ;;  %v3494_v54 = vsel %vm99_vm6, %v9452_v38, 0.0 }
 0x255   :  { %2720 = vadd.xlane.f32.xlu0 %v2719_v32  ;;  %v3195_v8 = vpop.f32.mrb[18].mxu1  ;;  %v3519_v3 = vmul.f32 %v9454_v29, %v9454_v29  ;;  %v3495_v24 = vsel %vm99_vm6, %v9454_v29, 0.0 }
 0x256   :  { %v3197_v46 = vpop.f32.mrb[19].mxu1  ;;  %v3196_v53 = vadd.f32 %v3195_v8, %v9199_v0  ;;  %v3529_v61 = vsel %vm99_vm6, %v3518_v41, 0.0  ;;  %v3496_v55 = vadd.f32 %v3495_v24, %v3494_v54 }
 0x257   :  { %v3198_v22 = vadd.f32 %v3197_v46, %v9199_v0  ;;  %v3530_v15 = vsel %vm99_vm6, %v3519_v3, 0.0 }
 0x258   :  { %v9461_v48 = vmax.f32 %v3196_v53, 0.0  ;;  %v3531_v34 = vadd.f32 %v3530_v15, %v3529_v61 }
 0x259   :  { %v9472_v50 = vmax.f32 %v3198_v22, 0.0 }
 0x25a   :  { %v3520_v59 = vmul.f32 %v9461_v48, %v9461_v48  ;;  %v3497_v36 = vsel %vm99_vm6, %v9461_v48, 0.0 }
 0x25b   :  { %v3521_v18 = vmul.f32 %v9472_v50, %v9472_v50  ;;  %v3498_v46 = vadd.f32 %v3497_v36, %v3496_v55  ;;  %v3499_v27 = vsel %vm99_vm6, %v9472_v50, 0.0 }
 0x25c   :  { %v3532_v43 = vsel %vm99_vm6, %v3520_v59, 0.0 }
 0x25d   :  { %v3533_v20 = vadd.f32 %v3532_v43, %v3531_v34  ;;  %v3534_v53 = vsel %vm99_vm6, %v3521_v18, 0.0  ;;  %v3500_v24 = vadd.f32 %v3499_v27, %v3498_v46 }
 0x25e   :  { %v3266_v12 = vpop.f32.mrb[20].mxu0 }
 0x25f   :  { %v3268_v33 = vpop.f32.mrb[21].mxu0  ;;  %v3267_v14 = vadd.f32 %v3266_v12, %v9199_v0  ;;  %v3535_v59 = vadd.f32 %v3534_v53, %v3533_v20 }
 0x260   :  { %v3269_v8 = vadd.f32 %v3268_v33, %v9199_v0 }
 0x261   :  { %v9480_v32 = vmax.f32 %v3267_v14, 0.0 }
 0x262   :  { %v9488_v3 = vmax.f32 %v3269_v8, 0.0 }
 0x263   :  { %v3522_v41 = vmul.f32 %v9480_v32, %v9480_v32  ;;  %v3501_v33 = vsel %vm99_vm6, %v9480_v32, 0.0 }
 0x264   :  { %v3523_v55 = vmul.f32 %v9488_v3, %v9488_v3  ;;  %v3502_v36 = vadd.f32 %v3501_v33, %v3500_v24  ;;  %v3503_v34 = vsel %vm99_vm6, %v9488_v3, 0.0 }
 0x265   :  { %v3536_v14 = vsel %vm99_vm6, %v3522_v41, 0.0 }
 0x266   :  { %v3537_v8 = vadd.f32 %v3536_v14, %v3535_v59  ;;  %v3538_v46 = vsel %vm99_vm6, %v3523_v55, 0.0  ;;  %v3504_v20 = vadd.f32 %v3503_v34, %v3502_v36 }
 0x275   :  { %v3337_v12 = vpop.f32.mrb[20].mxu1 }
 0x276   :  { %v3338_v22 = vadd.f32 %v3337_v12, %v9199_v0  ;;  %v3339_v54 = vpop.f32.mrb[21].mxu1 }
 0x277   :  { %v3340_v15 = vadd.f32 %v3339_v54, %v9199_v0 }
 0x278   :  { %v9493_v61 = vmax.f32 %v3338_v22, 0.0  ;;  %v3539_v22 = vadd.f32 %v3538_v46, %v3537_v8 }
 0x279   :  { %v9503_v18 = vmax.f32 %v3340_v15, 0.0 }
 0x27a   :  { %v3524_v43 = vmul.f32 %v9493_v61, %v9493_v61  ;;  %v3505_v27 = vsel %vm99_vm6, %v9493_v61, 0.0 }
 0x27b   :  { %v3525_v53 = vmul.f32 %v9503_v18, %v9503_v18  ;;  %v3506_v54 = vadd.f32 %v3505_v27, %v3504_v20  ;;  %v3507_v59 = vsel %vm99_vm6, %v9503_v18, 0.0 }
 0x27c   :  { %v3540_v12 = vsel %vm99_vm6, %v3524_v43, 0.0 }
 0x27d   :  { %v3541_v62 = vadd.f32 %v3540_v12, %v3539_v22  ;;  %v3542_v34 = vsel %vm99_vm6, %v3525_v53, 0.0  ;;  %v3508_v8 = vadd.f32 %v3507_v59, %v3506_v54 }
 0x27f   :  { %v3479_v41 = vpop.f32.mrb[22].mxu1 }
 0x280   :  { %v3480_v24 = vadd.f32 %v3479_v41, %v9199_v0  ;;  %v3408_v33 = vpop.f32.mrb[22].mxu0  ;;  %v5661_v15 = vpop.f32.mrb[23].mxu1  ;;  %v3543_v41 = vadd.f32 %v3542_v34, %v3541_v62 }
 0x281   :  { %v3409_v14 = vadd.f32 %v3408_v33, %v9199_v0  ;;  %v3410_v55 = vpop.f32.mrb[23].mxu0 }
 0x282   :  { %v3411_v36 = vadd.f32 %v3410_v55, %v9199_v0  ;;  %v3493_v43 = vmax.f32 %v3480_v24, 0.0 }
 0x283   :  { %v9517_v9 = vmax.f32 %v3409_v14, 0.0 }
 0x284   :  { %v9519_v46 = vmax.f32 %v3411_v36, 0.0  ;;  %v3528_v53 = vmul.f32 %v3493_v43, %v3493_v43  ;;  %v3513_v59 = vsel %vm989_vm0, %v3493_v43, 0.0 }
 0x285   :  { %v3509_v27 = vsel %vm99_vm6, %v9517_v9, 0.0  ;;  %v3526_v20 = vmul.f32 %v9517_v9, %v9517_v9 }
 0x286   :  { %v3510_v33 = vadd.f32 %v3509_v27, %v3508_v8  ;;  %v3511_v12 = vsel %vm99_vm6, %v9519_v46, 0.0  ;;  %v3527_v0 = vmul.f32 %v9519_v46, %v9519_v46  ;;  %v3548_v62 = vsel %vm989_vm0, %v3528_v53, 0.0 }
 0x287   :  { %v3544_v22 = vsel %vm99_vm6, %v3526_v20, 0.0  ;;  %vm10979_vm0 = vcmask 1041408  }
 0x288   :  { %v3512_v54 = vadd.f32 %v3511_v12, %v3510_v33  ;;  %v3545_v24 = vadd.f32 %v3544_v22, %v3543_v41  ;;  %v3546_v15 = vsel %vm99_vm6, %v3527_v0, 0.0 }
 0x28a   :  { %v3514_v14 = vadd.f32 %v3513_v59, %v3512_v54  ;;  %v3547_v55 = vadd.f32 %v3546_v15, %v3545_v24 }
 0x28c   :  { %3515 = vadd.xlane.f32.xlu1 %v3514_v14  ;;  %v3549_v36 = vadd.f32 %v3548_v62, %v3547_v55  ;;  %v3558_v55 = vld [vmem:[%s10969_s24] sm:$0xf] }
 0x28e   :  { %3550 = vadd.xlane.f32.xlu0 %v3549_v36 }
 0x29a   :  { %v993_v34 = vpop.xlane.xlu0 %992 }
 0x29e   :  { %v1028_v8 = vpop.xlane.xlu0 %1027 }
 0x2b7   :  { %v1849_v27 = vpop.xlane.xlu1 %1848 }
 0x2b8   :  { %v1850_v23 = vadd.f32 %v1849_v27, %v993_v34 }
 0x2b9   :  { %v1884_v45 = vpop.xlane.xlu0 %1883 }
 0x2ba   :  { %v1885_v33 = vadd.f32 %v1884_v45, %v1028_v8  ;;  %v3562_v45 = vld [vmem:[%s10970_s26] sm:$0xf] }
 0x2e0   :  { %v2686_v5 = vpop.xlane.xlu1 %2685 }
 0x2e1   :  { %v2687_v41 = vadd.f32 %v2686_v5, %v1850_v23 }
 0x2e2   :  { %v2721_v20 = vpop.xlane.xlu0 %2720 }
 0x2e3   :  { %v2722_v0 = vadd.f32 %v2721_v20, %v1885_v33 }
 0x319   :  { %v3516_v12 = vpop.xlane.xlu1 %3515 }
 0x31a   :  { %v3517_v22 = vadd.f32 %v3516_v12, %v2687_v41 }
 0x31b   :  { %v3551_v43 = vpop.xlane.xlu0 %3550 }
 0x31c   :  { %v3554_v54 = vmul.f32 0.00018939393, %v3517_v22  ;;  %v3552_v24 = vadd.f32 %v3551_v43, %v2722_v0 }
 0x31e   :  { %v3556_v15 = vmul.f32 %v3554_v54, %v3554_v54  ;;  %v3555_v53 = vmul.f32 0.00018939393, %v3552_v24 }
 0x320   :  { %v3557_v59 = vsub.f32 %v3555_v53, %v3556_v15 }
 0x322   :  { %v3559_v14 = vadd.f32 1e-05, %v3557_v59 }
 0x324   :  { %7126 = vrsqrt.f32 %v3559_v14 }
 0x32e   :  { %v7127_v62 = vpop.eup %7126 }
 0x32f   :  { %v3561_v36 = vmul.f32 %v7127_v62, %v3558_v55 }
 0x331   :  { %3567 = vperm.xlu1 %6809, %v3561_v36   ;;  %v3563_v5 = vmul.f32 %v3561_v36, %v3554_v54 }
 0x333   :  { %v3564_v23 = vsub.f32 %v3562_v45, %v3563_v5 }
 0x335   :  { %3582 = vperm.xlu0 %6810, %v3564_v23  }
 0x3b0   :  { %v9539_v34 = vpop.permute.xlu1 %3567 }
 0x3b1   :  { %v3579_v8 = vmul.f32 %v9539_v34, %v9270_v7  ;;  %v3604_v27 = vmul.f32 %v9539_v34, %v9353_v16  ;;  %v3574_v20 = vmul.f32 %v9539_v34, %v9237_v35  ;;  %v3599_v33 = vmul.f32 %v9539_v34, %v9318_v47 }
 0x3b2   :  { %v3630_v41 = vmul.f32 %v9539_v34, %v9403_v49  ;;  %v3650_v0 = vmul.f32 %v9539_v34, %v9488_v3  ;;  %v3575_v7 = vmul.f32 %v9539_v34, %v9241_v19  ;;  %v3600_v16 = vmul.f32 %v9539_v34, %v9321_v31 }
 0x3b3   :  { %v3634_v35 = vmul.f32 %v9539_v34, %v9436_v44  ;;  %v3654_v19 = vmul.f32 %v9539_v34, %v9519_v46  ;;  %v3576_v31 = vmul.f32 %v9539_v34, %v9239_v39  ;;  %v3601_v55 = vmul.f32 %v9539_v34, %v9328_v30 }
 0x3b4   :  { %v9551_v12 = vpop.permute.xlu0 %3582  ;;  %v3570_v46 = vmul.f32 %v9539_v34, %v9204_v60  ;;  %v3577_v39 = vmul.f32 %v9539_v34, %v9249_v28  ;;  %v3602_v62 = vmul.f32 %v9539_v34, %v9334_v17  ;;  %v3571_v36 = vmul.f32 %v9539_v34, %v9206_v2 }
 0x3b5   :  { %v3594_v22 = vadd.f32 %v9551_v12, %v3579_v8  ;;  %v3614_v47 = vadd.f32 %v3604_v27, %v9551_v12  ;;  %v3589_v49 = vadd.f32 %v9551_v12, %v3574_v20  ;;  %v3609_v43 = vadd.f32 %v3599_v33, %v9551_v12 }
 0x3b6   :  { %v3640_v54 = vadd.f32 %v3630_v41, %v9551_v12  ;;  %v3660_v3 = vadd.f32 %v3650_v0, %v9551_v12  ;;  %v3590_v15 = vadd.f32 %v9551_v12, %v3575_v7  ;;  %v3610_v53 = vadd.f32 %v3600_v16, %v9551_v12 }
 0x3b7   :  { %v3624_v24 = vmax.f32 %v3594_v22, %v3614_v47  ;;  %v9571_v44 = vmax.f32 %v3589_v49, %v3609_v43  ;;  %v3644_v59 = vadd.f32 %v3634_v35, %v9551_v12  ;;  %v3664_v14 = vadd.f32 %v3654_v19, %v9551_v12 }
 0x3b8   :  { %v3591_v30 = vadd.f32 %v9551_v12, %v3576_v31  ;;  %v3611_v45 = vadd.f32 %v3601_v55, %v9551_v12  ;;  %v3585_v60 = vadd.f32 %v9551_v12, %v3570_v46  ;;  %v3595_v5 = vmul.f32 %v9539_v34, %v9292_v40 }
 0x3b9   :  { %3722 = vrot.lane.b32.xlu0 %v3624_v24, %s7178_s27  ;;  %3698 = vrot.lane.b32.xlu1 %v9571_v44, %s7178_s27  ;;  %v9595_v23 = vmax.f32 %v3640_v54, %v3660_v3  ;;  %v9597_v8 = vmax.f32 %v3590_v15, %v3610_v53  ;;  %v3586_v28 = vadd.f32 %v9551_v12, %v3571_v36 }
 0x3ba   :  { %v3596_v17 = vmul.f32 %v9539_v34, %v9294_v52  ;;  %v3674_v27 = vmax.f32 %v3644_v59, %v3664_v14  ;;  %v3592_v2 = vadd.f32 %v9551_v12, %v3577_v39  ;;  %v3605_v20 = vadd.f32 %v3595_v5, %v9551_v12 }
 0x3bb   :  { %v3625_v33 = vmul.f32 %v9539_v34, %v9369_v6  ;;  %v3626_v41 = vmul.f32 %v9539_v34, %v9371_v25  ;;  %v3645_v52 = vmul.f32 %v9539_v34, %v9452_v38  ;;  %v9615_v0 = vmax.f32 %v3591_v30, %v3611_v45 }
 0x3bc   :  { %v3606_v40 = vadd.f32 %v3596_v17, %v9551_v12  ;;  %v3612_v7 = vadd.f32 %v3602_v62, %v9551_v12  ;;  %v9618_v16 = vmax.f32 %v3585_v60, %v3605_v20  ;;  %v3646_v6 = vmul.f32 %v9539_v34, %v9454_v29 }
 0x3bd   :  { %3753 = vrot.lane.b32.xlu0 %v9595_v23, %s7178_s27  ;;  %3700 = vrot.lane.b32.xlu1 %v9597_v8, %s7178_s27  ;;  %v3635_v22 = vadd.f32 %v3625_v33, %v9551_v12  ;;  %v3636_v47 = vadd.f32 %v3626_v41, %v9551_v12  ;;  %v3655_v25 = vadd.f32 %v3645_v52, %v9551_v12 }
 0x3be   :  { %v9622_v35 = vmax.f32 %v3586_v28, %v3606_v40  ;;  %v3631_v38 = vmul.f32 %v9539_v34, %v9417_v10  ;;  %v3656_v49 = vadd.f32 %v3646_v6, %v9551_v12  ;;  %v3651_v29 = vmul.f32 %v9539_v34, %v9493_v61 }
 0x3bf   :  { %v9635_v43 = vmax.f32 %v3592_v2, %v3612_v7  ;;  %v9641_v10 = vmax.f32 %v3635_v22, %v3655_v25  ;;  %v3632_v24 = vmul.f32 %v9539_v34, %v9419_v51  ;;  %v3652_v15 = vmul.f32 %v9539_v34, %v9503_v18 }
 0x3c0   :  { %v3641_v54 = vadd.f32 %v3631_v38, %v9551_v12  ;;  %v6821_v3 = vpack.i.bf16 %v9622_v35, %v9618_v16  ;;  %v3661_v19 = vadd.f32 %v3651_v29, %v9551_v12  ;;  %v9643_v31 = vmax.f32 %v3636_v47, %v3656_v49 }
 0x3c1   :  { %3775 = vrot.lane.b32.xlu0 %v3674_v27, %s7178_s27  ;;  %3709 = vrot.lane.b32.xlu1 %v9615_v0, %s7178_s27  ;;  %v3642_v61 = vadd.f32 %v3632_v24, %v9551_v12  ;;  %v3662_v53 = vadd.f32 %v3652_v15, %v9551_v12  ;;  %v3578_v51 = vmul.f32 %v9539_v34, %v9267_v21 }
 0x3c2   :  { %v9654_v59 = vmax.f32 %v3641_v54, %v3661_v19  ;;  %v6826_v14 = vpack.i.bf16 %v9643_v31, %v9641_v10  ;;  %v3603_v18 = vmul.f32 %v9539_v34, %v9351_v26  ;;  %v3572_v55 = vmul.f32 %v9539_v34, %v9212_v37 }
 0x3c3   :  { %v3573_v46 = vmul.f32 %v9539_v34, %v9225_v63  ;;  %v3597_v39 = vmul.f32 %v9539_v34, %v9284_v42  ;;  %v3598_v21 = vmul.f32 %v9539_v34, %v9289_v1  ;;  %v9673_v62 = vmax.f32 %v3642_v61, %v3662_v53 }
 0x3c4   :  { %v3593_v26 = vadd.f32 %v9551_v12, %v3578_v51  ;;  %v3613_v37 = vadd.f32 %v3603_v18, %v9551_v12  ;;  %v3587_v36 = vadd.f32 %v9551_v12, %v3572_v55  ;;  %v3629_v5 = vmul.f32 %v9539_v34, %v9401_v4 }
 0x3c5   :  { %3711 = vrot.lane.b32.xlu1 %v9635_v43, %s7178_s27  ;;  %6822 = vrot.lane.b32.xlu0 %v6821_v3, %s7178_s27  ;;  %v3588_v30 = vadd.f32 %v9551_v12, %v3573_v46  ;;  %v3607_v45 = vadd.f32 %v3597_v39, %v9551_v12  ;;  %v3608_v63 = vadd.f32 %v3598_v21, %v9551_v12 }
 0x3c6   :  { %v9683_v42 = vmax.f32 %v3593_v26, %v3613_v37  ;;  %v3649_v28 = vmul.f32 %v9539_v34, %v9480_v32  ;;  %v3639_v27 = vadd.f32 %v3629_v5, %v9551_v12  ;;  %v3633_v20 = vmul.f32 %v9539_v34, %v9434_v57 }
 0x3c7   :  { %v3617_v1 = vmax.f32 %v3587_v36, %v3607_v45  ;;  %v3618_v60 = vmax.f32 %v3588_v30, %v3608_v63  ;;  %v3653_v33 = vmul.f32 %v9539_v34, %v9517_v9  ;;  %v3627_v40 = vmul.f32 %v9539_v34, %v9385_v11 }
 0x3c8   :  { %v3659_v2 = vadd.f32 %v3649_v28, %v9551_v12  ;;  %v3628_v4 = vmul.f32 %v9539_v34, %v9387_v56  ;;  %v3647_v32 = vmul.f32 %v9539_v34, %v9461_v48  ;;  %v3648_v41 = vmul.f32 %v9539_v34, %v9472_v50 }
 0x3c9   :  { %3762 = vrot.lane.b32.xlu1 %v9654_v59, %s7178_s27  ;;  %6827 = vrot.lane.b32.xlu0 %v6826_v14, %s7178_s27  ;;  %v6811_v17 = vpack.i.bf16 %v3618_v60, %v3617_v1  ;;  %v3643_v52 = vadd.f32 %v3633_v20, %v9551_v12  ;;  %v3663_v57 = vadd.f32 %v3653_v33, %v9551_v12 }
 0x3ca   :  { %v3637_v9 = vadd.f32 %v3627_v40, %v9551_v12  ;;  %v9709_v7 = vmax.f32 %v3639_v27, %v3659_v2  ;;  %v3638_v11 = vadd.f32 %v3628_v4, %v9551_v12  ;;  %v3657_v6 = vadd.f32 %v3647_v32, %v9551_v12 }
 0x3cb   :  { %v3658_v56 = vadd.f32 %v3648_v41, %v9551_v12  ;;  %v3673_v48 = vmax.f32 %v3643_v52, %v3663_v57 }
 0x3cc   :  { %v3667_v22 = vmax.f32 %v3637_v9, %v3657_v6 }
 0x3cd   :  { %3764 = vrot.lane.b32.xlu1 %v9673_v62, %s7178_s27  ;;  %v9716_v50 = vmax.f32 %v3638_v11, %v3658_v56 }
 0x3cf   :  { %v6816_v34 = vpack.i.bf16 %v9716_v50, %v3667_v22 }
 0x3d1   :  { %3720 = vrot.lane.b32.xlu1 %v9683_v42, %s7178_s27 }
 0x3d5   :  { %6812 = vrot.lane.b32.xlu1 %v6811_v17, %s7178_s27 }
 0x3d9   :  { %3751 = vrot.lane.b32.xlu1 %v9709_v7, %s7178_s27 }
 0x3dd   :  { %3773 = vrot.lane.b32.xlu1 %v3673_v48, %s7178_s27 }
 0x3e1   :  { %6817 = vrot.lane.b32.xlu1 %v6816_v34, %s7178_s27 }
 0x42b   :  { %v3699_v47 = vpop.permute.xlu1 %3698  ;;  %v3723_v46 = vpop.permute.xlu0 %3722 }
 0x42c   :  { %v9757_v26 = vmax.f32 %v3618_v60, %v3699_v47 }
 0x42f   :  { %v3701_v25 = vpop.permute.xlu1 %3700 }
 0x430   :  { %v3702_v51 = vsel %vm3681_vm1, %v3699_v47, %v3701_v25 }
 0x431   :  { %v9751_v39 = vmax.f32 %v9571_v44, %v3702_v51  ;;  %v3754_v44 = vpop.permute.xlu0 %3753 }
 0x433   :  { %v3710_v38 = vpop.permute.xlu1 %3709  ;;  %v6841_v30 = vpack.i.bf16 %v9751_v39, %v9757_v26 }
 0x434   :  { %v9722_v49 = vmax.f32 %v9597_v8, %v3710_v38 }
 0x436   :  { %3902 = vrot.lane.b32.xlu0 %v9722_v49, %s7179_s28  ;;  %v3915_v57 = vrot.slane %v9722_v49, 4 }
 0x437   :  { %v3712_v12 = vpop.permute.xlu1 %3711 }
 0x438   :  { %v3713_v19 = vsel %vm3681_vm1, %v3710_v38, %v3712_v12 }
 0x439   :  { %v9733_v8 = vmax.f32 %v9615_v0, %v3713_v19 }
 0x43b   :  { %v3763_v29 = vpop.permute.xlu1 %3762  ;;  %v6831_v14 = vpack.i.bf16 %v9733_v8, %v9722_v49 }
 0x43c   :  { %v9727_v54 = vmax.f32 %v9595_v23, %v3763_v29 }
 0x43e   :  { %4352 = vrot.lane.b32.xlu0 %v9727_v54, %s7179_s28 }
 0x43f   :  { %v3765_v3 = vpop.permute.xlu1 %3764 }
 0x440   :  { %v3766_v36 = vsel %vm3681_vm1, %v3763_v29, %v3765_v3 }
 0x441   :  { %v3770_v63 = vmax.f32 %v9654_v59, %v3766_v36 }
 0x443   :  { %v3721_v24 = vpop.permute.xlu1 %3720  ;;  %v6846_v28 = vpack.i.bf16 %v3770_v63, %v9727_v54  ;;  %v3879_v6 = vrot.slane %v3770_v63, 4 }
 0x444   :  { %v9736_v15 = vmax.f32 %v9635_v43, %v3721_v24  ;;  %v3724_v40 = vsel %vm3681_vm1, %v3721_v24, %v3723_v46 }
 0x445   :  { %v3728_v41 = vmax.f32 %v9683_v42, %v3724_v40  ;;  %v3847_v42 = vrot.slane %v9757_v26, 4 }
 0x446   :  { %3967 = vrot.lane.b32.xlu1 %v9736_v15, %s7179_s28  ;;  %v4393_v3 = vrot.slane %v9736_v15, 4 }
 0x447   :  { %v6813_v61 = vpop.permute.xlu1 %6812  ;;  %v6916_v56 = vpack.i.bf16 %v3728_v41, %v3879_v6 }
 0x448   :  { %v6815_v23 = vunpack.i.h.bf16 %v6813_v61  ;;  %v6814_v53 = vunpack.i.l.bf16 %v6813_v61 }
 0x44a   :  { %v3691_v18 = vsel %vm3681_vm1, %v6814_v53, %v6815_v23  ;;  %v9745_v55 = vmax.f32 %v9622_v35, %v6814_v53  ;;  %6832 = vrot.lane.b32.xlu1 %v6831_v14, %s7180_s4 }
 0x44b   :  { %v9748_v0 = vmax.f32 %v3617_v1, %v3691_v18  ;;  %v3752_v43 = vpop.permute.xlu1 %3751 }
 0x44c   :  { %v3755_v20 = vsel %vm3681_vm1, %v3752_v43, %v3754_v44  ;;  %v3786_v23 = vrot.slane %v9745_v55, 4 }
 0x44d   :  { %v9755_v21 = vpack.i.bf16 %v9748_v0, %v9745_v55  ;;  %v9795_v4 = vmax.f32 %v9709_v7, %v3755_v20  ;;  %v3848_v7 = vrot.slane %v9751_v39, 4  ;;  %v3787_v53 = vrot.slane %v9748_v0, 4 }
 0x44f   :  { %v3774_v37 = vpop.permute.xlu1 %3773  ;;  %6837 = vrot.lane.b32.xlu1 %v9755_v21, %s7162_s25  ;;  %v6906_v11 = vpack.i.bf16 %v3848_v7, %v3847_v42  ;;  %v3818_v38 = vrot.slane %v9795_v4, 4 }
 0x450   :  { %v9762_v35 = vmax.f32 %v9673_v62, %v3774_v37  ;;  %v3776_v62 = vpop.permute.xlu0 %3775 }
 0x451   :  { %v3777_v17 = vsel %vm3681_vm1, %v3774_v37, %v3776_v62  ;;  %v6971_v37 = vpack.i.bf16 %v3879_v6, %v9733_v8 }
 0x452   :  { %4416 = vrot.lane.b32.xlu0 %v9762_v35, %s7179_s28  ;;  %v3781_v59 = vmax.f32 %v3673_v48, %v3777_v17  ;;  %v3916_v48 = vrot.slane %v9733_v8, 4  ;;  %v3944_v12 = vrot.slane %v9762_v35, 4 }
 0x453   :  { %v6818_v45 = vpop.permute.xlu1 %6817  ;;  %6842 = vrot.lane.b32.xlu1 %v6841_v30, %s7162_s25 }
 0x454   :  { %v6820_v1 = vunpack.i.h.bf16 %v6818_v45  ;;  %v6819_v60 = vunpack.i.l.bf16 %v6818_v45  ;;  %v6856_v32 = vpack.i.bf16 %v3781_v59, %v9762_v35  ;;  %v3945_v29 = vrot.slane %v3781_v59, 4  ;;  %v6823_v18 = vpop.permute.xlu0 %6822 }
 0x455   :  { %v6825_v36 = vunpack.i.h.bf16 %v6823_v18 }
 0x456   :  { %v3744_v5 = vsel %vm3681_vm1, %v6819_v60, %v6820_v1  ;;  %3836 = vrot.lane.b32.xlu0 %v9757_v26, %s7179_s28  ;;  %v9779_v27 = vmax.f32 %v9643_v31, %v6819_v60  ;;  %v9792_v31 = vmax.f32 %v9716_v50, %v3752_v43  ;;  %v6931_v50 = vpack.i.bf16 %v3916_v48, %v3915_v57 }
 0x457   :  { %3904 = vrot.lane.b32.xlu1 %v9733_v8, %s7179_s28  ;;  %v9781_v2 = vmax.f32 %v3667_v22, %v3744_v5  ;;  %v3878_v22 = vrot.slane %v9727_v54, 4  ;;  %v6911_v54 = vpack.i.bf16 %v3916_v48, %v9795_v4  ;;  %v6926_v24 = vpack.i.bf16 %v3945_v29, %v3944_v12 }
 0x458   :  { %v6871_v52 = vpack.i.bf16 %v9795_v4, %v9792_v31  ;;  %v6891_v9 = vpack.i.bf16 %v9792_v31, %v3915_v57  ;;  %v3817_v25 = vrot.slane %v9792_v31, 4  ;;  %v3865_v14 = vrot.slane %v9779_v27, 4  ;;  %v6828_v35 = vpop.permute.xlu0 %6827 }
 0x459   :  { %v6866_v33 = vpack.i.bf16 %v9781_v2, %v9779_v27  ;;  %v6896_v34 = vpack.i.bf16 %v3878_v22, %v9736_v15  ;;  %v6901_v47 = vpack.i.bf16 %v3878_v22, %v9722_v49  ;;  %v4394_v49 = vrot.slane %v3728_v41, 4 }
 0x45a   :  { %6847 = vrot.lane.b32.xlu0 %v6846_v28, %s7181_s29  ;;  %v6961_v19 = vpack.i.bf16 %v3818_v38, %v3817_v25  ;;  %v6981_v15 = vpack.i.bf16 %v3787_v53, %v3786_v23  ;;  %v3866_v51 = vrot.slane %v9781_v2, 4  ;;  %v6951_v43 = vpack.i.bf16 %v3879_v6, %v3878_v22 }
 0x45b   :  { %6862 = vrot.lane.b32.xlu1 %v6841_v30, %s7182_s30  ;;  %v6966_v61 = vpack.i.bf16 %v4394_v49, %v4393_v3  ;;  %v6830_v44 = vunpack.i.h.bf16 %v6828_v35  ;;  %v6829_v45 = vunpack.i.l.bf16 %v6828_v35 }
 0x45c   :  { %v7001_v46 = vpack.i.bf16 %v3866_v51, %v3865_v14 }
 0x45d   :  { %v3735_v1 = vsel %vm3681_vm1, %v6829_v45, %v6830_v44 }
 0x45e   :  { %6852 = vrot.lane.b32.xlu0 %v6846_v28, %s7180_s4  ;;  %v9862_v60 = vmax.f32 %v9641_v10, %v3735_v1 }
 0x45f   :  { %6867 = vrot.lane.b32.xlu1 %v6866_v33, %s7162_s25 }
 0x462   :  { %6857 = vrot.lane.b32.xlu0 %v6856_v32, %s7180_s4 }
 0x463   :  { %3969 = vrot.lane.b32.xlu1 %v3728_v41, %s7179_s28 }
 0x466   :  { %6872 = vrot.lane.b32.xlu0 %v6871_v52, %s7162_s25 }
 0x467   :  { %4354 = vrot.lane.b32.xlu1 %v3770_v63, %s7179_s28 }
 0x46a   :  { %6892 = vrot.lane.b32.xlu0 %v6891_v9, %s7181_s29 }
 0x46b   :  { %4418 = vrot.lane.b32.xlu1 %v3781_v59, %s7179_s28 }
 0x46e   :  { %6907 = vrot.lane.b32.xlu0 %v6906_v11, %s7181_s29 }
 0x46f   :  { %6877 = vrot.lane.b32.xlu1 %v6841_v30, %s7180_s4  ;;  %v6824_v30 = vunpack.i.l.bf16 %v6823_v18 }
 0x471   :  { %v3682_v63 = vsel %vm3681_vm1, %v6824_v30, %v6825_v36  ;;  %vm10982_vm1 = vcmask 1045504  }
 0x472   :  { %6917 = vrot.lane.b32.xlu0 %v6916_v56, %s7180_s4  ;;  %v9859_v8 = vmax.f32 %v9618_v16, %v3682_v63 }
 0x473   :  { %6882 = vrot.lane.b32.xlu1 %v6866_v33, %s7181_s29 }
 0x474   :  { %v4268_v5 = vrot.slane %v9859_v8, 4 }
 0x476   :  { %6922 = vrot.lane.b32.xlu0 %v6906_v11, %s7182_s30  ;;  %v6996_v28 = vpack.i.bf16 %v4268_v5, %v9859_v8 }
 0x477   :  { %6887 = vrot.lane.b32.xlu1 %v6871_v52, %s7180_s4 }
 0x47a   :  { %6932 = vrot.lane.b32.xlu0 %v6931_v50, %s7182_s30 }
 0x47b   :  { %6897 = vrot.lane.b32.xlu1 %v6896_v34, %s7180_s4 }
 0x47e   :  { %6947 = vrot.lane.b32.xlu0 %v6906_v11, %s7162_s25 }
 0x47f   :  { %6902 = vrot.lane.b32.xlu1 %v6901_v47, %s7182_s30 }
 0x482   :  { %6957 = vrot.lane.b32.xlu0 %v6931_v50, %s7179_s28 }
 0x483   :  { %6912 = vrot.lane.b32.xlu1 %v6911_v54, %s7181_s29 }
 0x486   :  { %6962 = vrot.lane.b32.xlu0 %v6961_v19, %s7182_s30 }
 0x487   :  { %6927 = vrot.lane.b32.xlu1 %v6926_v24, %s7180_s4 }
 0x48a   :  { %6967 = vrot.lane.b32.xlu0 %v6966_v61, %s7179_s28 }
 0x48b   :  { %6937 = vrot.lane.b32.xlu1 %v6961_v19, %s7181_s29 }
 0x48e   :  { %6982 = vrot.lane.b32.xlu0 %v6981_v15, %s7181_s29 }
 0x48f   :  { %6942 = vrot.lane.b32.xlu1 %v6981_v15, %s7162_s25 }
 0x492   :  { %6987 = vrot.lane.b32.xlu0 %v6961_v19, %s7180_s4 }
 0x493   :  { %6952 = vrot.lane.b32.xlu1 %v6951_v43, %s7181_s29 }
 0x496   :  { %7002 = vrot.lane.b32.xlu0 %v7001_v46, %s7181_s29 }
 0x497   :  { %6972 = vrot.lane.b32.xlu1 %v6971_v37, %s7182_s30 }
 0x49a   :  { %7007 = vrot.lane.b32.xlu0 %v6906_v11, %s7179_s28 }
 0x49b   :  { %3838 = vrot.lane.b32.xlu1 %v9751_v39, %s7179_s28 }
 0x49f   :  { %6977 = vrot.lane.b32.xlu1 %v9755_v21, %s7182_s30 }
 0x4a3   :  { %4284 = vrot.lane.b32.xlu1 %v9862_v60, %s7162_s25 }
 0x4a7   :  { %6992 = vrot.lane.b32.xlu1 %v6981_v15, %s7182_s30 }
 0x4a8   :  { %v3903_v62 = vpop.permute.xlu0 %3902 }
 0x4a9   :  { %4004 = vrot.lane.b32.xlu0 %v3903_v62, %s7183_s0 }
 0x4ab   :  { %6997 = vrot.lane.b32.xlu1 %v6996_v28, %s7162_s25 }
 0x4af   :  { %7012 = vrot.lane.b32.xlu1 %v7001_v46, %s7182_s30  ;;  %s7195_s30 = smov [#allocation2]  }
 0x4b0   :  { %v4353_v10 = vpop.permute.xlu0 %4352 }
 0x4b8   :  { %v3968_v16 = vpop.permute.xlu1 %3967 }
 0x4b9   :  { %4048 = vrot.lane.b32.xlu0 %v3968_v16, %s7184_s23 }
 0x4bc   :  { %v6833_v21 = vpop.permute.xlu1 %6832 }
 0x4bd   :  { %4453 = vrot.lane.b32.xlu0 %v4353_v10, %s7183_s0  ;;  %v6835_v7 = vunpack.i.h.bf16 %v6833_v21  ;;  %v6834_v42 = vunpack.i.l.bf16 %v6833_v21 }
 0x4bf   :  { %v3862_v48 = vsel %vm3801_vm8, %v6834_v42, %v6835_v7  ;;  %v3909_v34 = vsel %vm99_vm6, %v6834_v42, %v3865_v14 }
 0x4c0   :  { %v3910_v12 = vsel %vm99_vm6, %v3862_v48, %v3866_v51 }
 0x4c1   :  { %v6838_v17 = vpop.permute.xlu1 %6837  ;;  %v7016_v3 = vpack.i.bf16 %v3910_v12, %v3909_v34 }
 0x4c2   :  { %v6840_v23 = vunpack.i.h.bf16 %v6838_v17  ;;  %v6839_v53 = vunpack.i.l.bf16 %v6838_v17 }
 0x4c4   :  { %v9874_v59 = vpop.permute.xlu0 %4416  ;;  %v3892_v35 = vsel %vm3891_vm9, %v6839_v53, %v6840_v23 }
 0x4c5   :  { %v9876_v20 = vpop.permute.xlu1 %6842 }
 0x4c6   :  { %v6844_v7 = vunpack.i.l.bf16 %v9876_v20 }
 0x4c8   :  { %v9878_v33 = vpop.permute.xlu0 %3836 }
 0x4c9   :  { %v3905_v40 = vpop.permute.xlu1 %3904 }
 0x4ca   :  { %v3906_v32 = vsel %vm3840_vm5, %v3903_v62, %v3905_v40 }
 0x4cb   :  { %4006 = vrot.lane.b32.xlu1 %v3906_v32, %s7183_s0  ;;  %v6845_v32 = vunpack.i.h.bf16 %v9876_v20 }
 0x4cc   :  { %v9882_v41 = vpop.permute.xlu0 %6847 }
 0x4cd   :  { %v9884_v52 = vpop.permute.xlu1 %6862  ;;  %v6849_v42 = vunpack.i.l.bf16 %v9882_v41 }
 0x4d0   :  { %v9886_v57 = vpop.permute.xlu0 %6852 }
 0x4d1   :  { %v9888_v9 = vpop.permute.xlu1 %6867  ;;  %v6855_v53 = vunpack.i.h.bf16 %v9886_v57 }
 0x4d4   :  { %v9890_v11 = vpop.permute.xlu0 %6857 }
 0x4d5   :  { %v3970_v6 = vpop.permute.xlu1 %3969 }
 0x4d6   :  { %v3971_v56 = vsel %vm3840_vm5, %v3968_v16, %v3970_v6 }
 0x4d7   :  { %4050 = vrot.lane.b32.xlu0 %v3971_v56, %s7184_s23 }
 0x4d8   :  { %v9895_v22 = vpop.permute.xlu0 %6872 }
 0x4d9   :  { %v4355_v50 = vpop.permute.xlu1 %4354  ;;  %v6874_v12 = vunpack.i.l.bf16 %v9895_v22 }
 0x4da   :  { %v4356_v47 = vsel %vm3840_vm5, %v4353_v10, %v4355_v50  ;;  %v3957_v50 = vsel %vm3891_vm9, %v6844_v7, %v6845_v32 }
 0x4db   :  { %4455 = vrot.lane.b32.xlu1 %v4356_v47, %s7183_s0  ;;  %v6875_v47 = vunpack.i.h.bf16 %v9895_v22 }
 0x4dc   :  { %v9901_v29 = vpop.permute.xlu0 %6892 }
 0x4dd   :  { %v9903_v54 = vpop.permute.xlu1 %4418  ;;  %v6894_v44 = vunpack.i.l.bf16 %v9901_v29 }
 0x4df   :  { %7017 = vrot.lane.b32.xlu1 %v7016_v3, %s7183_s0  ;;  %v3972_v28 = vsel %vm99_vm6, %v9757_v26, %v6894_v44  ;;  %v6850_v26 = vunpack.i.h.bf16 %v9882_v41 }
 0x4e0   :  { %v9906_v49 = vpop.permute.xlu0 %6907 }
 0x4e1   :  { %v9908_v19 = vpop.permute.xlu1 %6877  ;;  %v3939_v34 = vsel %vm3792_vm10, %v6849_v42, %v6850_v26  ;;  %v6910_v20 = vunpack.i.h.bf16 %v9906_v49 }
 0x4e4   :  { %v9910_v24 = vpop.permute.xlu0 %6917 }
 0x4e5   :  { %v6883_v61 = vpop.permute.xlu1 %6882 }
 0x4e6   :  { %v6885_v15 = vunpack.i.h.bf16 %v6883_v61  ;;  %v6884_v14 = vunpack.i.l.bf16 %v6883_v61  ;;  %v6909_v61 = vunpack.i.l.bf16 %v9906_v49  ;;  %v6869_v49 = vunpack.i.l.bf16 %v9888_v9 }
 0x4e8   :  { %v9913_v51 = vsel %vm3792_vm10, %v6884_v14, %v6885_v15  ;;  %v6923_v18 = vpop.permute.xlu0 %6922  ;;  %v6854_v15 = vunpack.i.l.bf16 %v9886_v57 }
 0x4e9   :  { %v6925_v43 = vunpack.i.h.bf16 %v6923_v18  ;;  %v6924_v46 = vunpack.i.l.bf16 %v6923_v18  ;;  %v9915_v37 = vpop.permute.xlu1 %6887 }
 0x4eb   :  { %v3899_v36 = vsel %vm3833_vm12, %v6924_v46, %v6925_v43  ;;  %v3913_v30 = vsel %vm99_vm6, %v3892_v35, %v6924_v46  ;;  %v6870_v43 = vunpack.i.h.bf16 %v9888_v9 }
 0x4ec   :  { %v3914_v45 = vsel %vm99_vm6, %v6840_v23, %v3899_v36  ;;  %v6933_v63 = vpop.permute.xlu0 %6932 }
 0x4ed   :  { %v7046_v1 = vpack.i.bf16 %v3914_v45, %v3913_v30  ;;  %v9922_v5 = vpop.permute.xlu1 %6897  ;;  %v6934_v56 = vunpack.i.l.bf16 %v6933_v63 }
 0x4ee   :  { %v6899_v62 = vunpack.i.l.bf16 %v9922_v5 }
 0x4ef   :  { %7047 = vrot.lane.b32.xlu1 %v7046_v1, %s7183_s0  ;;  %v3978_v46 = vsel %vm99_vm6, %v3957_v50, %v6934_v56  ;;  %v4314_v50 = vsel %vm3801_vm8, %v6854_v15, %v6855_v53 }
 0x4f0   :  { %v3974_v16 = vsel %vm99_vm6, %v6899_v62, %v3817_v25  ;;  %v9935_v10 = vpop.permute.xlu0 %6947  ;;  %v6935_v25 = vunpack.i.h.bf16 %v6933_v63 }
 0x4f1   :  { %v7021_v21 = vpack.i.bf16 %v3974_v16, %v3972_v28  ;;  %v9937_v17 = vpop.permute.xlu1 %6902  ;;  %v4406_v28 = vsel %vm3891_vm9, %v6874_v12, %v6875_v47  ;;  %v3853_v16 = vsel %vm3792_vm10, %v6909_v61, %v6910_v20  ;;  %v6900_v12 = vunpack.i.h.bf16 %v9922_v5 }
 0x4f2   :  { %v3964_v14 = vsel %vm3833_vm12, %v6934_v56, %v6935_v25  ;;  %v6905_v18 = vunpack.i.h.bf16 %v9937_v17  ;;  %v6904_v45 = vunpack.i.l.bf16 %v9937_v17  ;;  %v6949_v20 = vunpack.i.l.bf16 %v9935_v10 }
 0x4f3   :  { %7022 = vrot.lane.b32.xlu0 %v7021_v21, %s7184_s23  ;;  %v3979_v7 = vsel %vm99_vm6, %v6845_v32, %v3964_v14  ;;  %v6895_v32 = vunpack.i.h.bf16 %v9901_v29  ;;  %v3908_v14 = vsel %vm99_vm6, %v9748_v0, %v3853_v16 }
 0x4f4   :  { %v9940_v40 = vpop.permute.xlu0 %6957  ;;  %v4427_v26 = vsel %vm99_vm6, %v4406_v28, %v6905_v18 }
 0x4f5   :  { %v9946_v6 = vpop.permute.xlu1 %6912 }
 0x4f8   :  { %v9948_v48 = vpop.permute.xlu0 %6962 }
 0x4f9   :  { %v6928_v3 = vpop.permute.xlu1 %6927 }
 0x4fa   :  { %v6930_v41 = vunpack.i.h.bf16 %v6928_v3  ;;  %v6929_v23 = vunpack.i.l.bf16 %v6928_v3  ;;  %v6950_v3 = vunpack.i.h.bf16 %v9935_v10  ;;  %v10972_v10 = vld [vmem:[#allocation6_spill] sm:$0xff] }
 0x4fc   :  { %v3950_v35 = vsel %vm3801_vm8, %v6929_v23, %v6930_v41  ;;  %v3976_v36 = vsel %vm99_vm6, %v6849_v42, %v6929_v23  ;;  %v9964_v30 = vpop.permute.xlu0 %6967  ;;  %v6914_v42 = vunpack.i.l.bf16 %v9946_v6  ;;  %v3907_v23 = vsel %vm99_vm6, %v9745_v55, %v6909_v61 }
 0x4fd   :  { %v7026_v63 = vpack.i.bf16 %v3978_v46, %v3976_v36  ;;  %v6969_v57 = vunpack.i.l.bf16 %v9964_v30  ;;  %v9969_v1 = vpop.permute.xlu1 %6937  ;;  %v3977_v21 = vsel %vm99_vm6, %v3939_v34, %v3950_v35  ;;  %v4342_v35 = vsel %vm3891_vm9, %v6869_v49, %v6870_v43 }
 0x4fe   :  { %v7056_v56 = vpack.i.bf16 %v3979_v7, %v3977_v21  ;;  %v6919_v36 = vunpack.i.l.bf16 %v9910_v24  ;;  %v3873_v28 = vsel %vm3792_vm10, %v6895_v32, %v6914_v42  ;;  %v6965_v21 = vunpack.i.h.bf16 %v9948_v48 }
 0x4ff   :  { %v4425_v25 = vsel %vm99_vm6, %v6904_v45, %v6969_v57  ;;  %7027 = vrot.lane.b32.xlu0 %v7026_v63, %s7184_s23  ;;  %v6915_v63 = vunpack.i.h.bf16 %v9946_v6  ;;  %v6964_v55 = vunpack.i.l.bf16 %v9948_v48  ;;  %v7036_v16 = vpack.i.bf16 %v3908_v14, %v3907_v23 }
 0x500   :  { %v7031_v34 = vpack.i.bf16 %v4427_v26, %v4425_v25  ;;  %7057 = vrot.lane.b32.xlu1 %v7056_v56, %s7184_s23  ;;  %v3884_v7 = vsel %vm3801_vm8, %v6900_v12, %v6919_v36  ;;  %v4383_v49 = vsel %vm3891_vm9, %v6949_v20, %v6950_v3  ;;  %v6859_v42 = vunpack.i.l.bf16 %v9890_v11 }
 0x501   :  { %v6943_v41 = vpop.permute.xlu1 %6942  ;;  %v3912_v48 = vsel %vm99_vm6, %v3873_v28, %v3884_v7  ;;  %v6939_v23 = vunpack.i.l.bf16 %v9969_v1  ;;  %v4349_v20 = vsel %vm3833_vm12, %v6964_v55, %v6965_v21  ;;  %v6959_v28 = vunpack.i.l.bf16 %v9940_v40 }
 0x502   :  { %v6945_v46 = vunpack.i.h.bf16 %v6943_v41  ;;  %v6944_v53 = vunpack.i.l.bf16 %v6943_v41  ;;  %v6940_v41 = vunpack.i.h.bf16 %v9969_v1  ;;  %v4363_v21 = vsel %vm99_vm6, %v4342_v35, %v6964_v55 }
 0x503   :  { %7032 = vrot.lane.b32.xlu0 %v7031_v34, %s7184_s23  ;;  %v6920_v34 = vunpack.i.h.bf16 %v9910_v24  ;;  %v6960_v24 = vunpack.i.h.bf16 %v9940_v40  ;;  %v4364_v5 = vsel %vm99_vm6, %v6870_v43, %v4349_v20  ;;  %v6865_v40 = vunpack.i.h.bf16 %v9884_v52 }
 0x504   :  { %v4321_v0 = vsel %vm3891_vm9, %v6944_v53, %v6945_v46  ;;  %v4360_v61 = vsel %vm99_vm6, %v4314_v50, %v6945_v46  ;;  %v3921_v50 = vsel %vm3792_vm10, %v6894_v44, %v6915_v63  ;;  %v4423_v46 = vsel %vm99_vm6, %v6859_v42, %v4383_v49 }
 0x505   :  { %v4359_v6 = vsel %vm99_vm6, %v6854_v15, %v4321_v0  ;;  %v6953_v26 = vpop.permute.xlu1 %6952  ;;  %v3911_v15 = vsel %vm99_vm6, %v6895_v32, %v6900_v12  ;;  %v3930_v29 = vsel %vm3801_vm8, %v6899_v62, %v6920_v34  ;;  %v6970_v32 = vunpack.i.h.bf16 %v9964_v30  ;;  %v10976_v34 = vld [vmem:[#allocation8_spill] sm:$0xff] }
 0x506   :  { %v7066_v25 = vpack.i.bf16 %v4360_v61, %v4359_v6  ;;  %v6954_v56 = vunpack.i.l.bf16 %v6953_v26  ;;  %v7041_v53 = vpack.i.bf16 %v3912_v48, %v3911_v15  ;;  %v3973_v63 = vsel %vm99_vm6, %v9751_v39, %v3921_v50  ;;  %v10977_v50 = vld [vmem:[#allocation10_spill] sm:$0xff] }
 0x507   :  { %7037 = vrot.lane.b32.xlu0 %v7036_v16, %s7183_s0  ;;  %v4307_v62 = vsel %vm3792_vm10, %v6939_v23, %v6940_v41  ;;  %v3975_v9 = vsel %vm99_vm6, %v3930_v29, %v3818_v38  ;;  %v6864_v43 = vunpack.i.l.bf16 %v9884_v52  ;;  %v7081_v55 = vpack.i.bf16 %v4364_v5, %v4363_v21 }
 0x508   :  { %v4421_v14 = vsel %vm99_vm6, %v9792_v31, %v6954_v56  ;;  %7067 = vrot.lane.b32.xlu1 %v7066_v25, %s7183_s0  ;;  %v7051_v35 = vpack.i.bf16 %v3975_v9, %v3973_v63  ;;  %v4357_v17 = vsel %vm99_vm6, %v9779_v27, %v6939_v23  ;;  %v4335_v61 = vsel %vm3840_vm5, %v6959_v28, %v6960_v24  ;;  %v6983_v23 = vpop.permute.xlu0 %6982 }
 0x509   :  { %v7071_v44 = vpack.i.bf16 %v4423_v46, %v4421_v14  ;;  %v6973_v1 = vpop.permute.xlu1 %6972  ;;  %v6955_v16 = vunpack.i.h.bf16 %v6953_v26  ;;  %v4328_v30 = vsel %vm3833_vm12, %v6864_v43, %v6865_v40  ;;  %v4361_v27 = vsel %vm99_vm6, %v6864_v43, %v6959_v28 }
 0x50a   :  { %v6975_v12 = vunpack.i.h.bf16 %v6973_v1  ;;  %v6974_v36 = vunpack.i.l.bf16 %v6973_v1  ;;  %v6860_v49 = vunpack.i.h.bf16 %v9890_v11  ;;  %v6984_v9 = vunpack.i.l.bf16 %v6983_v23 }
 0x50b   :  { %7042 = vrot.lane.b32.xlu0 %v7041_v53, %s7183_s0  ;;  %v4369_v6 = vsel %vm3792_vm10, %v6954_v56, %v6955_v16  ;;  %v4420_v56 = vsel %vm3840_vm5, %v9874_v59, %v9903_v54  ;;  %v3783_v54 = vld [vmem:[%s10726_s6] sm:$0xff]  ;;  %v3805_v16 = vrot.slane %v9862_v60, 4  ;;  %vm4767_vm9 = vcmask 818176   ;;  %s7193_s6 = smov 98  }
 0x50c   :  { %v4413_v0 = vsel %vm3833_vm12, %v6905_v18, %v6975_v12  ;;  %v4390_v39 = vsel %vm3833_vm12, %v6904_v45, %v6974_v36  ;;  %7072 = vrot.lane.b32.xlu1 %v7071_v44, %s7184_s23  ;;  %v4399_v18 = vsel %vm3840_vm5, %v6969_v57, %v6970_v32  ;;  %v4358_v45 = vsel %vm99_vm6, %v9781_v2, %v4307_v62  ;;  %v6988_v20 = vpop.permute.xlu0 %6987 }
 0x50d   :  { %v4426_v38 = vsel %vm99_vm6, %v4390_v39, %v4399_v18  ;;  %v4428_v52 = vsel %vm99_vm6, %v6875_v47, %v4413_v0  ;;  %v7061_v57 = vpack.i.bf16 %v4358_v45, %v4357_v17  ;;  %v4362_v2 = vsel %vm99_vm6, %v4328_v30, %v4335_v61  ;;  %v3839_v41 = vpop.permute.xlu1 %3838 }
 0x50e   :  { %v7091_v7 = vpack.i.bf16 %v4428_v52, %v4426_v38  ;;  %v7076_v22 = vpack.i.bf16 %v4362_v2, %v4361_v27  ;;  %v4422_v47 = vsel %vm99_vm6, %v9795_v4, %v4369_v6  ;;  %v4376_v26 = vsel %vm3801_vm8, %v6859_v42, %v6860_v49  ;;  %v10971_v42 = vld [vmem:[#allocation7_spill] sm:$0xff] }
 0x50f   :  { %7052 = vrot.lane.b32.xlu0 %v7051_v35, %s7184_s23  ;;  %v4424_v25 = vsel %vm99_vm6, %v4376_v26, %v6950_v3  ;;  %v10973_v48 = vpack.i.bf16 %v10971_v42, %v10972_v10  ;;  %v10975_v3 = vld [vmem:[#allocation30_spill] sm:$0xff]  ;;  %v6880_v62 = vunpack.i.h.bf16 %v9908_v19  ;;  %v6879_v0 = vunpack.i.l.bf16 %v9908_v19 }
 0x510   :  { %7082 = vrot.lane.b32.xlu1 %v7081_v55, %s7183_s0  ;;  %v7086_v11 = vpack.i.bf16 %v4424_v25, %v4422_v47  ;;  %v7003_v46 = vpop.permute.xlu0 %7002  ;;  %v6985_v39 = vunpack.i.h.bf16 %v6983_v23  ;;  %v6990_v40 = vunpack.i.h.bf16 %v6988_v20  ;;  %v6989_v43 = vunpack.i.l.bf16 %v6988_v20 }
 0x511   :  { %v10108_v15 = vpop.permute.xlu1 %6977  ;;  %v7005_v35 = vunpack.i.h.bf16 %v7003_v46  ;;  %v7004_v55 = vunpack.i.l.bf16 %v7003_v46  ;;  %v6890_v45 = vunpack.i.h.bf16 %v9915_v37  ;;  %v6889_v61 = vunpack.i.l.bf16 %v9915_v37 }
 0x512   :  { %v3802_v38 = vsel %vm3801_vm8, %v6879_v0, %v6880_v62  ;;  %v3793_v19 = vsel %vm3792_vm10, %v6984_v9, %v6985_v39  ;;  %v3823_v52 = vsel %vm3801_vm8, %v6989_v43, %v6990_v40  ;;  %v10155_v47 = vsel %vm3840_vm5, %v9878_v33, %v3839_v41 }
 0x513   :  { %7062 = vrot.lane.b32.xlu0 %v7061_v57, %s7183_s0  ;;  %v4260_v30 = vsel %vm3792_vm10, %v7004_v55, %v7005_v35  ;;  %v10150_v37 = vsel %vm3801_vm8, %v6889_v61, %v6890_v45  ;;  %v3844_v49 = vsel %vm99_vm6, %v3802_v38, %v3805_v16  ;;  %v3843_v26 = vsel %vm99_vm6, %v9859_v8, %v3793_v19  ;;  %vm10988_vm8 = vmmov %vm10979_vm0 }
 0x514   :  { %7092 = vrot.lane.b32.xlu1 %v7091_v7, %s7184_s23  ;;  %v7008_v24 = vpop.permute.xlu0 %7007  ;;  %v3845_v25 = vsel %vm99_vm6, %v9913_v51, %v3823_v52  ;;  %v6980_v42 = vunpack.i.h.bf16 %v10108_v15  ;;  %v6979_v10 = vunpack.i.l.bf16 %v10108_v15  ;;  %vm4241_vm10 = vcmask 801792  }
 0x515   :  { %v10110_v14 = vpop.permute.xlu1 %4284  ;;  %v7010_v57 = vunpack.i.h.bf16 %v7008_v24  ;;  %v7009_v27 = vunpack.i.l.bf16 %v7008_v24 }
 0x517   :  { %7077 = vrot.lane.b32.xlu0 %v7076_v22, %s7183_s0  ;;  %s7189_s0 = smov 59  }
 0x518   :  { %4295 = vrot.lane.b32.xlu1 %v9795_v4, %s7179_s28  ;;  %v10974_v4 = vld [vmem:[#allocation9_spill] sm:$0xff] }
 0x519   :  { %v10112_v29 = vpop.permute.xlu1 %6992 }
 0x51a   :  { %v6994_v8 = vunpack.i.l.bf16 %v10112_v29 }
 0x51b   :  { %7087 = vrot.lane.b32.xlu0 %v7086_v11, %s7184_s23  ;;  %v10116_v1 = vpop.permute.xlu0 %4004  ;;  %v10163_v11 = vsel %vm99_vm6, %v9862_v60, %v4260_v30 }
 0x51c   :  { %4498 = vrot.lane.b32.xlu1 %v4420_v56, %s7184_s23  ;;  %v10166_v56 = vsel %vm3840_vm5, %v7009_v27, %v7010_v57 }
 0x51d   :  { %v10114_v44 = vpop.permute.xlu1 %6997 }
 0x51e   :  { %v6999_v60 = vunpack.i.l.bf16 %v10114_v44  ;;  %v7000_v45 = vunpack.i.h.bf16 %v10114_v44 }
 0x51f   :  { %4293 = vrot.lane.b32.xlu0 %v9792_v31, %s7179_s28  ;;  %v7101_v31 = vpack.i.bf16 %v10977_v50, %v10976_v34 }
 0x520   :  { %7097 = vrot.lane.b32.xlu1 %v10973_v48, %s7185_s21 }
 0x521   :  { %v10120_v32 = vpop.permute.xlu1 %7012 }
 0x523   :  { %4496 = vrot.lane.b32.xlu0 %v9874_v59, %s7184_s23  ;;  %v4761_v59 = vld [vmem:[%s10730_s10] sm:$0xff]  ;;  %s7194_s10 = smov 29  }
 0x524   :  { %4743 = vrot.lane.b32.xlu1 %v10974_v4, %s7185_s21 }
 0x527   :  { %4734 = vrot.lane.b32.xlu0 %v10975_v3, %s7162_s25 }
 0x528   :  { %4081 = vperm.xlu1 %6809, %v3783_v54   ;;  %v6995_v54 = vunpack.i.h.bf16 %v10112_v29 }
 0x52a   :  { %v3834_v40 = vsel %vm3833_vm12, %v6994_v8, %v6995_v54 }
 0x52b   :  { %7102 = vrot.lane.b32.xlu0 %v7101_v31, %s7185_s21  ;;  %v10118_v53 = vpop.permute.xlu0 %4048  ;;  %v3846_v61 = vsel %vm99_vm6, %v6999_v60, %v3834_v40 }
 0x52f   :  { %4751 = vrot.lane.b32.xlu0 %v7783_v58, %s7185_s21  ;;  %v10124_v36 = vpop.permute.xlu0 %4453 }
 0x533   :  { %4764 = vperm.xlu0 %6810, %v4761_v59  }
 0x53d   :  { %v10122_v12 = vpop.permute.xlu1 %4006 }
 0x53e   :  { %v4013_v38 = vsel %vm4008_vm14, %v10116_v1, %v10122_v12 }
 0x549   :  { %v10128_v28 = vpop.permute.xlu0 %4050 }
 0x54d   :  { %v10126_v63 = vpop.permute.xlu1 %4455 }
 0x551   :  { %v7018_v5 = vpop.permute.xlu1 %7017 }
 0x552   :  { %v7020_v6 = vunpack.i.h.bf16 %v7018_v5  ;;  %v7019_v22 = vunpack.i.l.bf16 %v7018_v5 }
 0x554   :  { %v4010_v41 = vsel %vm4008_vm14, %v7019_v22, %v7020_v6  ;;  %v4069_v23 = vsel %vm4067_vm13, %v3844_v49, %v7019_v22 }
 0x561   :  { %v10136_v17 = vpop.permute.xlu1 %7047 }
 0x562   :  { %v7050_v20 = vunpack.i.h.bf16 %v10136_v17  ;;  %v7049_v46 = vunpack.i.l.bf16 %v10136_v17  ;;  %v10190_v17 = vsel %vm3833_vm12, %v6979_v10, %v6980_v42  ;;  %v7015_v42 = vunpack.i.h.bf16 %v10120_v32 }
 0x564   :  { %v4012_v19 = vsel %vm4008_vm14, %v7049_v46, %v7050_v20  ;;  %v4071_v6 = vsel %vm4067_vm13, %v3846_v61, %v7049_v46 }
 0x565   :  { %v10130_v21 = vpop.permute.xlu0 %7022 }
 0x566   :  { %v7025_v33 = vunpack.i.h.bf16 %v10130_v21  ;;  %v7024_v15 = vunpack.i.l.bf16 %v10130_v21 }
 0x568   :  { %v4075_v9 = vsel %vm4073_vm3, %v4010_v41, %v7025_v33 }
 0x571   :  { %v10134_v18 = vpop.permute.xlu0 %7027 }
 0x572   :  { %v10147_v7 = vpop.permute.xlu1 %7057  ;;  %v7030_v5 = vunpack.i.h.bf16 %v10134_v18  ;;  %v7029_v16 = vunpack.i.l.bf16 %v10134_v18 }
 0x573   :  { %v7060_v57 = vunpack.i.h.bf16 %v10147_v7  ;;  %v7059_v44 = vunpack.i.l.bf16 %v10147_v7  ;;  %v4078_v7 = vsel %vm4073_vm3, %v4013_v38, %v10118_v53 }
 0x574   :  { %v4077_v49 = vsel %vm4073_vm3, %v4012_v19, %v7030_v5 }
 0x575   :  { %v10145_v2 = vpop.permute.xlu0 %7032  ;;  %v4056_v60 = vsel %vm4052_vm15, %v7030_v5, %v7060_v57  ;;  %v4055_v41 = vsel %vm4052_vm15, %v7029_v16, %v7059_v44  ;;  %v4301_v57 = vsel %vm99_vm6, %v10190_v17, %v10166_v56  ;;  %v4057_v44 = vsel %vm4052_vm15, %v10118_v53, %v10128_v28 }
 0x576   :  { %v7035_v19 = vunpack.i.h.bf16 %v10145_v2 }
 0x579   :  { %v7038_v48 = vpop.permute.xlu0 %7037 }
 0x57a   :  { %v7040_v31 = vunpack.i.h.bf16 %v7038_v48  ;;  %v7039_v51 = vunpack.i.l.bf16 %v7038_v48  ;;  %v10173_v59 = vpop.permute.xlu1 %7067 }
 0x57b   :  { %v7070_v54 = vunpack.i.h.bf16 %v10173_v59  ;;  %v7069_v8 = vunpack.i.l.bf16 %v10173_v59  ;;  %v4300_v59 = vsel %vm99_vm6, %v10150_v37, %v7000_v45  ;;  %v10978_v37 = vmov 0.0|0.0  }
 0x57c   :  { %v4009_v24 = vsel %vm4008_vm14, %v7039_v51, %v7040_v31  ;;  %v4068_v29 = vsel %vm4067_vm13, %v3843_v26, %v7039_v51 }
 0x57d   :  { %v6013_v62 = vpack.c.bf16 %v4069_v23, %v4068_v29  ;;  %v7043_v0 = vpop.permute.xlu0 %7042  ;;  %v4074_v39 = vsel %vm4073_vm3, %v4009_v24, %v7024_v15 }
 0x57e   :  { %v7045_v43 = vunpack.i.h.bf16 %v7043_v0  ;;  %v7044_v21 = vunpack.i.l.bf16 %v7043_v0  ;;  %v10187_v35 = vpop.permute.xlu1 %7072  ;;  %v6011_v55 = vpack.c.bf16 %v4075_v9, %v4074_v39  ;;  %v10228_v0 = vld [vmem:[%s10725_s5] sm:$0xff]  ;;  %v4458_v39 = vsel %vm4008_vm14, %v7069_v8, %v7070_v54 }
 0x57f   :  { %v7074_v5 = vunpack.i.l.bf16 %v10187_v35  ;;  %v4515_v9 = vsel %vm4067_vm13, %v4300_v59, %v7069_v8  ;;  %v4754_v8 = vsel %vm10979_vm0, %v10976_v34, %v10977_v50  ;;  %v10980_v50 = vld [vmem:[#allocation24_spill] sm:$0xff]  ;;  %v10983_v59 = vld [vmem:[#allocation41_spill] sm:$0xff]  ;;  %vm5003_vm0 = vcmask 236544  }
 0x580   :  { %v4011_v52 = vsel %vm4008_vm14, %v7044_v21, %v7045_v43  ;;  %v4070_v30 = vsel %vm4067_vm13, %v3845_v25, %v7044_v21  ;;  %6012 = vmatprep.subr.bf16.mxu0 %v6011_v55  ;;  %v7014_v25 = vunpack.i.l.bf16 %v10120_v32  ;;  %v7075_v32 = vunpack.i.h.bf16 %v10187_v35 }
 0x581   :  { %v7053_v27 = vpop.permute.xlu0 %7052  ;;  %6014 = vmatpush1.bf16.msra.mxu0 %v6013_v62  ;;  %v4076_v18 = vsel %vm4073_vm3, %v4011_v52, %v7029_v16  ;;  %v6017_v10 = vpack.c.bf16 %v4071_v6, %v4070_v30  ;;  %v7034_v52 = vunpack.i.l.bf16 %v10145_v2 }
 0x582   :  { %v7055_v12 = vunpack.i.h.bf16 %v7053_v27  ;;  %v7054_v22 = vunpack.i.l.bf16 %v7053_v27  ;;  %v6015_v26 = vpack.c.bf16 %v4077_v49, %v4076_v18  ;;  %v7083_v48 = vpop.permute.xlu1 %7082  ;;  %v4520_v55 = vsel %vm4073_vm3, %v4458_v39, %v7075_v32 }
 0x583   :  { %v7085_v46 = vunpack.i.h.bf16 %v7083_v48  ;;  %v7084_v24 = vunpack.i.l.bf16 %v7083_v48 }
 0x584   :  { %v4054_v31 = vsel %vm4052_vm15, %v7025_v33, %v7055_v12  ;;  %v4053_v51 = vsel %vm4052_vm15, %v7024_v15, %v7054_v22  ;;  %6016 = vmatprep.subr.bf16.mxu0 %v6015_v26  ;;  %v4072_v33 = vsel %vm4067_vm13, %v10155_v47, %v10116_v1  ;;  %v4291_v15 = vsel %vm3833_vm12, %v7014_v25, %v7015_v42 }
 0x585   :  { %v6020_v23 = vpack.c.bf16 %v4054_v31, %v4053_v51  ;;  %v7063_v20 = vpop.permute.xlu0 %7062  ;;  %6018 = vmatpush1.bf16.msra.mxu0 %v6017_v10  ;;  %v6023_v47 = vpack.c.bf16 %v4056_v60, %v4055_v41  ;;  %v4460_v45 = vsel %vm4008_vm14, %v7084_v24, %v7085_v46  ;;  %v4302_v30 = vsel %vm99_vm6, %v10110_v14, %v4291_v15 }
 0x586   :  { %v7065_v29 = vunpack.i.h.bf16 %v7063_v20  ;;  %v7064_v62 = vunpack.i.l.bf16 %v7063_v20  ;;  %5486 = vmatprep.subr.msk.mxu0 %vm99_vm6, %v4078_v7  ;;  %v7093_v61 = vpop.permute.xlu1 %7092  ;;  %v4517_v14 = vsel %vm4067_vm13, %v4302_v30, %v7084_v24  ;;  %v4522_v17 = vsel %vm4073_vm3, %v4460_v45, %v7035_v19 }
 0x587   :  { %6021 = vmatpush3.bf16.msra.mxu1 %v6020_v23  ;;  %v7095_v2 = vunpack.i.h.bf16 %v7093_v61  ;;  %v7094_v6 = vunpack.i.l.bf16 %v7093_v61  ;;  %v4461_v51 = vsel %vm4008_vm14, %v10124_v36, %v10126_v63  ;;  %v6040_v23 = vpack.c.bf16 %v4754_v8, %v10974_v4  ;;  %v10981_v63 = vld [vmem:[#allocation36_spill] sm:$0xff] }
 0x588   :  { %v4457_v40 = vsel %vm4008_vm14, %v7064_v62, %v7065_v29  ;;  %v4514_v1 = vsel %vm4067_vm13, %v10163_v11, %v7064_v62  ;;  %6022 = vmatprep.subr.bf16.mxu1 %v10978_v37  ;;  %v4755_v4 = vsel %vm99_vm6, %v7783_v58, %v10980_v50  ;;  %vm4729_vm12 = vcmask 80896  }
 0x589   :  { %v6027_v43 = vpack.c.bf16 %v4515_v9, %v4514_v1  ;;  %v7078_v21 = vpop.permute.xlu0 %7077  ;;  %5487 = vmatpush1.msk.msra.mxu0 %vm99_vm6, %v4072_v33  ;;  %v4519_v35 = vsel %vm4073_vm3, %v4457_v40, %v7074_v5  ;;  %v4503_v48 = vsel %vm4052_vm15, %v7035_v19, %v7095_v2  ;;  %v4502_v7 = vsel %vm4052_vm15, %v7034_v52, %v7094_v6  ;;  %v10985_v9 = vld [vmem:[#allocation38_spill] sm:$0xff]  ;;  %v10986_v40 = vld [vmem:[#allocation5_spill] sm:$0xff] }
 0x58a   :  { %v7080_v16 = vunpack.i.h.bf16 %v7078_v21  ;;  %v7079_v38 = vunpack.i.l.bf16 %v7078_v21  ;;  %5488 = vmatmul.mubr.msk.f32.vlgmr.msra.gmra.mrb[24].mxu0 %vm4084_vm2, %v10228_v0  ;;  %v6025_v11 = vpack.c.bf16 %v4520_v55, %v4519_v35  ;;  %v4296_v54 = vpop.permute.xlu1 %4295  ;;  %v6037_v60 = vpack.c.bf16 %v4503_v48, %v4502_v7  ;;  %v4733_v35 = vld [vmem:[%s10729_s9] sm:$0xff]  ;;  %s7187_s9 = smov 69  }
 0x58b   :  { %6024 = vmatpush3.bf16.msra.mxu1 %v6023_v47  ;;  %4596 = vmatprep.mubr.f32.mxu0 %v10949_v13  ;;  %v10987_v1 = vpack.c.bf16 %v10985_v9, %v10986_v40 }
 0x58c   :  { %v4459_v27 = vsel %vm4008_vm14, %v7079_v38, %v7080_v16  ;;  %v4516_v18 = vsel %vm4067_vm13, %v4301_v57, %v7079_v38  ;;  %6026 = vmatprep.subr.bf16.mxu0 %v6025_v11  ;;  %5670 = vmatprep.subr.mxu1 %v10949_v13  ;;  %vm4994_vm14 = vcmask 482304  }
 0x58d   :  { %v7088_v49 = vpop.permute.xlu0 %7087  ;;  %6028 = vmatpush1.bf16.msra.mxu0 %v6027_v43  ;;  %v4521_v56 = vsel %vm4073_vm3, %v4459_v27, %v7034_v52  ;;  %v6031_v28 = vpack.c.bf16 %v4517_v14, %v4516_v18 }
 0x58e   :  { %v7090_v12 = vunpack.i.h.bf16 %v7088_v49  ;;  %v7089_v22 = vunpack.i.l.bf16 %v7088_v49  ;;  %v6029_v53 = vpack.c.bf16 %v4522_v17, %v4521_v56  ;;  %v4499_v34 = vpop.permute.xlu1 %4498 }
 0x58f   :  { %5671 = vmatpush3.msk.msra.mxu1 %vm99_vm6, %v4057_v44 }
 0x590   :  { %v4500_v26 = vsel %vm4052_vm15, %v7074_v5, %v7089_v22  ;;  %v4501_v42 = vsel %vm4052_vm15, %v7075_v32, %v7090_v12  ;;  %5673 = vmatmul.mubr.msk.f32.vlgmr.msra.gmra.mrb[24].mxu1 %vm4084_vm2, %v10228_v0  ;;  %6030 = vmatprep.subr.bf16.mxu0 %v6029_v53 }
 0x591   :  { %v6034_v25 = vpack.c.bf16 %v4501_v42, %v4500_v26  ;;  %v4294_v10 = vpop.permute.xlu0 %4293  ;;  %6032 = vmatpush1.bf16.msra.mxu0 %v6031_v28  ;;  %6033 = vmatprep.subr.bf16.mxu1 %v10978_v37 }
 0x592   :  { %5685 = vmatprep.mubr.msk.f32.mxu1 %vm7176_vm4, %v10949_v13  ;;  %v4297_v31 = vsel %vm3840_vm5, %v4294_v10, %v4296_v54  ;;  %v7098_v58 = vpop.permute.xlu1 %7097  ;;  %vm10984_vm5 = vmmov %vm10982_vm1 }
 0x593   :  { %6035 = vmatpush3.bf16.msra.mxu1 %v6034_v25  ;;  %v4518_v20 = vsel %vm4067_vm13, %v4297_v31, %v10124_v36  ;;  %v4756_v36 = vsel %vm10982_vm1, %v10975_v3, %v10981_v63  ;;  %v7099_v3 = vunpack.i.l.bf16 %v7098_v58  ;;  %v7100_v33 = vunpack.i.h.bf16 %v7098_v58 }
 0x594   :  { %6036 = vmatprep.subr.bf16.mxu1 %v10978_v37  ;;  %v6043_v29 = vpack.c.bf16 %v4756_v36, %v4755_v4 }
 0x595   :  { %v4497_v41 = vpop.permute.xlu0 %4496 }
 0x596   :  { %v4523_v32 = vsel %vm4073_vm3, %v4461_v51, %v4497_v41  ;;  %v4504_v46 = vsel %vm4052_vm15, %v4497_v41, %v4499_v34  ;;  %v4744_v43 = vpop.permute.xlu1 %4743  ;;  %vm4997_vm15 = vcmask 400384  }
 0x597   :  { %5491 = vmatprep.subr.msk.mxu0 %vm99_vm6, %v4523_v32  ;;  %6038 = vmatpush3.bf16.msra.mxu1 %v6037_v60 }
 0x598   :  { %5492 = vmatpush1.msk.msra.mxu0 %vm99_vm6, %v4518_v20  ;;  %5683 = vmatprep.subr.mxu1 %v10949_v13 }
 0x599   :  { %5493 = vmatmul.mubr.msk.f32.vlgmr.msra.gmra.mrb[26].mxu0 %vm4084_vm2, %v10228_v0  ;;  %6039 = vmatprep.subr.bf16.mxu0 %v10978_v37  ;;  %v4735_v24 = vpop.permute.xlu0 %4734 }
 0x59a   :  { %6041 = vmatpush3.bf16.msra.mxu0 %v6040_v23  ;;  %5714 = vmatprep.mubr.msk.f32.mxu0 %vm7176_vm4, %v10949_v13  ;;  %v4759_v15 = vsel %vm10984_vm5, %v4735_v24, %v7099_v3 }
 0x59b   :  { %5684 = vmatpush3.msk.msra.mxu1 %vm99_vm6, %v4504_v46  ;;  %6042 = vmatprep.subr.bf16.mxu0 %v10978_v37  ;;  %v6052_v39 = vpack.c.bf16 %v7100_v33, %v4759_v15 }
 0x59c   :  { %5686 = vmatmul.mubr.msk.f32.vlgmr.msra.gmra.mrb[26].mxu1 %vm4084_vm2, %v10228_v0  ;;  %6057 = vmatprep.subr.bf16.mxu1 %v10978_v37  ;;  %vm5000_vm2 = vcmask 318464  }
 0x59d   :  { %5747 = vmatprep.mubr.msk.f32.mxu1 %vm7176_vm4, %v10949_v13  ;;  %v7103_v62 = vpop.permute.xlu0 %7102 }
 0x59e   :  { %6044 = vmatpush3.bf16.msra.mxu0 %v6043_v29  ;;  %v7105_v5 = vunpack.i.h.bf16 %v7103_v62  ;;  %v7104_v0 = vunpack.i.l.bf16 %v7103_v62 }
 0x59f   :  { %6045 = vmatprep.subr.bf16.mxu0 %v10978_v37 }
 0x5a0   :  { %v4760_v47 = vsel %vm10988_vm8, %v7104_v0, %v7105_v5 }
 0x5a1   :  { %v6055_v21 = vpack.c.bf16 %v4760_v47, %v4744_v43  ;;  %v4752_v55 = vpop.permute.xlu0 %4751 }
 0x5a2   :  { %6047 = vmatpush3.bf16.msra.mxu0 %v10983_v59 }
 0x5a3   :  { %6048 = vmatprep.subr.bf16.mxu0 %v10978_v37 }
 0x5a6   :  { %6050 = vmatpush3.bf16.msra.mxu0 %v10987_v1 }
 0x5a7   :  { %6051 = vmatprep.subr.bf16.mxu0 %v10978_v37  ;;  %v4082_v61 = vpop.permute.xlu1 %4081 }
 0x5aa   :  { %6053 = vmatpush3.bf16.msra.mxu0 %v6052_v39 }
 0x5ab   :  { %6054 = vmatprep.subr.bf16.mxu0 %v10978_v37 }
 0x5ae   :  { %6056 = vmatpush3.bf16.msra.mxu0 %v6055_v21 }
 0x5af   :  { %5712 = vmatprep.subr.mxu0 %v10949_v13 }
 0x5b2   :  { %5713 = vmatpush3.msk.msra.mxu0 %vm99_vm6, %v4752_v55  ;;  %v4765_v4 = vpop.permute.xlu0 %4764  ;;  %vm10989_vm6 = vmmov %vm10982_vm1  ;;  %vm10990_vm1 = vcmask 1040384  }
 0x5b3   :  { %5715 = vmatmul.mubr.msk.f32.vlgmr.msra.gmra.mrb[28].mxu0 %vm4767_vm9, %v4733_v35  ;;  %v4696_v35 = vld [vmem:[%s10727_s7] sm:$0xff]  ;;  %vm10991_vm5 = vmmov %vm10990_vm1 }
 0x65d   :  { %v4162_v45 = vpop.f32.mrb[24].mxu0 }
 0x65e   :  { %v4164_v16 = vpop.f32.mrb[25].mxu0  ;;  %v4163_v38 = vadd.f32 %v4162_v45, %v4082_v61 }
 0x65f   :  { %v4165_v11 = vadd.f32 %v4164_v16, %v4082_v61 }
 0x660   :  { %v10318_v19 = vmax.f32 %v4163_v38, 0.0 }
 0x661   :  { %v10320_v52 = vmax.f32 %v4165_v11, 0.0  ;;  %v4700_v11 = vld [vmem:[%s10728_s8] sm:$0xff]  ;;  %s7188_s8 = smov 118  }
 0x662   :  { %v4247_v54 = vmul.f32 %v10318_v19, %v10318_v19 }
 0x663   :  { %v4233_v30 = vpop.f32.mrb[24].mxu1  ;;  %v4240_v18 = vadd.f32 %v10320_v52, %v10318_v19  ;;  %v4248_v8 = vmul.f32 %v10320_v52, %v10320_v52 }
 0x664   :  { %v4234_v57 = vadd.f32 %v4233_v30, %v4082_v61  ;;  %v5674_v44 = vpop.f32.mrb[25].mxu1 }
 0x665   :  { %v4250_v34 = vadd.f32 %v4248_v8, %v4247_v54  ;;  %v4866_v44 = vld [vmem:[%s10732_s12] sm:$0xff]  ;;  %v4883_v8 = vld [vmem:[%s10733_s13 + $0x48] sm:$0xff] }
 0x666   :  { %v4239_v27 = vmax.f32 %v4234_v57, 0.0  ;;  %v4882_v54 = vld [vmem:[%s10733_s13 + $0x40] sm:$0xff] }
 0x668   :  { %v4242_v14 = vsel %vm4241_vm10, %v4239_v27, 0.0  ;;  %v4249_v25 = vmul.f32 %v4239_v27, %v4239_v27 }
 0x669   :  { %v4243_v2 = vadd.f32 %v4242_v14, %v4240_v18  ;;  %v4855_v18 = vld [vmem:[%s10731_s11] sm:$0xff] }
 0x66a   :  { %v4251_v23 = vsel %vm4241_vm10, %v4249_v25, 0.0 }
 0x66b   :  { %4244 = vadd.xlane.f32.xlu1 %v4243_v2  ;;  %v4252_v50 = vadd.f32 %v4251_v23, %v4250_v34  ;;  %v4887_v23 = vld [vmem:[%s10733_s13 + $0x68] sm:$0xff] }
 0x66c   :  { %v4598_v49 = vpop.f32.mrb[26].mxu0 }
 0x66d   :  { %v4599_v56 = vadd.f32 %v4598_v49, %v4082_v61  ;;  %v4600_v17 = vpop.f32.mrb[27].mxu0  ;;  %v4874_v49 = vld [vmem:[%s10733_s13] sm:$0xff] }
 0x66e   :  { %v4601_v6 = vadd.f32 %v4600_v17, %v4082_v61  ;;  %v4876_v17 = vld [vmem:[%s10733_s13 + $0x10] sm:$0xff] }
 0x66f   :  { %v10325_v12 = vmax.f32 %v4599_v56, 0.0  ;;  %v4669_v22 = vpop.f32.mrb[26].mxu1  ;;  %v4875_v56 = vld [vmem:[%s10733_s13 + $0x8] sm:$0xff] }
 0x670   :  { %v10327_v53 = vmax.f32 %v4601_v6, 0.0  ;;  %v4670_v28 = vadd.f32 %v4669_v22, %v4082_v61  ;;  %v5687_v26 = vpop.f32.mrb[27].mxu1  ;;  %v6058_v6 = vpack.c.bf16 %v4875_v56, %v4874_v49  ;;  %v4877_v22 = vld [vmem:[%s10733_s13 + $0x18] sm:$0xff]  ;;  %v5070_v56 = vld [vmem:[%s10734_s14 + $0xa0] sm:$0xff] }
 0x671   :  { %v4682_v42 = vmul.f32 %v10325_v12, %v10325_v12  ;;  %v4878_v26 = vld [vmem:[%s10733_s13 + $0x20] sm:$0xff] }
 0x672   :  { %v4676_v10 = vadd.f32 %v10327_v53, %v10325_v12  ;;  %v4683_v48 = vmul.f32 %v10327_v53, %v10327_v53  ;;  %v4675_v7 = vmax.f32 %v4670_v28, 0.0  ;;  %6059 = vmatpush3.bf16.msra.mxu1 %v6058_v6  ;;  %v6061_v28 = vpack.c.bf16 %v4877_v22, %v4876_v17  ;;  %v5088_v6 = vld [vmem:[%s10734_s14 + $0x130] sm:$0xff] }
 0x673   :  { %6060 = vmatprep.subr.bf16.mxu1 %v10978_v37 }
 0x674   :  { %v4677_v31 = vsel %vm4241_vm10, %v4675_v7, 0.0  ;;  %v4684_v51 = vmul.f32 %v4675_v7, %v4675_v7  ;;  %v4685_v60 = vadd.f32 %v4683_v48, %v4682_v42  ;;  %v4879_v42 = vld [vmem:[%s10733_s13 + $0x28] sm:$0xff]  ;;  %v4881_v48 = vld [vmem:[%s10733_s13 + $0x38] sm:$0xff] }
 0x675   :  { %v4678_v41 = vadd.f32 %v4677_v31, %v4676_v10  ;;  %v6064_v25 = vpack.c.bf16 %v4879_v42, %v4878_v26  ;;  %v4880_v10 = vld [vmem:[%s10733_s13 + $0x30] sm:$0xff]  ;;  %v6070_v31 = vpack.c.bf16 %v4883_v8, %v4882_v54  ;;  %v5089_v26 = vld [vmem:[%s10734_s14 + $0x138] sm:$0xff]  ;;  %v5090_v8 = vld [vmem:[%s10734_s14 + $0x140] sm:$0xff] }
 0x676   :  { %v4686_v32 = vsel %vm4241_vm10, %v4684_v51, 0.0  ;;  %6062 = vmatpush3.bf16.msra.mxu1 %v6061_v28  ;;  %v6067_v7 = vpack.c.bf16 %v4881_v48, %v4880_v10  ;;  %v4884_v51 = vld [vmem:[%s10733_s13 + $0x50] sm:$0xff]  ;;  %v5071_v28 = vld [vmem:[%s10734_s14 + $0xa8] sm:$0xff]  ;;  %v6120_v54 = vpack.c.bf16 %v5089_v26, %v5088_v6 }
 0x677   :  { %4679 = vadd.xlane.f32.xlu0 %v4678_v41  ;;  %v4687_v20 = vadd.f32 %v4686_v32, %v4685_v60  ;;  %6063 = vmatprep.subr.bf16.mxu1 %v10978_v37  ;;  %v4885_v60 = vld [vmem:[%s10733_s13 + $0x58] sm:$0xff]  ;;  %v4886_v32 = vld [vmem:[%s10733_s13 + $0x60] sm:$0xff]  ;;  %v6086_v42 = vpack.c.bf16 %v5071_v28, %v5070_v56  ;;  %v5055_v10 = vld [vmem:[%s10734_s14 + $0x28] sm:$0xff] }
 0x678   :  { %v6073_v41 = vpack.c.bf16 %v4885_v60, %v4884_v51  ;;  %v6076_v34 = vpack.c.bf16 %v4887_v23, %v4886_v32  ;;  %v5072_v48 = vld [vmem:[%s10734_s14 + $0xb0] sm:$0xff]  ;;  %v5091_v51 = vld [vmem:[%s10734_s14 + $0x148] sm:$0xff]  ;;  %v5057_v32 = vld [vmem:[%s10734_s14 + $0x38] sm:$0xff] }
 0x679   :  { %4688 = vadd.xlane.f32.xlu1 %v4687_v20  ;;  %v5074_v23 = vld [vmem:[%s10734_s14 + $0xc0] sm:$0xff]  ;;  %v5064_v6 = vld [vmem:[%s10734_s14 + $0x70] sm:$0xff] }
 0x67a   :  { %6065 = vmatpush3.bf16.msra.mxu1 %v6064_v25  ;;  %v5054_v25 = vld [vmem:[%s10734_s14 + $0x20] sm:$0xff]  ;;  %v5104_v28 = vld [vmem:[%s10734_s14 + $0x1b0] sm:$0xff] }
 0x67b   :  { %4253 = vadd.xlane.f32.xlu0 %v4252_v50  ;;  %6066 = vmatprep.subr.bf16.mxu1 %v10978_v37 }
 0x67e   :  { %6068 = vmatpush3.bf16.msra.mxu1 %v6067_v7  ;;  %v5073_v7 = vld [vmem:[%s10734_s14 + $0xb8] sm:$0xff] }
 0x67f   :  { %6069 = vmatprep.subr.bf16.mxu1 %v10978_v37  ;;  %v6090_v60 = vpack.c.bf16 %v5073_v7, %v5072_v48  ;;  %v5105_v48 = vld [vmem:[%s10734_s14 + $0x1b8] sm:$0xff] }
 0x682   :  { %6071 = vmatpush3.bf16.msra.mxu1 %v6070_v31  ;;  %v6088_v31 = vpack.c.bf16 %v5055_v10, %v5054_v25 }
 0x683   :  { %6072 = vmatprep.subr.bf16.mxu1 %v10978_v37 }
 0x686   :  { %v4839_v63 = vpop.f32.mrb[28].mxu0  ;;  %6074 = vmatpush3.bf16.msra.mxu1 %v6073_v41  ;;  %v5056_v41 = vld [vmem:[%s10734_s14 + $0x30] sm:$0xff] }
 0x687   :  { %v10342_v36 = vadd.f32 %v4839_v63, %v4765_v4  ;;  %v5716_v46 = vpop.f32.mrb[29].mxu0  ;;  %6075 = vmatprep.subr.bf16.mxu1 %v10978_v37 }
 0x689   :  { %v4843_v24 = vsel %vm4067_vm13, %v10342_v36, 0.0  ;;  %v4848_v29 = vmul.f32 %v10342_v36, %v10342_v36 }
 0x68a   :  { %4844 = vadd.xlane.f32.xlu0 %v4843_v24  ;;  %6077 = vmatpush3.bf16.msra.mxu1 %v6076_v34  ;;  %v4888_v24 = vld [vmem:[%s10733_s13 + $0x70] sm:$0x3f]  ;;  %v6123_v34 = vpack.c.bf16 %v5091_v51, %v5090_v8  ;;  %v5106_v8 = vld [vmem:[%s10734_s14 + $0x1c0] sm:$0xff]  ;;  %s7191_s13 = smov 108  }
 0x68b   :  { %v4849_v58 = vsel %vm4067_vm13, %v4848_v29, 0.0  ;;  %5745 = vmatprep.subr.mxu1 %v10949_v13 }
 0x68c   :  { %4850 = vadd.xlane.f32.xlu1 %v4849_v58 }
 0x68e   :  { %5746 = vmatpush3.msk.msra.mxu1 %vm10989_vm6, %v4888_v24 }
 0x68f   :  { %6110 = vmatprep.subr.bf16.mxu1 %v10978_v37 }
 0x6f8   :  { %v4245_v3 = vpop.xlane.xlu1 %4244 }
 0x704   :  { %v4680_v62 = vpop.xlane.xlu0 %4679 }
 0x705   :  { %v4681_v33 = vadd.f32 %v4680_v62, %v4245_v3 }
 0x706   :  { %v4689_v15 = vpop.xlane.xlu1 %4688 }
 0x707   :  { %v4692_v59 = vmul.f32 0.0014124294, %v4681_v33 }
 0x708   :  { %v4254_v5 = vpop.xlane.xlu0 %4253 }
 0x709   :  { %v4690_v0 = vadd.f32 %v4689_v15, %v4254_v5  ;;  %v4694_v39 = vmul.f32 %v4692_v59, %v4692_v59 }
 0x70b   :  { %v4693_v9 = vmul.f32 0.0014124294, %v4690_v0 }
 0x70d   :  { %v4695_v40 = vsub.f32 %v4693_v9, %v4694_v39 }
 0x70f   :  { %v4697_v1 = vadd.f32 1e-05, %v4695_v40 }
 0x711   :  { %7128 = vrsqrt.f32 %v4697_v1 }
 0x717   :  { %v4845_v47 = vpop.xlane.xlu0 %4844 }
 0x718   :  { %v10349_v43 = vmul.f32 0.008474576, %v4845_v47  ;;  %v5082_v47 = vld [vmem:[%s10734_s14 + $0x100] sm:$0xff] }
 0x719   :  { %v4851_v21 = vpop.xlane.xlu1 %4850 }
 0x71a   :  { %v4853_v55 = vmul.f32 %v10349_v43, %v10349_v43  ;;  %v4852_v45 = vmul.f32 0.008474576, %v4851_v21  ;;  %v5083_v21 = vld [vmem:[%s10734_s14 + $0x108] sm:$0xff] }
 0x71b   :  { %v7129_v61 = vpop.eup %7128 }
 0x71c   :  { %v4854_v16 = vsub.f32 %v4852_v45, %v4853_v55  ;;  %v4699_v38 = vmul.f32 %v7129_v61, %v4696_v35  ;;  %v5085_v35 = vld [vmem:[%s10734_s14 + $0x118] sm:$0xff]  ;;  %v5066_v55 = vld [vmem:[%s10734_s14 + $0x80] sm:$0xff]  ;;  %v5067_v61 = vld [vmem:[%s10734_s14 + $0x88] sm:$0xff] }
 0x71e   :  { %v4856_v30 = vadd.f32 1e-05, %v4854_v16  ;;  %4705 = vperm.xlu0 %6810, %v4699_v38   ;;  %v4701_v57 = vmul.f32 %v4699_v38, %v4692_v59  ;;  %v5050_v16 = vld [vmem:[%s10734_s14] sm:$0xff]  ;;  %v5051_v38 = vld [vmem:[%s10734_s14 + $0x8] sm:$0xff] }
 0x720   :  { %7130 = vrsqrt.f32 %v4856_v30  ;;  %v4702_v27 = vsub.f32 %v4700_v11, %v4701_v57  ;;  %v5086_v11 = vld [vmem:[%s10734_s14 + $0x120] sm:$0xff]  ;;  %v5087_v30 = vld [vmem:[%s10734_s14 + $0x128] sm:$0xff]  ;;  %v6078_v57 = vpack.c.bf16 %v5067_v61, %v5066_v55 }
 0x721   :  { %v6117_v17 = vpack.c.bf16 %v5087_v30, %v5086_v11  ;;  %v5062_v61 = vld [vmem:[%s10734_s14 + $0x60] sm:$0xff]  ;;  %v5103_v30 = vld [vmem:[%s10734_s14 + $0x1a8] sm:$0xff] }
 0x722   :  { %4869 = vperm.xlu0 %6810, %v4866_v44   ;;  %4712 = vperm.xlu1 %6809, %v4702_v27   ;;  %v6080_v44 = vpack.c.bf16 %v5051_v38, %v5050_v16  ;;  %v5068_v27 = vld [vmem:[%s10734_s14 + $0x90] sm:$0xff]  ;;  %v5063_v16 = vld [vmem:[%s10734_s14 + $0x68] sm:$0xff]  ;;  %v5102_v38 = vld [vmem:[%s10734_s14 + $0x1a0] sm:$0xff] }
 0x723   :  { %6079 = vmatprep.subr.bf16.mxu0 %v6078_v57  ;;  %v6104_v11 = vpack.c.bf16 %v5063_v16, %v5062_v61  ;;  %v5080_v57 = vld [vmem:[%s10734_s14 + $0xf0] sm:$0xff] }
 0x724   :  { %6081 = vmatpush3.bf16.msra.mxu0 %v6080_v44  ;;  %v5081_v44 = vld [vmem:[%s10734_s14 + $0xf8] sm:$0xff] }
 0x72a   :  { %v7131_v14 = vpop.eup %7130 }
 0x72b   :  { %v4858_v2 = vmul.f32 %v7131_v14, %v4855_v18  ;;  %v5069_v18 = vld [vmem:[%s10734_s14 + $0x98] sm:$0xff]  ;;  %v5052_v14 = vld [vmem:[%s10734_s14 + $0x10] sm:$0xff] }
 0x72c   :  { %v6082_v49 = vpack.c.bf16 %v5069_v18, %v5068_v27  ;;  %v6141_v18 = vpack.c.bf16 %v5103_v30, %v5102_v38 }
 0x72d   :  { %4862 = vperm.xlu1 %6809, %v4858_v2   ;;  %v5053_v2 = vld [vmem:[%s10734_s14 + $0x18] sm:$0xff] }
 0x72e   :  { %v6084_v22 = vpack.c.bf16 %v5053_v2, %v5052_v14  ;;  %6083 = vmatprep.subr.bf16.mxu0 %v6082_v49  ;;  %v6106_v14 = vpack.c.bf16 %v5081_v44, %v5080_v57 }
 0x730   :  { %6085 = vmatpush3.bf16.msra.mxu0 %v6084_v22  ;;  %v5065_v22 = vld [vmem:[%s10734_s14 + $0x78] sm:$0xff] }
 0x731   :  { %6087 = vmatprep.subr.bf16.mxu0 %v6086_v42  ;;  %v6108_v7 = vpack.c.bf16 %v5065_v22, %v5064_v6  ;;  %v5304_v6 = vld [vmem:[%s10738_s18 + $0x18] sm:$0xff] }
 0x734   :  { %6089 = vmatpush3.bf16.msra.mxu0 %v6088_v31  ;;  %v5107_v31 = vld [vmem:[%s10734_s14 + $0x1c8] sm:$0xff] }
 0x735   :  { %6091 = vmatprep.subr.bf16.mxu0 %v6090_v60 }
 0x79d   :  { %v4706_v20 = vpop.permute.xlu0 %4705 }
 0x79e   :  { %v4708_v50 = vmul.f32 %v4706_v20, %v10318_v19  ;;  %v4709_v4 = vmul.f32 %v4706_v20, %v10320_v52  ;;  %v4717_v63 = vmul.f32 %v4706_v20, %v10325_v12  ;;  %v4718_v46 = vmul.f32 %v4706_v20, %v10327_v53  ;;  %v5075_v20 = vld [vmem:[%s10734_s14 + $0xc8] sm:$0xff] }
 0x79f   :  { %v4859_v53 = vsub.f32 %v10342_v36, %v10349_v43  ;;  %v5084_v36 = vld [vmem:[%s10734_s14 + $0x110] sm:$0xff]  ;;  %v6111_v43 = vpack.c.bf16 %v5083_v21, %v5082_v47 }
 0x7a0   :  { %v6114_v45 = vpack.c.bf16 %v5085_v35, %v5084_v36  ;;  %v5100_v47 = vld [vmem:[%s10734_s14 + $0x190] sm:$0xff]  ;;  %v5101_v36 = vld [vmem:[%s10734_s14 + $0x198] sm:$0xff]  ;;  %v5079_v35 = vld [vmem:[%s10734_s14 + $0xe8] sm:$0xff] }
 0x7a1   :  { %v4713_v29 = vpop.permute.xlu1 %4712  ;;  %v4870_v12 = vpop.permute.xlu0 %4869  ;;  %v6138_v55 = vpack.c.bf16 %v5101_v36, %v5100_v47 }
 0x7a2   :  { %v4715_v58 = vadd.f32 %v4713_v29, %v4708_v50  ;;  %v4716_v3 = vadd.f32 %v4713_v29, %v4709_v4  ;;  %v4719_v62 = vadd.f32 %v4717_v63, %v4713_v29  ;;  %v4720_v33 = vadd.f32 %v4718_v46, %v4713_v29  ;;  %v5092_v4 = vld [vmem:[%s10734_s14 + $0x150] sm:$0xff]  ;;  %v5093_v63 = vld [vmem:[%s10734_s14 + $0x158] sm:$0xff]  ;;  %v5094_v29 = vld [vmem:[%s10734_s14 + $0x160] sm:$0xff] }
 0x7a3   :  { %v6092_v50 = vpack.c.bf16 %v5057_v32, %v5056_v41  ;;  %v6094_v46 = vpack.c.bf16 %v5075_v20, %v5074_v23  ;;  %v6126_v24 = vpack.c.bf16 %v5093_v63, %v5092_v4  ;;  %v6147_v41 = vpack.c.bf16 %v5107_v31, %v5106_v8  ;;  %v5108_v20 = vld [vmem:[%s10734_s14 + $0x1d0] sm:$0xff] }
 0x7a4   :  { %v4722_v19 = vmax.f32 %v4716_v3, %v4720_v33  ;;  %v4721_v59 = vmax.f32 %v4715_v58, %v4719_v62  ;;  %v5095_v58 = vld [vmem:[%s10734_s14 + $0x168] sm:$0xff]  ;;  %v5096_v62 = vld [vmem:[%s10734_s14 + $0x170] sm:$0xff]  ;;  %v5097_v33 = vld [vmem:[%s10734_s14 + $0x178] sm:$0xff] }
 0x7a5   :  { %6093 = vmatpush3.bf16.msra.mxu0 %v6092_v50  ;;  %v6129_v3 = vpack.c.bf16 %v5095_v58, %v5094_v29  ;;  %v5311_v31 = vld [vmem:[%s10738_s18 + $0x50] sm:$0xff] }
 0x7a6   :  { %4727 = vrot.lane.b32.xlu0 %v4722_v19, %s7186_s22  ;;  %4725 = vrot.lane.b32.xlu1 %v4721_v59, %s7186_s22  ;;  %v6132_v19 = vpack.c.bf16 %v5097_v33, %v5096_v62  ;;  %s7190_s22 = smov 49  }
 0x7a7   :  { %6095 = vmatprep.subr.bf16.mxu0 %v6094_v46 }
 0x7ac   :  { %v4863_v52 = vpop.permute.xlu1 %4862 }
 0x7ad   :  { %v4865_v15 = vmul.f32 %v4863_v52, %v4859_v53  ;;  %v5059_v52 = vld [vmem:[%s10734_s14 + $0x48] sm:$0xff] }
 0x7af   :  { %v4872_v9 = vadd.f32 %v4870_v12, %v4865_v15  ;;  %v5098_v12 = vld [vmem:[%s10734_s14 + $0x180] sm:$0xff]  ;;  %v5099_v15 = vld [vmem:[%s10734_s14 + $0x188] sm:$0xff] }
 0x818   :  { %v4728_v5 = vpop.permute.xlu0 %4727  ;;  %v4726_v0 = vpop.permute.xlu1 %4725 }
 0x819   :  { %v4730_v39 = vsel %vm4729_vm12, %v4726_v0, %v4728_v5  ;;  %v5076_v5 = vld [vmem:[%s10734_s14 + $0xd0] sm:$0xff]  ;;  %v5077_v0 = vld [vmem:[%s10734_s14 + $0xd8] sm:$0xff] }
 0x81a   :  { %v4732_v40 = vmax.f32 %v4721_v59, %v4730_v39  ;;  %v5058_v59 = vld [vmem:[%s10734_s14 + $0x40] sm:$0xff]  ;;  %v6135_v39 = vpack.c.bf16 %v5099_v15, %v5098_v12 }
 0x81b   :  { %v6096_v53 = vpack.c.bf16 %v5059_v52, %v5058_v59 }
 0x81c   :  { %v4873_v1 = vadd.f32 %v4872_v9, %v4732_v40  ;;  %v6098_v9 = vpack.c.bf16 %v5077_v0, %v5076_v5  ;;  %v5060_v40 = vld [vmem:[%s10734_s14 + $0x50] sm:$0xff] }
 0x81d   :  { %6097 = vmatpush3.bf16.msra.mxu0 %v6096_v53 }
 0x81e   :  { %5748 = vmatmul.mubr.msk.f32.vlgmr.msra.gmra.mrb[28].mxu1 %vm4067_vm13, %v4873_v1  ;;  %6099 = vmatprep.subr.bf16.mxu0 %v6098_v9  ;;  %v5061_v1 = vld [vmem:[%s10734_s14 + $0x58] sm:$0xff] }
 0x81f   :  { %6112 = vmatpush1.bf16.msra.mxu1 %v6111_v43  ;;  %v6100_v21 = vpack.c.bf16 %v5061_v1, %v5060_v40  ;;  %v5078_v43 = vld [vmem:[%s10734_s14 + $0xe0] sm:$0xff] }
 0x820   :  { %6113 = vmatprep.subr.bf16.mxu1 %v10978_v37 }
 0x821   :  { %6101 = vmatpush3.bf16.msra.mxu0 %v6100_v21 }
 0x823   :  { %6115 = vmatpush1.bf16.msra.mxu1 %v6114_v45  ;;  %v6102_v45 = vpack.c.bf16 %v5079_v35, %v5078_v43 }
 0x824   :  { %6116 = vmatprep.subr.bf16.mxu1 %v10978_v37 }
 0x825   :  { %6103 = vmatprep.subr.bf16.mxu0 %v6102_v45 }
 0x826   :  { %6105 = vmatpush3.bf16.msra.mxu0 %v6104_v11 }
 0x827   :  { %6118 = vmatpush1.bf16.msra.mxu1 %v6117_v17  ;;  %6107 = vmatprep.subr.bf16.mxu0 %v6106_v14 }
 0x828   :  { %6119 = vmatprep.subr.bf16.mxu1 %v10978_v37 }
 0x82a   :  { %6109 = vmatpush3.bf16.msra.mxu0 %v6108_v7  ;;  %v5309_v7 = vld [vmem:[%s10738_s18 + $0x40] sm:$0xff] }
 0x82b   :  { %6121 = vmatpush1.bf16.msra.mxu1 %v6120_v54  ;;  %v6144_v54 = vpack.c.bf16 %v5105_v48, %v5104_v28  ;;  %6149 = vmatprep.subr.bf16.mxu0 %v10978_v37  ;;  %v5305_v28 = vld [vmem:[%s10738_s18 + $0x20] sm:$0xff] }
 0x82c   :  { %6122 = vmatprep.subr.bf16.mxu1 %v10978_v37 }
 0x82f   :  { %6124 = vmatpush1.bf16.msra.mxu1 %v6123_v34 }
 0x830   :  { %6125 = vmatprep.subr.bf16.mxu1 %v10978_v37 }
 0x833   :  { %6127 = vmatpush1.bf16.msra.mxu1 %v6126_v24 }
 0x834   :  { %6128 = vmatprep.subr.bf16.mxu1 %v10978_v37 }
 0x837   :  { %6130 = vmatpush1.bf16.msra.mxu1 %v6129_v3 }
 0x838   :  { %6131 = vmatprep.subr.bf16.mxu1 %v10978_v37 }
 0x83b   :  { %6133 = vmatpush1.bf16.msra.mxu1 %v6132_v19 }
 0x83c   :  { %6134 = vmatprep.subr.bf16.mxu1 %v10978_v37 }
 0x83f   :  { %6136 = vmatpush1.bf16.msra.mxu1 %v6135_v39 }
 0x840   :  { %6137 = vmatprep.subr.bf16.mxu1 %v10978_v37 }
 0x843   :  { %6139 = vmatpush1.bf16.msra.mxu1 %v6138_v55 }
 0x844   :  { %6140 = vmatprep.subr.bf16.mxu1 %v10978_v37 }
 0x847   :  { %6142 = vmatpush1.bf16.msra.mxu1 %v6141_v18 }
 0x848   :  { %6143 = vmatprep.subr.bf16.mxu1 %v10978_v37 }
 0x84b   :  { %6145 = vmatpush1.bf16.msra.mxu1 %v6144_v54  ;;  %v5310_v54 = vld [vmem:[%s10738_s18 + $0x48] sm:$0xff] }
 0x84c   :  { %6146 = vmatprep.subr.bf16.mxu1 %v10978_v37  ;;  %v6162_v8 = vpack.c.bf16 %v5310_v54, %v5309_v7 }
 0x84f   :  { %6148 = vmatpush1.bf16.msra.mxu1 %v6147_v41  ;;  %v5313_v41 = vld [vmem:[%s10738_s18 + $0x60] sm:$0xff] }
 0x850   :  { %5241 = vmatprep.subr.mxu1 %v10949_v13 }
 0x853   :  { %5242 = vmatpush1.msra.mxu1 %v5108_v20  ;;  %v5315_v20 = vld [vmem:[%s10738_s18 + $0x70] sm:$0xff] }
 0x8f1   :  { %v10591_v27 = vpop.f32.mrb[28].mxu1 }
 0x8f2   :  { %5005 = vrot.lane.b32.xlu1 %v10591_v27, %s7187_s9  ;;  %v5749_v2 = vpop.f32.mrb[29].mxu1  ;;  %v4970_v49 = vrot.slane %v10591_v27, 2  ;;  %v4974_v56 = vrot.slane %v10591_v27, 3  ;;  %v4966_v17 = vrot.slane %v10591_v27, 1  ;;  %v4978_v25 = vrot.slane %v10591_v27, 4 }
 0x8f3   :  { %v4982_v10 = vrot.slane %v10591_v27, 5  ;;  %v4986_v32 = vrot.slane %v10591_v27, 6  ;;  %v4990_v23 = vrot.slane %v10591_v27, 7  ;;  %v5301_v2 = vld [vmem:[%s10738_s18] sm:$0xff] }
 0x8f4   :  { %v7111_v26 = vpack.i.bf16 %v4970_v49, %v4974_v56  ;;  %v7106_v42 = vpack.i.bf16 %v4966_v17, %v4970_v49  ;;  %v7116_v51 = vpack.i.bf16 %v4974_v56, %v4978_v25  ;;  %v5302_v49 = vld [vmem:[%s10738_s18 + $0x8] sm:$0xff] }
 0x8f5   :  { %v7121_v60 = vpack.i.bf16 %v4982_v10, %v4978_v25  ;;  %v6150_v56 = vpack.c.bf16 %v5302_v49, %v5301_v2  ;;  %v5307_v25 = vld [vmem:[%s10738_s18 + $0x30] sm:$0xff] }
 0x8f6   :  { %7112 = vrot.lane.b32.xlu0 %v7111_v26, %s7188_s8  ;;  %7107 = vrot.lane.b32.xlu1 %v7106_v42, %s7189_s0  ;;  %v5306_v26 = vld [vmem:[%s10738_s18 + $0x28] sm:$0xff]  ;;  %s5404_s8 = sshll.u32 %s7195_s30, 4  ;;  %s5405_s8 = int_to_ptr.vmem [resolvable:$true] %s5404_s8 }
 0x8f7   :  { %v6156_v42 = vpack.c.bf16 %v5306_v26, %v5305_v28  ;;  %p7143_p1 = scmp.lt.s32.totalorder %s5405_s8, %s5405_s8 }
 0x8fa   :  { %7117 = vrot.lane.b32.xlu0 %v7116_v51, %s7190_s22  ;;  %7122 = vrot.lane.b32.xlu1 %v7121_v60, %s7191_s13  ;;  %v5312_v51 = vld [vmem:[%s10738_s18 + $0x58] sm:$0xff] }
 0x8fb   :  { %v6165_v60 = vpack.c.bf16 %v5312_v51, %v5311_v31 }
 0x8fe   :  { %5021 = vrot.lane.b32.xlu0 %v4986_v32, %s7192_s2  ;;  %5024 = vrot.lane.b32.xlu1 %v4990_v23, %s7193_s6 }
 0x902   :  { %4983 = vrot.lane.b32.xlu0 %v4982_v10, %s7192_s2  ;;  %4987 = vrot.lane.b32.xlu1 %v4986_v32, %s7193_s6  ;;  %v5308_v10 = vld [vmem:[%s10738_s18 + $0x38] sm:$0xff]  ;;  %v5314_v32 = vld [vmem:[%s10738_s18 + $0x68] sm:$0xff] }
 0x903   :  { %v6159_v48 = vpack.c.bf16 %v5308_v10, %v5307_v25 }
 0x906   :  { %4991 = vrot.lane.b32.xlu0 %v4990_v23, %s7194_s10  ;;  %v6168_v23 = vpack.c.bf16 %v5314_v32, %v5313_v41 }
 0x964   :  { %v5006_v34 = vpop.permute.xlu1 %5005 }
 0x965   :  { %v5027_v29 = vsel %vm4994_vm14, %v5006_v34, %v4966_v17  ;;  %v5303_v17 = vld [vmem:[%s10738_s18 + $0x10] sm:$0xff] }
 0x966   :  { %v6153_v22 = vpack.c.bf16 %v5304_v6, %v5303_v17 }
 0x968   :  { %v7113_v50 = vpop.permute.xlu0 %7112  ;;  %v7108_v4 = vpop.permute.xlu1 %7107 }
 0x969   :  { %v7110_v63 = vunpack.i.h.bf16 %v7108_v4  ;;  %v7109_v46 = vunpack.i.l.bf16 %v7108_v4  ;;  %v7114_v24 = vunpack.i.l.bf16 %v7113_v50  ;;  %v7115_v58 = vunpack.i.h.bf16 %v7113_v50 }
 0x96b   :  { %v5028_v3 = vsel %vm4067_vm13, %v5027_v29, %v7109_v46  ;;  %v4995_v19 = vsel %vm4994_vm14, %v10591_v27, %v7110_v63  ;;  %v5029_v53 = vsel %vm4997_vm15, %v7109_v46, %v7114_v24  ;;  %v5500_v63 = vld [vmem:[%s10735_s15] ss:$0 sm:$0xff] }
 0x96c   :  { %v7118_v62 = vpop.permute.xlu0 %7117  ;;  %v7123_v33 = vpop.permute.xlu1 %7122  ;;  %v5038_v15 = vrot.slane %v5028_v3, 7  ;;  %v4996_v21 = vsel %vm4067_vm13, %v4995_v19, %v7115_v58  ;;  %vm10992_vm13 = vmmov %vm10990_vm1 }
 0x96d   :  { %v7120_v59 = vunpack.i.h.bf16 %v7118_v62  ;;  %v7119_v52 = vunpack.i.l.bf16 %v7118_v62  ;;  %v7124_v12 = vunpack.i.l.bf16 %v7123_v33  ;;  %v7125_v0 = vunpack.i.h.bf16 %v7123_v33 }
 0x96e   :  { %v5046_v35 = vsel %vm10991_vm5, %v4996_v21, %v5038_v15 }
 0x96f   :  { %v5030_v5 = vsel %vm4073_vm3, %v5029_v53, %v7119_v52  ;;  %v4998_v39 = vsel %vm4997_vm15, %v7115_v58, %v7120_v59  ;;  %v5031_v43 = vsel %vm5000_vm2, %v7119_v52, %v7125_v0 }
 0x970   :  { %v5022_v9 = vpop.permute.xlu0 %5021  ;;  %v5025_v40 = vpop.permute.xlu1 %5024  ;;  %v4999_v1 = vsel %vm4073_vm3, %v4998_v39, %v7124_v12  ;;  %v5039_v47 = vrot.slane %v5030_v5, 7  ;;  %vm10993_vm3 = vmmov %vm10990_vm1 }
 0x971   :  { %v5033_v45 = vsel %vm5003_vm0, %v5022_v9, %v5025_v40  ;;  %v5032_v38 = vsel %vm4241_vm10, %v5031_v43, %v5022_v9 }
 0x972   :  { %v5047_v36 = vsel %vm10990_vm1, %v4999_v1, %v5039_v47  ;;  %v5041_v11 = vrot.slane %v5033_v45, 7  ;;  %v5040_v44 = vrot.slane %v5032_v38, 7  ;;  %v5282_v45 = vld [vmem:[%s10736_s16] sm:$0x1]  ;;  %s7138_s16 = scalar_lea.vmem %s5405_s8, 32 }
 0x973   :  { %5183 = vmatprep.mubr.f32.mxu0 %v5047_v36  ;;  %p7139_p0 = scmp.ne.s32.totalorder %s5405_s8, %s7138_s16  ;;  %p7144_p2 = scmp.lt.s32.totalorder %s7138_s16, %s7138_s16 }
 0x974   :  { %v4984_v55 = vpop.permute.xlu0 %4983  ;;  %5184 = vmatmul.mubr.f32.vlgmr.msra.gmra.mrb[30].mxu0 %v5046_v35  ;;  %v4988_v16 = vpop.permute.xlu1 %4987  ;;  %v5287_v35 = vlaneseq }
 0x975   :  { %v5001_v61 = vsel %vm5000_vm2, %v7124_v12, %v4984_v55  ;;  %5780 = vmatprep.mubr.msk.f32.mxu0 %vm7176_vm4, %v10949_v13  ;;  %6151 = vmatpush3.bf16.msra.mxu0 %v6150_v56  ;;  %vm5260_vm4 = vcmask 975872   ;;  %p7145_p3 = por %p7144_p2, %p7143_p1 }
 0x976   :  { %v5002_v30 = vsel %vm4241_vm10, %v5001_v61, %v4988_v16  ;;  %6152 = vmatprep.subr.bf16.mxu0 %v10978_v37  ;;  %v5288_v55 = vshrl.u32 %v5287_v35, 7 }
 0x977   :  { %v5048_v14 = vsel %vm10993_vm3, %v5002_v30, %v5040_v44  ;;  %p7146_p4 = pnand %p7145_p3, %p7139_p0 }
 0x978   :  { %v4992_v57 = vpop.permute.xlu0 %4991  ;;  %v5289_v61 = vsub.s32 0, %v5288_v55 }
 0x979   :  { %v5004_v27 = vsel %vm5003_vm0, %v4988_v16, %v4992_v57  ;;  %6154 = vmatpush3.bf16.msra.mxu0 %v6153_v22  ;;  %v5502_v57 = vld [vmem:[%s10737_s17] ss:$0 sm:$0xff] }
 0x97a   :  { %v5049_v18 = vsel %vm10992_vm13, %v5004_v27, %v5041_v11  ;;  %6155 = vmatprep.subr.bf16.mxu0 %v10978_v37 }
 0x97b   :  { %5501 = vmatprep.mubr.msk.f32.mxu1 %vm463_vm11, %v5049_v18  ;;  %v5503_v18 = vld [vmem:[%s10739_s19] ss:$0 sm:$0xff]  ;;  %vm5396_vm11 = vcmask 74752  }
 0x97c   :  { %5254 = vmatmul.mubr.f32.vlgmr.msra.gmra.mrb[30].mxu1 %v5048_v14 }
 0x97d   :  { %6157 = vmatpush3.bf16.msra.mxu0 %v6156_v42 }
 0x97e   :  { %6158 = vmatprep.subr.bf16.mxu0 %v10978_v37 }
 0x981   :  { %6160 = vmatpush3.bf16.msra.mxu0 %v6159_v48 }
 0x982   :  { %6161 = vmatprep.subr.bf16.mxu0 %v10978_v37 }
 0x985   :  { %6163 = vmatpush3.bf16.msra.mxu0 %v6162_v8 }
 0x986   :  { %6164 = vmatprep.subr.bf16.mxu0 %v10978_v37 }
 0x989   :  { %6166 = vmatpush3.bf16.msra.mxu0 %v6165_v60 }
 0x98a   :  { %6167 = vmatprep.subr.bf16.mxu0 %v10978_v37 }
 0x98d   :  { %6169 = vmatpush3.bf16.msra.mxu0 %v6168_v23 }
 0x98e   :  { %5778 = vmatprep.subr.mxu0 %v10949_v13 }
 0x991   :  { %5779 = vmatpush3.msra.mxu0 %v5315_v20 }
 0xa47   :  { %v5599_v34 = vpop.f32.mrb[30].mxu0 }
 0xa48   :  { %v5600_v50 = vpop.f32.mrb[31].mxu0 }
 0xa49   :  { %v5601_v4 = vadd.f32 %v5600_v50, %v5599_v34 }
 0xa4b   :  { %v5186_v46 = vadd.f32 %v5601_v4, %v5500_v63 }
 0xa4f   :  { %v5255_v24 = vpop.f32.mrb[30].mxu1 }
 0xa50   :  { %v5256_v29 = vadd.f32 %v5255_v24, %v5186_v46  ;;  %v5257_v58 = vpop.f32.mrb[31].mxu1 }
 0xa52   :  { %v5259_v37 = vmax.f32 %v5256_v29, 0.0 }
 0xa54   :  { %v5261_v3 = vsel %vm5260_vm4, %v5259_v37, 0.0  ;;  %v5270_v13 = vmul.f32 %v5259_v37, %v5259_v37 }
 0xa55   :  { %v5262_v62 = vrot.slane %v5261_v3, 4 }
 0xa56   :  { %v5271_v33 = vsel %vm5260_vm4, %v5270_v13, 0.0 }
 0xa57   :  { %v5263_v19 = vadd.f32 %v5262_v62, %v5261_v3  ;;  %v5272_v59 = vrot.slane %v5271_v33, 4 }
 0xa59   :  { %v5264_v52 = vrot.slane %v5263_v19, 2  ;;  %v5273_v12 = vadd.f32 %v5272_v59, %v5271_v33 }
 0xa5b   :  { %v5265_v53 = vadd.f32 %v5264_v52, %v5263_v19  ;;  %v5274_v15 = vrot.slane %v5273_v12, 2 }
 0xa5d   :  { %v5266_v5 = vrot.slane %v5265_v53, 1  ;;  %v5275_v0 = vadd.f32 %v5274_v15, %v5273_v12 }
 0xa5f   :  { %v5267_v39 = vadd.f32 %v5266_v5, %v5265_v53  ;;  %v5276_v9 = vrot.slane %v5275_v0, 1 }
 0xa61   :  { %v5269_v40 = vmul.f32 0.5, %v5267_v39  ;;  %v5277_v1 = vadd.f32 %v5276_v9, %v5275_v0 }
 0xa63   :  { %v5278_v47 = vmul.f32 0.5, %v5277_v1  ;;  %v5279_v21 = vmul.f32 %v5269_v40, %v5269_v40  ;;  %v5281_v11 = vsub.f32 %v5259_v37, %v5269_v40 }
 0xa65   :  { %v5280_v36 = vsub.f32 %v5278_v47, %v5279_v21 }
 0xa67   :  { %v5283_v43 = vadd.f32 1e-05, %v5280_v36 }
 0xa69   :  { %7132 = vrsqrt.f32 %v5283_v43 }
 0xa73   :  { %v7133_v16 = vpop.eup %7132 }
 0xa74   :  { %v5285_v38 = vmul.f32 %v7133_v16, %v5282_v45 }
 0xa76   :  { %v5290_v30 = vrot.slane %v5285_v38, %v5289_v61 }
 0xa78   :  { %v5292_v44 = vmul.f32 %v5290_v30, %v5281_v11 }
 0xa7a   :  { %v5300_v27 = vadd.f32 %v5502_v57, %v5292_v44 }
 0xa7c   :  { %5781 = vmatmul.mubr.msk.f32.vlgmr.msra.gmra.mrb[32].mxu0 %vm443_vm7, %v5300_v27 }
 0xb4f   :  { %v5392_v14 = vpop.f32.mrb[32].mxu0 }
 0xb50   :  { %v5393_v2 = vadd.f32 %v5503_v18, %v5392_v14  ;;  %v5782_v49 = vpop.f32.mrb[33].mxu0 }
 0xb52   :  { %5397 = vst.msk [vmem:[#allocation2] sm:$0x3] %vm5396_vm11, %v5393_v2 }
 0xb53   :  { %7149 = shalt.err (!%p7146_p4)
}
 0xb54   :  { %s7150_s23 = scalar_lea.hbm %s10740_s20, 32 }
 0xb55   :  { %p7151_p5 = scmp.ne.s32.totalorder %s10740_s20, %s7150_s23  ;;  %p7154_p6 = scmp.lt.u32.totalorder %s7150_s23, %s10740_s20 }
 0xb57   :  { %p7156_p7 = pnand %p7154_p6, %p7151_p5 }
 0xb59   :  { %7159 = shalt.err (!%p7156_p7)
}
 0xb5a   :  { %5407 = dma.vmem_to_hbm [thread:$0]  %s5405_s8, 32, %s10740_s20, [#allocation3]  }
 0xb5b   :  { %7160 = dma.done.wait [#allocation3], 32  }
 0xb5c   :  { %7161 = vsyncadd [#allocation3], 4294967264 }
 0xb5d   :  { %5411 = vsyncpa [#allocation3], 1 }

</bundles_post_ra>
